<compile_context>
chip_gen: v7x
topology: tpu7x:2x2x1
jax: 0.10.0
libtpu: 0.0.40
codegen_flags: <defaults>
</compile_context>

<pallas_src>
import functools

import jax
import jax.numpy as jnp
from jax.experimental import pallas as pl
from jax.experimental.pallas import tpu as pltpu


_IMAGENET_MEAN = (0.485, 0.456, 0.406)
_IMAGENET_STD = (0.229, 0.224, 0.225)

_VMEM_LIMIT = 32 * 1024 * 1024  # explicit scoped-VMEM budget, safe on v5e/v6e/v7x


def _gelu(x):
    c = 0.7978845608028654  # sqrt(2/pi)
    return 0.5 * x * (1.0 + jnp.tanh(c * (x + 0.044715 * x * x * x)))


def _pick_bft(bf, max_bft=8):
    """Frames per grid step: amortize per-step overhead while keeping >= 2 grid
    steps so the 'parallel' axis can pipeline / shard across v7x's two TCs."""
    for cand in range(min(max_bft, bf), 0, -1):
        if bf % cand == 0 and bf // cand >= 2:
            return cand
    return bf


def _zero_halo(pad_ref):
    """Zero only the 1-px halo of the pad scratch (interior is rewritten each step)."""
    bft, hp, wp, c = pad_ref.shape
    pad_ref[:, 0:1, :, :] = jnp.zeros((bft, 1, wp, c), jnp.float32)
    pad_ref[:, hp - 1:hp, :, :] = jnp.zeros((bft, 1, wp, c), jnp.float32)
    pad_ref[:, :, 0:1, :] = jnp.zeros((bft, hp, 1, c), jnp.float32)
    pad_ref[:, :, wp - 1:wp, :] = jnp.zeros((bft, hp, 1, c), jnp.float32)


_TAPS = [(dy, dx) for dy in range(3) for dx in range(3)]


# ----------------------------------------------------------------------------
# Pallas kernels
# ----------------------------------------------------------------------------

def _stem_kernel(x_ref, mean_ref, w_ref, b_ref, o_ref, pad_ref):
    """conv_stem: 3x3 / stride-2 / pad-1 conv (+BN folded).

    ImageNet 1/std is folded into w (per input channel); the per-channel mean is
    subtracted here BEFORE zero padding, so padded taps contribute exactly 0 (same
    as normalizing first and zero-padding, as in the reference)."""
    BFt, H, W, Cin = x_ref.shape
    Cout = w_ref.shape[-1]
    Ho, Wo = H // 2, W // 2
    _zero_halo(pad_ref)
    pad_ref[:, 1:H + 1, 1:W + 1, :] = x_ref[...] - mean_ref[0]
    acc = jnp.zeros((BFt, Ho, Wo, Cout), jnp.float32)
    for t, (dy, dx) in enumerate(_TAPS):
        # strided reads: only stride-2 output positions are accumulated (no sel matmul)
        xs = pad_ref[:, pl.ds(dy, Ho, stride=2), pl.ds(dx, Wo, stride=2), :]
        for c in range(Cin):
            acc = acc + xs[:, :, :, c:c + 1] * w_ref[t * Cin + c]     # VPU broadcast-MAC
    o_ref[...] = (acc + b_ref[0]).astype(o_ref.dtype)


def _mbconv_kernel(x_ref, ew_ref, eb_ref, dww_ref, dwb_ref, sw1_ref, sw2_ref,
                   pw_ref, pb_ref, o_ref, pad_ref, *, stride, residual):
    """One fused MBConv block: 1x1 expand(+BN)+GELU -> dw3x3(+BN)+GELU ->
    SqueezeExcitation -> gate -> 1x1 project(+BN) [+ residual].
    The expanded hidden activation lives only in VMEM."""
    BFt = pad_ref.shape[0]
    H, W = pad_ref.shape[1] - 2, pad_ref.shape[2] - 2
    Chid = pad_ref.shape[3]
    Cin = ew_ref.shape[0]
    Cout = pw_ref.shape[1]
    Ho, Wo = H // stride, W // stride
    S, So = H * W, Ho * Wo

    # -- 1x1 expand (+BN folded) + GELU (bf16 MXU inputs, f32 accumulation) --
    x = x_ref[...].reshape(BFt * S, Cin)
    hid = _gelu(jnp.dot(x, ew_ref[...], preferred_element_type=jnp.float32)
                + eb_ref[...])                                       # (BFt*S, Chid) f32

    # -- zero halo only, write interior --
    _zero_halo(pad_ref)
    pad_ref[:, 1:H + 1, 1:W + 1, :] = hid.reshape(BFt, H, W, Chid)

    # -- depthwise 3x3 (+BN) + GELU; stride-2 via strided reads --
    acc = jnp.zeros((BFt, Ho, Wo, Chid), jnp.float32)
    for t, (dy, dx) in enumerate(_TAPS):
        if stride == 2:
            xs = pad_ref[:, pl.ds(dy, Ho, stride=2), pl.ds(dx, Wo, stride=2), :]
        else:
            xs = pad_ref[:, dy:dy + H, dx:dx + W, :]
        acc = acc + xs * dww_ref[t]
    h2 = _gelu(acc + dwb_ref[0])                                     # (BFt,Ho,Wo,Chid)

    # -- SqueezeExcitation (per frame in this batch) --
    m = jnp.mean(h2, axis=(1, 2))                                    # squeeze: (BFt,Chid)
    z = jax.nn.silu(jnp.dot(m, sw1_ref[...], preferred_element_type=jnp.float32))
    g = jax.nn.sigmoid(jnp.dot(z, sw2_ref[...], preferred_element_type=jnp.float32))
    gated = (h2 * g[:, None, None, :]).reshape(BFt * So, Chid).astype(jnp.bfloat16)

    # -- 1x1 project (+BN folded) [+ MBConvResidual, eval mode] --
    y = jnp.dot(gated, pw_ref[...], preferred_element_type=jnp.float32) + pb_ref[...]
    if residual:
        y = y + x.astype(jnp.float32)
    o_ref[...] = y.reshape(BFt, So, Cout).astype(o_ref.dtype)


def _head_tl_kernel(x_ref, hw_ref, hb_ref, w1_ref, b1_ref, w2_ref, b2_ref, o_ref):
    """mlp_head + TokenLearner, fully fused per frame-batch:
    head matmul -> grouped conv#1 (dense-equivalent on repeated input) + GELU ->
    grouped conv#2 (block-diag, bf16) -> attention-weighted spatial mean.
    (No softmax — the reference TokenLearner reduces mean(x * attn) directly.)"""
    BFt, S, Cl = x_ref.shape
    E = hw_ref.shape[1]
    G = w2_ref.shape[1]
    x = x_ref[...].reshape(BFt * S, Cl)                              # bf16
    tok = jnp.dot(x, hw_ref[...], preferred_element_type=jnp.float32) + hb_ref[...]
    h = _gelu(jnp.dot(tok.astype(jnp.bfloat16), w1_ref[...],
                      preferred_element_type=jnp.float32) + b1_ref[...])
    attn = jnp.dot(h.astype(jnp.bfloat16), w2_ref[...],
                   preferred_element_type=jnp.float32) + b2_ref[...]  # (BFt*S, G)
    attn_b = attn.reshape(BFt, S, G).astype(jnp.bfloat16)
    tok_b = tok.reshape(BFt, S, E).astype(jnp.bfloat16)
    out = jnp.einsum("bsg,bse->bge", attn_b, tok_b,
                     preferred_element_type=jnp.float32)              # (BFt, G, E)
    o_ref[...] = out * (1.0 / S)                                      # spatial mean


# ----------------------------------------------------------------------------
# pallas_call wrappers
# ----------------------------------------------------------------------------

def _cparams():
    return pltpu.CompilerParams(dimension_semantics=("parallel",),
                                vmem_limit_bytes=_VMEM_LIMIT)


def pallas_stem(x, w, b, *, bft):
    BF, H, W, Cin = x.shape
    Cout = w.shape[-1]
    Ho, Wo = H // 2, W // 2
    mean = jnp.asarray(_IMAGENET_MEAN, jnp.float32)[None, :]
    return pl.pallas_call(
        _stem_kernel,
        out_shape=jax.ShapeDtypeStruct((BF, Ho, Wo, Cout), jnp.bfloat16),
        grid=(BF // bft,),
        in_specs=[
            pl.BlockSpec((bft, H, W, Cin), lambda i: (i, 0, 0, 0)),
            pl.BlockSpec((1, Cin), lambda i: (0, 0)),
            pl.BlockSpec((9 * Cin, Cout), lambda i: (0, 0)),
            pl.BlockSpec((1, Cout), lambda i: (0, 0)),
        ],
        out_specs=pl.BlockSpec((bft, Ho, Wo, Cout), lambda i: (i, 0, 0, 0)),
        scratch_shapes=[pltpu.VMEM((bft, H + 2, W + 2, Cin), jnp.float32)],
        compiler_params=_cparams(),
    )(x, mean, w, b)


def pallas_mbconv(x, p, *, H, W, stride, residual, bft):
    BF = x.shape[0]
    Chid = p["e_w"].shape[1]
    Cout = p["p_w"].shape[1]
    Ho, Wo = H // stride, W // stride
    So = Ho * Wo
    xb = x.shape[1:]
    kern = functools.partial(_mbconv_kernel, stride=stride, residual=residual)
    return pl.pallas_call(
        kern,
        out_shape=jax.ShapeDtypeStruct((BF, So, Cout), jnp.bfloat16),
        grid=(BF // bft,),
        in_specs=[
            pl.BlockSpec((bft,) + xb, lambda i: (i,) + (0,) * len(xb)),
            pl.BlockSpec(p["e_w"].shape, lambda i: (0, 0)),
            pl.BlockSpec(p["e_b"].shape, lambda i: (0, 0)),
            pl.BlockSpec(p["dw_w"].shape, lambda i: (0, 0)),
            pl.BlockSpec(p["dw_b"].shape, lambda i: (0, 0)),
            pl.BlockSpec(p["se_w1"].shape, lambda i: (0, 0)),
            pl.BlockSpec(p["se_w2"].shape, lambda i: (0, 0)),
            pl.BlockSpec(p["p_w"].shape, lambda i: (0, 0)),
            pl.BlockSpec(p["p_b"].shape, lambda i: (0, 0)),
        ],
        out_specs=pl.BlockSpec((bft, So, Cout), lambda i: (i, 0, 0)),
        scratch_shapes=[pltpu.VMEM((bft, H + 2, W + 2, Chid), jnp.float32)],
        compiler_params=_cparams(),
    )(x, p["e_w"], p["e_b"], p["dw_w"], p["dw_b"], p["se_w1"], p["se_w2"],
      p["p_w"], p["p_b"])


def pallas_head_token_learner(x, params, *, bft):
    BF, S, Cl = x.shape
    E = params["head_w"].shape[1]
    GI = params["tl_w1"].shape[1]
    G = params["tl_w2"].shape[1]
    return pl.pallas_call(
        _head_tl_kernel,
        out_shape=jax.ShapeDtypeStruct((BF, G, E), jnp.float32),
        grid=(BF // bft,),
        in_specs=[
            pl.BlockSpec((bft, S, Cl), lambda i: (i, 0, 0)),
            pl.BlockSpec((Cl, E), lambda i: (0, 0)),
            pl.BlockSpec((1, E), lambda i: (0, 0)),
            pl.BlockSpec((E, GI), lambda i: (0, 0)),
            pl.BlockSpec((1, GI), lambda i: (0, 0)),
            pl.BlockSpec((GI, G), lambda i: (0, 0)),
            pl.BlockSpec((1, G), lambda i: (0, 0)),
        ],
        out_specs=pl.BlockSpec((bft, G, E), lambda i: (i, 0, 0)),
        compiler_params=_cparams(),
    )(x, params["head_w"], params["head_b"], params["tl_w1"], params["tl_b1"],
      params["tl_w2"], params["tl_b2"])


# ----------------------------------------------------------------------------
# Forward pass (glue is free reshapes only)
# ----------------------------------------------------------------------------

def tokenizer_forward(params, video, text_embeds=None):
    # video: (B, F, C, H, W) float32 in [0, 1]
    # TODO(synk): ModalConditioner / classifier_free_guidance cond_fns are external;
    # text_embeds is accepted for interface fidelity but conditioning is identity.
    del text_embeds
    B, F, C, H, W = video.shape
    BF = B * F
    bft = _pick_bft(BF)
    x = video.reshape(BF, C, H, W).transpose(0, 2, 3, 1)            # pack '* c h w' -> NHWC
    x = pallas_stem(x, params["stem_w"], params["stem_b"], bft=bft)  # (BF, H/2, W/2, 16)
    H1, W1 = H // 2, W // 2
    x = pallas_mbconv(x, params["mb1"], H=H1, W=W1, stride=2, residual=False, bft=bft)
    H2, W2 = H1 // 2, W1 // 2                                        # (BF, H2*W2, 24)
    x = pallas_mbconv(x, params["mb2"], H=H2, W=W2, stride=1, residual=True, bft=bft)
    learned = pallas_head_token_learner(x, params, bft=bft)          # (BF, G, embed)
    G, E = learned.shape[1], learned.shape[2]
    # 'b f c n -> b (f n) c' is a pure reshape (per-frame tokens already (n, c)).
    return learned.reshape(B, F * G, E)


# ----------------------------------------------------------------------------
# Deterministic synthetic parameters (BatchNorm folded; ImageNet 1/std folded)
# ----------------------------------------------------------------------------

def init_params(key, *, stem_dim=16, dims=(16, 24, 24), embed_dim=32,
                expansion_rate=4, shrinkage_rate=0.25,
                num_output_tokens=8, ff_mult=2):
    keys = iter(jax.random.split(key, 64))

    def nrm(shape, scale=0.1):
        return scale * jax.random.normal(next(keys), shape, jnp.float32)

    def bn(c):
        gamma = 1.0 + 0.1 * jax.random.normal(next(keys), (c,), jnp.float32)
        beta = 0.1 * jax.random.normal(next(keys), (c,), jnp.float32)
        mean = 0.1 * jax.random.normal(next(keys), (c,), jnp.float32)
        var = 0.5 + jax.random.uniform(next(keys), (c,), jnp.float32)
        return gamma, beta, mean, var

    def fold_bn(w, b, bn_p, eps=1e-5):
        gamma, beta, mean, var = bn_p
        s = gamma * jax.lax.rsqrt(var + eps)
        return w * s, (((b - mean) * s) + beta)[None, :]

    params = {}

    # conv_stem: 3x3 s2 conv (bias=False) + BN; rows ordered (dy, dx, cin).
    # ImageNet 1/std folded per input channel; mean is subtracted in-kernel.
    w = nrm((3, 3, 3, stem_dim)).reshape(27, stem_dim)
    w, b = fold_bn(w, jnp.zeros((stem_dim,), jnp.float32), bn(stem_dim))
    inv_std = 1.0 / jnp.asarray(_IMAGENET_STD, jnp.float32)
    w = w * jnp.tile(inv_std, 9)[:, None]
    params["stem_w"], params["stem_b"] = w, b

    def mbconv_params(dim_in, dim_out):
        hidden = int(expansion_rate * dim_out)
        se_hidden = int(hidden * shrinkage_rate)
        e_w, e_b = fold_bn(nrm((dim_in, hidden)), nrm((hidden,), 0.05), bn(hidden))
        dw_w, dw_b = fold_bn(nrm((9, hidden)), nrm((hidden,), 0.05), bn(hidden))
        p_w, p_b = fold_bn(nrm((hidden, dim_out)), nrm((dim_out,), 0.05), bn(dim_out))
        return dict(e_w=e_w.astype(jnp.bfloat16), e_b=e_b,
                    dw_w=dw_w, dw_b=dw_b,
                    se_w1=nrm((hidden, se_hidden)), se_w2=nrm((se_hidden, hidden)),
                    p_w=p_w.astype(jnp.bfloat16), p_b=p_b)

    params["mb1"] = mbconv_params(dims[0], dims[1])
    params["mb2"] = mbconv_params(dims[1], dims[2])

    params["head_w"] = nrm((dims[2], embed_dim)).astype(jnp.bfloat16)
    params["head_b"] = nrm((embed_dim,), 0.05)[None, :]

    inner_pg = embed_dim * ff_mult                 # per-group hidden of TokenLearner
    gi = num_output_tokens * inner_pg
    params["tl_w1"] = nrm((embed_dim, gi)).astype(jnp.bfloat16)   # grouped conv#1 (dense-equiv)
    params["tl_b1"] = nrm((gi,), 0.05)[None, :]
    w2_groups = nrm((num_output_tokens, inner_pg))
    w2 = jnp.zeros((gi, num_output_tokens), jnp.float32)
    for g in range(num_output_tokens):             # grouped conv#2 -> block-diagonal (bf16)
        w2 = w2.at[g * inner_pg:(g + 1) * inner_pg, g].set(w2_groups[g])
    params["tl_w2"] = w2.astype(jnp.bfloat16)
    params["tl_b2"] = nrm((num_output_tokens,), 0.05)[None, :]
    return params


if __name__ == "__main__":
    key = jax.random.PRNGKey(0)
    k_params, k_video, k_text = jax.random.split(key, 3)
    params = init_params(k_params)

    B, F, H, W = 2, 2, 16, 16
    video = jax.random.uniform(k_video, (B, F, 3, H, W), jnp.float32)      # (B,F,C,H,W)
    text_embeds = jax.random.normal(k_text, (B, 32), jnp.float32)          # unused (see TODO)

    fwd = jax.jit(tokenizer_forward)
    out = jax.block_until_ready(fwd(params, video, text_embeds))

    assert out.shape == (B, F * 8, 32), out.shape                          # b (f n) c
    assert bool(jnp.all(jnp.isfinite(out)))
    print("KERNEL_OK")
</pallas_src>

<mosaic_0001>
module attributes {stable_mosaic.version = 11 : i64} {
  func.func @_stem_kernel(%arg0: i32, %arg1: memref<2x16x16x3xf32, #tpu.memory_space<vmem>>, %arg2: memref<1x3xf32, #tpu.memory_space<vmem>>, %arg3: memref<27x16xf32, #tpu.memory_space<vmem>>, %arg4: memref<1x16xf32, #tpu.memory_space<vmem>>, %arg5: memref<2x8x8x16xbf16, #tpu.memory_space<vmem>>, %arg6: memref<2x18x18x3xf32, #tpu.memory_space<vmem>>) attributes {dimension_semantics = [#tpu.dimension_semantics<parallel>], iteration_bounds = array<i64: 2>, scalar_prefetch = 0 : i64, scratch_operands = 1 : i64, tpu.core_type = #tpu.core_type<tc>, window_params = [{transform_indices = @transform_0, window_bounds = array<i64: 2, 16, 16, 3>}, {pipeline_mode = #tpu.pipeline_mode<synchronous>, transform_indices = @transform_1, window_bounds = array<i64: 1, 3>}, {pipeline_mode = #tpu.pipeline_mode<synchronous>, transform_indices = @transform_2, window_bounds = array<i64: 27, 16>}, {pipeline_mode = #tpu.pipeline_mode<synchronous>, transform_indices = @transform_3, window_bounds = array<i64: 1, 16>}, {transform_indices = @transform_4, window_bounds = array<i64: 2, 8, 8, 16>}]} {
    %cst = arith.constant 0.000000e+00 : f32
    %0 = vector.broadcast %cst : f32 to vector<2x1x18x3xf32>
    %c0 = arith.constant 0 : index
    %c0_0 = arith.constant 0 : index
    %c0_1 = arith.constant 0 : index
    %c0_2 = arith.constant 0 : index
    %1 = vector.load %arg6[%c0, %c0_0, %c0_1, %c0_2] : memref<2x18x18x3xf32, #tpu.memory_space<vmem>>, vector<2x1x18x3xf32>
    tpu.vector_store %arg6[%c0, %c0_0, %c0_1, %c0_2], %0 {strides = array<i32>} : memref<2x18x18x3xf32, #tpu.memory_space<vmem>>, vector<2x1x18x3xf32>,
    %cst_3 = arith.constant 0.000000e+00 : f32
    %2 = vector.broadcast %cst_3 : f32 to vector<2x1x18x3xf32>
    %c0_4 = arith.constant 0 : index
    %c17 = arith.constant 17 : index
    %c0_5 = arith.constant 0 : index
    %c0_6 = arith.constant 0 : index
    %3 = vector.load %arg6[%c0_4, %c17, %c0_5, %c0_6] : memref<2x18x18x3xf32, #tpu.memory_space<vmem>>, vector<2x1x18x3xf32>
    tpu.vector_store %arg6[%c0_4, %c17, %c0_5, %c0_6], %2 {strides = array<i32>} : memref<2x18x18x3xf32, #tpu.memory_space<vmem>>, vector<2x1x18x3xf32>,
    %cst_7 = arith.constant 0.000000e+00 : f32
    %4 = vector.broadcast %cst_7 : f32 to vector<2x18x1x3xf32>
    %c0_8 = arith.constant 0 : index
    %c0_9 = arith.constant 0 : index
    %c0_10 = arith.constant 0 : index
    %c0_11 = arith.constant 0 : index
    %5 = vector.load %arg6[%c0_8, %c0_9, %c0_10, %c0_11] : memref<2x18x18x3xf32, #tpu.memory_space<vmem>>, vector<2x18x1x3xf32>
    tpu.vector_store %arg6[%c0_8, %c0_9, %c0_10, %c0_11], %4 {strides = array<i32>} : memref<2x18x18x3xf32, #tpu.memory_space<vmem>>, vector<2x18x1x3xf32>,
    %cst_12 = arith.constant 0.000000e+00 : f32
    %6 = vector.broadcast %cst_12 : f32 to vector<2x18x1x3xf32>
    %c0_13 = arith.constant 0 : index
    %c0_14 = arith.constant 0 : index
    %c17_15 = arith.constant 17 : index
    %c0_16 = arith.constant 0 : index
    %7 = vector.load %arg6[%c0_13, %c0_14, %c17_15, %c0_16] : memref<2x18x18x3xf32, #tpu.memory_space<vmem>>, vector<2x18x1x3xf32>
    tpu.vector_store %arg6[%c0_13, %c0_14, %c17_15, %c0_16], %6 {strides = array<i32>} : memref<2x18x18x3xf32, #tpu.memory_space<vmem>>, vector<2x18x1x3xf32>,
    %c0_17 = arith.constant 0 : index
    %c0_18 = arith.constant 0 : index
    %c0_19 = arith.constant 0 : index
    %c0_20 = arith.constant 0 : index
    %8 = vector.load %arg1[%c0_17, %c0_18, %c0_19, %c0_20] : memref<2x16x16x3xf32, #tpu.memory_space<vmem>>, vector<2x16x16x3xf32>
    %c0_21 = arith.constant 0 : index
    %c0_22 = arith.constant 0 : index
    %9 = vector.load %arg2[%c0_21, %c0_22] : memref<1x3xf32, #tpu.memory_space<vmem>>, vector<1x3xf32>
    %10 = vector.shape_cast %9 : vector<1x3xf32> to vector<3xf32>
    %11 = vector.shape_cast %10 : vector<3xf32> to vector<1x1x1x3xf32>
    %12 = vector.broadcast %11 : vector<1x1x1x3xf32> to vector<2x16x16x3xf32>
    %13 = arith.subf %8, %12 : vector<2x16x16x3xf32>
    %c0_23 = arith.constant 0 : index
    %c1 = arith.constant 1 : index
    %c1_24 = arith.constant 1 : index
    %c0_25 = arith.constant 0 : index
    %14 = vector.load %arg6[%c0_23, %c1, %c1_24, %c0_25] : memref<2x18x18x3xf32, #tpu.memory_space<vmem>>, vector<2x16x16x3xf32>
    tpu.vector_store %arg6[%c0_23, %c1, %c1_24, %c0_25], %13 {strides = array<i32>} : memref<2x18x18x3xf32, #tpu.memory_space<vmem>>, vector<2x16x16x3xf32>,
    %cst_26 = arith.constant 0.000000e+00 : f32
    %15 = vector.broadcast %cst_26 : f32 to vector<2x8x8x16xf32>
    %c0_27 = arith.constant 0 : index
    %c0_28 = arith.constant 0 : index
    %c0_29 = arith.constant 0 : index
    %c0_30 = arith.constant 0 : index
    %16 = tpu.strided_load %arg6[%c0_27, %c0_28, %c0_29, %c0_30] {strides = array<i32: 1, 2, 2, 1>} : memref<2x18x18x3xf32, #tpu.memory_space<vmem>>, vector<2x8x8x3xf32>
    %17 = vector.extract_strided_slice %16 {offsets = [0, 0, 0, 0], sizes = [2, 8, 8, 1], strides = [1, 1, 1, 1]} : vector<2x8x8x3xf32> to vector<2x8x8x1xf32>
    %c0_31 = arith.constant 0 : index
    %c0_32 = arith.constant 0 : index
    %18 = vector.load %arg3[%c0_31, %c0_32] : memref<27x16xf32, #tpu.memory_space<vmem>>, vector<1x16xf32>
    %19 = vector.shape_cast %18 : vector<1x16xf32> to vector<16xf32>
    %20 = vector.shape_cast %19 : vector<16xf32> to vector<1x1x1x16xf32>
    %21 = vector.broadcast %17 : vector<2x8x8x1xf32> to vector<2x8x8x16xf32>
    %22 = vector.broadcast %20 : vector<1x1x1x16xf32> to vector<2x8x8x16xf32>
    %23 = arith.mulf %21, %22 : vector<2x8x8x16xf32>
    %24 = arith.addf %15, %23 : vector<2x8x8x16xf32>
    %25 = vector.extract_strided_slice %16 {offsets = [0, 0, 0, 1], sizes = [2, 8, 8, 1], strides = [1, 1, 1, 1]} : vector<2x8x8x3xf32> to vector<2x8x8x1xf32>
    %c1_33 = arith.constant 1 : index
    %c0_34 = arith.constant 0 : index
    %26 = vector.load %arg3[%c1_33, %c0_34] : memref<27x16xf32, #tpu.memory_space<vmem>>, vector<1x16xf32>
    %27 = vector.shape_cast %26 : vector<1x16xf32> to vector<16xf32>
    %28 = vector.shape_cast %27 : vector<16xf32> to vector<1x1x1x16xf32>
    %29 = vector.broadcast %25 : vector<2x8x8x1xf32> to vector<2x8x8x16xf32>
    %30 = vector.broadcast %28 : vector<1x1x1x16xf32> to vector<2x8x8x16xf32>
    %31 = arith.mulf %29, %30 : vector<2x8x8x16xf32>
    %32 = arith.addf %24, %31 : vector<2x8x8x16xf32>
    %33 = vector.extract_strided_slice %16 {offsets = [0, 0, 0, 2], sizes = [2, 8, 8, 1], strides = [1, 1, 1, 1]} : vector<2x8x8x3xf32> to vector<2x8x8x1xf32>
    %c2 = arith.constant 2 : index
    %c0_35 = arith.constant 0 : index
    %34 = vector.load %arg3[%c2, %c0_35] : memref<27x16xf32, #tpu.memory_space<vmem>>, vector<1x16xf32>
    %35 = vector.shape_cast %34 : vector<1x16xf32> to vector<16xf32>
    %36 = vector.shape_cast %35 : vector<16xf32> to vector<1x1x1x16xf32>
    %37 = vector.broadcast %33 : vector<2x8x8x1xf32> to vector<2x8x8x16xf32>
    %38 = vector.broadcast %36 : vector<1x1x1x16xf32> to vector<2x8x8x16xf32>
    %39 = arith.mulf %37, %38 : vector<2x8x8x16xf32>
    %40 = arith.addf %32, %39 : vector<2x8x8x16xf32>
    %c0_36 = arith.constant 0 : index
    %c0_37 = arith.constant 0 : index
    %c1_38 = arith.constant 1 : index
    %c0_39 = arith.constant 0 : index
    %41 = tpu.strided_load %arg6[%c0_36, %c0_37, %c1_38, %c0_39] {strides = array<i32: 1, 2, 2, 1>} : memref<2x18x18x3xf32, #tpu.memory_space<vmem>>, vector<2x8x8x3xf32>
    %42 = vector.extract_strided_slice %41 {offsets = [0, 0, 0, 0], sizes = [2, 8, 8, 1], strides = [1, 1, 1, 1]} : vector<2x8x8x3xf32> to vector<2x8x8x1xf32>
    %c3 = arith.constant 3 : index
    %c0_40 = arith.constant 0 : index
    %43 = vector.load %arg3[%c3, %c0_40] : memref<27x16xf32, #tpu.memory_space<vmem>>, vector<1x16xf32>
    %44 = vector.shape_cast %43 : vector<1x16xf32> to vector<16xf32>
    %45 = vector.shape_cast %44 : vector<16xf32> to vector<1x1x1x16xf32>
    %46 = vector.broadcast %42 : vector<2x8x8x1xf32> to vector<2x8x8x16xf32>
    %47 = vector.broadcast %45 : vector<1x1x1x16xf32> to vector<2x8x8x16xf32>
    %48 = arith.mulf %46, %47 : vector<2x8x8x16xf32>
    %49 = arith.addf %40, %48 : vector<2x8x8x16xf32>
    %50 = vector.extract_strided_slice %41 {offsets = [0, 0, 0, 1], sizes = [2, 8, 8, 1], strides = [1, 1, 1, 1]} : vector<2x8x8x3xf32> to vector<2x8x8x1xf32>
    %c4 = arith.constant 4 : index
    %c0_41 = arith.constant 0 : index
    %51 = vector.load %arg3[%c4, %c0_41] : memref<27x16xf32, #tpu.memory_space<vmem>>, vector<1x16xf32>
    %52 = vector.shape_cast %51 : vector<1x16xf32> to vector<16xf32>
    %53 = vector.shape_cast %52 : vector<16xf32> to vector<1x1x1x16xf32>
    %54 = vector.broadcast %50 : vector<2x8x8x1xf32> to vector<2x8x8x16xf32>
    %55 = vector.broadcast %53 : vector<1x1x1x16xf32> to vector<2x8x8x16xf32>
    %56 = arith.mulf %54, %55 : vector<2x8x8x16xf32>
    %57 = arith.addf %49, %56 : vector<2x8x8x16xf32>
    %58 = vector.extract_strided_slice %41 {offsets = [0, 0, 0, 2], sizes = [2, 8, 8, 1], strides = [1, 1, 1, 1]} : vector<2x8x8x3xf32> to vector<2x8x8x1xf32>
    %c5 = arith.constant 5 : index
    %c0_42 = arith.constant 0 : index
    %59 = vector.load %arg3[%c5, %c0_42] : memref<27x16xf32, #tpu.memory_space<vmem>>, vector<1x16xf32>
    %60 = vector.shape_cast %59 : vector<1x16xf32> to vector<16xf32>
    %61 = vector.shape_cast %60 : vector<16xf32> to vector<1x1x1x16xf32>
    %62 = vector.broadcast %58 : vector<2x8x8x1xf32> to vector<2x8x8x16xf32>
    %63 = vector.broadcast %61 : vector<1x1x1x16xf32> to vector<2x8x8x16xf32>
    %64 = arith.mulf %62, %63 : vector<2x8x8x16xf32>
    %65 = arith.addf %57, %64 : vector<2x8x8x16xf32>
    %c0_43 = arith.constant 0 : index
    %c0_44 = arith.constant 0 : index
    %c2_45 = arith.constant 2 : index
    %c0_46 = arith.constant 0 : index
    %66 = tpu.strided_load %arg6[%c0_43, %c0_44, %c2_45, %c0_46] {strides = array<i32: 1, 2, 2, 1>} : memref<2x18x18x3xf32, #tpu.memory_space<vmem>>, vector<2x8x8x3xf32>
    %67 = vector.extract_strided_slice %66 {offsets = [0, 0, 0, 0], sizes = [2, 8, 8, 1], strides = [1, 1, 1, 1]} : vector<2x8x8x3xf32> to vector<2x8x8x1xf32>
    %c6 = arith.constant 6 : index
    %c0_47 = arith.constant 0 : index
    %68 = vector.load %arg3[%c6, %c0_47] : memref<27x16xf32, #tpu.memory_space<vmem>>, vector<1x16xf32>
    %69 = vector.shape_cast %68 : vector<1x16xf32> to vector<16xf32>
    %70 = vector.shape_cast %69 : vector<16xf32> to vector<1x1x1x16xf32>
    %71 = vector.broadcast %67 : vector<2x8x8x1xf32> to vector<2x8x8x16xf32>
    %72 = vector.broadcast %70 : vector<1x1x1x16xf32> to vector<2x8x8x16xf32>
    %73 = arith.mulf %71, %72 : vector<2x8x8x16xf32>
    %74 = arith.addf %65, %73 : vector<2x8x8x16xf32>
    %75 = vector.extract_strided_slice %66 {offsets = [0, 0, 0, 1], sizes = [2, 8, 8, 1], strides = [1, 1, 1, 1]} : vector<2x8x8x3xf32> to vector<2x8x8x1xf32>
    %c7 = arith.constant 7 : index
    %c0_48 = arith.constant 0 : index
    %76 = vector.load %arg3[%c7, %c0_48] : memref<27x16xf32, #tpu.memory_space<vmem>>, vector<1x16xf32>
    %77 = vector.shape_cast %76 : vector<1x16xf32> to vector<16xf32>
    %78 = vector.shape_cast %77 : vector<16xf32> to vector<1x1x1x16xf32>
    %79 = vector.broadcast %75 : vector<2x8x8x1xf32> to vector<2x8x8x16xf32>
    %80 = vector.broadcast %78 : vector<1x1x1x16xf32> to vector<2x8x8x16xf32>
    %81 = arith.mulf %79, %80 : vector<2x8x8x16xf32>
    %82 = arith.addf %74, %81 : vector<2x8x8x16xf32>
    %83 = vector.extract_strided_slice %66 {offsets = [0, 0, 0, 2], sizes = [2, 8, 8, 1], strides = [1, 1, 1, 1]} : vector<2x8x8x3xf32> to vector<2x8x8x1xf32>
    %c8 = arith.constant 8 : index
    %c0_49 = arith.constant 0 : index
    %84 = vector.load %arg3[%c8, %c0_49] : memref<27x16xf32, #tpu.memory_space<vmem>>, vector<1x16xf32>
    %85 = vector.shape_cast %84 : vector<1x16xf32> to vector<16xf32>
    %86 = vector.shape_cast %85 : vector<16xf32> to vector<1x1x1x16xf32>
    %87 = vector.broadcast %83 : vector<2x8x8x1xf32> to vector<2x8x8x16xf32>
    %88 = vector.broadcast %86 : vector<1x1x1x16xf32> to vector<2x8x8x16xf32>
    %89 = arith.mulf %87, %88 : vector<2x8x8x16xf32>
    %90 = arith.addf %82, %89 : vector<2x8x8x16xf32>
    %c0_50 = arith.constant 0 : index
    %c1_51 = arith.constant 1 : index
    %c0_52 = arith.constant 0 : index
    %c0_53 = arith.constant 0 : index
    %91 = tpu.strided_load %arg6[%c0_50, %c1_51, %c0_52, %c0_53] {strides = array<i32: 1, 2, 2, 1>} : memref<2x18x18x3xf32, #tpu.memory_space<vmem>>, vector<2x8x8x3xf32>
    %92 = vector.extract_strided_slice %91 {offsets = [0, 0, 0, 0], sizes = [2, 8, 8, 1], strides = [1, 1, 1, 1]} : vector<2x8x8x3xf32> to vector<2x8x8x1xf32>
    %c9 = arith.constant 9 : index
    %c0_54 = arith.constant 0 : index
    %93 = vector.load %arg3[%c9, %c0_54] : memref<27x16xf32, #tpu.memory_space<vmem>>, vector<1x16xf32>
    %94 = vector.shape_cast %93 : vector<1x16xf32> to vector<16xf32>
    %95 = vector.shape_cast %94 : vector<16xf32> to vector<1x1x1x16xf32>
    %96 = vector.broadcast %92 : vector<2x8x8x1xf32> to vector<2x8x8x16xf32>
    %97 = vector.broadcast %95 : vector<1x1x1x16xf32> to vector<2x8x8x16xf32>
    %98 = arith.mulf %96, %97 : vector<2x8x8x16xf32>
    %99 = arith.addf %90, %98 : vector<2x8x8x16xf32>
    %100 = vector.extract_strided_slice %91 {offsets = [0, 0, 0, 1], sizes = [2, 8, 8, 1], strides = [1, 1, 1, 1]} : vector<2x8x8x3xf32> to vector<2x8x8x1xf32>
    %c10 = arith.constant 10 : index
    %c0_55 = arith.constant 0 : index
    %101 = vector.load %arg3[%c10, %c0_55] : memref<27x16xf32, #tpu.memory_space<vmem>>, vector<1x16xf32>
    %102 = vector.shape_cast %101 : vector<1x16xf32> to vector<16xf32>
    %103 = vector.shape_cast %102 : vector<16xf32> to vector<1x1x1x16xf32>
    %104 = vector.broadcast %100 : vector<2x8x8x1xf32> to vector<2x8x8x16xf32>
    %105 = vector.broadcast %103 : vector<1x1x1x16xf32> to vector<2x8x8x16xf32>
    %106 = arith.mulf %104, %105 : vector<2x8x8x16xf32>
    %107 = arith.addf %99, %106 : vector<2x8x8x16xf32>
    %108 = vector.extract_strided_slice %91 {offsets = [0, 0, 0, 2], sizes = [2, 8, 8, 1], strides = [1, 1, 1, 1]} : vector<2x8x8x3xf32> to vector<2x8x8x1xf32>
    %c11 = arith.constant 11 : index
    %c0_56 = arith.constant 0 : index
    %109 = vector.load %arg3[%c11, %c0_56] : memref<27x16xf32, #tpu.memory_space<vmem>>, vector<1x16xf32>
    %110 = vector.shape_cast %109 : vector<1x16xf32> to vector<16xf32>
    %111 = vector.shape_cast %110 : vector<16xf32> to vector<1x1x1x16xf32>
    %112 = vector.broadcast %108 : vector<2x8x8x1xf32> to vector<2x8x8x16xf32>
    %113 = vector.broadcast %111 : vector<1x1x1x16xf32> to vector<2x8x8x16xf32>
    %114 = arith.mulf %112, %113 : vector<2x8x8x16xf32>
    %115 = arith.addf %107, %114 : vector<2x8x8x16xf32>
    %c0_57 = arith.constant 0 : index
    %c1_58 = arith.constant 1 : index
    %c1_59 = arith.constant 1 : index
    %c0_60 = arith.constant 0 : index
    %116 = tpu.strided_load %arg6[%c0_57, %c1_58, %c1_59, %c0_60] {strides = array<i32: 1, 2, 2, 1>} : memref<2x18x18x3xf32, #tpu.memory_space<vmem>>, vector<2x8x8x3xf32>
    %117 = vector.extract_strided_slice %116 {offsets = [0, 0, 0, 0], sizes = [2, 8, 8, 1], strides = [1, 1, 1, 1]} : vector<2x8x8x3xf32> to vector<2x8x8x1xf32>
    %c12 = arith.constant 12 : index
    %c0_61 = arith.constant 0 : index
    %118 = vector.load %arg3[%c12, %c0_61] : memref<27x16xf32, #tpu.memory_space<vmem>>, vector<1x16xf32>
    %119 = vector.shape_cast %118 : vector<1x16xf32> to vector<16xf32>
    %120 = vector.shape_cast %119 : vector<16xf32> to vector<1x1x1x16xf32>
    %121 = vector.broadcast %117 : vector<2x8x8x1xf32> to vector<2x8x8x16xf32>
    %122 = vector.broadcast %120 : vector<1x1x1x16xf32> to vector<2x8x8x16xf32>
    %123 = arith.mulf %121, %122 : vector<2x8x8x16xf32>
    %124 = arith.addf %115, %123 : vector<2x8x8x16xf32>
    %125 = vector.extract_strided_slice %116 {offsets = [0, 0, 0, 1], sizes = [2, 8, 8, 1], strides = [1, 1, 1, 1]} : vector<2x8x8x3xf32> to vector<2x8x8x1xf32>
    %c13 = arith.constant 13 : index
    %c0_62 = arith.constant 0 : index
    %126 = vector.load %arg3[%c13, %c0_62] : memref<27x16xf32, #tpu.memory_space<vmem>>, vector<1x16xf32>
    %127 = vector.shape_cast %126 : vector<1x16xf32> to vector<16xf32>
    %128 = vector.shape_cast %127 : vector<16xf32> to vector<1x1x1x16xf32>
    %129 = vector.broadcast %125 : vector<2x8x8x1xf32> to vector<2x8x8x16xf32>
    %130 = vector.broadcast %128 : vector<1x1x1x16xf32> to vector<2x8x8x16xf32>
    %131 = arith.mulf %129, %130 : vector<2x8x8x16xf32>
    %132 = arith.addf %124, %131 : vector<2x8x8x16xf32>
    %133 = vector.extract_strided_slice %116 {offsets = [0, 0, 0, 2], sizes = [2, 8, 8, 1], strides = [1, 1, 1, 1]} : vector<2x8x8x3xf32> to vector<2x8x8x1xf32>
    %c14 = arith.constant 14 : index
    %c0_63 = arith.constant 0 : index
    %134 = vector.load %arg3[%c14, %c0_63] : memref<27x16xf32, #tpu.memory_space<vmem>>, vector<1x16xf32>
    %135 = vector.shape_cast %134 : vector<1x16xf32> to vector<16xf32>
    %136 = vector.shape_cast %135 : vector<16xf32> to vector<1x1x1x16xf32>
    %137 = vector.broadcast %133 : vector<2x8x8x1xf32> to vector<2x8x8x16xf32>
    %138 = vector.broadcast %136 : vector<1x1x1x16xf32> to vector<2x8x8x16xf32>
    %139 = arith.mulf %137, %138 : vector<2x8x8x16xf32>
    %140 = arith.addf %132, %139 : vector<2x8x8x16xf32>
    %c0_64 = arith.constant 0 : index
    %c1_65 = arith.constant 1 : index
    %c2_66 = arith.constant 2 : index
    %c0_67 = arith.constant 0 : index
    %141 = tpu.strided_load %arg6[%c0_64, %c1_65, %c2_66, %c0_67] {strides = array<i32: 1, 2, 2, 1>} : memref<2x18x18x3xf32, #tpu.memory_space<vmem>>, vector<2x8x8x3xf32>
    %142 = vector.extract_strided_slice %141 {offsets = [0, 0, 0, 0], sizes = [2, 8, 8, 1], strides = [1, 1, 1, 1]} : vector<2x8x8x3xf32> to vector<2x8x8x1xf32>
    %c15 = arith.constant 15 : index
    %c0_68 = arith.constant 0 : index
    %143 = vector.load %arg3[%c15, %c0_68] : memref<27x16xf32, #tpu.memory_space<vmem>>, vector<1x16xf32>
    %144 = vector.shape_cast %143 : vector<1x16xf32> to vector<16xf32>
    %145 = vector.shape_cast %144 : vector<16xf32> to vector<1x1x1x16xf32>
    %146 = vector.broadcast %142 : vector<2x8x8x1xf32> to vector<2x8x8x16xf32>
    %147 = vector.broadcast %145 : vector<1x1x1x16xf32> to vector<2x8x8x16xf32>
    %148 = arith.mulf %146, %147 : vector<2x8x8x16xf32>
    %149 = arith.addf %140, %148 : vector<2x8x8x16xf32>
    %150 = vector.extract_strided_slice %141 {offsets = [0, 0, 0, 1], sizes = [2, 8, 8, 1], strides = [1, 1, 1, 1]} : vector<2x8x8x3xf32> to vector<2x8x8x1xf32>
    %c16 = arith.constant 16 : index
    %c0_69 = arith.constant 0 : index
    %151 = vector.load %arg3[%c16, %c0_69] : memref<27x16xf32, #tpu.memory_space<vmem>>, vector<1x16xf32>
    %152 = vector.shape_cast %151 : vector<1x16xf32> to vector<16xf32>
    %153 = vector.shape_cast %152 : vector<16xf32> to vector<1x1x1x16xf32>
    %154 = vector.broadcast %150 : vector<2x8x8x1xf32> to vector<2x8x8x16xf32>
    %155 = vector.broadcast %153 : vector<1x1x1x16xf32> to vector<2x8x8x16xf32>
    %156 = arith.mulf %154, %155 : vector<2x8x8x16xf32>
    %157 = arith.addf %149, %156 : vector<2x8x8x16xf32>
    %158 = vector.extract_strided_slice %141 {offsets = [0, 0, 0, 2], sizes = [2, 8, 8, 1], strides = [1, 1, 1, 1]} : vector<2x8x8x3xf32> to vector<2x8x8x1xf32>
    %c17_70 = arith.constant 17 : index
    %c0_71 = arith.constant 0 : index
    %159 = vector.load %arg3[%c17_70, %c0_71] : memref<27x16xf32, #tpu.memory_space<vmem>>, vector<1x16xf32>
    %160 = vector.shape_cast %159 : vector<1x16xf32> to vector<16xf32>
    %161 = vector.shape_cast %160 : vector<16xf32> to vector<1x1x1x16xf32>
    %162 = vector.broadcast %158 : vector<2x8x8x1xf32> to vector<2x8x8x16xf32>
    %163 = vector.broadcast %161 : vector<1x1x1x16xf32> to vector<2x8x8x16xf32>
    %164 = arith.mulf %162, %163 : vector<2x8x8x16xf32>
    %165 = arith.addf %157, %164 : vector<2x8x8x16xf32>
    %c0_72 = arith.constant 0 : index
    %c2_73 = arith.constant 2 : index
    %c0_74 = arith.constant 0 : index
    %c0_75 = arith.constant 0 : index
    %166 = tpu.strided_load %arg6[%c0_72, %c2_73, %c0_74, %c0_75] {strides = array<i32: 1, 2, 2, 1>} : memref<2x18x18x3xf32, #tpu.memory_space<vmem>>, vector<2x8x8x3xf32>
    %167 = vector.extract_strided_slice %166 {offsets = [0, 0, 0, 0], sizes = [2, 8, 8, 1], strides = [1, 1, 1, 1]} : vector<2x8x8x3xf32> to vector<2x8x8x1xf32>
    %c18 = arith.constant 18 : index
    %c0_76 = arith.constant 0 : index
    %168 = vector.load %arg3[%c18, %c0_76] : memref<27x16xf32, #tpu.memory_space<vmem>>, vector<1x16xf32>
    %169 = vector.shape_cast %168 : vector<1x16xf32> to vector<16xf32>
    %170 = vector.shape_cast %169 : vector<16xf32> to vector<1x1x1x16xf32>
    %171 = vector.broadcast %167 : vector<2x8x8x1xf32> to vector<2x8x8x16xf32>
    %172 = vector.broadcast %170 : vector<1x1x1x16xf32> to vector<2x8x8x16xf32>
    %173 = arith.mulf %171, %172 : vector<2x8x8x16xf32>
    %174 = arith.addf %165, %173 : vector<2x8x8x16xf32>
    %175 = vector.extract_strided_slice %166 {offsets = [0, 0, 0, 1], sizes = [2, 8, 8, 1], strides = [1, 1, 1, 1]} : vector<2x8x8x3xf32> to vector<2x8x8x1xf32>
    %c19 = arith.constant 19 : index
    %c0_77 = arith.constant 0 : index
    %176 = vector.load %arg3[%c19, %c0_77] : memref<27x16xf32, #tpu.memory_space<vmem>>, vector<1x16xf32>
    %177 = vector.shape_cast %176 : vector<1x16xf32> to vector<16xf32>
    %178 = vector.shape_cast %177 : vector<16xf32> to vector<1x1x1x16xf32>
    %179 = vector.broadcast %175 : vector<2x8x8x1xf32> to vector<2x8x8x16xf32>
    %180 = vector.broadcast %178 : vector<1x1x1x16xf32> to vector<2x8x8x16xf32>
    %181 = arith.mulf %179, %180 : vector<2x8x8x16xf32>
    %182 = arith.addf %174, %181 : vector<2x8x8x16xf32>
    %183 = vector.extract_strided_slice %166 {offsets = [0, 0, 0, 2], sizes = [2, 8, 8, 1], strides = [1, 1, 1, 1]} : vector<2x8x8x3xf32> to vector<2x8x8x1xf32>
    %c20 = arith.constant 20 : index
    %c0_78 = arith.constant 0 : index
    %184 = vector.load %arg3[%c20, %c0_78] : memref<27x16xf32, #tpu.memory_space<vmem>>, vector<1x16xf32>
    %185 = vector.shape_cast %184 : vector<1x16xf32> to vector<16xf32>
    %186 = vector.shape_cast %185 : vector<16xf32> to vector<1x1x1x16xf32>
    %187 = vector.broadcast %183 : vector<2x8x8x1xf32> to vector<2x8x8x16xf32>
    %188 = vector.broadcast %186 : vector<1x1x1x16xf32> to vector<2x8x8x16xf32>
    %189 = arith.mulf %187, %188 : vector<2x8x8x16xf32>
    %190 = arith.addf %182, %189 : vector<2x8x8x16xf32>
    %c0_79 = arith.constant 0 : index
    %c2_80 = arith.constant 2 : index
    %c1_81 = arith.constant 1 : index
    %c0_82 = arith.constant 0 : index
    %191 = tpu.strided_load %arg6[%c0_79, %c2_80, %c1_81, %c0_82] {strides = array<i32: 1, 2, 2, 1>} : memref<2x18x18x3xf32, #tpu.memory_space<vmem>>, vector<2x8x8x3xf32>
    %192 = vector.extract_strided_slice %191 {offsets = [0, 0, 0, 0], sizes = [2, 8, 8, 1], strides = [1, 1, 1, 1]} : vector<2x8x8x3xf32> to vector<2x8x8x1xf32>
    %c21 = arith.constant 21 : index
    %c0_83 = arith.constant 0 : index
    %193 = vector.load %arg3[%c21, %c0_83] : memref<27x16xf32, #tpu.memory_space<vmem>>, vector<1x16xf32>
    %194 = vector.shape_cast %193 : vector<1x16xf32> to vector<16xf32>
    %195 = vector.shape_cast %194 : vector<16xf32> to vector<1x1x1x16xf32>
    %196 = vector.broadcast %192 : vector<2x8x8x1xf32> to vector<2x8x8x16xf32>
    %197 = vector.broadcast %195 : vector<1x1x1x16xf32> to vector<2x8x8x16xf32>
    %198 = arith.mulf %196, %197 : vector<2x8x8x16xf32>
    %199 = arith.addf %190, %198 : vector<2x8x8x16xf32>
    %200 = vector.extract_strided_slice %191 {offsets = [0, 0, 0, 1], sizes = [2, 8, 8, 1], strides = [1, 1, 1, 1]} : vector<2x8x8x3xf32> to vector<2x8x8x1xf32>
    %c22 = arith.constant 22 : index
    %c0_84 = arith.constant 0 : index
    %201 = vector.load %arg3[%c22, %c0_84] : memref<27x16xf32, #tpu.memory_space<vmem>>, vector<1x16xf32>
    %202 = vector.shape_cast %201 : vector<1x16xf32> to vector<16xf32>
    %203 = vector.shape_cast %202 : vector<16xf32> to vector<1x1x1x16xf32>
    %204 = vector.broadcast %200 : vector<2x8x8x1xf32> to vector<2x8x8x16xf32>
    %205 = vector.broadcast %203 : vector<1x1x1x16xf32> to vector<2x8x8x16xf32>
    %206 = arith.mulf %204, %205 : vector<2x8x8x16xf32>
    %207 = arith.addf %199, %206 : vector<2x8x8x16xf32>
    %208 = vector.extract_strided_slice %191 {offsets = [0, 0, 0, 2], sizes = [2, 8, 8, 1], strides = [1, 1, 1, 1]} : vector<2x8x8x3xf32> to vector<2x8x8x1xf32>
    %c23 = arith.constant 23 : index
    %c0_85 = arith.constant 0 : index
    %209 = vector.load %arg3[%c23, %c0_85] : memref<27x16xf32, #tpu.memory_space<vmem>>, vector<1x16xf32>
    %210 = vector.shape_cast %209 : vector<1x16xf32> to vector<16xf32>
    %211 = vector.shape_cast %210 : vector<16xf32> to vector<1x1x1x16xf32>
    %212 = vector.broadcast %208 : vector<2x8x8x1xf32> to vector<2x8x8x16xf32>
    %213 = vector.broadcast %211 : vector<1x1x1x16xf32> to vector<2x8x8x16xf32>
    %214 = arith.mulf %212, %213 : vector<2x8x8x16xf32>
    %215 = arith.addf %207, %214 : vector<2x8x8x16xf32>
    %c0_86 = arith.constant 0 : index
    %c2_87 = arith.constant 2 : index
    %c2_88 = arith.constant 2 : index
    %c0_89 = arith.constant 0 : index
    %216 = tpu.strided_load %arg6[%c0_86, %c2_87, %c2_88, %c0_89] {strides = array<i32: 1, 2, 2, 1>} : memref<2x18x18x3xf32, #tpu.memory_space<vmem>>, vector<2x8x8x3xf32>
    %217 = vector.extract_strided_slice %216 {offsets = [0, 0, 0, 0], sizes = [2, 8, 8, 1], strides = [1, 1, 1, 1]} : vector<2x8x8x3xf32> to vector<2x8x8x1xf32>
    %c24 = arith.constant 24 : index
    %c0_90 = arith.constant 0 : index
    %218 = vector.load %arg3[%c24, %c0_90] : memref<27x16xf32, #tpu.memory_space<vmem>>, vector<1x16xf32>
    %219 = vector.shape_cast %218 : vector<1x16xf32> to vector<16xf32>
    %220 = vector.shape_cast %219 : vector<16xf32> to vector<1x1x1x16xf32>
    %221 = vector.broadcast %217 : vector<2x8x8x1xf32> to vector<2x8x8x16xf32>
    %222 = vector.broadcast %220 : vector<1x1x1x16xf32> to vector<2x8x8x16xf32>
    %223 = arith.mulf %221, %222 : vector<2x8x8x16xf32>
    %224 = arith.addf %215, %223 : vector<2x8x8x16xf32>
    %225 = vector.extract_strided_slice %216 {offsets = [0, 0, 0, 1], sizes = [2, 8, 8, 1], strides = [1, 1, 1, 1]} : vector<2x8x8x3xf32> to vector<2x8x8x1xf32>
    %c25 = arith.constant 25 : index
    %c0_91 = arith.constant 0 : index
    %226 = vector.load %arg3[%c25, %c0_91] : memref<27x16xf32, #tpu.memory_space<vmem>>, vector<1x16xf32>
    %227 = vector.shape_cast %226 : vector<1x16xf32> to vector<16xf32>
    %228 = vector.shape_cast %227 : vector<16xf32> to vector<1x1x1x16xf32>
    %229 = vector.broadcast %225 : vector<2x8x8x1xf32> to vector<2x8x8x16xf32>
    %230 = vector.broadcast %228 : vector<1x1x1x16xf32> to vector<2x8x8x16xf32>
    %231 = arith.mulf %229, %230 : vector<2x8x8x16xf32>
    %232 = arith.addf %224, %231 : vector<2x8x8x16xf32>
    %233 = vector.extract_strided_slice %216 {offsets = [0, 0, 0, 2], sizes = [2, 8, 8, 1], strides = [1, 1, 1, 1]} : vector<2x8x8x3xf32> to vector<2x8x8x1xf32>
    %c26 = arith.constant 26 : index
    %c0_92 = arith.constant 0 : index
    %234 = vector.load %arg3[%c26, %c0_92] : memref<27x16xf32, #tpu.memory_space<vmem>>, vector<1x16xf32>
    %235 = vector.shape_cast %234 : vector<1x16xf32> to vector<16xf32>
    %236 = vector.shape_cast %235 : vector<16xf32> to vector<1x1x1x16xf32>
    %237 = vector.broadcast %233 : vector<2x8x8x1xf32> to vector<2x8x8x16xf32>
    %238 = vector.broadcast %236 : vector<1x1x1x16xf32> to vector<2x8x8x16xf32>
    %239 = arith.mulf %237, %238 : vector<2x8x8x16xf32>
    %240 = arith.addf %232, %239 : vector<2x8x8x16xf32>
    %c0_93 = arith.constant 0 : index
    %c0_94 = arith.constant 0 : index
    %241 = vector.load %arg4[%c0_93, %c0_94] : memref<1x16xf32, #tpu.memory_space<vmem>>, vector<1x16xf32>
    %242 = vector.shape_cast %241 : vector<1x16xf32> to vector<16xf32>
    %243 = vector.shape_cast %242 : vector<16xf32> to vector<1x1x1x16xf32>
    %244 = vector.broadcast %243 : vector<1x1x1x16xf32> to vector<2x8x8x16xf32>
    %245 = arith.addf %240, %244 : vector<2x8x8x16xf32>
    %246 = arith.truncf %245 : vector<2x8x8x16xf32> to vector<2x8x8x16xbf16>
    %c0_95 = arith.constant 0 : index
    %c0_96 = arith.constant 0 : index
    %c0_97 = arith.constant 0 : index
    %c0_98 = arith.constant 0 : index
    %247 = vector.load %arg5[%c0_95, %c0_96, %c0_97, %c0_98] : memref<2x8x8x16xbf16, #tpu.memory_space<vmem>>, vector<2x8x8x16xbf16>
    tpu.vector_store %arg5[%c0_95, %c0_96, %c0_97, %c0_98], %246 {strides = array<i32>} : memref<2x8x8x16xbf16, #tpu.memory_space<vmem>>, vector<2x8x8x16xbf16>,
    return
  }
  func.func @transform_0(%arg0: i32) -> (i32, i32, i32, i32) {
    %c0_i32 = arith.constant 0 : i32
    %c0_i32_0 = arith.constant 0 : i32
    %c0_i32_1 = arith.constant 0 : i32
    %c0_i32_2 = arith.constant 0 : i32
    return %arg0, %c0_i32, %c0_i32_0, %c0_i32_1 : i32, i32, i32, i32
  }
  func.func @transform_1(%arg0: i32) -> (i32, i32) {
    %c0_i32 = arith.constant 0 : i32
    %c0_i32_0 = arith.constant 0 : i32
    %c0_i32_1 = arith.constant 0 : i32
    return %c0_i32, %c0_i32_0 : i32, i32
  }
  func.func @transform_2(%arg0: i32) -> (i32, i32) {
    %c0_i32 = arith.constant 0 : i32
    %c0_i32_0 = arith.constant 0 : i32
    %c0_i32_1 = arith.constant 0 : i32
    return %c0_i32, %c0_i32_0 : i32, i32
  }
  func.func @transform_3(%arg0: i32) -> (i32, i32) {
    %c0_i32 = arith.constant 0 : i32
    %c0_i32_0 = arith.constant 0 : i32
    %c0_i32_1 = arith.constant 0 : i32
    return %c0_i32, %c0_i32_0 : i32, i32
  }
  func.func @transform_4(%arg0: i32) -> (i32, i32, i32, i32) {
    %c0_i32 = arith.constant 0 : i32
    %c0_i32_0 = arith.constant 0 : i32
    %c0_i32_1 = arith.constant 0 : i32
    %c0_i32_2 = arith.constant 0 : i32
    return %arg0, %c0_i32, %c0_i32_0, %c0_i32_1 : i32, i32, i32, i32
  }
}

module attributes {stable_mosaic.version = 11 : i64} {
  func.func @_head_tl_kernel(%arg0: i32, %arg1: memref<2x16x24xbf16, #tpu.memory_space<vmem>>, %arg2: memref<24x32xbf16, #tpu.memory_space<vmem>>, %arg3: memref<1x32xf32, #tpu.memory_space<vmem>>, %arg4: memref<32x512xbf16, #tpu.memory_space<vmem>>, %arg5: memref<1x512xf32, #tpu.memory_space<vmem>>, %arg6: memref<512x8xbf16, #tpu.memory_space<vmem>>, %arg7: memref<1x8xf32, #tpu.memory_space<vmem>>, %arg8: memref<2x8x32xf32, #tpu.memory_space<vmem>>) attributes {dimension_semantics = [#tpu.dimension_semantics<parallel>], iteration_bounds = array<i64: 2>, scalar_prefetch = 0 : i64, scratch_operands = 0 : i64, tpu.core_type = #tpu.core_type<tc>, window_params = [{transform_indices = @transform_0, window_bounds = array<i64: 2, 16, 24>}, {pipeline_mode = #tpu.pipeline_mode<synchronous>, transform_indices = @transform_1, window_bounds = array<i64: 24, 32>}, {pipeline_mode = #tpu.pipeline_mode<synchronous>, transform_indices = @transform_2, window_bounds = array<i64: 1, 32>}, {pipeline_mode = #tpu.pipeline_mode<synchronous>, transform_indices = @transform_3, window_bounds = array<i64: 32, 512>}, {pipeline_mode = #tpu.pipeline_mode<synchronous>, transform_indices = @transform_4, window_bounds = array<i64: 1, 512>}, {pipeline_mode = #tpu.pipeline_mode<synchronous>, transform_indices = @transform_5, window_bounds = array<i64: 512, 8>}, {pipeline_mode = #tpu.pipeline_mode<synchronous>, transform_indices = @transform_6, window_bounds = array<i64: 1, 8>}, {transform_indices = @transform_7, window_bounds = array<i64: 2, 8, 32>}]} {
    %c0 = arith.constant 0 : index
    %c0_0 = arith.constant 0 : index
    %c0_1 = arith.constant 0 : index
    %0 = vector.load %arg1[%c0, %c0_0, %c0_1] : memref<2x16x24xbf16, #tpu.memory_space<vmem>>, vector<2x16x24xbf16>
    %1 = vector.shape_cast %0 : vector<2x16x24xbf16> to vector<32x24xbf16>
    %c0_2 = arith.constant 0 : index
    %c0_3 = arith.constant 0 : index
    %2 = vector.load %arg2[%c0_2, %c0_3] : memref<24x32xbf16, #tpu.memory_space<vmem>>, vector<24x32xbf16>
    %cst = arith.constant dense<0.000000e+00> : vector<32x32xf32>
    %3 = tpu.matmul %1, %2, %cst {dimension_numbers = #tpu.dot_dimension_numbers<[1], [0], [0], [1], [0, 0, 1, 1], [], []>} : vector<32x24xbf16>, vector<24x32xbf16>, vector<32x32xf32> -> vector<32x32xf32>
    %c0_4 = arith.constant 0 : index
    %c0_5 = arith.constant 0 : index
    %4 = vector.load %arg3[%c0_4, %c0_5] : memref<1x32xf32, #tpu.memory_space<vmem>>, vector<1x32xf32>
    %5 = vector.broadcast %4 : vector<1x32xf32> to vector<32x32xf32>
    %6 = arith.addf %3, %5 : vector<32x32xf32>
    %7 = arith.truncf %6 : vector<32x32xf32> to vector<32x32xbf16>
    %c0_6 = arith.constant 0 : index
    %c0_7 = arith.constant 0 : index
    %8 = vector.load %arg4[%c0_6, %c0_7] : memref<32x512xbf16, #tpu.memory_space<vmem>>, vector<32x512xbf16>
    %cst_8 = arith.constant dense<0.000000e+00> : vector<32x512xf32>
    %9 = tpu.matmul %7, %8, %cst_8 {dimension_numbers = #tpu.dot_dimension_numbers<[1], [0], [0], [1], [0, 0, 1, 1], [], []>} : vector<32x32xbf16>, vector<32x512xbf16>, vector<32x512xf32> -> vector<32x512xf32>
    %c0_9 = arith.constant 0 : index
    %c0_10 = arith.constant 0 : index
    %10 = vector.load %arg5[%c0_9, %c0_10] : memref<1x512xf32, #tpu.memory_space<vmem>>, vector<1x512xf32>
    %11 = vector.broadcast %10 : vector<1x512xf32> to vector<32x512xf32>
    %12 = arith.addf %9, %11 : vector<32x512xf32>
    %cst_11 = arith.constant 5.000000e-01 : f32
    %13 = vector.broadcast %cst_11 : f32 to vector<32x512xf32>
    %14 = arith.mulf %13, %12 : vector<32x512xf32>
    %cst_12 = arith.constant 4.471500e-02 : f32
    %15 = vector.broadcast %cst_12 : f32 to vector<32x512xf32>
    %16 = arith.mulf %15, %12 : vector<32x512xf32>
    %17 = arith.mulf %16, %12 : vector<32x512xf32>
    %18 = arith.mulf %17, %12 : vector<32x512xf32>
    %19 = arith.addf %12, %18 : vector<32x512xf32>
    %cst_13 = arith.constant 0.797884583 : f32
    %20 = vector.broadcast %cst_13 : f32 to vector<32x512xf32>
    %21 = arith.mulf %20, %19 : vector<32x512xf32>
    %22 = math.tanh %21 : vector<32x512xf32>
    %cst_14 = arith.constant 1.000000e+00 : f32
    %23 = vector.broadcast %cst_14 : f32 to vector<32x512xf32>
    %24 = arith.addf %23, %22 : vector<32x512xf32>
    %25 = arith.mulf %14, %24 : vector<32x512xf32>
    %26 = arith.truncf %25 : vector<32x512xf32> to vector<32x512xbf16>
    %c0_15 = arith.constant 0 : index
    %c0_16 = arith.constant 0 : index
    %27 = vector.load %arg6[%c0_15, %c0_16] : memref<512x8xbf16, #tpu.memory_space<vmem>>, vector<512x8xbf16>
    %cst_17 = arith.constant dense<0.000000e+00> : vector<32x8xf32>
    %28 = tpu.matmul %26, %27, %cst_17 {dimension_numbers = #tpu.dot_dimension_numbers<[1], [0], [0], [1], [0, 0, 1, 1], [], []>} : vector<32x512xbf16>, vector<512x8xbf16>, vector<32x8xf32> -> vector<32x8xf32>
    %c0_18 = arith.constant 0 : index
    %c0_19 = arith.constant 0 : index
    %29 = vector.load %arg7[%c0_18, %c0_19] : memref<1x8xf32, #tpu.memory_space<vmem>>, vector<1x8xf32>
    %30 = vector.broadcast %29 : vector<1x8xf32> to vector<32x8xf32>
    %31 = arith.addf %28, %30 : vector<32x8xf32>
    %32 = vector.shape_cast %31 : vector<32x8xf32> to vector<2x16x8xf32>
    %33 = arith.truncf %32 : vector<2x16x8xf32> to vector<2x16x8xbf16>
    %34 = vector.shape_cast %6 : vector<32x32xf32> to vector<2x16x32xf32>
    %35 = arith.truncf %34 : vector<2x16x32xf32> to vector<2x16x32xbf16>
    "tpu.trace_start"() <{level = 10 : i32, message = "bsg,bse->bge"}> : () -> ()
    %cst_20 = arith.constant dense<0.000000e+00> : vector<2x8x32xf32>
    %36 = tpu.matmul %33, %35, %cst_20 {dimension_numbers = #tpu.dot_dimension_numbers<[1], [1], [2], [2], [0, 0, 0, 2, 1, 2], [0], [0]>} : vector<2x16x8xbf16>, vector<2x16x32xbf16>, vector<2x8x32xf32> -> vector<2x8x32xf32>
    "tpu.trace_stop"() : () -> ()
    %cst_21 = arith.constant 6.250000e-02 : f32
    %37 = vector.broadcast %cst_21 : f32 to vector<2x8x32xf32>
    %38 = arith.mulf %36, %37 : vector<2x8x32xf32>
    %c0_22 = arith.constant 0 : index
    %c0_23 = arith.constant 0 : index
    %c0_24 = arith.constant 0 : index
    %39 = vector.load %arg8[%c0_22, %c0_23, %c0_24] : memref<2x8x32xf32, #tpu.memory_space<vmem>>, vector<2x8x32xf32>
    tpu.vector_store %arg8[%c0_22, %c0_23, %c0_24], %38 {strides = array<i32>} : memref<2x8x32xf32, #tpu.memory_space<vmem>>, vector<2x8x32xf32>,
    return
  }
  func.func @transform_0(%arg0: i32) -> (i32, i32, i32) {
    %c0_i32 = arith.constant 0 : i32
    %c0_i32_0 = arith.constant 0 : i32
    %c0_i32_1 = arith.constant 0 : i32
    return %arg0, %c0_i32, %c0_i32_0 : i32, i32, i32
  }
  func.func @transform_1(%arg0: i32) -> (i32, i32) {
    %c0_i32 = arith.constant 0 : i32
    %c0_i32_0 = arith.constant 0 : i32
    %c0_i32_1 = arith.constant 0 : i32
    return %c0_i32, %c0_i32_0 : i32, i32
  }
  func.func @transform_2(%arg0: i32) -> (i32, i32) {
    %c0_i32 = arith.constant 0 : i32
    %c0_i32_0 = arith.constant 0 : i32
    %c0_i32_1 = arith.constant 0 : i32
    return %c0_i32, %c0_i32_0 : i32, i32
  }
  func.func @transform_3(%arg0: i32) -> (i32, i32) {
    %c0_i32 = arith.constant 0 : i32
    %c0_i32_0 = arith.constant 0 : i32
    %c0_i32_1 = arith.constant 0 : i32
    return %c0_i32, %c0_i32_0 : i32, i32
  }
  func.func @transform_4(%arg0: i32) -> (i32, i32) {
    %c0_i32 = arith.constant 0 : i32
    %c0_i32_0 = arith.constant 0 : i32
    %c0_i32_1 = arith.constant 0 : i32
    return %c0_i32, %c0_i32_0 : i32, i32
  }
  func.func @transform_5(%arg0: i32) -> (i32, i32) {
    %c0_i32 = arith.constant 0 : i32
    %c0_i32_0 = arith.constant 0 : i32
    %c0_i32_1 = arith.constant 0 : i32
    return %c0_i32, %c0_i32_0 : i32, i32
  }
  func.func @transform_6(%arg0: i32) -> (i32, i32) {
    %c0_i32 = arith.constant 0 : i32
    %c0_i32_0 = arith.constant 0 : i32
    %c0_i32_1 = arith.constant 0 : i32
    return %c0_i32, %c0_i32_0 : i32, i32
  }
  func.func @transform_7(%arg0: i32) -> (i32, i32, i32) {
    %c0_i32 = arith.constant 0 : i32
    %c0_i32_0 = arith.constant 0 : i32
    %c0_i32_1 = arith.constant 0 : i32
    return %arg0, %c0_i32, %c0_i32_0 : i32, i32, i32
  }
}

module attributes {stable_mosaic.version = 11 : i64} {
  func.func @_mbconv_kernel(%arg0: i32, %arg1: memref<2x8x8x16xbf16, #tpu.memory_space<vmem>>, %arg2: memref<16x96xbf16, #tpu.memory_space<vmem>>, %arg3: memref<1x96xf32, #tpu.memory_space<vmem>>, %arg4: memref<9x96xf32, #tpu.memory_space<vmem>>, %arg5: memref<1x96xf32, #tpu.memory_space<vmem>>, %arg6: memref<96x24xf32, #tpu.memory_space<vmem>>, %arg7: memref<24x96xf32, #tpu.memory_space<vmem>>, %arg8: memref<96x24xbf16, #tpu.memory_space<vmem>>, %arg9: memref<1x24xf32, #tpu.memory_space<vmem>>, %arg10: memref<2x16x24xbf16, #tpu.memory_space<vmem>>, %arg11: memref<2x10x10x96xf32, #tpu.memory_space<vmem>>) attributes {dimension_semantics = [#tpu.dimension_semantics<parallel>], iteration_bounds = array<i64: 2>, scalar_prefetch = 0 : i64, scratch_operands = 1 : i64, tpu.core_type = #tpu.core_type<tc>, window_params = [{transform_indices = @transform_0, window_bounds = array<i64: 2, 8, 8, 16>}, {pipeline_mode = #tpu.pipeline_mode<synchronous>, transform_indices = @transform_1, window_bounds = array<i64: 16, 96>}, {pipeline_mode = #tpu.pipeline_mode<synchronous>, transform_indices = @transform_2, window_bounds = array<i64: 1, 96>}, {pipeline_mode = #tpu.pipeline_mode<synchronous>, transform_indices = @transform_3, window_bounds = array<i64: 9, 96>}, {pipeline_mode = #tpu.pipeline_mode<synchronous>, transform_indices = @transform_4, window_bounds = array<i64: 1, 96>}, {pipeline_mode = #tpu.pipeline_mode<synchronous>, transform_indices = @transform_5, window_bounds = array<i64: 96, 24>}, {pipeline_mode = #tpu.pipeline_mode<synchronous>, transform_indices = @transform_6, window_bounds = array<i64: 24, 96>}, {pipeline_mode = #tpu.pipeline_mode<synchronous>, transform_indices = @transform_7, window_bounds = array<i64: 96, 24>}, {pipeline_mode = #tpu.pipeline_mode<synchronous>, transform_indices = @transform_8, window_bounds = array<i64: 1, 24>}, {transform_indices = @transform_9, window_bounds = array<i64: 2, 16, 24>}]} {
    %c0 = arith.constant 0 : index
    %c0_0 = arith.constant 0 : index
    %c0_1 = arith.constant 0 : index
    %c0_2 = arith.constant 0 : index
    %0 = vector.load %arg1[%c0, %c0_0, %c0_1, %c0_2] : memref<2x8x8x16xbf16, #tpu.memory_space<vmem>>, vector<2x8x8x16xbf16>
    %1 = vector.shape_cast %0 : vector<2x8x8x16xbf16> to vector<128x16xbf16>
    %c0_3 = arith.constant 0 : index
    %c0_4 = arith.constant 0 : index
    %2 = vector.load %arg2[%c0_3, %c0_4] : memref<16x96xbf16, #tpu.memory_space<vmem>>, vector<16x96xbf16>
    %cst = arith.constant dense<0.000000e+00> : vector<128x96xf32>
    %3 = tpu.matmul %1, %2, %cst {dimension_numbers = #tpu.dot_dimension_numbers<[1], [0], [0], [1], [0, 0, 1, 1], [], []>} : vector<128x16xbf16>, vector<16x96xbf16>, vector<128x96xf32> -> vector<128x96xf32>
    %c0_5 = arith.constant 0 : index
    %c0_6 = arith.constant 0 : index
    %4 = vector.load %arg3[%c0_5, %c0_6] : memref<1x96xf32, #tpu.memory_space<vmem>>, vector<1x96xf32>
    %5 = vector.broadcast %4 : vector<1x96xf32> to vector<128x96xf32>
    %6 = arith.addf %3, %5 : vector<128x96xf32>
    %cst_7 = arith.constant 5.000000e-01 : f32
    %7 = vector.broadcast %cst_7 : f32 to vector<128x96xf32>
    %8 = arith.mulf %7, %6 : vector<128x96xf32>
    %cst_8 = arith.constant 4.471500e-02 : f32
    %9 = vector.broadcast %cst_8 : f32 to vector<128x96xf32>
    %10 = arith.mulf %9, %6 : vector<128x96xf32>
    %11 = arith.mulf %10, %6 : vector<128x96xf32>
    %12 = arith.mulf %11, %6 : vector<128x96xf32>
    %13 = arith.addf %6, %12 : vector<128x96xf32>
    %cst_9 = arith.constant 0.797884583 : f32
    %14 = vector.broadcast %cst_9 : f32 to vector<128x96xf32>
    %15 = arith.mulf %14, %13 : vector<128x96xf32>
    %16 = math.tanh %15 : vector<128x96xf32>
    %cst_10 = arith.constant 1.000000e+00 : f32
    %17 = vector.broadcast %cst_10 : f32 to vector<128x96xf32>
    %18 = arith.addf %17, %16 : vector<128x96xf32>
    %19 = arith.mulf %8, %18 : vector<128x96xf32>
    %cst_11 = arith.constant 0.000000e+00 : f32
    %20 = vector.broadcast %cst_11 : f32 to vector<2x1x10x96xf32>
    %c0_12 = arith.constant 0 : index
    %c0_13 = arith.constant 0 : index
    %c0_14 = arith.constant 0 : index
    %c0_15 = arith.constant 0 : index
    %21 = vector.load %arg11[%c0_12, %c0_13, %c0_14, %c0_15] : memref<2x10x10x96xf32, #tpu.memory_space<vmem>>, vector<2x1x10x96xf32>
    tpu.vector_store %arg11[%c0_12, %c0_13, %c0_14, %c0_15], %20 {strides = array<i32>} : memref<2x10x10x96xf32, #tpu.memory_space<vmem>>, vector<2x1x10x96xf32>,
    %cst_16 = arith.constant 0.000000e+00 : f32
    %22 = vector.broadcast %cst_16 : f32 to vector<2x1x10x96xf32>
    %c0_17 = arith.constant 0 : index
    %c9 = arith.constant 9 : index
    %c0_18 = arith.constant 0 : index
    %c0_19 = arith.constant 0 : index
    %23 = vector.load %arg11[%c0_17, %c9, %c0_18, %c0_19] : memref<2x10x10x96xf32, #tpu.memory_space<vmem>>, vector<2x1x10x96xf32>
    tpu.vector_store %arg11[%c0_17, %c9, %c0_18, %c0_19], %22 {strides = array<i32>} : memref<2x10x10x96xf32, #tpu.memory_space<vmem>>, vector<2x1x10x96xf32>,
    %cst_20 = arith.constant 0.000000e+00 : f32
    %24 = vector.broadcast %cst_20 : f32 to vector<2x10x1x96xf32>
    %c0_21 = arith.constant 0 : index
    %c0_22 = arith.constant 0 : index
    %c0_23 = arith.constant 0 : index
    %c0_24 = arith.constant 0 : index
    %25 = vector.load %arg11[%c0_21, %c0_22, %c0_23, %c0_24] : memref<2x10x10x96xf32, #tpu.memory_space<vmem>>, vector<2x10x1x96xf32>
    tpu.vector_store %arg11[%c0_21, %c0_22, %c0_23, %c0_24], %24 {strides = array<i32>} : memref<2x10x10x96xf32, #tpu.memory_space<vmem>>, vector<2x10x1x96xf32>,
    %cst_25 = arith.constant 0.000000e+00 : f32
    %26 = vector.broadcast %cst_25 : f32 to vector<2x10x1x96xf32>
    %c0_26 = arith.constant 0 : index
    %c0_27 = arith.constant 0 : index
    %c9_28 = arith.constant 9 : index
    %c0_29 = arith.constant 0 : index
    %27 = vector.load %arg11[%c0_26, %c0_27, %c9_28, %c0_29] : memref<2x10x10x96xf32, #tpu.memory_space<vmem>>, vector<2x10x1x96xf32>
    tpu.vector_store %arg11[%c0_26, %c0_27, %c9_28, %c0_29], %26 {strides = array<i32>} : memref<2x10x10x96xf32, #tpu.memory_space<vmem>>, vector<2x10x1x96xf32>,
    %28 = vector.shape_cast %19 : vector<128x96xf32> to vector<2x8x8x96xf32>
    %c0_30 = arith.constant 0 : index
    %c1 = arith.constant 1 : index
    %c1_31 = arith.constant 1 : index
    %c0_32 = arith.constant 0 : index
    %29 = vector.load %arg11[%c0_30, %c1, %c1_31, %c0_32] : memref<2x10x10x96xf32, #tpu.memory_space<vmem>>, vector<2x8x8x96xf32>
    tpu.vector_store %arg11[%c0_30, %c1, %c1_31, %c0_32], %28 {strides = array<i32>} : memref<2x10x10x96xf32, #tpu.memory_space<vmem>>, vector<2x8x8x96xf32>,
    %cst_33 = arith.constant 0.000000e+00 : f32
    %30 = vector.broadcast %cst_33 : f32 to vector<2x4x4x96xf32>
    %c0_34 = arith.constant 0 : index
    %c0_35 = arith.constant 0 : index
    %c0_36 = arith.constant 0 : index
    %c0_37 = arith.constant 0 : index
    %31 = tpu.strided_load %arg11[%c0_34, %c0_35, %c0_36, %c0_37] {strides = array<i32: 1, 2, 2, 1>} : memref<2x10x10x96xf32, #tpu.memory_space<vmem>>, vector<2x4x4x96xf32>
    %c0_38 = arith.constant 0 : index
    %c0_39 = arith.constant 0 : index
    %32 = vector.load %arg4[%c0_38, %c0_39] : memref<9x96xf32, #tpu.memory_space<vmem>>, vector<1x96xf32>
    %33 = vector.shape_cast %32 : vector<1x96xf32> to vector<96xf32>
    %34 = vector.shape_cast %33 : vector<96xf32> to vector<1x1x1x96xf32>
    %35 = vector.broadcast %34 : vector<1x1x1x96xf32> to vector<2x4x4x96xf32>
    %36 = arith.mulf %31, %35 : vector<2x4x4x96xf32>
    %37 = arith.addf %30, %36 : vector<2x4x4x96xf32>
    %c0_40 = arith.constant 0 : index
    %c0_41 = arith.constant 0 : index
    %c1_42 = arith.constant 1 : index
    %c0_43 = arith.constant 0 : index
    %38 = tpu.strided_load %arg11[%c0_40, %c0_41, %c1_42, %c0_43] {strides = array<i32: 1, 2, 2, 1>} : memref<2x10x10x96xf32, #tpu.memory_space<vmem>>, vector<2x4x4x96xf32>
    %c1_44 = arith.constant 1 : index
    %c0_45 = arith.constant 0 : index
    %39 = vector.load %arg4[%c1_44, %c0_45] : memref<9x96xf32, #tpu.memory_space<vmem>>, vector<1x96xf32>
    %40 = vector.shape_cast %39 : vector<1x96xf32> to vector<96xf32>
    %41 = vector.shape_cast %40 : vector<96xf32> to vector<1x1x1x96xf32>
    %42 = vector.broadcast %41 : vector<1x1x1x96xf32> to vector<2x4x4x96xf32>
    %43 = arith.mulf %38, %42 : vector<2x4x4x96xf32>
    %44 = arith.addf %37, %43 : vector<2x4x4x96xf32>
    %c0_46 = arith.constant 0 : index
    %c0_47 = arith.constant 0 : index
    %c2 = arith.constant 2 : index
    %c0_48 = arith.constant 0 : index
    %45 = tpu.strided_load %arg11[%c0_46, %c0_47, %c2, %c0_48] {strides = array<i32: 1, 2, 2, 1>} : memref<2x10x10x96xf32, #tpu.memory_space<vmem>>, vector<2x4x4x96xf32>
    %c2_49 = arith.constant 2 : index
    %c0_50 = arith.constant 0 : index
    %46 = vector.load %arg4[%c2_49, %c0_50] : memref<9x96xf32, #tpu.memory_space<vmem>>, vector<1x96xf32>
    %47 = vector.shape_cast %46 : vector<1x96xf32> to vector<96xf32>
    %48 = vector.shape_cast %47 : vector<96xf32> to vector<1x1x1x96xf32>
    %49 = vector.broadcast %48 : vector<1x1x1x96xf32> to vector<2x4x4x96xf32>
    %50 = arith.mulf %45, %49 : vector<2x4x4x96xf32>
    %51 = arith.addf %44, %50 : vector<2x4x4x96xf32>
    %c0_51 = arith.constant 0 : index
    %c1_52 = arith.constant 1 : index
    %c0_53 = arith.constant 0 : index
    %c0_54 = arith.constant 0 : index
    %52 = tpu.strided_load %arg11[%c0_51, %c1_52, %c0_53, %c0_54] {strides = array<i32: 1, 2, 2, 1>} : memref<2x10x10x96xf32, #tpu.memory_space<vmem>>, vector<2x4x4x96xf32>
    %c3 = arith.constant 3 : index
    %c0_55 = arith.constant 0 : index
    %53 = vector.load %arg4[%c3, %c0_55] : memref<9x96xf32, #tpu.memory_space<vmem>>, vector<1x96xf32>
    %54 = vector.shape_cast %53 : vector<1x96xf32> to vector<96xf32>
    %55 = vector.shape_cast %54 : vector<96xf32> to vector<1x1x1x96xf32>
    %56 = vector.broadcast %55 : vector<1x1x1x96xf32> to vector<2x4x4x96xf32>
    %57 = arith.mulf %52, %56 : vector<2x4x4x96xf32>
    %58 = arith.addf %51, %57 : vector<2x4x4x96xf32>
    %c0_56 = arith.constant 0 : index
    %c1_57 = arith.constant 1 : index
    %c1_58 = arith.constant 1 : index
    %c0_59 = arith.constant 0 : index
    %59 = tpu.strided_load %arg11[%c0_56, %c1_57, %c1_58, %c0_59] {strides = array<i32: 1, 2, 2, 1>} : memref<2x10x10x96xf32, #tpu.memory_space<vmem>>, vector<2x4x4x96xf32>
    %c4 = arith.constant 4 : index
    %c0_60 = arith.constant 0 : index
    %60 = vector.load %arg4[%c4, %c0_60] : memref<9x96xf32, #tpu.memory_space<vmem>>, vector<1x96xf32>
    %61 = vector.shape_cast %60 : vector<1x96xf32> to vector<96xf32>
    %62 = vector.shape_cast %61 : vector<96xf32> to vector<1x1x1x96xf32>
    %63 = vector.broadcast %62 : vector<1x1x1x96xf32> to vector<2x4x4x96xf32>
    %64 = arith.mulf %59, %63 : vector<2x4x4x96xf32>
    %65 = arith.addf %58, %64 : vector<2x4x4x96xf32>
    %c0_61 = arith.constant 0 : index
    %c1_62 = arith.constant 1 : index
    %c2_63 = arith.constant 2 : index
    %c0_64 = arith.constant 0 : index
    %66 = tpu.strided_load %arg11[%c0_61, %c1_62, %c2_63, %c0_64] {strides = array<i32: 1, 2, 2, 1>} : memref<2x10x10x96xf32, #tpu.memory_space<vmem>>, vector<2x4x4x96xf32>
    %c5 = arith.constant 5 : index
    %c0_65 = arith.constant 0 : index
    %67 = vector.load %arg4[%c5, %c0_65] : memref<9x96xf32, #tpu.memory_space<vmem>>, vector<1x96xf32>
    %68 = vector.shape_cast %67 : vector<1x96xf32> to vector<96xf32>
    %69 = vector.shape_cast %68 : vector<96xf32> to vector<1x1x1x96xf32>
    %70 = vector.broadcast %69 : vector<1x1x1x96xf32> to vector<2x4x4x96xf32>
    %71 = arith.mulf %66, %70 : vector<2x4x4x96xf32>
    %72 = arith.addf %65, %71 : vector<2x4x4x96xf32>
    %c0_66 = arith.constant 0 : index
    %c2_67 = arith.constant 2 : index
    %c0_68 = arith.constant 0 : index
    %c0_69 = arith.constant 0 : index
    %73 = tpu.strided_load %arg11[%c0_66, %c2_67, %c0_68, %c0_69] {strides = array<i32: 1, 2, 2, 1>} : memref<2x10x10x96xf32, #tpu.memory_space<vmem>>, vector<2x4x4x96xf32>
    %c6 = arith.constant 6 : index
    %c0_70 = arith.constant 0 : index
    %74 = vector.load %arg4[%c6, %c0_70] : memref<9x96xf32, #tpu.memory_space<vmem>>, vector<1x96xf32>
    %75 = vector.shape_cast %74 : vector<1x96xf32> to vector<96xf32>
    %76 = vector.shape_cast %75 : vector<96xf32> to vector<1x1x1x96xf32>
    %77 = vector.broadcast %76 : vector<1x1x1x96xf32> to vector<2x4x4x96xf32>
    %78 = arith.mulf %73, %77 : vector<2x4x4x96xf32>
    %79 = arith.addf %72, %78 : vector<2x4x4x96xf32>
    %c0_71 = arith.constant 0 : index
    %c2_72 = arith.constant 2 : index
    %c1_73 = arith.constant 1 : index
    %c0_74 = arith.constant 0 : index
    %80 = tpu.strided_load %arg11[%c0_71, %c2_72, %c1_73, %c0_74] {strides = array<i32: 1, 2, 2, 1>} : memref<2x10x10x96xf32, #tpu.memory_space<vmem>>, vector<2x4x4x96xf32>
    %c7 = arith.constant 7 : index
    %c0_75 = arith.constant 0 : index
    %81 = vector.load %arg4[%c7, %c0_75] : memref<9x96xf32, #tpu.memory_space<vmem>>, vector<1x96xf32>
    %82 = vector.shape_cast %81 : vector<1x96xf32> to vector<96xf32>
    %83 = vector.shape_cast %82 : vector<96xf32> to vector<1x1x1x96xf32>
    %84 = vector.broadcast %83 : vector<1x1x1x96xf32> to vector<2x4x4x96xf32>
    %85 = arith.mulf %80, %84 : vector<2x4x4x96xf32>
    %86 = arith.addf %79, %85 : vector<2x4x4x96xf32>
    %c0_76 = arith.constant 0 : index
    %c2_77 = arith.constant 2 : index
    %c2_78 = arith.constant 2 : index
    %c0_79 = arith.constant 0 : index
    %87 = tpu.strided_load %arg11[%c0_76, %c2_77, %c2_78, %c0_79] {strides = array<i32: 1, 2, 2, 1>} : memref<2x10x10x96xf32, #tpu.memory_space<vmem>>, vector<2x4x4x96xf32>
    %c8 = arith.constant 8 : index
    %c0_80 = arith.constant 0 : index
    %88 = vector.load %arg4[%c8, %c0_80] : memref<9x96xf32, #tpu.memory_space<vmem>>, vector<1x96xf32>
    %89 = vector.shape_cast %88 : vector<1x96xf32> to vector<96xf32>
    %90 = vector.shape_cast %89 : vector<96xf32> to vector<1x1x1x96xf32>
    %91 = vector.broadcast %90 : vector<1x1x1x96xf32> to vector<2x4x4x96xf32>
    %92 = arith.mulf %87, %91 : vector<2x4x4x96xf32>
    %93 = arith.addf %86, %92 : vector<2x4x4x96xf32>
    %c0_81 = arith.constant 0 : index
    %c0_82 = arith.constant 0 : index
    %94 = vector.load %arg5[%c0_81, %c0_82] : memref<1x96xf32, #tpu.memory_space<vmem>>, vector<1x96xf32>
    %95 = vector.shape_cast %94 : vector<1x96xf32> to vector<96xf32>
    %96 = vector.shape_cast %95 : vector<96xf32> to vector<1x1x1x96xf32>
    %97 = vector.broadcast %96 : vector<1x1x1x96xf32> to vector<2x4x4x96xf32>
    %98 = arith.addf %93, %97 : vector<2x4x4x96xf32>
    %cst_83 = arith.constant 5.000000e-01 : f32
    %99 = vector.broadcast %cst_83 : f32 to vector<2x4x4x96xf32>
    %100 = arith.mulf %99, %98 : vector<2x4x4x96xf32>
    %cst_84 = arith.constant 4.471500e-02 : f32
    %101 = vector.broadcast %cst_84 : f32 to vector<2x4x4x96xf32>
    %102 = arith.mulf %101, %98 : vector<2x4x4x96xf32>
    %103 = arith.mulf %102, %98 : vector<2x4x4x96xf32>
    %104 = arith.mulf %103, %98 : vector<2x4x4x96xf32>
    %105 = arith.addf %98, %104 : vector<2x4x4x96xf32>
    %cst_85 = arith.constant 0.797884583 : f32
    %106 = vector.broadcast %cst_85 : f32 to vector<2x4x4x96xf32>
    %107 = arith.mulf %106, %105 : vector<2x4x4x96xf32>
    %108 = math.tanh %107 : vector<2x4x4x96xf32>
    %cst_86 = arith.constant 1.000000e+00 : f32
    %109 = vector.broadcast %cst_86 : f32 to vector<2x4x4x96xf32>
    %110 = arith.addf %109, %108 : vector<2x4x4x96xf32>
    %111 = arith.mulf %100, %110 : vector<2x4x4x96xf32>
    %cst_87 = arith.constant dense<0.000000e+00> : vector<2x96xf32>
    %112 = vector.multi_reduction <add>, %111, %cst_87 [1, 2] : vector<2x4x4x96xf32> to vector<2x96xf32>
    %cst_88 = arith.constant 1.600000e+01 : f32
    %113 = vector.broadcast %cst_88 : f32 to vector<2x96xf32>
    %114 = arith.divf %112, %113 : vector<2x96xf32>
    %c0_89 = arith.constant 0 : index
    %c0_90 = arith.constant 0 : index
    %115 = vector.load %arg6[%c0_89, %c0_90] : memref<96x24xf32, #tpu.memory_space<vmem>>, vector<96x24xf32>
    %cst_91 = arith.constant dense<0.000000e+00> : vector<2x24xf32>
    %116 = tpu.matmul %114, %115, %cst_91 {dimension_numbers = #tpu.dot_dimension_numbers<[1], [0], [0], [1], [0, 0, 1, 1], [], []>} : vector<2x96xf32>, vector<96x24xf32>, vector<2x24xf32> -> vector<2x24xf32>
    %117 = arith.negf %116 : vector<2x24xf32>
    %118 = math.exp %117 : vector<2x24xf32>
    %cst_92 = arith.constant 1.000000e+00 : f32
    %119 = vector.broadcast %cst_92 : f32 to vector<2x24xf32>
    %120 = arith.addf %119, %118 : vector<2x24xf32>
    %121 = arith.divf %119, %120 : vector<2x24xf32>
    %122 = arith.mulf %116, %121 : vector<2x24xf32>
    %c0_93 = arith.constant 0 : index
    %c0_94 = arith.constant 0 : index
    %123 = vector.load %arg7[%c0_93, %c0_94] : memref<24x96xf32, #tpu.memory_space<vmem>>, vector<24x96xf32>
    %cst_95 = arith.constant dense<0.000000e+00> : vector<2x96xf32>
    %124 = tpu.matmul %122, %123, %cst_95 {dimension_numbers = #tpu.dot_dimension_numbers<[1], [0], [0], [1], [0, 0, 1, 1], [], []>} : vector<2x24xf32>, vector<24x96xf32>, vector<2x96xf32> -> vector<2x96xf32>
    %125 = arith.negf %124 : vector<2x96xf32>
    %126 = math.exp %125 : vector<2x96xf32>
    %cst_96 = arith.constant 1.000000e+00 : f32
    %127 = vector.broadcast %cst_96 : f32 to vector<2x96xf32>
    %128 = arith.addf %127, %126 : vector<2x96xf32>
    %129 = arith.divf %127, %128 : vector<2x96xf32>
    %130 = vector.shape_cast %129 : vector<2x96xf32> to vector<2x1x1x96xf32>
    %131 = vector.broadcast %130 : vector<2x1x1x96xf32> to vector<2x4x4x96xf32>
    %132 = arith.mulf %111, %131 : vector<2x4x4x96xf32>
    %133 = vector.shape_cast %132 : vector<2x4x4x96xf32> to vector<32x96xf32>
    %134 = arith.truncf %133 : vector<32x96xf32> to vector<32x96xbf16>
    %c0_97 = arith.constant 0 : index
    %c0_98 = arith.constant 0 : index
    %135 = vector.load %arg8[%c0_97, %c0_98] : memref<96x24xbf16, #tpu.memory_space<vmem>>, vector<96x24xbf16>
    %cst_99 = arith.constant dense<0.000000e+00> : vector<32x24xf32>
    %136 = tpu.matmul %134, %135, %cst_99 {dimension_numbers = #tpu.dot_dimension_numbers<[1], [0], [0], [1], [0, 0, 1, 1], [], []>} : vector<32x96xbf16>, vector<96x24xbf16>, vector<32x24xf32> -> vector<32x24xf32>
    %c0_100 = arith.constant 0 : index
    %c0_101 = arith.constant 0 : index
    %137 = vector.load %arg9[%c0_100, %c0_101] : memref<1x24xf32, #tpu.memory_space<vmem>>, vector<1x24xf32>
    %138 = vector.broadcast %137 : vector<1x24xf32> to vector<32x24xf32>
    %139 = arith.addf %136, %138 : vector<32x24xf32>
    %140 = vector.shape_cast %139 : vector<32x24xf32> to vector<2x16x24xf32>
    %141 = arith.truncf %140 : vector<2x16x24xf32> to vector<2x16x24xbf16>
    %c0_102 = arith.constant 0 : index
    %c0_103 = arith.constant 0 : index
    %c0_104 = arith.constant 0 : index
    %142 = vector.load %arg10[%c0_102, %c0_103, %c0_104] : memref<2x16x24xbf16, #tpu.memory_space<vmem>>, vector<2x16x24xbf16>
    tpu.vector_store %arg10[%c0_102, %c0_103, %c0_104], %141 {strides = array<i32>} : memref<2x16x24xbf16, #tpu.memory_space<vmem>>, vector<2x16x24xbf16>,
    return
  }
  func.func @transform_0(%arg0: i32) -> (i32, i32, i32, i32) {
    %c0_i32 = arith.constant 0 : i32
    %c0_i32_0 = arith.constant 0 : i32
    %c0_i32_1 = arith.constant 0 : i32
    %c0_i32_2 = arith.constant 0 : i32
    return %arg0, %c0_i32, %c0_i32_0, %c0_i32_1 : i32, i32, i32, i32
  }
  func.func @transform_1(%arg0: i32) -> (i32, i32) {
    %c0_i32 = arith.constant 0 : i32
    %c0_i32_0 = arith.constant 0 : i32
    %c0_i32_1 = arith.constant 0 : i32
    return %c0_i32, %c0_i32_0 : i32, i32
  }
  func.func @transform_2(%arg0: i32) -> (i32, i32) {
    %c0_i32 = arith.constant 0 : i32
    %c0_i32_0 = arith.constant 0 : i32
    %c0_i32_1 = arith.constant 0 : i32
    return %c0_i32, %c0_i32_0 : i32, i32
  }
  func.func @transform_3(%arg0: i32) -> (i32, i32) {
    %c0_i32 = arith.constant 0 : i32
    %c0_i32_0 = arith.constant 0 : i32
    %c0_i32_1 = arith.constant 0 : i32
    return %c0_i32, %c0_i32_0 : i32, i32
  }
  func.func @transform_4(%arg0: i32) -> (i32, i32) {
    %c0_i32 = arith.constant 0 : i32
    %c0_i32_0 = arith.constant 0 : i32
    %c0_i32_1 = arith.constant 0 : i32
    return %c0_i32, %c0_i32_0 : i32, i32
  }
  func.func @transform_5(%arg0: i32) -> (i32, i32) {
    %c0_i32 = arith.constant 0 : i32
    %c0_i32_0 = arith.constant 0 : i32
    %c0_i32_1 = arith.constant 0 : i32
    return %c0_i32, %c0_i32_0 : i32, i32
  }
  func.func @transform_6(%arg0: i32) -> (i32, i32) {
    %c0_i32 = arith.constant 0 : i32
    %c0_i32_0 = arith.constant 0 : i32
    %c0_i32_1 = arith.constant 0 : i32
    return %c0_i32, %c0_i32_0 : i32, i32
  }
  func.func @transform_7(%arg0: i32) -> (i32, i32) {
    %c0_i32 = arith.constant 0 : i32
    %c0_i32_0 = arith.constant 0 : i32
    %c0_i32_1 = arith.constant 0 : i32
    return %c0_i32, %c0_i32_0 : i32, i32
  }
  func.func @transform_8(%arg0: i32) -> (i32, i32) {
    %c0_i32 = arith.constant 0 : i32
    %c0_i32_0 = arith.constant 0 : i32
    %c0_i32_1 = arith.constant 0 : i32
    return %c0_i32, %c0_i32_0 : i32, i32
  }
  func.func @transform_9(%arg0: i32) -> (i32, i32, i32) {
    %c0_i32 = arith.constant 0 : i32
    %c0_i32_0 = arith.constant 0 : i32
    %c0_i32_1 = arith.constant 0 : i32
    return %arg0, %c0_i32, %c0_i32_0 : i32, i32, i32
  }
}

module attributes {stable_mosaic.version = 11 : i64} {
  func.func @_mbconv_kernel(%arg0: i32, %arg1: memref<2x16x24xbf16, #tpu.memory_space<vmem>>, %arg2: memref<24x96xbf16, #tpu.memory_space<vmem>>, %arg3: memref<1x96xf32, #tpu.memory_space<vmem>>, %arg4: memref<9x96xf32, #tpu.memory_space<vmem>>, %arg5: memref<1x96xf32, #tpu.memory_space<vmem>>, %arg6: memref<96x24xf32, #tpu.memory_space<vmem>>, %arg7: memref<24x96xf32, #tpu.memory_space<vmem>>, %arg8: memref<96x24xbf16, #tpu.memory_space<vmem>>, %arg9: memref<1x24xf32, #tpu.memory_space<vmem>>, %arg10: memref<2x16x24xbf16, #tpu.memory_space<vmem>>, %arg11: memref<2x6x6x96xf32, #tpu.memory_space<vmem>>) attributes {dimension_semantics = [#tpu.dimension_semantics<parallel>], iteration_bounds = array<i64: 2>, scalar_prefetch = 0 : i64, scratch_operands = 1 : i64, tpu.core_type = #tpu.core_type<tc>, window_params = [{transform_indices = @transform_0, window_bounds = array<i64: 2, 16, 24>}, {pipeline_mode = #tpu.pipeline_mode<synchronous>, transform_indices = @transform_1, window_bounds = array<i64: 24, 96>}, {pipeline_mode = #tpu.pipeline_mode<synchronous>, transform_indices = @transform_2, window_bounds = array<i64: 1, 96>}, {pipeline_mode = #tpu.pipeline_mode<synchronous>, transform_indices = @transform_3, window_bounds = array<i64: 9, 96>}, {pipeline_mode = #tpu.pipeline_mode<synchronous>, transform_indices = @transform_4, window_bounds = array<i64: 1, 96>}, {pipeline_mode = #tpu.pipeline_mode<synchronous>, transform_indices = @transform_5, window_bounds = array<i64: 96, 24>}, {pipeline_mode = #tpu.pipeline_mode<synchronous>, transform_indices = @transform_6, window_bounds = array<i64: 24, 96>}, {pipeline_mode = #tpu.pipeline_mode<synchronous>, transform_indices = @transform_7, window_bounds = array<i64: 96, 24>}, {pipeline_mode = #tpu.pipeline_mode<synchronous>, transform_indices = @transform_8, window_bounds = array<i64: 1, 24>}, {transform_indices = @transform_9, window_bounds = array<i64: 2, 16, 24>}]} {
    %c0 = arith.constant 0 : index
    %c0_0 = arith.constant 0 : index
    %c0_1 = arith.constant 0 : index
    %0 = vector.load %arg1[%c0, %c0_0, %c0_1] : memref<2x16x24xbf16, #tpu.memory_space<vmem>>, vector<2x16x24xbf16>
    %1 = vector.shape_cast %0 : vector<2x16x24xbf16> to vector<32x24xbf16>
    %c0_2 = arith.constant 0 : index
    %c0_3 = arith.constant 0 : index
    %2 = vector.load %arg2[%c0_2, %c0_3] : memref<24x96xbf16, #tpu.memory_space<vmem>>, vector<24x96xbf16>
    %cst = arith.constant dense<0.000000e+00> : vector<32x96xf32>
    %3 = tpu.matmul %1, %2, %cst {dimension_numbers = #tpu.dot_dimension_numbers<[1], [0], [0], [1], [0, 0, 1, 1], [], []>} : vector<32x24xbf16>, vector<24x96xbf16>, vector<32x96xf32> -> vector<32x96xf32>
    %c0_4 = arith.constant 0 : index
    %c0_5 = arith.constant 0 : index
    %4 = vector.load %arg3[%c0_4, %c0_5] : memref<1x96xf32, #tpu.memory_space<vmem>>, vector<1x96xf32>
    %5 = vector.broadcast %4 : vector<1x96xf32> to vector<32x96xf32>
    %6 = arith.addf %3, %5 : vector<32x96xf32>
    %cst_6 = arith.constant 5.000000e-01 : f32
    %7 = vector.broadcast %cst_6 : f32 to vector<32x96xf32>
    %8 = arith.mulf %7, %6 : vector<32x96xf32>
    %cst_7 = arith.constant 4.471500e-02 : f32
    %9 = vector.broadcast %cst_7 : f32 to vector<32x96xf32>
    %10 = arith.mulf %9, %6 : vector<32x96xf32>
    %11 = arith.mulf %10, %6 : vector<32x96xf32>
    %12 = arith.mulf %11, %6 : vector<32x96xf32>
    %13 = arith.addf %6, %12 : vector<32x96xf32>
    %cst_8 = arith.constant 0.797884583 : f32
    %14 = vector.broadcast %cst_8 : f32 to vector<32x96xf32>
    %15 = arith.mulf %14, %13 : vector<32x96xf32>
    %16 = math.tanh %15 : vector<32x96xf32>
    %cst_9 = arith.constant 1.000000e+00 : f32
    %17 = vector.broadcast %cst_9 : f32 to vector<32x96xf32>
    %18 = arith.addf %17, %16 : vector<32x96xf32>
    %19 = arith.mulf %8, %18 : vector<32x96xf32>
    %cst_10 = arith.constant 0.000000e+00 : f32
    %20 = vector.broadcast %cst_10 : f32 to vector<2x1x6x96xf32>
    %c0_11 = arith.constant 0 : index
    %c0_12 = arith.constant 0 : index
    %c0_13 = arith.constant 0 : index
    %c0_14 = arith.constant 0 : index
    %21 = vector.load %arg11[%c0_11, %c0_12, %c0_13, %c0_14] : memref<2x6x6x96xf32, #tpu.memory_space<vmem>>, vector<2x1x6x96xf32>
    tpu.vector_store %arg11[%c0_11, %c0_12, %c0_13, %c0_14], %20 {strides = array<i32>} : memref<2x6x6x96xf32, #tpu.memory_space<vmem>>, vector<2x1x6x96xf32>,
    %cst_15 = arith.constant 0.000000e+00 : f32
    %22 = vector.broadcast %cst_15 : f32 to vector<2x1x6x96xf32>
    %c0_16 = arith.constant 0 : index
    %c5 = arith.constant 5 : index
    %c0_17 = arith.constant 0 : index
    %c0_18 = arith.constant 0 : index
    %23 = vector.load %arg11[%c0_16, %c5, %c0_17, %c0_18] : memref<2x6x6x96xf32, #tpu.memory_space<vmem>>, vector<2x1x6x96xf32>
    tpu.vector_store %arg11[%c0_16, %c5, %c0_17, %c0_18], %22 {strides = array<i32>} : memref<2x6x6x96xf32, #tpu.memory_space<vmem>>, vector<2x1x6x96xf32>,
    %cst_19 = arith.constant 0.000000e+00 : f32
    %24 = vector.broadcast %cst_19 : f32 to vector<2x6x1x96xf32>
    %c0_20 = arith.constant 0 : index
    %c0_21 = arith.constant 0 : index
    %c0_22 = arith.constant 0 : index
    %c0_23 = arith.constant 0 : index
    %25 = vector.load %arg11[%c0_20, %c0_21, %c0_22, %c0_23] : memref<2x6x6x96xf32, #tpu.memory_space<vmem>>, vector<2x6x1x96xf32>
    tpu.vector_store %arg11[%c0_20, %c0_21, %c0_22, %c0_23], %24 {strides = array<i32>} : memref<2x6x6x96xf32, #tpu.memory_space<vmem>>, vector<2x6x1x96xf32>,
    %cst_24 = arith.constant 0.000000e+00 : f32
    %26 = vector.broadcast %cst_24 : f32 to vector<2x6x1x96xf32>
    %c0_25 = arith.constant 0 : index
    %c0_26 = arith.constant 0 : index
    %c5_27 = arith.constant 5 : index
    %c0_28 = arith.constant 0 : index
    %27 = vector.load %arg11[%c0_25, %c0_26, %c5_27, %c0_28] : memref<2x6x6x96xf32, #tpu.memory_space<vmem>>, vector<2x6x1x96xf32>
    tpu.vector_store %arg11[%c0_25, %c0_26, %c5_27, %c0_28], %26 {strides = array<i32>} : memref<2x6x6x96xf32, #tpu.memory_space<vmem>>, vector<2x6x1x96xf32>,
    %28 = vector.shape_cast %19 : vector<32x96xf32> to vector<2x4x4x96xf32>
    %c0_29 = arith.constant 0 : index
    %c1 = arith.constant 1 : index
    %c1_30 = arith.constant 1 : index
    %c0_31 = arith.constant 0 : index
    %29 = vector.load %arg11[%c0_29, %c1, %c1_30, %c0_31] : memref<2x6x6x96xf32, #tpu.memory_space<vmem>>, vector<2x4x4x96xf32>
    tpu.vector_store %arg11[%c0_29, %c1, %c1_30, %c0_31], %28 {strides = array<i32>} : memref<2x6x6x96xf32, #tpu.memory_space<vmem>>, vector<2x4x4x96xf32>,
    %cst_32 = arith.constant 0.000000e+00 : f32
    %30 = vector.broadcast %cst_32 : f32 to vector<2x4x4x96xf32>
    %c0_33 = arith.constant 0 : index
    %c0_34 = arith.constant 0 : index
    %c0_35 = arith.constant 0 : index
    %c0_36 = arith.constant 0 : index
    %31 = vector.load %arg11[%c0_33, %c0_34, %c0_35, %c0_36] : memref<2x6x6x96xf32, #tpu.memory_space<vmem>>, vector<2x4x4x96xf32>
    %c0_37 = arith.constant 0 : index
    %c0_38 = arith.constant 0 : index
    %32 = vector.load %arg4[%c0_37, %c0_38] : memref<9x96xf32, #tpu.memory_space<vmem>>, vector<1x96xf32>
    %33 = vector.shape_cast %32 : vector<1x96xf32> to vector<96xf32>
    %34 = vector.shape_cast %33 : vector<96xf32> to vector<1x1x1x96xf32>
    %35 = vector.broadcast %34 : vector<1x1x1x96xf32> to vector<2x4x4x96xf32>
    %36 = arith.mulf %31, %35 : vector<2x4x4x96xf32>
    %37 = arith.addf %30, %36 : vector<2x4x4x96xf32>
    %c0_39 = arith.constant 0 : index
    %c0_40 = arith.constant 0 : index
    %c1_41 = arith.constant 1 : index
    %c0_42 = arith.constant 0 : index
    %38 = vector.load %arg11[%c0_39, %c0_40, %c1_41, %c0_42] : memref<2x6x6x96xf32, #tpu.memory_space<vmem>>, vector<2x4x4x96xf32>
    %c1_43 = arith.constant 1 : index
    %c0_44 = arith.constant 0 : index
    %39 = vector.load %arg4[%c1_43, %c0_44] : memref<9x96xf32, #tpu.memory_space<vmem>>, vector<1x96xf32>
    %40 = vector.shape_cast %39 : vector<1x96xf32> to vector<96xf32>
    %41 = vector.shape_cast %40 : vector<96xf32> to vector<1x1x1x96xf32>
    %42 = vector.broadcast %41 : vector<1x1x1x96xf32> to vector<2x4x4x96xf32>
    %43 = arith.mulf %38, %42 : vector<2x4x4x96xf32>
    %44 = arith.addf %37, %43 : vector<2x4x4x96xf32>
    %c0_45 = arith.constant 0 : index
    %c0_46 = arith.constant 0 : index
    %c2 = arith.constant 2 : index
    %c0_47 = arith.constant 0 : index
    %45 = vector.load %arg11[%c0_45, %c0_46, %c2, %c0_47] : memref<2x6x6x96xf32, #tpu.memory_space<vmem>>, vector<2x4x4x96xf32>
    %c2_48 = arith.constant 2 : index
    %c0_49 = arith.constant 0 : index
    %46 = vector.load %arg4[%c2_48, %c0_49] : memref<9x96xf32, #tpu.memory_space<vmem>>, vector<1x96xf32>
    %47 = vector.shape_cast %46 : vector<1x96xf32> to vector<96xf32>
    %48 = vector.shape_cast %47 : vector<96xf32> to vector<1x1x1x96xf32>
    %49 = vector.broadcast %48 : vector<1x1x1x96xf32> to vector<2x4x4x96xf32>
    %50 = arith.mulf %45, %49 : vector<2x4x4x96xf32>
    %51 = arith.addf %44, %50 : vector<2x4x4x96xf32>
    %c0_50 = arith.constant 0 : index
    %c1_51 = arith.constant 1 : index
    %c0_52 = arith.constant 0 : index
    %c0_53 = arith.constant 0 : index
    %52 = vector.load %arg11[%c0_50, %c1_51, %c0_52, %c0_53] : memref<2x6x6x96xf32, #tpu.memory_space<vmem>>, vector<2x4x4x96xf32>
    %c3 = arith.constant 3 : index
    %c0_54 = arith.constant 0 : index
    %53 = vector.load %arg4[%c3, %c0_54] : memref<9x96xf32, #tpu.memory_space<vmem>>, vector<1x96xf32>
    %54 = vector.shape_cast %53 : vector<1x96xf32> to vector<96xf32>
    %55 = vector.shape_cast %54 : vector<96xf32> to vector<1x1x1x96xf32>
    %56 = vector.broadcast %55 : vector<1x1x1x96xf32> to vector<2x4x4x96xf32>
    %57 = arith.mulf %52, %56 : vector<2x4x4x96xf32>
    %58 = arith.addf %51, %57 : vector<2x4x4x96xf32>
    %c0_55 = arith.constant 0 : index
    %c1_56 = arith.constant 1 : index
    %c1_57 = arith.constant 1 : index
    %c0_58 = arith.constant 0 : index
    %59 = vector.load %arg11[%c0_55, %c1_56, %c1_57, %c0_58] : memref<2x6x6x96xf32, #tpu.memory_space<vmem>>, vector<2x4x4x96xf32>
    %c4 = arith.constant 4 : index
    %c0_59 = arith.constant 0 : index
    %60 = vector.load %arg4[%c4, %c0_59] : memref<9x96xf32, #tpu.memory_space<vmem>>, vector<1x96xf32>
    %61 = vector.shape_cast %60 : vector<1x96xf32> to vector<96xf32>
    %62 = vector.shape_cast %61 : vector<96xf32> to vector<1x1x1x96xf32>
    %63 = vector.broadcast %62 : vector<1x1x1x96xf32> to vector<2x4x4x96xf32>
    %64 = arith.mulf %59, %63 : vector<2x4x4x96xf32>
    %65 = arith.addf %58, %64 : vector<2x4x4x96xf32>
    %c0_60 = arith.constant 0 : index
    %c1_61 = arith.constant 1 : index
    %c2_62 = arith.constant 2 : index
    %c0_63 = arith.constant 0 : index
    %66 = vector.load %arg11[%c0_60, %c1_61, %c2_62, %c0_63] : memref<2x6x6x96xf32, #tpu.memory_space<vmem>>, vector<2x4x4x96xf32>
    %c5_64 = arith.constant 5 : index
    %c0_65 = arith.constant 0 : index
    %67 = vector.load %arg4[%c5_64, %c0_65] : memref<9x96xf32, #tpu.memory_space<vmem>>, vector<1x96xf32>
    %68 = vector.shape_cast %67 : vector<1x96xf32> to vector<96xf32>
    %69 = vector.shape_cast %68 : vector<96xf32> to vector<1x1x1x96xf32>
    %70 = vector.broadcast %69 : vector<1x1x1x96xf32> to vector<2x4x4x96xf32>
    %71 = arith.mulf %66, %70 : vector<2x4x4x96xf32>
    %72 = arith.addf %65, %71 : vector<2x4x4x96xf32>
    %c0_66 = arith.constant 0 : index
    %c2_67 = arith.constant 2 : index
    %c0_68 = arith.constant 0 : index
    %c0_69 = arith.constant 0 : index
    %73 = vector.load %arg11[%c0_66, %c2_67, %c0_68, %c0_69] : memref<2x6x6x96xf32, #tpu.memory_space<vmem>>, vector<2x4x4x96xf32>
    %c6 = arith.constant 6 : index
    %c0_70 = arith.constant 0 : index
    %74 = vector.load %arg4[%c6, %c0_70] : memref<9x96xf32, #tpu.memory_space<vmem>>, vector<1x96xf32>
    %75 = vector.shape_cast %74 : vector<1x96xf32> to vector<96xf32>
    %76 = vector.shape_cast %75 : vector<96xf32> to vector<1x1x1x96xf32>
    %77 = vector.broadcast %76 : vector<1x1x1x96xf32> to vector<2x4x4x96xf32>
    %78 = arith.mulf %73, %77 : vector<2x4x4x96xf32>
    %79 = arith.addf %72, %78 : vector<2x4x4x96xf32>
    %c0_71 = arith.constant 0 : index
    %c2_72 = arith.constant 2 : index
    %c1_73 = arith.constant 1 : index
    %c0_74 = arith.constant 0 : index
    %80 = vector.load %arg11[%c0_71, %c2_72, %c1_73, %c0_74] : memref<2x6x6x96xf32, #tpu.memory_space<vmem>>, vector<2x4x4x96xf32>
    %c7 = arith.constant 7 : index
    %c0_75 = arith.constant 0 : index
    %81 = vector.load %arg4[%c7, %c0_75] : memref<9x96xf32, #tpu.memory_space<vmem>>, vector<1x96xf32>
    %82 = vector.shape_cast %81 : vector<1x96xf32> to vector<96xf32>
    %83 = vector.shape_cast %82 : vector<96xf32> to vector<1x1x1x96xf32>
    %84 = vector.broadcast %83 : vector<1x1x1x96xf32> to vector<2x4x4x96xf32>
    %85 = arith.mulf %80, %84 : vector<2x4x4x96xf32>
    %86 = arith.addf %79, %85 : vector<2x4x4x96xf32>
    %c0_76 = arith.constant 0 : index
    %c2_77 = arith.constant 2 : index
    %c2_78 = arith.constant 2 : index
    %c0_79 = arith.constant 0 : index
    %87 = vector.load %arg11[%c0_76, %c2_77, %c2_78, %c0_79] : memref<2x6x6x96xf32, #tpu.memory_space<vmem>>, vector<2x4x4x96xf32>
    %c8 = arith.constant 8 : index
    %c0_80 = arith.constant 0 : index
    %88 = vector.load %arg4[%c8, %c0_80] : memref<9x96xf32, #tpu.memory_space<vmem>>, vector<1x96xf32>
    %89 = vector.shape_cast %88 : vector<1x96xf32> to vector<96xf32>
    %90 = vector.shape_cast %89 : vector<96xf32> to vector<1x1x1x96xf32>
    %91 = vector.broadcast %90 : vector<1x1x1x96xf32> to vector<2x4x4x96xf32>
    %92 = arith.mulf %87, %91 : vector<2x4x4x96xf32>
    %93 = arith.addf %86, %92 : vector<2x4x4x96xf32>
    %c0_81 = arith.constant 0 : index
    %c0_82 = arith.constant 0 : index
    %94 = vector.load %arg5[%c0_81, %c0_82] : memref<1x96xf32, #tpu.memory_space<vmem>>, vector<1x96xf32>
    %95 = vector.shape_cast %94 : vector<1x96xf32> to vector<96xf32>
    %96 = vector.shape_cast %95 : vector<96xf32> to vector<1x1x1x96xf32>
    %97 = vector.broadcast %96 : vector<1x1x1x96xf32> to vector<2x4x4x96xf32>
    %98 = arith.addf %93, %97 : vector<2x4x4x96xf32>
    %cst_83 = arith.constant 5.000000e-01 : f32
    %99 = vector.broadcast %cst_83 : f32 to vector<2x4x4x96xf32>
    %100 = arith.mulf %99, %98 : vector<2x4x4x96xf32>
    %cst_84 = arith.constant 4.471500e-02 : f32
    %101 = vector.broadcast %cst_84 : f32 to vector<2x4x4x96xf32>
    %102 = arith.mulf %101, %98 : vector<2x4x4x96xf32>
    %103 = arith.mulf %102, %98 : vector<2x4x4x96xf32>
    %104 = arith.mulf %103, %98 : vector<2x4x4x96xf32>
    %105 = arith.addf %98, %104 : vector<2x4x4x96xf32>
    %cst_85 = arith.constant 0.797884583 : f32
    %106 = vector.broadcast %cst_85 : f32 to vector<2x4x4x96xf32>
    %107 = arith.mulf %106, %105 : vector<2x4x4x96xf32>
    %108 = math.tanh %107 : vector<2x4x4x96xf32>
    %cst_86 = arith.constant 1.000000e+00 : f32
    %109 = vector.broadcast %cst_86 : f32 to vector<2x4x4x96xf32>
    %110 = arith.addf %109, %108 : vector<2x4x4x96xf32>
    %111 = arith.mulf %100, %110 : vector<2x4x4x96xf32>
    %cst_87 = arith.constant dense<0.000000e+00> : vector<2x96xf32>
    %112 = vector.multi_reduction <add>, %111, %cst_87 [1, 2] : vector<2x4x4x96xf32> to vector<2x96xf32>
    %cst_88 = arith.constant 1.600000e+01 : f32
    %113 = vector.broadcast %cst_88 : f32 to vector<2x96xf32>
    %114 = arith.divf %112, %113 : vector<2x96xf32>
    %c0_89 = arith.constant 0 : index
    %c0_90 = arith.constant 0 : index
    %115 = vector.load %arg6[%c0_89, %c0_90] : memref<96x24xf32, #tpu.memory_space<vmem>>, vector<96x24xf32>
    %cst_91 = arith.constant dense<0.000000e+00> : vector<2x24xf32>
    %116 = tpu.matmul %114, %115, %cst_91 {dimension_numbers = #tpu.dot_dimension_numbers<[1], [0], [0], [1], [0, 0, 1, 1], [], []>} : vector<2x96xf32>, vector<96x24xf32>, vector<2x24xf32> -> vector<2x24xf32>
    %117 = arith.negf %116 : vector<2x24xf32>
    %118 = math.exp %117 : vector<2x24xf32>
    %cst_92 = arith.constant 1.000000e+00 : f32
    %119 = vector.broadcast %cst_92 : f32 to vector<2x24xf32>
    %120 = arith.addf %119, %118 : vector<2x24xf32>
    %121 = arith.divf %119, %120 : vector<2x24xf32>
    %122 = arith.mulf %116, %121 : vector<2x24xf32>
    %c0_93 = arith.constant 0 : index
    %c0_94 = arith.constant 0 : index
    %123 = vector.load %arg7[%c0_93, %c0_94] : memref<24x96xf32, #tpu.memory_space<vmem>>, vector<24x96xf32>
    %cst_95 = arith.constant dense<0.000000e+00> : vector<2x96xf32>
    %124 = tpu.matmul %122, %123, %cst_95 {dimension_numbers = #tpu.dot_dimension_numbers<[1], [0], [0], [1], [0, 0, 1, 1], [], []>} : vector<2x24xf32>, vector<24x96xf32>, vector<2x96xf32> -> vector<2x96xf32>
    %125 = arith.negf %124 : vector<2x96xf32>
    %126 = math.exp %125 : vector<2x96xf32>
    %cst_96 = arith.constant 1.000000e+00 : f32
    %127 = vector.broadcast %cst_96 : f32 to vector<2x96xf32>
    %128 = arith.addf %127, %126 : vector<2x96xf32>
    %129 = arith.divf %127, %128 : vector<2x96xf32>
    %130 = vector.shape_cast %129 : vector<2x96xf32> to vector<2x1x1x96xf32>
    %131 = vector.broadcast %130 : vector<2x1x1x96xf32> to vector<2x4x4x96xf32>
    %132 = arith.mulf %111, %131 : vector<2x4x4x96xf32>
    %133 = vector.shape_cast %132 : vector<2x4x4x96xf32> to vector<32x96xf32>
    %134 = arith.truncf %133 : vector<32x96xf32> to vector<32x96xbf16>
    %c0_97 = arith.constant 0 : index
    %c0_98 = arith.constant 0 : index
    %135 = vector.load %arg8[%c0_97, %c0_98] : memref<96x24xbf16, #tpu.memory_space<vmem>>, vector<96x24xbf16>
    %cst_99 = arith.constant dense<0.000000e+00> : vector<32x24xf32>
    %136 = tpu.matmul %134, %135, %cst_99 {dimension_numbers = #tpu.dot_dimension_numbers<[1], [0], [0], [1], [0, 0, 1, 1], [], []>} : vector<32x96xbf16>, vector<96x24xbf16>, vector<32x24xf32> -> vector<32x24xf32>
    %c0_100 = arith.constant 0 : index
    %c0_101 = arith.constant 0 : index
    %137 = vector.load %arg9[%c0_100, %c0_101] : memref<1x24xf32, #tpu.memory_space<vmem>>, vector<1x24xf32>
    %138 = vector.broadcast %137 : vector<1x24xf32> to vector<32x24xf32>
    %139 = arith.addf %136, %138 : vector<32x24xf32>
    %140 = arith.extf %1 : vector<32x24xbf16> to vector<32x24xf32>
    %141 = arith.addf %139, %140 : vector<32x24xf32>
    %142 = vector.shape_cast %141 : vector<32x24xf32> to vector<2x16x24xf32>
    %143 = arith.truncf %142 : vector<2x16x24xf32> to vector<2x16x24xbf16>
    %c0_102 = arith.constant 0 : index
    %c0_103 = arith.constant 0 : index
    %c0_104 = arith.constant 0 : index
    %144 = vector.load %arg10[%c0_102, %c0_103, %c0_104] : memref<2x16x24xbf16, #tpu.memory_space<vmem>>, vector<2x16x24xbf16>
    tpu.vector_store %arg10[%c0_102, %c0_103, %c0_104], %143 {strides = array<i32>} : memref<2x16x24xbf16, #tpu.memory_space<vmem>>, vector<2x16x24xbf16>,
    return
  }
  func.func @transform_0(%arg0: i32) -> (i32, i32, i32) {
    %c0_i32 = arith.constant 0 : i32
    %c0_i32_0 = arith.constant 0 : i32
    %c0_i32_1 = arith.constant 0 : i32
    return %arg0, %c0_i32, %c0_i32_0 : i32, i32, i32
  }
  func.func @transform_1(%arg0: i32) -> (i32, i32) {
    %c0_i32 = arith.constant 0 : i32
    %c0_i32_0 = arith.constant 0 : i32
    %c0_i32_1 = arith.constant 0 : i32
    return %c0_i32, %c0_i32_0 : i32, i32
  }
  func.func @transform_2(%arg0: i32) -> (i32, i32) {
    %c0_i32 = arith.constant 0 : i32
    %c0_i32_0 = arith.constant 0 : i32
    %c0_i32_1 = arith.constant 0 : i32
    return %c0_i32, %c0_i32_0 : i32, i32
  }
  func.func @transform_3(%arg0: i32) -> (i32, i32) {
    %c0_i32 = arith.constant 0 : i32
    %c0_i32_0 = arith.constant 0 : i32
    %c0_i32_1 = arith.constant 0 : i32
    return %c0_i32, %c0_i32_0 : i32, i32
  }
  func.func @transform_4(%arg0: i32) -> (i32, i32) {
    %c0_i32 = arith.constant 0 : i32
    %c0_i32_0 = arith.constant 0 : i32
    %c0_i32_1 = arith.constant 0 : i32
    return %c0_i32, %c0_i32_0 : i32, i32
  }
  func.func @transform_5(%arg0: i32) -> (i32, i32) {
    %c0_i32 = arith.constant 0 : i32
    %c0_i32_0 = arith.constant 0 : i32
    %c0_i32_1 = arith.constant 0 : i32
    return %c0_i32, %c0_i32_0 : i32, i32
  }
  func.func @transform_6(%arg0: i32) -> (i32, i32) {
    %c0_i32 = arith.constant 0 : i32
    %c0_i32_0 = arith.constant 0 : i32
    %c0_i32_1 = arith.constant 0 : i32
    return %c0_i32, %c0_i32_0 : i32, i32
  }
  func.func @transform_7(%arg0: i32) -> (i32, i32) {
    %c0_i32 = arith.constant 0 : i32
    %c0_i32_0 = arith.constant 0 : i32
    %c0_i32_1 = arith.constant 0 : i32
    return %c0_i32, %c0_i32_0 : i32, i32
  }
  func.func @transform_8(%arg0: i32) -> (i32, i32) {
    %c0_i32 = arith.constant 0 : i32
    %c0_i32_0 = arith.constant 0 : i32
    %c0_i32_1 = arith.constant 0 : i32
    return %c0_i32, %c0_i32_0 : i32, i32
  }
  func.func @transform_9(%arg0: i32) -> (i32, i32, i32) {
    %c0_i32 = arith.constant 0 : i32
    %c0_i32_0 = arith.constant 0 : i32
    %c0_i32_1 = arith.constant 0 : i32
    return %arg0, %c0_i32, %c0_i32_0 : i32, i32, i32
  }
}

</mosaic_0001>

<bundles_post_ra>
// kernel: tokenizer_forward.7
= control target key start
LH: loop header
LB: loop body
LE: loop exit
PB: predicated region body
PF: predicated region fallthrough
CT: control target
= control target key end

     0   :  { %12 = vsyncpa [#allocation3], 0  ;;  %s2042_s0 = inlined_call_operand.vmem [shape: bf16[4,16,24], index: 0, kind: input, shape index: {}]   ;;  %s2043_s1 = inlined_call_operand.vmem [shape: bf16[24,32], index: 1, kind: input, shape index: {}]   ;;  %s2044_s2 = inlined_call_operand.vmem [shape: f32[1,32], index: 2, kind: input, shape index: {}]   ;;  %s2045_s3 = inlined_call_operand.vmem [shape: bf16[32,512], index: 3, kind: input, shape index: {}]   ;;  %s2046_s4 = inlined_call_operand.vmem [shape: f32[1,512], index: 4, kind: input, shape index: {}]   ;;  %s2047_s5 = inlined_call_operand.vmem [shape: bf16[512,8], index: 5, kind: input, shape index: {}]   ;;  %s2048_s6 = inlined_call_operand.vmem [shape: f32[1,8], index: 6, kind: input, shape index: {}]   ;;  %s2049_s7 = inlined_call_operand.hbm [shape: f32[4,8,32], index: 7, kind: output, shape index: {}]  }
   0x1   :  { %14 = vsyncpa [#allocation3 + $0x1], 0  ;;  %s1664_s24 = smov 0   ;;  %s1666_s25 = smov 0  }
   0x2   :  { %s1668_s26 = smov 0   ;;  %s1670_s27 = smov 0  }
   0x3 LB: > { %s1685_s28 = sadd.s32 4294967295, %s1616_s27   ;;  %s1276_s29 = sadd.s32 4294967294, %s1616_s27   ;;  %s1616_s27 = sphi %s1670_s27, %s2055_s27   ;;  %s1612_s26 = sphi %s1668_s26, %s2054_s26   ;;  %s1608_s25 = sphi %s1666_s25, %s2053_s25   ;;  %s1604_s24 = sphi %s1664_s24, %s2052_s24  }
   0x4   : > { %s1689_s30 = sadd.s32 1, %s1616_s27   ;;  %s179_s8 = sadd.s32 1, %s1612_s26 }
   0x5   : > { %s176_s9 = ssub.s32 %s1616_s27, %s1689_s30  ;;  %p189_p0 = scmp.ne.s32.totalorder %s1612_s26, %s1608_s25 }
   0x6   : > { %p177_p1 = scmp.eq.s32.totalorder %s176_s9, 0  ;;  %p190_p2 = scmp.eq.s32.totalorder %s1685_s28, 1 }
   0x7   : > { %p195_p3 = scmp.ne.s32.totalorder %s1608_s25, %s1604_s24  ;;  %p196_p4 = scmp.eq.s32.totalorder %s1276_s29, 1 }
   0x8   : > { %s1700_s10 = scalar_select %p177_p1, %s1612_s26, %s179_s8  }
   0x9   : > { %p1702_p5 = por %p190_p2, %p189_p0  ;;  %p1706_p6 = por %p196_p4, %p195_p3 }
   0xa   : > { %p1279_p7 = scmp.ge.s32.totalorder %s1616_s27, 1  ;;  %p242_p8 = scmp.lt.s32.totalorder %s1616_s27, 3 }
   0xc   : > { %p243_p9 = pnand %p1279_p7, %p242_p8 }
   0xd   : > { %v1474_v0 = vld [vmem:[%s2043_s1] sm:$0xff] (!%p243_p9)   ;;  %v1475_v1 = vld [vmem:[%s2043_s1 + $0x8] ss:$0 sps:$4 sm:$0xff] (!%p243_p9)   ;;  %vm324_vm0 = vcmask (!%p243_p9), 1043456   ;;  %s1281_s17 = sshll.u32 (!%p243_p9), %s1685_s28, 1  ;;  %vm317_vm1 = vcmask (!%p243_p9), 195584   ;;  %v389_v58 = vlaneseq (!%p243_p9) }
   0xe   : > { %246 = sbr.rel (%p243_p9) target bundleno = 1061 (0x425), region = 48  ;;  %1409 = vmatprep.subr.bf16.mxu0 (!%p243_p9), %v1474_v0  ;;  %p276_p10 = scmp.lt.s32.totalorder (!%p243_p9), %s1281_s17, 3  ;;  %v326_v2 = vsel (!%p243_p9), %vm324_vm0, %v1475_v1, 0  ;;  %v1478_v5 = vld [vmem:[%s2045_s3 + $0x4] ss:$16 sps:$4 sm:$0xff] (!%p243_p9)   ;;  %v1618_v13 = vmov (!%p243_p9), 0  }
   0xf   : > { %1410 = vmatpush3.bf16.msra.mxu0 (!%p243_p9), %v1474_v0  ;;  %v1482_v6 = vld [vmem:[%s2045_s3 + $0xc] ss:$16 sps:$4 sm:$0xff] (!%p243_p9)   ;;  %v1480_v7 = vld [vmem:[%s2045_s3 + $0x8] ss:$16 sps:$4 sm:$0xff] (!%p243_p9)   ;;  %v1483_v8 = vld [vmem:[%s2045_s3] ss:$16 sps:$4 sm:$0xff] (!%p243_p9)   ;;  %456 = vmatprep.subr.bf16.mxu1 (!%p243_p9), %v1478_v5 }
  0x10   : > { %1429 = vmatprep.subr.msk.bf16.mxu0 (!%p243_p9), %vm324_vm0, %v1475_v1  ;;  %457 = vmatpush1.bf16.msra.mxu1 (!%p243_p9), %v1483_v8  ;;  %v1484_v9 = vld [vmem:[%s2045_s3 + $0x24] ss:$16 sps:$4 sm:$0xff] (!%p243_p9)   ;;  %v1488_v10 = vld [vmem:[%s2045_s3 + $0x2c] ss:$16 sps:$4 sm:$0xff] (!%p243_p9)   ;;  %v1486_v11 = vld [vmem:[%s2045_s3 + $0x28] ss:$16 sps:$4 sm:$0xff] (!%p243_p9)  }
  0x11   : > { %v1489_v12 = vld [vmem:[%s2045_s3 + $0x20] ss:$16 sps:$4 sm:$0xff] (!%p243_p9)   ;;  %458 = vmatprep.subr.bf16.mxu1 (!%p243_p9), %v1484_v9  ;;  %488 = vmatprep.mubr.bf16.mxu1 (!%p243_p9), %v1618_v13  ;;  %vm449_vm2 = vcmask (!%p243_p9), 261120   ;;  %v1494_v29 = vld [vmem:[%s2047_s5 + $0x48] sm:$0xff] (!%p243_p9)   ;;  %v1502_v37 = vld [vmem:[%s2047_s5 + $0x58] sm:$0xff] (!%p243_p9)   ;;  %v1619_v57 = vmov (!%p243_p9), 0.0  }
  0x12   : > { %v1284_v15 = vld [vmem:[%s2044_s2] ss:$0 sm:$0xff] (!%p243_p9)  ;;  %v1495_v30 = vld [vmem:[%s2047_s5 + $0xc8] sm:$0xff] (!%p243_p9)   ;;  %v1498_v33 = vld [vmem:[%s2047_s5 + $0x50] sm:$0xff] (!%p243_p9)   ;;  %v390_v59 = vshrl.u32 (!%p243_p9), %v389_v58, 7  ;;  %vm1620_vm3 = vmmov (!%p243_p9), 0  }
  0x13   : > { %1412 = vmatpush3.bf16.msra.mxu0 (!%p243_p9), %v326_v2  ;;  %v1490_v25 = vld [vmem:[%s2047_s5 + $0x40] sm:$0xff] (!%p243_p9)   ;;  %v1496_v31 = vld [vmem:[%s2047_s5 + $0x8] sm:$0xff] (!%p243_p9)   ;;  %v1499_v34 = vld [vmem:[%s2047_s5 + $0xd0] sm:$0xff] (!%p243_p9)   ;;  %vm1093_vm4 = vcmask (!%p243_p9), 130048   ;;  %s272_s29 = sand.u32 (!%p243_p9), 1, %s1608_s25   ;;  %s1344_s14 = sshll.u32 (!%p243_p9), %s1685_s28, 8 }
  0x14   : > { %509 = vmatprep.subr.bf16.mxu0 (!%p243_p9), %v1482_v6  ;;  %459 = vmatpush1.bf16.msra.mxu1 (!%p243_p9), %v1489_v12  ;;  %v1491_v26 = vld [vmem:[%s2047_s5 + $0xc0] sm:$0xff] (!%p243_p9)   ;;  %v1497_v32 = vld [vmem:[%s2047_s5 + $0x88] sm:$0xff] (!%p243_p9)   ;;  %v1500_v35 = vld [vmem:[%s2047_s5 + $0x10] sm:$0xff] (!%p243_p9)   ;;  %v391_v60 = vsub.s32 (!%p243_p9), 0, %v390_v59  ;;  %v399_v61 = vsub.s32 (!%p243_p9), 2, %v390_v59  ;;  %v395_v63 = vsub.s32 (!%p243_p9), 1, %v390_v59 }
  0x15   : > { %s2057_s17 = smov (!%p276_p10, %s1281_s17), 3  ;;  %1349 = vmatprep.subr.bf16.mxu1 %v1490_v25  ;;  %v1492_v27 = vld [vmem:[%s2047_s5] sm:$0xff]   ;;  %v1501_v36 = vld [vmem:[%s2047_s5 + $0x90] sm:$0xff]   ;;  %v1503_v38 = vld [vmem:[%s2047_s5 + $0xd8] sm:$0xff]   ;;  %v403_v2 = vsub.s32 3, %v390_v59  ;;  %s1280_s8 = sshll.u32 %s272_s29, 4 }
  0x16   : > { %s1343_s18 = sshll.u32 %s2057_s17, 3  ;;  %v1493_v28 = vld [vmem:[%s2047_s5 + $0x80] sm:$0xff]   ;;  %v1504_v39 = vld [vmem:[%s2047_s5 + $0x18] sm:$0xff]   ;;  %v1510_v45 = vld [vmem:[%s2047_s5 + $0x68] sm:$0xff]   ;;  %s274_s9 = scalar_lea.vmem [#allocation2], %s1280_s8 }
  0x17   : > { %s280_s21 = scalar_lea.vmem %s2042_s0, %s1343_s18  ;;  %v1505_v40 = vld [vmem:[%s2047_s5 + $0x98] sm:$0xff]   ;;  %v1506_v41 = vld [vmem:[%s2047_s5 + $0x60] sm:$0xff]   ;;  %v1511_v46 = vld [vmem:[%s2047_s5 + $0xe8] sm:$0xff]   ;;  %s1214_s13 = sshll.u32 %s274_s9, 4  ;;  %s1993_s13 = int_to_ptr.vmem [resolvable:$true] %s1214_s13 }
  0x18   : > { %v1476_v3 = vld [vmem:[%s280_s21] sm:$0xff]   ;;  %v1477_v4 = vld [vmem:[%s280_s21 + $0x8] sm:$0xff]   ;;  %v1514_v49 = vld [vmem:[%s2047_s5 + $0x70] sm:$0xff]   ;;  %s1998_s17 = scalar_lea.hbm %s2049_s7, %s1344_s14  ;;  %s2001_s18 = scalar_lea.sflag [#allocation3], %s272_s29 }
  0x19   : > { %1413 = vmatprep.mubr.msk.bf16.mxu0 %vm317_vm1, %v1476_v3  ;;  %v1507_v42 = vld [vmem:[%s2047_s5 + $0xe0] sm:$0xff]   ;;  %v1512_v47 = vld [vmem:[%s2047_s5 + $0x28] sm:$0xff]   ;;  %v1515_v50 = vld [vmem:[%s2047_s5 + $0xf0] sm:$0xff]   ;;  %s1554_s28 = scalar_lea.vmem %s1993_s13, 256  ;;  %s1621_s19 = smov [#allocation2]  }
  0x1a   : > { %1414 = vmatmul.mubr.msk.bf16.vlgmr.msra.gmra.mrb[0].mxu0 %vm317_vm1, %v1477_v4  ;;  %v1508_v43 = vld [vmem:[%s2047_s5 + $0x20] sm:$0xff]   ;;  %v1513_v48 = vld [vmem:[%s2047_s5 + $0xa8] sm:$0xff]   ;;  %v1516_v51 = vld [vmem:[%s2047_s5 + $0x30] sm:$0xff]   ;;  %p1555_p11 = scmp.ne.s32.totalorder %s1993_s13, %s1554_s28  ;;  %s1558_s20 = sshll.u32 %s1621_s19, 4  ;;  %s1559_s20 = int_to_ptr.vmem [resolvable:$false] %s1558_s20 }
  0x1b   : > { %510 = vmatpush1.bf16.msra.mxu0 %v1480_v7  ;;  %541 = vmatprep.mubr.bf16.mxu0 %v1618_v13  ;;  %v1509_v44 = vld [vmem:[%s2047_s5 + $0xa0] sm:$0xff]   ;;  %v1517_v52 = vld [vmem:[%s2047_s5 + $0xb0] sm:$0xff]   ;;  %v1518_v53 = vld [vmem:[%s2047_s5 + $0x78] sm:$0xff]   ;;  %s1560_s21 = scalar_lea.vmem %s1559_s20, 512  ;;  %p1561_p0 = scmp.lt.s32.totalorder %s1993_s13, %s1559_s20 }
  0x1c   : > { %511 = vmatprep.subr.bf16.mxu0 %v1488_v10  ;;  %v1519_v54 = vld [vmem:[%s2047_s5 + $0xf8] sm:$0xff]   ;;  %v387_v62 = vld [vmem:[%s2046_s4] sm:$0xf]  ;;  %p1556_p12 = pnand %p1555_p11, %p1702_p5  ;;  %p1562_p1 = scmp.lt.s32.totalorder %s1560_s21, %s1554_s28 }
  0x1d   : > { %v1520_v55 = vld [vmem:[%s2047_s5 + $0x38] sm:$0xff]   ;;  %v1862_v0 = vrot.slane %v387_v62, %v391_v60  ;;  %v1864_v1 = vrot.slane %v387_v62, %v399_v61  ;;  %v1866_v5 = vrot.slane %v387_v62, %v395_v63  ;;  %v1870_v10 = vrot.slane %v387_v62, %v403_v2 }
  0x1e   : > { %v1521_v56 = vld [vmem:[%s2047_s5 + $0xb8] sm:$0xff]   ;;  %p1557_p13 = pneg %p1556_p12  ;;  %p1563_p2 = por %p1562_p1, %p1561_p0 }
  0x1f   : > { %512 = vmatpush1.bf16.msra.mxu0 %v1486_v11 }
  0x20   : > { %1377 = vmatprep.subr.bf16.mxu0 %v1491_v26  ;;  %p1564_p3 = pnand %p1563_p2, %p1557_p13 }
  0xed   : > { %v1415_v14 = vpop.f32.mrb[0].mxu0 }
  0xee   : > { %v362_v16 = vpop.f32.mrb[1].mxu0  ;;  %v371_v18 = vadd.f32 %v1415_v14, %v1284_v15 }
  0xef   : > { %v1416_v17 = vpop.f32.mrb[2].mxu0  ;;  %v363_v21 = vadd.f32 %v1284_v15, %v362_v16 }
  0xf0   : > { %v374_v19 = vadd.f32 %v1416_v17, %v1284_v15  ;;  %v365_v20 = vpop.f32.mrb[3].mxu0 }
  0xf1   : > { %v366_v22 = vadd.f32 %v1284_v15, %v365_v20 }
  0xf2   : > { %v1749_v23 = vpack.c.bf16 %v374_v19, %v371_v18 }
  0xf3   : > { %v1751_v24 = vpack.c.bf16 %v366_v22, %v363_v21 }
  0xf5   : > { %1299 = vmatmul.mubr.msk.bf16.vlgmr.msra.gmra.mrb[0].mxu1 %vm449_vm2, %v1751_v24  ;;  %1301 = vmatmul.mubr.msk.bf16.vlgmr.msra.gmra.mrb[4].mxu0 %vm449_vm2, %v1751_v24 }
  0xf6   : > { %498 = vmatprep.mubr.bf16.mxu1 %v1618_v13  ;;  %551 = vmatprep.mubr.bf16.mxu0 %v1618_v13 }
  0xf7   : > { %1350 = vmatpush3.bf16.msra.mxu1 %v1492_v27  ;;  %1378 = vmatpush3.bf16.msra.mxu0 %v1493_v28 }
  0xf8   : > { %1351 = vmatprep.subr.bf16.mxu1 %v1494_v29  ;;  %1379 = vmatprep.subr.bf16.mxu0 %v1495_v30 }
  0xfb   : > { %1352 = vmatpush3.bf16.msra.mxu1 %v1496_v31  ;;  %1380 = vmatpush3.bf16.msra.mxu0 %v1497_v32 }
  0xfc   : > { %1353 = vmatprep.subr.bf16.mxu1 %v1498_v33  ;;  %1381 = vmatprep.subr.bf16.mxu0 %v1499_v34 }
  0xfd   : > { %1300 = vmatmul.mubr.msk.bf16.gmra.mrb[4].mxu1 %vm449_vm2, %v1749_v23  ;;  %1302 = vmatmul.mubr.msk.bf16.gmra.mrb[8].mxu0 %vm449_vm2, %v1749_v23 }
  0xff   : > { %1354 = vmatpush3.bf16.msra.mxu1 %v1500_v35  ;;  %1382 = vmatpush3.bf16.msra.mxu0 %v1501_v36 }
 0x100   : > { %1355 = vmatprep.subr.bf16.mxu1 %v1502_v37  ;;  %1383 = vmatprep.subr.bf16.mxu0 %v1503_v38 }
 0x103   : > { %1356 = vmatpush3.bf16.msra.mxu1 %v1504_v39  ;;  %1384 = vmatpush3.bf16.msra.mxu0 %v1505_v40 }
 0x104   : > { %1357 = vmatprep.subr.bf16.mxu1 %v1506_v41  ;;  %1385 = vmatprep.subr.bf16.mxu0 %v1507_v42 }
 0x107   : > { %1358 = vmatpush3.bf16.msra.mxu1 %v1508_v43  ;;  %1386 = vmatpush3.bf16.msra.mxu0 %v1509_v44 }
 0x108   : > { %1359 = vmatprep.subr.bf16.mxu1 %v1510_v45  ;;  %1387 = vmatprep.subr.bf16.mxu0 %v1511_v46 }
 0x10b   : > { %1360 = vmatpush3.bf16.msra.mxu1 %v1512_v47  ;;  %1388 = vmatpush3.bf16.msra.mxu0 %v1513_v48 }
 0x10c   : > { %1361 = vmatprep.subr.bf16.mxu1 %v1514_v49  ;;  %1389 = vmatprep.subr.bf16.mxu0 %v1515_v50 }
 0x10f   : > { %1362 = vmatpush3.bf16.msra.mxu1 %v1516_v51  ;;  %1390 = vmatpush3.bf16.msra.mxu0 %v1517_v52 }
 0x110   : > { %1363 = vmatprep.subr.bf16.mxu1 %v1518_v53  ;;  %1391 = vmatprep.subr.bf16.mxu0 %v1519_v54 }
 0x113   : > { %1364 = vmatpush3.bf16.msra.mxu1 %v1520_v55  ;;  %1392 = vmatpush3.bf16.msra.mxu0 %v1521_v56 }
 0x114   : > { %1417 = vmatprep.subr.bf16.mxu1 %v1619_v57  ;;  %1423 = vmatprep.subr.bf16.mxu0 %v1619_v57 }
 0x1c8   : > { %v490_v3 = vpop.f32.mrb[0].mxu1  ;;  %v543_v4 = vpop.f32.mrb[4].mxu0 }
 0x1c9   : > { %v491_v6 = vadd.f32 %v490_v3, %v1862_v0  ;;  %v544_v7 = vadd.f32 %v543_v4, %v1864_v1  ;;  %v492_v8 = vpop.f32.mrb[1].mxu1  ;;  %v545_v9 = vpop.f32.mrb[5].mxu0 }
 0x1ca   : > { %v494_v11 = vpop.f32.mrb[2].mxu1  ;;  %v547_v12 = vpop.f32.mrb[6].mxu0  ;;  %v1873_v15 = vadd.f32 %v492_v8, %v1866_v5  ;;  %v1883_v25 = vadd.f32 %v545_v9, %v1870_v10 }
 0x1cb   : > { %v578_v13 = vmul.f32 0.044715, %v491_v6  ;;  %v580_v14 = vmul.f32 0.044715, %v544_v7  ;;  %v495_v16 = vadd.f32 %v494_v11, %v1862_v0  ;;  %v1877_v17 = vadd.f32 %v547_v12, %v1864_v1  ;;  %v496_v18 = vpop.f32.mrb[3].mxu1  ;;  %v549_v19 = vpop.f32.mrb[7].mxu0 }
 0x1cc   : > { %v1880_v22 = vadd.f32 %v496_v18, %v1866_v5  ;;  %v1886_v27 = vadd.f32 %v549_v19, %v1870_v10  ;;  %v1888_v28 = vmul.f32 0.5, %v491_v6  ;;  %v579_v32 = vmul.f32 0.044715, %v1873_v15 }
 0x1cd   : > { %v594_v20 = vmul.f32 %v578_v13, %v491_v6  ;;  %v596_v21 = vmul.f32 %v580_v14, %v544_v7  ;;  %v582_v26 = vmul.f32 0.044715, %v495_v16  ;;  %v584_v31 = vmul.f32 0.044715, %v1877_v17 }
 0x1ce   : > { %v583_v34 = vmul.f32 0.044715, %v1880_v22  ;;  %v1893_v38 = vmul.f32 0.5, %v544_v7  ;;  %v581_v43 = vmul.f32 0.044715, %v1883_v25  ;;  %v595_v54 = vmul.f32 %v579_v32, %v1873_v15 }
 0x1cf   : > { %v610_v29 = vmul.f32 %v594_v20, %v491_v6  ;;  %v612_v30 = vmul.f32 %v596_v21, %v544_v7  ;;  %v598_v33 = vmul.f32 %v582_v26, %v495_v16  ;;  %v600_v40 = vmul.f32 %v584_v31, %v1877_v17 }
 0x1d0   : > { %v500_v35 = vpop.f32.mrb[4].mxu1  ;;  %v553_v36 = vpop.f32.mrb[8].mxu0  ;;  %v585_v45 = vmul.f32 0.044715, %v1886_v27  ;;  %v599_v56 = vmul.f32 %v583_v34, %v1880_v22  ;;  %v597_v62 = vmul.f32 %v581_v43, %v1883_v25  ;;  %v611_v8 = vmul.f32 %v595_v54, %v1873_v15 }
 0x1d1   : > { %v626_v37 = vadd.f32 %v610_v29, %v491_v6  ;;  %v628_v39 = vadd.f32 %v612_v30, %v544_v7  ;;  %v502_v41 = vpop.f32.mrb[5].mxu1  ;;  %v555_v42 = vpop.f32.mrb[9].mxu0  ;;  %v614_v44 = vmul.f32 %v598_v33, %v495_v16  ;;  %v1899_v46 = vadd.f32 %v500_v35, %v1862_v0 }
 0x1d2   : > { %v504_v47 = vpop.f32.mrb[6].mxu1  ;;  %v557_v48 = vpop.f32.mrb[10].mxu0  ;;  %v616_v51 = vmul.f32 %v600_v40, %v1877_v17  ;;  %v1905_v58 = vadd.f32 %v553_v36, %v1864_v1  ;;  %v1910_v61 = vadd.f32 %v502_v41, %v1866_v5  ;;  %v601_v2 = vmul.f32 %v585_v45, %v1886_v27 }
 0x1d3   : > { %v642_v49 = vmul.f32 0.7978846, %v626_v37  ;;  %v644_v50 = vmul.f32 0.7978846, %v628_v39  ;;  %v506_v52 = vpop.f32.mrb[7].mxu1  ;;  %v559_v53 = vpop.f32.mrb[11].mxu0  ;;  %v630_v55 = vadd.f32 %v614_v44, %v495_v16  ;;  %v1916_v6 = vadd.f32 %v555_v42, %v1870_v10 }
 0x1d4   : > { %v632_v59 = vadd.f32 %v616_v51, %v1877_v17  ;;  %v586_v60 = vmul.f32 0.044715, %v1899_v46  ;;  %v587_v4 = vmul.f32 0.044715, %v1910_v61  ;;  %v1919_v7 = vadd.f32 %v504_v47, %v1862_v0 }
 0x1d5   : > { %1522 = vtanh.f32 %v642_v49  ;;  %v646_v63 = vmul.f32 0.7978846, %v630_v55  ;;  %v615_v9 = vmul.f32 %v599_v56, %v1880_v22  ;;  %v1924_v11 = vadd.f32 %v557_v48, %v1864_v1 }
 0x1d6   : > { %1524 = vtanh.f32 %v644_v50  ;;  %v648_v3 = vmul.f32 0.7978846, %v632_v59  ;;  %v602_v12 = vmul.f32 %v586_v60, %v1899_v46  ;;  %v588_v13 = vmul.f32 0.044715, %v1905_v58 }
 0x1d7   : > { %1526 = vtanh.f32 %v646_v63  ;;  %v589_v14 = vmul.f32 0.044715, %v1916_v6  ;;  %v566_v18 = vmul.f32 0.5, %v495_v16  ;;  %v603_v19 = vmul.f32 %v587_v4, %v1910_v61 }
 0x1d8   : > { %1528 = vtanh.f32 %v648_v3  ;;  %v1931_v0 = vadd.f32 %v506_v52, %v1866_v5  ;;  %v1934_v20 = vadd.f32 %v559_v53, %v1870_v10  ;;  %v613_v21 = vmul.f32 %v597_v62, %v1883_v25 }
 0x1d9   : > { %v617_v1 = vmul.f32 %v601_v2, %v1886_v27  ;;  %v590_v26 = vmul.f32 0.044715, %v1919_v7  ;;  %v592_v29 = vmul.f32 0.044715, %v1924_v11  ;;  %v605_v30 = vmul.f32 %v589_v14, %v1916_v6 }
 0x1da   : > { %v591_v16 = vmul.f32 0.044715, %v1931_v0  ;;  %v593_v31 = vmul.f32 0.044715, %v1934_v20  ;;  %v627_v5 = vadd.f32 %v611_v8, %v1873_v15  ;;  %v568_v32 = vmul.f32 0.5, %v1877_v17 }
 0x1db   : > { %v618_v10 = vmul.f32 %v602_v12, %v1899_v46  ;;  %v604_v33 = vmul.f32 %v588_v13, %v1905_v58  ;;  %v631_v34 = vadd.f32 %v615_v9, %v1880_v22  ;;  %v619_v35 = vmul.f32 %v603_v19, %v1910_v61 }
 0x1dc   : > { %v607_v36 = vmul.f32 %v591_v16, %v1931_v0  ;;  %v609_v37 = vmul.f32 %v593_v31, %v1934_v20  ;;  %v643_v39 = vmul.f32 0.7978846, %v627_v5  ;;  %v606_v41 = vmul.f32 %v590_v26, %v1919_v7 }
 0x1dd   : > { %v647_v42 = vmul.f32 0.7978846, %v631_v34  ;;  %v629_v43 = vadd.f32 %v613_v21, %v1883_v25  ;;  %v633_v17 = vadd.f32 %v617_v1, %v1886_v27  ;;  %v621_v45 = vmul.f32 %v605_v30, %v1916_v6 }
 0x1de   : > { %v608_v47 = vmul.f32 %v592_v29, %v1924_v11  ;;  %v623_v48 = vmul.f32 %v607_v36, %v1931_v0  ;;  %1530 = vtanh.f32 %v643_v39  ;;  %v620_v53 = vmul.f32 %v604_v33, %v1905_v58 }
 0x1df   : > { %v1523_v40 = vpop.eup %1522  ;;  %1532 = vtanh.f32 %v647_v42  ;;  %v645_v49 = vmul.f32 0.7978846, %v629_v43  ;;  %v649_v50 = vmul.f32 0.7978846, %v633_v17  ;;  %v625_v54 = vmul.f32 %v609_v37, %v1934_v20 }
 0x1e0   : > { %v1525_v44 = vpop.eup %1524  ;;  %v674_v51 = vadd.f32 1.0, %v1523_v40  ;;  %v635_v56 = vadd.f32 %v619_v35, %v1910_v61  ;;  %v622_v60 = vmul.f32 %v606_v41, %v1919_v7  ;;  %v639_v63 = vadd.f32 %v623_v48, %v1931_v0 }
 0x1e1   : > { %v1527_v52 = vpop.eup %1526  ;;  %v676_v55 = vadd.f32 1.0, %v1525_v44  ;;  %1534 = vtanh.f32 %v645_v49  ;;  %v624_v2 = vmul.f32 %v608_v47, %v1924_v11  ;;  %v637_v13 = vadd.f32 %v621_v45, %v1916_v6 }
 0x1e2   : > { %v1529_v59 = vpop.eup %1528  ;;  %v678_v62 = vadd.f32 1.0, %v1527_v52  ;;  %1536 = vtanh.f32 %v649_v50  ;;  %v651_v4 = vmul.f32 0.7978846, %v635_v56  ;;  %v690_v8 = vmul.f32 %v674_v51, %v1888_v28 }
 0x1e3   : > { %v680_v3 = vadd.f32 1.0, %v1529_v59  ;;  %v655_v12 = vmul.f32 0.7978846, %v639_v63  ;;  %v692_v14 = vmul.f32 %v676_v55, %v1893_v38  ;;  %v641_v21 = vadd.f32 %v625_v54, %v1934_v20 }
 0x1e4   : > { %v694_v9 = vmul.f32 %v678_v62, %v566_v18  ;;  %1538 = vtanh.f32 %v651_v4  ;;  %v653_v26 = vmul.f32 0.7978846, %v637_v13  ;;  %v634_v16 = vadd.f32 %v618_v10, %v1899_v46 }
 0x1e5   : > { %v696_v19 = vmul.f32 %v680_v3, %v568_v32  ;;  %1540 = vtanh.f32 %v655_v12  ;;  %v657_v30 = vmul.f32 0.7978846, %v641_v21  ;;  %v638_v31 = vadd.f32 %v622_v60, %v1919_v7 }
 0x1e6   : > { %v706_v1 = vpack.c.bf16 %v694_v9, %v690_v8  ;;  %1542 = vtanh.f32 %v653_v26  ;;  %v636_v28 = vadd.f32 %v620_v53, %v1905_v58  ;;  %v650_v5 = vmul.f32 0.7978846, %v634_v16 }
 0x1e7   : > { %v708_v29 = vpack.c.bf16 %v696_v19, %v692_v14  ;;  %1544 = vtanh.f32 %v657_v30  ;;  %v654_v38 = vmul.f32 0.7978846, %v638_v31  ;;  %v640_v32 = vadd.f32 %v624_v2, %v1924_v11 }
 0x1e8   : > { %v1531_v18 = vpop.eup %1530  ;;  %v563_v34 = vmul.f32 0.5, %v1873_v15  ;;  %v652_v36 = vmul.f32 0.7978846, %v636_v28  ;;  %v567_v37 = vmul.f32 0.5, %v1880_v22  ;;  %1546 = vtanh.f32 %v650_v5 }
 0x1e9   : > { %v1533_v33 = vpop.eup %1532  ;;  %v675_v35 = vadd.f32 1.0, %v1531_v18  ;;  %v656_v10 = vmul.f32 0.7978846, %v640_v32  ;;  %1548 = vtanh.f32 %v654_v38  ;;  %v565_v44 = vmul.f32 0.5, %v1883_v25 }
 0x1ea   : > { %v679_v39 = vadd.f32 1.0, %v1533_v33  ;;  %1550 = vtanh.f32 %v652_v36  ;;  %v569_v45 = vmul.f32 0.5, %v1886_v27  ;;  %v571_v52 = vmul.f32 0.5, %v1910_v61 }
 0x1eb   : > { %v1535_v40 = vpop.eup %1534  ;;  %v691_v42 = vmul.f32 %v675_v35, %v563_v34  ;;  %1552 = vtanh.f32 %v656_v10  ;;  %v575_v53 = vmul.f32 0.5, %v1931_v0  ;;  %v573_v62 = vmul.f32 0.5, %v1916_v6 }
 0x1ec   : > { %v1537_v41 = vpop.eup %1536  ;;  %v695_v43 = vmul.f32 %v679_v39, %v567_v37  ;;  %v677_v17 = vadd.f32 1.0, %v1535_v40  ;;  %v577_v63 = vmul.f32 0.5, %v1934_v20  ;;  %v574_v13 = vmul.f32 0.5, %v1919_v7 }
 0x1ed   : > { %v681_v47 = vadd.f32 1.0, %v1537_v41  ;;  %v572_v20 = vmul.f32 0.5, %v1905_v58  ;;  %v1303_v58 = vld [vmem:[%s2048_s6] ss:$0 sm:$0xff] }
 0x1ee   : > { %v1539_v15 = vpop.eup %1538  ;;  %v707_v48 = vpack.c.bf16 %v695_v43, %v691_v42  ;;  %v693_v22 = vmul.f32 %v677_v17, %v565_v44 }
 0x1ef   : > { %v1541_v49 = vpop.eup %1540  ;;  %v697_v50 = vmul.f32 %v681_v47, %v569_v45  ;;  %v683_v51 = vadd.f32 1.0, %v1539_v15 }
 0x1f0   : > { %1009 = vmatprep.mubr.bf16.mxu1 %v707_v48  ;;  %v687_v54 = vadd.f32 1.0, %v1541_v49  ;;  %v1543_v55 = vpop.eup %1542 }
 0x1f1   : > { %v709_v56 = vpack.c.bf16 %v697_v50, %v693_v22  ;;  %1010 = vmatmul.mubr.bf16.vlgmr.msra.gmra.mrb[8].mxu1 %v706_v1  ;;  %v1545_v25 = vpop.eup %1544  ;;  %v699_v27 = vmul.f32 %v683_v51, %v571_v52  ;;  %v685_v60 = vadd.f32 1.0, %v1543_v55 }
 0x1f2   : > { %1418 = vmatpush3.bf16.msra.mxu1 %v1751_v24  ;;  %v703_v59 = vmul.f32 %v687_v54, %v575_v53  ;;  %v689_v2 = vadd.f32 1.0, %v1545_v25  ;;  %v1547_v3 = vpop.eup %1546  ;;  %v570_v24 = vmul.f32 0.5, %v1899_v46 }
 0x1f3   : > { %1058 = vmatprep.mubr.bf16.mxu0 %v709_v56  ;;  %v1549_v0 = vpop.eup %1548  ;;  %v701_v4 = vmul.f32 %v685_v60, %v573_v62  ;;  %v682_v9 = vadd.f32 1.0, %v1547_v3 }
 0x1f4   : > { %1059 = vmatmul.mubr.bf16.vlgmr.msra.gmra.mrb[12].mxu0 %v708_v29  ;;  %v711_v61 = vpack.c.bf16 %v703_v59, %v699_v27  ;;  %v705_v8 = vmul.f32 %v689_v2, %v577_v63  ;;  %v1551_v12 = vpop.eup %1550  ;;  %v686_v14 = vadd.f32 1.0, %v1549_v0  ;;  %v576_v29 = vmul.f32 0.5, %v1924_v11 }
 0x1f5   : > { %1424 = vmatpush3.bf16.msra.mxu0 %v1749_v23  ;;  %v1553_v6 = vpop.eup %1552  ;;  %v684_v21 = vadd.f32 1.0, %v1551_v12  ;;  %v698_v1 = vmul.f32 %v682_v9, %v570_v24 }
 0x1f6   : > { %1017 = vmatprep.mubr.bf16.mxu1 %v711_v61  ;;  %v713_v19 = vpack.c.bf16 %v705_v8, %v701_v4  ;;  %v702_v26 = vmul.f32 %v686_v14, %v574_v13  ;;  %v688_v23 = vadd.f32 1.0, %v1553_v6 }
 0x1f7   : > { %v700_v16 = vmul.f32 %v684_v21, %v572_v20 }
 0x1f8   : > { %1066 = vmatprep.mubr.bf16.mxu0 %v713_v19  ;;  %v710_v30 = vpack.c.bf16 %v702_v26, %v698_v1  ;;  %v704_v31 = vmul.f32 %v688_v23, %v576_v29 }
 0x1fa   : > { %1018 = vmatmul.mubr.bf16.gmra.mrb[12].mxu1 %v710_v30  ;;  %v712_v28 = vpack.c.bf16 %v704_v31, %v700_v16 }
 0x1fb   : > { %1419 = vmatprep.mubr.msk.bf16.mxu1 %vm1620_vm3, %v1619_v57 }
 0x1fc   : > { %1067 = vmatmul.mubr.bf16.gmra.mrb[16].mxu0 %v712_v28 }
 0x1fd   : > { %1425 = vmatprep.mubr.msk.bf16.mxu0 %vm1620_vm3, %v1619_v57 }
 0x2c4   : > { %v1365_v46 = vpop.f32.mrb[8].mxu1 }
 0x2c5   : > { %v1366_v7 = vpop.f32.mrb[9].mxu1 }
 0x2c6   : > { %v1367_v11 = vadd.f32 %v1366_v7, %v1365_v46  ;;  %v1368_v18 = vpop.f32.mrb[10].mxu1 }
 0x2c7   : > { %v1393_v5 = vpop.f32.mrb[12].mxu0  ;;  %v1369_v38 = vpop.f32.mrb[11].mxu1 }
 0x2c8   : > { %v1012_v32 = vadd.f32 %v1367_v11, %v1303_v58  ;;  %v1394_v33 = vpop.f32.mrb[13].mxu0  ;;  %v1370_v34 = vadd.f32 %v1369_v38, %v1368_v18 }
 0x2c9   : > { %v1395_v35 = vadd.f32 %v1394_v33, %v1393_v5  ;;  %v1396_v36 = vpop.f32.mrb[14].mxu0 }
 0x2ca   : > { %v1015_v37 = vadd.f32 %v1370_v34, %v1303_v58  ;;  %v1397_v39 = vpop.f32.mrb[15].mxu0 }
 0x2cb   : > { %v1398_v10 = vadd.f32 %v1397_v39, %v1396_v36  ;;  %v1061_v40 = vadd.f32 %v1395_v35, %v1012_v32 }
 0x2cd   : > { %v1064_v57 = vadd.f32 %v1398_v10, %v1015_v37  ;;  %v1371_v41 = vpop.f32.mrb[12].mxu1 }
 0x2ce   : > { %v1372_v43 = vpop.f32.mrb[13].mxu1 }
 0x2cf   : > { %v1075_v42 = vpack.c.bf16 %v1064_v57, %v1061_v40  ;;  %v1399_v17 = vpop.f32.mrb[16].mxu0  ;;  %v1373_v44 = vadd.f32 %v1372_v43, %v1371_v41  ;;  %v1374_v45 = vpop.f32.mrb[14].mxu1 }
 0x2d0   : > { %v1400_v47 = vpop.f32.mrb[17].mxu0  ;;  %v1375_v15 = vpop.f32.mrb[15].mxu1 }
 0x2d1   : > { %1077 = vxpose.xlu0.c.b16.start.end [1/1] (short) (narrow) %v1075_v42, 16  ;;  %v1020_v48 = vadd.f32 %v1373_v44, %v1303_v58  ;;  %v1401_v49 = vadd.f32 %v1400_v47, %v1399_v17  ;;  %v1402_v22 = vpop.f32.mrb[18].mxu0  ;;  %v1376_v50 = vadd.f32 %v1375_v15, %v1374_v45 }
 0x2d2   : > { %v1403_v51 = vpop.f32.mrb[19].mxu0 }
 0x2d3   : > { %v1069_v52 = vadd.f32 %v1401_v49, %v1020_v48  ;;  %v1023_v53 = vadd.f32 %v1376_v50, %v1303_v58  ;;  %v1404_v54 = vadd.f32 %v1403_v51, %v1402_v22 }
 0x2d5   : > { %v1072_v55 = vadd.f32 %v1404_v54, %v1023_v53 }
 0x2d7   : > { %v1076_v56 = vpack.c.bf16 %v1072_v55, %v1069_v52 }
 0x2d9   : > { %1137 = vxpose.xlu0.c.b16.start.end [1/1] (short) (narrow) %v1076_v56, 16 }
 0x337   : > { %v1085_v25 = vpop.trf.xlu0 }
 0x338   : > { %1420 = vmatmul.mubr.msk.bf16.vlgmr.msra.gmra.mrb[16].mxu1 %vm1093_vm4, %v1085_v25 }
 0x33f   : > { %v1145_v27 = vpop.trf.xlu0 }
 0x340   : > { %1426 = vmatmul.mubr.msk.bf16.vlgmr.msra.gmra.mrb[20].mxu0 %vm1093_vm4, %v1145_v27 }
 0x40b   : > { %v1131_v59 = vpop.f32.mrb[16].mxu1 }
 0x40c   : > { %v1196_v60 = vmul.f32 0.0625, %v1131_v59  ;;  %v1421_v62 = vpop.f32.mrb[17].mxu1 }
 0x40d   : > { %v1134_v63 = vpop.f32.mrb[18].mxu1 }
 0x40e   : > { %1198 = vst.msk [vmem:[%s274_s9] sm:$0xff] %vm449_vm2, %v1196_v60  ;;  %v1422_v2 = vpop.f32.mrb[19].mxu1 }
 0x413   : > { %v1190_v3 = vpop.f32.mrb[20].mxu0 }
 0x414   : > { %v1197_v61 = vmul.f32 0.0625, %v1190_v3  ;;  %v1427_v0 = vpop.f32.mrb[21].mxu0 }
 0x415   : > { %v1193_v4 = vpop.f32.mrb[22].mxu0 }
 0x416   : > { %1199 = vst.msk [vmem:[%s274_s9 + $0x8] sm:$0xff] %vm449_vm2, %v1197_v61  ;;  %v1428_v8 = vpop.f32.mrb[23].mxu0 }
 0x417   : > { %1567 = shalt.err (!%p1564_p3)
}
 0x418   : > { %s1568_s22 = scalar_lea.hbm %s1998_s17, 256  ;;  %s1572_s8 = scalar_lea.hbm %s2049_s7, 512 }
 0x419   : > { %p1569_p4 = scmp.ne.s32.totalorder %s1998_s17, %s1568_s22  ;;  %p1573_p9 = scmp.lt.u32.totalorder %s1998_s17, %s2049_s7 }
 0x41a   : > { %p1574_p10 = scmp.lt.u32.totalorder %s1572_s8, %s1568_s22  ;;  %p1576_p12 = scmp.lt.u32.totalorder %s1568_s22, %s1998_s17 }
 0x41b   : > { %p1570_p7 = pnand %p1569_p4, %p1702_p5 }
 0x41c   : > { %p1575_p11 = por %p1574_p10, %p1573_p9 }
 0x41d   : > { %p1571_p8 = pneg %p1570_p7 }
 0x41e   : > { %p1577_p13 = por %p1576_p12, %p1575_p11 }
 0x420   : > { %p1578_p0 = pnand %p1577_p13, %p1571_p8 }
 0x422   : > { %1581 = shalt.err (!%p1578_p0)
}
 0x423   : > { %s1622_s15 = smov 128   ;;  %s1623_s16 = smov 8  }
 0x424   : > { %1430 = dma.vmem_to_hbm [thread:$0]  (%p1702_p5), %s1993_s13, 256, %s1998_s17, %s2001_s18, %s1622_s15, %s1622_s15, %s1623_s16  }
 0x425 PF: > { %p1436_p1 = scmp.ge.s32.totalorder %s1616_s27, 2  ;;  %s1229_s28 = sand.u32 1, %s1604_s24  }
 0x426   : > { %s1230_s19 = scalar_lea.sflag [#allocation3], %s1229_s28 }
 0x427   : > { %p1433_p2 = pnand %p1436_p1, %p1706_p6 }
 0x429   : > { %1599 = dma.done.wait (!%p1433_p2), %s1230_s19, 256  }
 0x42a   : > { %1601 = vsyncadd (!%p1433_p2), %s1230_s19, 4294967040  ;;  %p17_p3 = scmp.ge.s32.totalorder %s1689_s30, 4   ;;  %s2052_s24 = smov %s1608_s25 }
 0x42b   : > { %s2053_s25 = smov %s1612_s26  ;;  %s2054_s26 = smov %s1700_s10 }
 0x42c   : > { %s2055_s27 = smov %s1689_s30  ;;  %19 = sbr.rel (!%p17_p3) target bundleno = 3 (0x3), region = 83 }
 0x433   :  { %1235 = vsyncpa [#allocation3], 1 }
 0x434   :  { %1237 = vsyncpa [#allocation3 + $0x1], 1 }

// kernel: tokenizer_forward.6
= control target key start
LH: loop header
LB: loop body
LE: loop exit
PB: predicated region body
PF: predicated region fallthrough
CT: control target
= control target key end

     0   :  { %s1620_s30 = smov 0   ;;  %s2022_s0 = inlined_call_operand.vmem [shape: bf16[4,16,24], index: 0, kind: input, shape index: {}]   ;;  %s2023_s1 = inlined_call_operand.vmem [shape: bf16[24,96], index: 1, kind: input, shape index: {}]   ;;  %s2024_s2 = inlined_call_operand.vmem [shape: f32[1,96], index: 2, kind: input, shape index: {}]   ;;  %s2025_s3 = inlined_call_operand.vmem [shape: f32[9,96], index: 3, kind: input, shape index: {}]   ;;  %s2026_s4 = inlined_call_operand.vmem [shape: f32[1,96], index: 4, kind: input, shape index: {}]   ;;  %s2027_s5 = inlined_call_operand.vmem [shape: f32[96,24], index: 5, kind: input, shape index: {}]   ;;  %s2028_s6 = inlined_call_operand.vmem [shape: f32[24,96], index: 6, kind: input, shape index: {}]   ;;  %s2029_s7 = inlined_call_operand.vmem [shape: bf16[96,24], index: 7, kind: input, shape index: {}]   ;;  %s2030_s8 = inlined_call_operand.vmem [shape: f32[1,24], index: 8, kind: input, shape index: {}]   ;;  %s2031_s9 = inlined_call_operand.vmem [shape: bf16[4,16,24], index: 9, kind: output, shape index: {}]  }
   0x1 LB: > { %s1336_s10 = sadd.s32 4294967295, %s1564_s30   ;;  %p1340_p0 = scmp.ge.s32.totalorder %s1564_s30, 1  ;;  %s1564_s30 = sphi %s1620_s30, %s19_s30  }
   0x2   : > { %p289_p1 = scmp.lt.s32.totalorder %s1564_s30, 3 }
   0x4   : > { %p290_p2 = pnand %p1340_p0, %p289_p1 }
   0x5   : > { %v1512_v0 = vld [vmem:[%s2023_s1] sm:$0xff] (!%p290_p2)   ;;  %v1513_v1 = vld [vmem:[%s2023_s1 + $0x8] ss:$0 sps:$4 sm:$0xff] (!%p290_p2)   ;;  %vm382_vm0 = vcmask (!%p290_p2), 1043456   ;;  %s1341_s15 = sshll.u32 (!%p290_p2), %s1336_s10, 1  ;;  %vm375_vm1 = vcmask (!%p290_p2), 195584  }
   0x6   : > { %293 = sbr.rel (%p290_p2) target bundleno = 1066 (0x42a), region = 56  ;;  %1418 = vmatprep.subr.bf16.mxu1 (!%p290_p2), %v1512_v0  ;;  %p328_p3 = scmp.lt.s32.totalorder (!%p290_p2), %s1341_s15, 3  ;;  %v384_v2 = vsel (!%p290_p2), %vm382_vm0, %v1513_v1, 0  ;;  %vm477_vm2 = vcmask (!%p290_p2), 778240   ;;  %v1566_v5 = vmov (!%p290_p2), 0.0   ;;  %vm471_vm3 = vcmask (!%p290_p2), 783360  }
   0x7   : > { %1419 = vmatpush3.bf16.msra.mxu1 (!%p290_p2), %v1512_v0  ;;  %485 = vst.msk [vmem:[#allocation2 + $0x38] sm:$0x1] (!%p290_p2), %vm477_vm2, %v1566_v5  ;;  %486 = vst.msk [vmem:[#allocation2 + $0x40] sm:$0x1] (!%p290_p2), %vm477_vm2, %v1566_v5  ;;  %v902_v6 = vld [vmem:[%s2027_s5] sm:$0xff] (!%p290_p2)  ;;  %v903_v7 = vld [vmem:[%s2027_s5 + $0x8] sm:$0xff] (!%p290_p2) }
   0x8   : > { %1499 = vmatprep.subr.msk.bf16.mxu1 (!%p290_p2), %vm382_vm0, %v1513_v1  ;;  %497 = vst.msk [vmem:[#allocation2 + $0x3d] sm:$0x1] (!%p290_p2), %vm477_vm2, %v1566_v5  ;;  %498 = vst.msk [vmem:[#allocation2 + $0x45] sm:$0x1] (!%p290_p2), %vm477_vm2, %v1566_v5  ;;  %v904_v8 = vld [vmem:[%s2027_s5 + $0x10] sm:$0xff] (!%p290_p2)  ;;  %v1567_v9 = vmov (!%p290_p2), 0.0|0.0   ;;  %v1479_v10 = vpack.c.bf16 (!%p290_p2), %v903_v7, %v902_v6 }
   0x9   : > { %479 = vst.msk [vmem:[#allocation2 + $0x8] sm:$0x1] (!%p290_p2), %vm477_vm2, %v1566_v5  ;;  %480 = vst.msk [vmem:[#allocation2 + $0x10] sm:$0x1] (!%p290_p2), %vm477_vm2, %v1566_v5  ;;  %v905_v11 = vld [vmem:[%s2027_s5 + $0x18] sm:$0xff] (!%p290_p2)  ;;  %vm1568_vm4 = vmmov (!%p290_p2), 0   ;;  %1496 = vmatprep.subr.bf16.mxu0 (!%p290_p2), %v1567_v9 }
   0xa   : > { %481 = vst.msk [vmem:[#allocation2 + $0x18] sm:$0x1] (!%p290_p2), %vm477_vm2, %v1566_v5  ;;  %482 = vst.msk [vmem:[#allocation2 + $0x20] sm:$0x1] (!%p290_p2), %vm477_vm2, %v1566_v5  ;;  %1459 = vmatprep.mubr.msk.f32.mxu0 (!%p290_p2), %vm1568_vm4, %v1566_v5  ;;  %v1482_v12 = vpack.c.bf16 (!%p290_p2), %v905_v11, %v904_v8  ;;  %v906_v13 = vld [vmem:[%s2027_s5 + $0x20] sm:$0xff] (!%p290_p2)  ;;  %v907_v14 = vld [vmem:[%s2027_s5 + $0x28] sm:$0xff] (!%p290_p2) }
   0xb   : > { %1421 = vmatpush3.bf16.msra.mxu1 (!%p290_p2), %v384_v2  ;;  %487 = vst.msk [vmem:[#allocation2 + $0x48] sm:$0x1] (!%p290_p2), %vm477_vm2, %v1566_v5  ;;  %488 = vst.msk [vmem:[#allocation2 + $0x50] sm:$0x1] (!%p290_p2), %vm477_vm2, %v1566_v5  ;;  %v1485_v15 = vpack.c.bf16 (!%p290_p2), %v907_v14, %v906_v13  ;;  %v908_v16 = vld [vmem:[%s2027_s5 + $0x30] sm:$0xff] (!%p290_p2)  ;;  %v909_v17 = vld [vmem:[%s2027_s5 + $0x38] sm:$0xff] (!%p290_p2) }
   0xc   : > { %491 = vst.msk [vmem:[#allocation2 + $0xd] sm:$0x1] (!%p290_p2), %vm477_vm2, %v1566_v5  ;;  %492 = vst.msk [vmem:[#allocation2 + $0x15] sm:$0x1] (!%p290_p2), %vm477_vm2, %v1566_v5  ;;  %1478 = vmatprep.subr.bf16.mxu1 (!%p290_p2), %v1567_v9  ;;  %v1488_v18 = vpack.c.bf16 (!%p290_p2), %v909_v17, %v908_v16  ;;  %v910_v19 = vld [vmem:[%s2027_s5 + $0x40] sm:$0xff] (!%p290_p2)  ;;  %v911_v20 = vld [vmem:[%s2027_s5 + $0x48] sm:$0xff] (!%p290_p2) }
   0xd   : > { %s2033_s15 = smov (!%p328_p3, %s1341_s15), 3  ;;  %493 = vst.msk [vmem:[#allocation2 + $0x1d] sm:$0x1] %vm477_vm2, %v1566_v5  ;;  %494 = vst.msk [vmem:[#allocation2 + $0x25] sm:$0x1] %vm477_vm2, %v1566_v5  ;;  %v1491_v21 = vpack.c.bf16 %v911_v20, %v910_v19  ;;  %v912_v22 = vld [vmem:[%s2027_s5 + $0x50] sm:$0xff] }
   0xe   : > { %s1383_s16 = sshll.u32 %s2033_s15, 3  ;;  %499 = vst.msk [vmem:[#allocation2 + $0x4d] sm:$0x1] %vm477_vm2, %v1566_v5  ;;  %500 = vst.msk [vmem:[#allocation2 + $0x55] sm:$0x1] %vm477_vm2, %v1566_v5  ;;  %v913_v23 = vld [vmem:[%s2027_s5 + $0x58] sm:$0xff] }
   0xf   : > { %s1642_s19 = scalar_lea.vmem %s2022_s0, %s1383_s16  ;;  %472 = vst.msk [vmem:[#allocation2] sm:$0x3f] %vm471_vm3, %v1566_v5  ;;  %473 = vst.msk [vmem:[#allocation2 + $0x30] sm:$0x3f] %vm471_vm3, %v1566_v5  ;;  %v1494_v24 = vpack.c.bf16 %v913_v23, %v912_v22  ;;  %v1347_v25 = vld [vmem:[%s2024_s2] ss:$0 sm:$0xff]  ;;  %s339_s20 = scalar_lea.vmem %s2031_s9, %s1383_s16 }
  0x10   : > { %v342_v3 = vld [vmem:[%s1642_s19] sm:$0xff]   ;;  %v344_v4 = vld [vmem:[%s1642_s19 + $0x8] sm:$0xff]   ;;  %475 = vst.msk [vmem:[#allocation2 + $0x28] sm:$0x3f] %vm471_vm3, %v1566_v5  ;;  %476 = vst.msk [vmem:[#allocation2 + $0x58] sm:$0x3f] %vm471_vm3, %v1566_v5 }
  0x11   : > { %1422 = vmatprep.mubr.msk.bf16.mxu1 %vm375_vm1, %v342_v3  ;;  %478 = vst.msk [vmem:[#allocation2] sm:$0x1] %vm477_vm2, %v1566_v5  ;;  %483 = vst.msk [vmem:[#allocation2 + $0x28] sm:$0x1] %vm477_vm2, %v1566_v5  ;;  %v1744_v54 = vld [vmem:[%s2025_s3] ss:$0 sm:$0xff] }
  0x12   : > { %1423 = vmatmul.mubr.msk.bf16.vlgmr.msra.gmra.mrb[0].mxu1 %vm375_vm1, %v344_v4  ;;  %484 = vst.msk [vmem:[#allocation2 + $0x30] sm:$0x1] %vm477_vm2, %v1566_v5  ;;  %489 = vst.msk [vmem:[#allocation2 + $0x58] sm:$0x1] %vm477_vm2, %v1566_v5  ;;  %v1749_v56 = vld [vmem:[%s2025_s3 + $0x1] ss:$0 sm:$0xff] }
  0x13   : > { %490 = vst.msk [vmem:[#allocation2 + $0x5] sm:$0x1] %vm477_vm2, %v1566_v5  ;;  %495 = vst.msk [vmem:[#allocation2 + $0x2d] sm:$0x1] %vm477_vm2, %v1566_v5  ;;  %1450 = vmatprep.mubr.msk.f32.mxu1 %vm1568_vm4, %v1566_v5  ;;  %1480 = vmatpush3.bf16.msra.mxu1 %v1479_v10  ;;  %vm515_vm5 = vcmask 781312   ;;  %vm916_vm6 = vcmask 1041409  }
  0x14   : > { %496 = vst.msk [vmem:[#allocation2 + $0x35] sm:$0x1] %vm477_vm2, %v1566_v5  ;;  %501 = vst.msk [vmem:[#allocation2 + $0x5d] sm:$0x1] %vm477_vm2, %v1566_v5  ;;  %1481 = vmatprep.subr.bf16.mxu1 %v1567_v9  ;;  %vm918_vm7 = vcmask 785408   ;;  %vm1273_vm8 = vcmask 191488  }
  0x16   : > { %v557_v58 = vld [vmem:[#allocation2 + $0x31] sm:$0xf]  ;;  %v553_v60 = vld [vmem:[#allocation2 + $0x1] sm:$0xf] }
  0x17   : > { %1483 = vmatpush3.bf16.msra.mxu1 %v1482_v12  ;;  %v570_v6 = vmul.f32 %v1749_v56, %v557_v58  ;;  %v566_v12 = vmul.f32 %v1749_v56, %v553_v60 }
  0x18   : > { %1484 = vmatprep.subr.bf16.mxu1 %v1567_v9  ;;  %v524_v57 = vld [vmem:[#allocation2] sm:$0xf] }
  0x19   : > { %v528_v55 = vld [vmem:[#allocation2 + $0x30] sm:$0xf]  ;;  %v537_v4 = vmul.f32 %v1744_v54, %v524_v57 }
  0x1a   : > { %v541_v0 = vmul.f32 %v1744_v54, %v528_v55  ;;  %v582_v16 = vld [vmem:[#allocation2 + $0x2] sm:$0xf] }
  0x1b   : > { %1486 = vmatpush3.bf16.msra.mxu1 %v1485_v15  ;;  %v586_v17 = vld [vmem:[#allocation2 + $0x32] sm:$0xf] }
  0x1c   : > { %1487 = vmatprep.subr.bf16.mxu1 %v1567_v9  ;;  %v578_v22 = vadd.f32 %v570_v6, %v541_v0 }
  0x1f   : > { %1489 = vmatpush3.bf16.msra.mxu1 %v1488_v18 }
  0x20   : > { %1490 = vmatprep.subr.bf16.mxu1 %v1567_v9 }
  0x23   : > { %1492 = vmatpush3.bf16.msra.mxu1 %v1491_v21 }
  0x24   : > { %1493 = vmatprep.subr.bf16.mxu1 %v1567_v9  ;;  %v1757_v9 = vld [vmem:[%s2025_s3 + $0x2] ss:$0 sm:$0xff] }
  0x27   : > { %1495 = vmatpush3.bf16.msra.mxu1 %v1494_v24  ;;  %v574_v24 = vadd.f32 %v566_v12, %v537_v4 }
  0xe5   : > { %v1424_v26 = vpop.f32.mrb[0].mxu1 }
  0xe6   : > { %v429_v27 = vadd.f32 %v1424_v26, %v1347_v25  ;;  %v420_v28 = vpop.f32.mrb[1].mxu1  ;;  %v599_v26 = vmul.f32 %v1757_v9, %v586_v17 }
  0xe7   : > { %v421_v29 = vadd.f32 %v1347_v25, %v420_v28  ;;  %v1425_v30 = vpop.f32.mrb[2].mxu1  ;;  %v702_v28 = vld [vmem:[#allocation2 + $0x28] sm:$0xf] }
  0xe8   : > { %v441_v31 = vmul.f32 0.044715, %v429_v27  ;;  %v432_v32 = vadd.f32 %v1425_v30, %v1347_v25  ;;  %v423_v33 = vpop.f32.mrb[3].mxu1  ;;  %v437_v62 = vmul.f32 0.5, %v429_v27  ;;  %v1776_v30 = vld [vmem:[%s2025_s3 + $0x4] ss:$0 sm:$0xff] }
  0xe9   : > { %v439_v34 = vmul.f32 0.044715, %v421_v29  ;;  %v424_v35 = vadd.f32 %v1347_v25, %v423_v33  ;;  %v435_v2 = vmul.f32 0.5, %v421_v29  ;;  %v595_v25 = vmul.f32 %v1757_v9, %v582_v16  ;;  %v735_v33 = vld [vmem:[#allocation2 + $0x59] sm:$0xf] }
  0xea   : > { %v445_v36 = vmul.f32 %v441_v31, %v429_v27  ;;  %v442_v37 = vmul.f32 0.044715, %v432_v32  ;;  %v438_v10 = vmul.f32 0.5, %v432_v32  ;;  %v706_v31 = vld [vmem:[#allocation2 + $0x58] sm:$0xf] }
  0xeb   : > { %v443_v38 = vmul.f32 %v439_v34, %v421_v29  ;;  %v440_v39 = vmul.f32 0.044715, %v424_v35  ;;  %v436_v14 = vmul.f32 0.5, %v424_v35  ;;  %v1783_v34 = vld [vmem:[%s2025_s3 + $0x5] ss:$0 sm:$0xff] }
  0xec   : > { %v449_v40 = vmul.f32 %v445_v36, %v429_v27  ;;  %v446_v41 = vmul.f32 %v442_v37, %v432_v32  ;;  %v764_v36 = vld [vmem:[#allocation2 + $0x5a] sm:$0xf]  ;;  %v1785_v37 = vadd.f32 %v595_v25, %v574_v24 }
  0xed   : > { %v447_v42 = vmul.f32 %v443_v38, %v421_v29  ;;  %v444_v43 = vmul.f32 %v440_v39, %v424_v35  ;;  %v607_v38 = vadd.f32 %v599_v26, %v578_v22  ;;  %v1790_v39 = vld [vmem:[%s2025_s3 + $0x6] ss:$0 sm:$0xff] }
  0xee   : > { %v453_v44 = vadd.f32 %v449_v40, %v429_v27  ;;  %v450_v45 = vmul.f32 %v446_v41, %v432_v32  ;;  %v1795_v40 = vld [vmem:[%s2025_s3 + $0x7] ss:$0 sm:$0xff]  ;;  %v1800_v41 = vld [vmem:[%s2025_s3 + $0x8] ss:$0 sm:$0xff] }
  0xef   : > { %v451_v46 = vadd.f32 %v447_v42, %v421_v29  ;;  %v448_v47 = vmul.f32 %v444_v43, %v424_v35  ;;  %v1771_v29 = vld [vmem:[%s2025_s3 + $0x3] ss:$0 sm:$0xff]  ;;  %v1820_v57 = vmul.f32 %v1800_v41, %v764_v36 }
  0xf0   : > { %v457_v48 = vmul.f32 0.7978846, %v453_v44  ;;  %v454_v49 = vadd.f32 %v450_v45, %v432_v32  ;;  %v731_v32 = vld [vmem:[#allocation2 + $0x29] sm:$0xf]  ;;  %v1803_v45 = vmul.f32 %v1790_v39, %v702_v28 }
  0xf1   : > { %v455_v50 = vmul.f32 0.7978846, %v451_v46  ;;  %v452_v51 = vadd.f32 %v448_v47, %v424_v35  ;;  %v760_v35 = vld [vmem:[#allocation2 + $0x2a] sm:$0xf]  ;;  %v1806_v46 = vmul.f32 %v1790_v39, %v706_v31  ;;  %v1809_v47 = vmul.f32 %v1795_v40, %v731_v32 }
  0xf2   : > { %1524 = vtanh.f32 %v457_v48  ;;  %v458_v52 = vmul.f32 0.7978846, %v454_v49  ;;  %v1812_v48 = vmul.f32 %v1795_v40, %v735_v33  ;;  %v1817_v55 = vmul.f32 %v1800_v41, %v760_v35 }
  0xf3   : > { %1526 = vtanh.f32 %v455_v50  ;;  %v456_v53 = vmul.f32 0.7978846, %v452_v51 }
  0xf4   : > { %1528 = vtanh.f32 %v458_v52 }
  0xf5   : > { %1530 = vtanh.f32 %v456_v53 }
  0xfc   : > { %v1525_v59 = vpop.eup %1524 }
  0xfd   : > { %v1527_v61 = vpop.eup %1526  ;;  %v465_v63 = vadd.f32 1.0, %v1525_v59 }
  0xfe   : > { %v1529_v1 = vpop.eup %1528  ;;  %v463_v3 = vadd.f32 1.0, %v1527_v61 }
  0xff   : > { %v1531_v7 = vpop.eup %1530  ;;  %v469_v8 = vmul.f32 %v465_v63, %v437_v62  ;;  %v466_v11 = vadd.f32 1.0, %v1529_v1 }
 0x100   : > { %v467_v13 = vmul.f32 %v463_v3, %v435_v2  ;;  %v464_v15 = vadd.f32 1.0, %v1531_v7 }
 0x101   : > { %v508_v18 = vcombine.high %v469_v8, %v469_v8  ;;  %520 = vst.msk [vmem:[#allocation2 + $0x39] sm:$0xf] %vm515_vm5, %v469_v8  ;;  %v470_v19 = vmul.f32 %v466_v11, %v438_v10 }
 0x102   : > { %v506_v20 = vcombine.high %v467_v13, %v467_v13  ;;  %516 = vst.msk [vmem:[#allocation2 + $0x9] sm:$0xf] %vm515_vm5, %v467_v13  ;;  %v468_v21 = vmul.f32 %v464_v15, %v436_v14 }
 0x103   : > { %521 = vst.msk [vmem:[#allocation2 + $0x41] sm:$0xf] %vm515_vm5, %v508_v18  ;;  %v509_v23 = vcombine.high %v470_v19, %v470_v19  ;;  %522 = vst.msk [vmem:[#allocation2 + $0x49] sm:$0xf] %vm515_vm5, %v470_v19 }
 0x104   : > { %517 = vst.msk [vmem:[#allocation2 + $0x11] sm:$0xf] %vm515_vm5, %v506_v20  ;;  %v507_v27 = vcombine.high %v468_v21, %v468_v21  ;;  %518 = vst.msk [vmem:[#allocation2 + $0x19] sm:$0xf] %vm515_vm5, %v468_v21 }
 0x105   : > { %523 = vst.msk [vmem:[#allocation2 + $0x51] sm:$0xf] %vm515_vm5, %v509_v23 }
 0x106   : > { %519 = vst.msk [vmem:[#allocation2 + $0x21] sm:$0xf] %vm515_vm5, %v507_v27 }
 0x108   : > { %v529_v42 = vld [vmem:[#allocation2 + $0x38] sm:$0xf] }
 0x109   : > { %v558_v43 = vld [vmem:[#allocation2 + $0x39] sm:$0xf]  ;;  %v542_v49 = vmul.f32 %v1744_v54, %v529_v42  ;;  %v525_v8 = vld [vmem:[#allocation2 + $0x8] sm:$0xf] }
 0x10a   : > { %v587_v44 = vld [vmem:[#allocation2 + $0x3a] sm:$0xf]  ;;  %v571_v50 = vmul.f32 %v1749_v56, %v558_v43  ;;  %v530_v58 = vld [vmem:[#allocation2 + $0x40] sm:$0xf]  ;;  %v538_v12 = vmul.f32 %v1744_v54, %v525_v8  ;;  %v554_v13 = vld [vmem:[#allocation2 + $0x9] sm:$0xf] }
 0x10b   : > { %v615_v51 = vld [vmem:[#allocation2 + $0x38] sm:$0xf]  ;;  %v559_v59 = vld [vmem:[#allocation2 + $0x41] sm:$0xf]  ;;  %v600_v61 = vmul.f32 %v1757_v9, %v587_v44  ;;  %v543_v1 = vmul.f32 %v1744_v54, %v530_v58  ;;  %v526_v11 = vld [vmem:[#allocation2 + $0x10] sm:$0xf]  ;;  %v567_v19 = vmul.f32 %v1749_v56, %v554_v13 }
 0x10c   : > { %v644_v52 = vld [vmem:[#allocation2 + $0x39] sm:$0xf]  ;;  %v588_v60 = vld [vmem:[#allocation2 + $0x42] sm:$0xf]  ;;  %v628_v62 = vmul.f32 %v1771_v29, %v615_v51  ;;  %v572_v2 = vmul.f32 %v1749_v56, %v559_v59  ;;  %v579_v3 = vadd.f32 %v571_v50, %v542_v49  ;;  %v555_v14 = vld [vmem:[#allocation2 + $0x11] sm:$0xf]  ;;  %v539_v18 = vmul.f32 %v1744_v54, %v526_v11 }
 0x10d   : > { %v673_v53 = vld [vmem:[#allocation2 + $0x3a] sm:$0xf]  ;;  %v1825_v63 = vmul.f32 %v1776_v30, %v644_v52  ;;  %v601_v4 = vmul.f32 %v1757_v9, %v588_v60  ;;  %v616_v6 = vld [vmem:[#allocation2 + $0x40] sm:$0xf]  ;;  %v568_v20 = vmul.f32 %v1749_v56, %v555_v14  ;;  %v583_v21 = vld [vmem:[#allocation2 + $0xa] sm:$0xf]  ;;  %v575_v32 = vadd.f32 %v567_v19, %v538_v12 }
 0x10e   : > { %v1828_v0 = vmul.f32 %v1783_v34, %v673_v53  ;;  %v645_v7 = vld [vmem:[#allocation2 + $0x41] sm:$0xf]  ;;  %v629_v10 = vmul.f32 %v1771_v29, %v616_v6  ;;  %v1835_v15 = vadd.f32 %v628_v62, %v607_v38  ;;  %v608_v17 = vadd.f32 %v600_v61, %v579_v3  ;;  %v584_v22 = vld [vmem:[#allocation2 + $0x12] sm:$0xf]  ;;  %v611_v23 = vld [vmem:[#allocation2 + $0x8] sm:$0xf] }
 0x10f   : > { %v1838_v16 = vmul.f32 %v1776_v30, %v645_v7  ;;  %v596_v24 = vmul.f32 %v1757_v9, %v583_v21  ;;  %v597_v25 = vmul.f32 %v1757_v9, %v584_v22  ;;  %v612_v26 = vld [vmem:[#allocation2 + $0x10] sm:$0xf]  ;;  %v624_v27 = vmul.f32 %v1771_v29, %v611_v23  ;;  %v640_v28 = vld [vmem:[#allocation2 + $0x9] sm:$0xf]  ;;  %v527_v62 = vld [vmem:[#allocation2 + $0x18] sm:$0xf] }
 0x110   : > { %v580_v31 = vadd.f32 %v572_v2, %v543_v1  ;;  %v625_v33 = vmul.f32 %v1771_v29, %v612_v26  ;;  %v653_v35 = vmul.f32 %v1776_v30, %v640_v28  ;;  %v531_v36 = vld [vmem:[#allocation2 + $0x48] sm:$0xf]  ;;  %v576_v42 = vadd.f32 %v568_v20, %v539_v18  ;;  %v641_v43 = vld [vmem:[#allocation2 + $0x11] sm:$0xf]  ;;  %v556_v1 = vld [vmem:[#allocation2 + $0x19] sm:$0xf] }
 0x111   : > { %v560_v38 = vld [vmem:[#allocation2 + $0x49] sm:$0xf]  ;;  %v544_v44 = vmul.f32 %v1744_v54, %v531_v36  ;;  %v632_v53 = vadd.f32 %v624_v27, %v1785_v37  ;;  %v604_v58 = vadd.f32 %v596_v24, %v575_v32  ;;  %v585_v2 = vld [vmem:[#allocation2 + $0x1a] sm:$0xf]  ;;  %v540_v6 = vmul.f32 %v1744_v54, %v527_v62  ;;  %v614_v37 = vld [vmem:[#allocation2 + $0x20] sm:$0xf] }
 0x112   : > { %v573_v49 = vmul.f32 %v1749_v56, %v560_v38  ;;  %v589_v50 = vld [vmem:[#allocation2 + $0x4a] sm:$0xf]  ;;  %v609_v52 = vadd.f32 %v601_v4, %v580_v31  ;;  %v605_v3 = vadd.f32 %v597_v25, %v576_v42  ;;  %v569_v7 = vmul.f32 %v1749_v56, %v556_v1  ;;  %v613_v11 = vld [vmem:[#allocation2 + $0x18] sm:$0xf]  ;;  %v618_v14 = vld [vmem:[#allocation2 + $0x50] sm:$0xf] }
 0x113   : > { %v617_v51 = vld [vmem:[#allocation2 + $0x48] sm:$0xf]  ;;  %v602_v59 = vmul.f32 %v1757_v9, %v589_v50  ;;  %v598_v8 = vmul.f32 %v1757_v9, %v585_v2  ;;  %v642_v4 = vld [vmem:[#allocation2 + $0x19] sm:$0xf]  ;;  %v626_v13 = vmul.f32 %v1771_v29, %v613_v11  ;;  %v627_v18 = vmul.f32 %v1771_v29, %v614_v37  ;;  %v643_v21 = vld [vmem:[#allocation2 + $0x21] sm:$0xf] }
 0x114   : > { %v630_v60 = vmul.f32 %v1771_v29, %v617_v51  ;;  %v646_v61 = vld [vmem:[#allocation2 + $0x49] sm:$0xf]  ;;  %v581_v12 = vadd.f32 %v573_v49, %v544_v44  ;;  %v633_v19 = vadd.f32 %v625_v33, %v604_v58  ;;  %v637_v20 = vadd.f32 %v629_v10, %v608_v17  ;;  %v647_v22 = vld [vmem:[#allocation2 + $0x51] sm:$0xf]  ;;  %v671_v36 = vld [vmem:[#allocation2 + $0x1a] sm:$0xf] }
 0x115   : > { %v577_v23 = vadd.f32 %v569_v7, %v540_v6  ;;  %v631_v54 = vmul.f32 %v1771_v29, %v618_v14  ;;  %v669_v25 = vld [vmem:[#allocation2 + $0xa] sm:$0xf]  ;;  %v634_v9 = vadd.f32 %v626_v13, %v605_v3  ;;  %v654_v26 = vmul.f32 %v1776_v30, %v641_v43  ;;  %v670_v17 = vld [vmem:[#allocation2 + $0x12] sm:$0xf]  ;;  %v672_v38 = vld [vmem:[#allocation2 + $0x22] sm:$0xf] }
 0x116   : > { %v610_v24 = vadd.f32 %v602_v59, %v581_v12  ;;  %v638_v56 = vadd.f32 %v630_v60, %v609_v52  ;;  %v655_v27 = vmul.f32 %v1776_v30, %v642_v4  ;;  %v656_v28 = vmul.f32 %v1776_v30, %v643_v21  ;;  %v674_v43 = vld [vmem:[#allocation2 + $0x42] sm:$0xf]  ;;  %v675_v50 = vld [vmem:[#allocation2 + $0x4a] sm:$0xf]  ;;  %v676_v51 = vld [vmem:[#allocation2 + $0x52] sm:$0xf] }
 0x117   : > { %v606_v31 = vadd.f32 %v598_v8, %v577_v23  ;;  %v659_v33 = vmul.f32 %v1776_v30, %v646_v61  ;;  %v660_v10 = vmul.f32 %v1776_v30, %v647_v22  ;;  %v661_v42 = vadd.f32 %v653_v35, %v632_v53  ;;  %v699_v53 = vld [vmem:[#allocation2 + $0x10] sm:$0xf]  ;;  %v700_v3 = vld [vmem:[#allocation2 + $0x18] sm:$0xf]  ;;  %v703_v6 = vld [vmem:[#allocation2 + $0x40] sm:$0xf] }
 0x118   : > { %v639_v32 = vadd.f32 %v631_v54, %v610_v24  ;;  %v662_v29 = vadd.f32 %v654_v26, %v633_v19  ;;  %v663_v44 = vadd.f32 %v655_v27, %v634_v9  ;;  %v665_v49 = vadd.f32 %v1825_v63, %v1835_v15  ;;  %v704_v12 = vld [vmem:[#allocation2 + $0x48] sm:$0xf]  ;;  %v705_v37 = vld [vmem:[#allocation2 + $0x50] sm:$0xf]  ;;  %v729_v24 = vld [vmem:[#allocation2 + $0x19] sm:$0xf] }
 0x119   : > { %v635_v52 = vadd.f32 %v627_v18, %v606_v31  ;;  %v666_v58 = vadd.f32 %v1838_v16, %v637_v20  ;;  %v667_v59 = vadd.f32 %v659_v33, %v638_v56  ;;  %v682_v61 = vmul.f32 %v1783_v34, %v669_v25  ;;  %v701_v16 = vld [vmem:[#allocation2 + $0x20] sm:$0xf]  ;;  %v728_v23 = vld [vmem:[#allocation2 + $0x11] sm:$0xf]  ;;  %v733_v27 = vld [vmem:[#allocation2 + $0x49] sm:$0xf] }
 0x11a   : > { %v668_v60 = vadd.f32 %v660_v10, %v639_v32  ;;  %v683_v30 = vmul.f32 %v1783_v34, %v670_v17  ;;  %v684_v62 = vmul.f32 %v1783_v34, %v671_v36  ;;  %v685_v35 = vmul.f32 %v1783_v34, %v672_v38  ;;  %v730_v54 = vld [vmem:[#allocation2 + $0x21] sm:$0xf] }
 0x11b   : > { %v664_v1 = vadd.f32 %v656_v28, %v635_v52  ;;  %v687_v63 = vmul.f32 %v1783_v34, %v674_v43  ;;  %v688_v15 = vmul.f32 %v1783_v34, %v675_v50  ;;  %v689_v2 = vmul.f32 %v1783_v34, %v676_v51  ;;  %v732_v26 = vld [vmem:[#allocation2 + $0x41] sm:$0xf]  ;;  %v734_v28 = vld [vmem:[#allocation2 + $0x51] sm:$0xf] }
 0x11c   : > { %v690_v7 = vadd.f32 %v682_v61, %v661_v42  ;;  %v691_v8 = vadd.f32 %v683_v30, %v662_v29  ;;  %v692_v11 = vadd.f32 %v684_v62, %v663_v44  ;;  %v694_v4 = vadd.f32 %v1828_v0, %v665_v49  ;;  %v757_v29 = vld [vmem:[#allocation2 + $0x12] sm:$0xf]  ;;  %v758_v49 = vld [vmem:[#allocation2 + $0x1a] sm:$0xf]  ;;  %v759_v43 = vld [vmem:[#allocation2 + $0x22] sm:$0xf] }
 0x11d   : > { %v693_v13 = vadd.f32 %v685_v35, %v664_v1  ;;  %v695_v14 = vadd.f32 %v687_v63, %v666_v58  ;;  %v696_v18 = vadd.f32 %v688_v15, %v667_v59  ;;  %v697_v19 = vadd.f32 %v689_v2, %v668_v60  ;;  %v761_v50 = vld [vmem:[#allocation2 + $0x42] sm:$0xf]  ;;  %v762_v60 = vld [vmem:[#allocation2 + $0x4a] sm:$0xf]  ;;  %v763_v61 = vld [vmem:[#allocation2 + $0x52] sm:$0xf] }
 0x11e   : > { %v712_v20 = vmul.f32 %v1790_v39, %v699_v53  ;;  %v713_v21 = vmul.f32 %v1790_v39, %v700_v3  ;;  %v714_v34 = vmul.f32 %v1790_v39, %v701_v16  ;;  %v716_v22 = vmul.f32 %v1790_v39, %v703_v6  ;;  %v1363_v16 = vld [vmem:[%s2026_s4] ss:$0 sm:$0xff] }
 0x11f   : > { %v717_v56 = vmul.f32 %v1790_v39, %v704_v12  ;;  %v718_v0 = vmul.f32 %v1790_v39, %v705_v37  ;;  %v723_v25 = vadd.f32 %v1803_v45, %v693_v13  ;;  %v727_v9 = vadd.f32 %v1806_v46, %v697_v19 }
 0x120   : > { %v720_v31 = vadd.f32 %v712_v20, %v690_v7  ;;  %v721_v32 = vadd.f32 %v713_v21, %v691_v8  ;;  %v722_v33 = vadd.f32 %v714_v34, %v692_v11  ;;  %v724_v10 = vadd.f32 %v716_v22, %v694_v4 }
 0x121   : > { %v725_v17 = vadd.f32 %v717_v56, %v695_v14  ;;  %v726_v36 = vadd.f32 %v718_v0, %v696_v18  ;;  %v741_v38 = vmul.f32 %v1795_v40, %v728_v23  ;;  %v742_v42 = vmul.f32 %v1795_v40, %v729_v24 }
 0x122   : > { %v743_v39 = vmul.f32 %v1795_v40, %v730_v54  ;;  %v745_v45 = vmul.f32 %v1795_v40, %v732_v26  ;;  %v746_v46 = vmul.f32 %v1795_v40, %v733_v27  ;;  %v747_v44 = vmul.f32 %v1795_v40, %v734_v28 }
 0x123   : > { %v749_v51 = vadd.f32 %v741_v38, %v720_v31  ;;  %v750_v52 = vadd.f32 %v742_v42, %v721_v32  ;;  %v752_v58 = vadd.f32 %v1809_v47, %v723_v25  ;;  %v756_v59 = vadd.f32 %v1812_v48, %v727_v9 }
 0x124   : > { %v751_v30 = vadd.f32 %v743_v39, %v722_v33  ;;  %v753_v62 = vadd.f32 %v745_v45, %v724_v10  ;;  %v754_v35 = vadd.f32 %v746_v46, %v725_v17  ;;  %v755_v53 = vadd.f32 %v747_v44, %v726_v36 }
 0x125   : > { %v770_v1 = vmul.f32 %v1800_v41, %v757_v29  ;;  %v771_v63 = vmul.f32 %v1800_v41, %v758_v49  ;;  %v772_v40 = vmul.f32 %v1800_v41, %v759_v43  ;;  %v774_v15 = vmul.f32 %v1800_v41, %v761_v50 }
 0x126   : > { %v775_v2 = vmul.f32 %v1800_v41, %v762_v60  ;;  %v776_v47 = vmul.f32 %v1800_v41, %v763_v61  ;;  %v781_v48 = vadd.f32 %v1817_v55, %v752_v58  ;;  %v785_v3 = vadd.f32 %v1820_v57, %v756_v59 }
 0x127   : > { %v778_v6 = vadd.f32 %v770_v1, %v749_v51  ;;  %v779_v7 = vadd.f32 %v771_v63, %v750_v52  ;;  %v780_v8 = vadd.f32 %v772_v40, %v751_v30  ;;  %v782_v11 = vadd.f32 %v774_v15, %v753_v62 }
 0x128   : > { %v783_v4 = vadd.f32 %v775_v2, %v754_v35  ;;  %v784_v12 = vadd.f32 %v776_v47, %v755_v53  ;;  %v1902_v37 = vadd.f32 %v1363_v16, %v781_v48  ;;  %v1910_v19 = vadd.f32 %v1363_v16, %v785_v3 }
 0x129   : > { %v793_v13 = vadd.f32 %v1363_v16, %v778_v6  ;;  %v794_v14 = vadd.f32 %v1363_v16, %v779_v7  ;;  %v795_v18 = vadd.f32 %v1363_v16, %v780_v8  ;;  %v1904_v41 = vadd.f32 %v1363_v16, %v782_v11 }
 0x12a   : > { %v1906_v55 = vadd.f32 %v1363_v16, %v783_v4  ;;  %v1908_v57 = vadd.f32 %v1363_v16, %v784_v12  ;;  %v812_v22 = vmul.f32 0.044715, %v1902_v37  ;;  %v816_v56 = vmul.f32 0.044715, %v1910_v19 }
 0x12b   : > { %v809_v20 = vmul.f32 0.044715, %v793_v13  ;;  %v810_v21 = vmul.f32 0.044715, %v794_v14  ;;  %v811_v34 = vmul.f32 0.044715, %v795_v18 }
 0x12c   : > { %v813_v23 = vmul.f32 0.044715, %v1904_v41  ;;  %v814_v24 = vmul.f32 0.044715, %v1906_v55  ;;  %v815_v54 = vmul.f32 0.044715, %v1908_v57  ;;  %v820_v26 = vmul.f32 %v812_v22, %v1902_v37 }
 0x12d   : > { %v817_v0 = vmul.f32 %v809_v20, %v793_v13  ;;  %v818_v25 = vmul.f32 %v810_v21, %v794_v14  ;;  %v819_v9 = vmul.f32 %v811_v34, %v795_v18  ;;  %v824_v32 = vmul.f32 %v816_v56, %v1910_v19 }
 0x12e   : > { %v821_v27 = vmul.f32 %v813_v23, %v1904_v41  ;;  %v822_v28 = vmul.f32 %v814_v24, %v1906_v55  ;;  %v823_v31 = vmul.f32 %v815_v54, %v1908_v57  ;;  %v828_v36 = vmul.f32 %v820_v26, %v1902_v37 }
 0x12f   : > { %v825_v33 = vmul.f32 %v817_v0, %v793_v13  ;;  %v826_v10 = vmul.f32 %v818_v25, %v794_v14  ;;  %v827_v17 = vmul.f32 %v819_v9, %v795_v18  ;;  %v832_v39 = vmul.f32 %v824_v32, %v1910_v19 }
 0x130   : > { %v829_v38 = vmul.f32 %v821_v27, %v1904_v41  ;;  %v830_v42 = vmul.f32 %v822_v28, %v1906_v55  ;;  %v831_v29 = vmul.f32 %v823_v31, %v1908_v57  ;;  %v836_v49 = vadd.f32 %v828_v36, %v1902_v37 }
 0x131   : > { %v833_v45 = vadd.f32 %v825_v33, %v793_v13  ;;  %v834_v46 = vadd.f32 %v826_v10, %v794_v14  ;;  %v835_v44 = vadd.f32 %v827_v17, %v795_v18  ;;  %v840_v58 = vadd.f32 %v832_v39, %v1910_v19 }
 0x132   : > { %v837_v43 = vadd.f32 %v829_v38, %v1904_v41  ;;  %v838_v50 = vadd.f32 %v830_v42, %v1906_v55  ;;  %v839_v51 = vadd.f32 %v831_v29, %v1908_v57  ;;  %v844_v61 = vmul.f32 0.7978846, %v836_v49 }
 0x133   : > { %v841_v52 = vmul.f32 0.7978846, %v833_v45  ;;  %v842_v59 = vmul.f32 0.7978846, %v834_v46  ;;  %v843_v60 = vmul.f32 0.7978846, %v835_v44 }
 0x134   : > { %v845_v30 = vmul.f32 0.7978846, %v837_v43  ;;  %v846_v62 = vmul.f32 0.7978846, %v838_v50  ;;  %v847_v35 = vmul.f32 0.7978846, %v839_v51 }
 0x135   : > { %1532 = vtanh.f32 %v841_v52  ;;  %v848_v53 = vmul.f32 0.7978846, %v840_v58  ;;  %v801_v40 = vmul.f32 0.5, %v793_v13  ;;  %v802_v47 = vmul.f32 0.5, %v794_v14 }
 0x136   : > { %1534 = vtanh.f32 %v842_v59  ;;  %v803_v16 = vmul.f32 0.5, %v795_v18  ;;  %v804_v11 = vmul.f32 0.5, %v1902_v37  ;;  %v805_v4 = vmul.f32 0.5, %v1904_v41 }
 0x137   : > { %1536 = vtanh.f32 %v843_v60  ;;  %v806_v13 = vmul.f32 0.5, %v1906_v55  ;;  %v807_v34 = vmul.f32 0.5, %v1908_v57  ;;  %v808_v25 = vmul.f32 0.5, %v1910_v19 }
 0x138   : > { %1538 = vtanh.f32 %v844_v61 }
 0x139   : > { %1540 = vtanh.f32 %v845_v30 }
 0x13a   : > { %1542 = vtanh.f32 %v846_v62 }
 0x13b   : > { %1544 = vtanh.f32 %v847_v35  ;;  %v998_v35 = vld [vmem:[%s2028_s6] sm:$0xff] }
 0x13c   : > { %1546 = vtanh.f32 %v848_v53  ;;  %v999_v53 = vld [vmem:[%s2028_s6 + $0x8] sm:$0xff] }
 0x13f   : > { %v1533_v1 = vpop.eup %1532 }
 0x140   : > { %v1535_v63 = vpop.eup %1534  ;;  %v857_v15 = vadd.f32 1.0, %v1533_v1  ;;  %v1497_v1 = vpack.c.bf16 %v999_v53, %v998_v35 }
 0x141   : > { %v1537_v2 = vpop.eup %1536  ;;  %v858_v48 = vadd.f32 1.0, %v1535_v63  ;;  %v1000_v63 = vld [vmem:[%s2028_s6 + $0x10] sm:$0xff] }
 0x142   : > { %v1539_v3 = vpop.eup %1538  ;;  %v859_v6 = vadd.f32 1.0, %v1537_v2  ;;  %v1932_v7 = vmul.f32 %v857_v15, %v801_v40  ;;  %1498 = vmatpush3.bf16.msra.mxu0 %v1497_v1 }
 0x143   : > { %v1541_v8 = vpop.eup %1540  ;;  %v860_v12 = vadd.f32 1.0, %v1539_v3  ;;  %v1936_v20 = vmul.f32 %v858_v48, %v802_v47  ;;  %1457 = vmatprep.subr.mxu0 %v1566_v5  ;;  %v1516_v5 = vld [vmem:[%s2029_s7] sm:$0xff]  }
 0x144   : > { %v1543_v21 = vpop.eup %1542  ;;  %v861_v14 = vadd.f32 1.0, %v1541_v8  ;;  %v1940_v22 = vmul.f32 %v859_v6, %v803_v16  ;;  %v873_v37 = vsel %vm515_vm5, %v1932_v7, 0.0  ;;  %v1517_v6 = vld [vmem:[%s2029_s7 + $0x8] sm:$0xff]   ;;  %v1518_v8 = vld [vmem:[%s2029_s7 + $0x10] sm:$0xff]  }
 0x145   : > { %v1545_v18 = vpop.eup %1544  ;;  %v862_v23 = vadd.f32 1.0, %v1543_v21  ;;  %v1942_v24 = vmul.f32 %v860_v12, %v804_v11  ;;  %v874_v41 = vsel %vm515_vm5, %v1936_v20, 0.0  ;;  %v1519_v11 = vld [vmem:[%s2029_s7 + $0x18] sm:$0xff]   ;;  %v1521_v12 = vld [vmem:[%s2029_s7 + $0x28] sm:$0xff]  }
 0x146   : > { %v1547_v54 = vpop.eup %1546  ;;  %v863_v56 = vadd.f32 1.0, %v1545_v18  ;;  %v1948_v0 = vmul.f32 %v861_v14, %v805_v4  ;;  %v875_v55 = vadd.f32 %v874_v41, %v873_v37  ;;  %v876_v57 = vsel %vm515_vm5, %v1940_v22, 0.0  ;;  %1458 = vmatpush3.msra.mxu0 %v1000_v63  ;;  %v1520_v4 = vld [vmem:[%s2029_s7 + $0x20] sm:$0xff]  }
 0x147   : > { %v864_v9 = vadd.f32 1.0, %v1547_v54  ;;  %v1953_v26 = vmul.f32 %v862_v23, %v806_v13  ;;  %v878_v32 = vsel %vm515_vm5, %v1942_v24, 0.0  ;;  %1462 = vmatprep.subr.bf16.mxu0 %v1516_v5  ;;  %v1569_v23 = vmov 1966171168  }
 0x148   : > { %v1955_v27 = vmul.f32 %v863_v56, %v807_v34  ;;  %v877_v28 = vadd.f32 %v876_v57, %v875_v55  ;;  %v886_v33 = vsel %vm515_vm5, %v1948_v0, 0.0  ;;  %v1082_v37 = vunpack.c.l.s4 %v1569_v23 }
 0x149   : > { %v1957_v31 = vmul.f32 %v864_v9, %v808_v25  ;;  %v887_v10 = vsel %vm515_vm5, %v1953_v26, 0.0  ;;  %v1084_v41 = vlaneseq }
 0x14a   : > { %v879_v17 = vadd.f32 %v878_v32, %v877_v28  ;;  %v888_v36 = vadd.f32 %v887_v10, %v886_v33  ;;  %v889_v19 = vsel %vm515_vm5, %v1955_v27, 0.0  ;;  %v1083_v54 = vunpack.c.0.s8 %v1082_v37 }
 0x14b   : > { %v891_v29 = vsel %vm515_vm5, %v1957_v31, 0.0  ;;  %v1085_v56 = vshrl.u32 %v1084_v41, 7 }
 0x14c   : > { %v880_v38 = vrot.slane %v879_v17, 4  ;;  %v890_v42 = vadd.f32 %v889_v19, %v888_v36 }
 0x14d   : > { %v1086_v55 = vsub.s32 %v1083_v54, %v1085_v56  ;;  %v1105_v9 = vsub.s32 0, %v1085_v56 }
 0x14e   : > { %v881_v39 = vadd.f32 %v880_v38, %v879_v17  ;;  %v892_v45 = vadd.f32 %v891_v29, %v890_v42 }
 0x150   : > { %v882_v46 = vrot.slane %v881_v39, 2  ;;  %v893_v44 = vrot.slane %v892_v45, 4 }
 0x152   : > { %v883_v49 = vadd.f32 %v882_v46, %v881_v39  ;;  %v894_v43 = vadd.f32 %v893_v44, %v892_v45 }
 0x154   : > { %v884_v50 = vrot.slane %v883_v49, 1  ;;  %v895_v51 = vrot.slane %v894_v43, 2 }
 0x156   : > { %v885_v52 = vadd.f32 %v884_v50, %v883_v49  ;;  %v896_v58 = vadd.f32 %v895_v51, %v894_v43 }
 0x158   : > { %v897_v59 = vrot.slane %v896_v58, 1  ;;  %v900_v61 = vmul.f32 0.0625, %v885_v52 }
 0x15a   : > { %v898_v60 = vadd.f32 %v897_v59, %v896_v58 }
 0x15c   : > { %v901_v30 = vmul.f32 0.0625, %v898_v60 }
 0x15e   : > { %v917_v62 = vsel %vm916_vm6, %v901_v30, %v900_v61 }
 0x15f   : > { %1451 = vmatmul.mubr.msk.f32.vlgmr.msra.gmra.mrb[4].mxu1 %vm918_vm7, %v917_v62 }
 0x232   : > { %v987_v40 = vpop.f32.mrb[4].mxu1 }
 0x233   : > { %v1365_v15 = vmul.f32 -1.442695, %v987_v40  ;;  %v1452_v2 = vpop.f32.mrb[5].mxu1 }
 0x235   : > { %1548 = vpow2.f32 %v1365_v15 }
 0x23f   : > { %v1549_v47 = vpop.eup %1548 }
 0x240   : > { %v994_v48 = vadd.f32 1.0, %v1549_v47 }
 0x242   : > { %1550 = vrcp.f32 %v994_v48 }
 0x24c   : > { %v1551_v3 = vpop.eup %1550 }
 0x24d   : > { %v997_v16 = vmul.f32 %v1551_v3, %v987_v40 }
 0x24f   : > { %1460 = vmatmul.mubr.msk.f32.vlgmr.msra.gmra.mrb[0].mxu0 %vm375_vm1, %v997_v16 }
 0x250   : > { %1463 = vmatpush3.bf16.msra.mxu0 %v1516_v5 }
 0x251   : > { %1464 = vmatprep.subr.bf16.mxu0 %v1517_v6 }
 0x254   : > { %1465 = vmatpush3.bf16.msra.mxu0 %v1517_v6 }
 0x255   : > { %1466 = vmatprep.subr.bf16.mxu0 %v1518_v8 }
 0x258   : > { %1467 = vmatpush3.bf16.msra.mxu0 %v1518_v8 }
 0x259   : > { %1468 = vmatprep.subr.bf16.mxu0 %v1519_v11 }
 0x25c   : > { %1469 = vmatpush3.bf16.msra.mxu0 %v1519_v11 }
 0x25d   : > { %1470 = vmatprep.subr.bf16.mxu0 %v1520_v4 }
 0x260   : > { %1471 = vmatpush3.bf16.msra.mxu0 %v1520_v4 }
 0x261   : > { %1472 = vmatprep.subr.bf16.mxu0 %v1521_v12 }
 0x264   : > { %1473 = vmatpush3.bf16.msra.mxu0 %v1521_v12 }
 0x322   : > { %v1070_v21 = vpop.f32.mrb[0].mxu0 }
 0x323   : > { %v1367_v13 = vmul.f32 -1.442695, %v1070_v21  ;;  %v1461_v34 = vpop.f32.mrb[1].mxu0 }
 0x325   : > { %1552 = vpow2.f32 %v1367_v13 }
 0x32f   : > { %v1553_v14 = vpop.eup %1552 }
 0x330   : > { %v1077_v18 = vadd.f32 1.0, %v1553_v14 }
 0x332   : > { %1554 = vrcp.f32 %v1077_v18 }
 0x33c   : > { %v1555_v57 = vpop.eup %1554 }
 0x33d   : > { %v1087_v25 = vrot.slane %v1555_v57, %v1086_v55 }
 0x33f   : > { %v1088_v28 = vcombine.high %v1087_v25, %v1087_v25  ;;  %v1095_v32 = vrot.slane %v1087_v25, %v1086_v55 }
 0x341   : > { %v1102_v33 = vrot.slane %v1088_v28, %v1086_v55  ;;  %v1106_v10 = vrot.slane %v1095_v32, %v1105_v9 }
 0x343   : > { %v1110_v17 = vrot.slane %v1102_v33, %v1105_v9  ;;  %v1113_v36 = vmul.f32 %v1106_v10, %v1932_v7  ;;  %v1114_v19 = vmul.f32 %v1106_v10, %v1936_v20  ;;  %v1115_v38 = vmul.f32 %v1106_v10, %v1940_v22  ;;  %v1368_v22 = vld [vmem:[%s2030_s8] ss:$0 sm:$0xff] }
 0x344   : > { %v1116_v42 = vmul.f32 %v1106_v10, %v1942_v24  ;;  %v1556_v24 = vld [vmem:[%s1642_s19 + $0x8] sm:$0xff]  }
 0x345   : > { %v1129_v29 = vcombine.low %v1113_v36, %v1114_v19  ;;  %v1117_v39 = vmul.f32 %v1110_v17, %v1948_v0  ;;  %v1118_v45 = vmul.f32 %v1110_v17, %v1953_v26  ;;  %v1119_v46 = vmul.f32 %v1110_v17, %v1955_v27  ;;  %v1557_v26 = vld [vmem:[%s1642_s19] sm:$0xff]  }
 0x346   : > { %v1130_v44 = vcombine.low %v1115_v38, %v1116_v42  ;;  %v1120_v49 = vmul.f32 %v1110_v17, %v1957_v31  ;;  %v1251_v0 = vunpack.c.l.bf16 %v1556_v24  ;;  %v1249_v27 = vunpack.c.l.bf16 %v1557_v26 }
 0x347   : > { %v1131_v43 = vcombine.low %v1117_v39, %v1118_v45  ;;  %v1252_v58 = vunpack.c.h.bf16 %v1556_v24  ;;  %v1250_v59 = vunpack.c.h.bf16 %v1557_v26 }
 0x348   : > { %v1137_v7 = vpack.c.bf16 %v1130_v44, %v1129_v29  ;;  %v1132_v50 = vcombine.low %v1119_v46, %v1120_v49 }
 0x34a   : > { %1474 = vmatprep.mubr.msk.bf16.mxu0 %vm918_vm7, %v1137_v7  ;;  %v1138_v20 = vpack.c.bf16 %v1132_v50, %v1131_v43 }
 0x34c   : > { %1475 = vmatmul.mubr.msk.bf16.vlgmr.msra.gmra.mrb[4].mxu0 %vm918_vm7, %v1138_v20 }
 0x41f   : > { %v1476_v51 = vpop.f32.mrb[4].mxu0 }
 0x420   : > { %v1243_v52 = vadd.f32 %v1476_v51, %v1368_v22  ;;  %v1234_v31 = vpop.f32.mrb[5].mxu0 }
 0x421   : > { %v1235_v60 = vadd.f32 %v1368_v22, %v1234_v31  ;;  %v1477_v61 = vpop.f32.mrb[6].mxu0 }
 0x422   : > { %v1255_v30 = vadd.f32 %v1251_v0, %v1243_v52  ;;  %v1246_v62 = vadd.f32 %v1477_v61, %v1368_v22  ;;  %v1237_v35 = vpop.f32.mrb[7].mxu0 }
 0x423   : > { %v1253_v53 = vadd.f32 %v1249_v27, %v1235_v60  ;;  %v1238_v1 = vadd.f32 %v1368_v22, %v1237_v35 }
 0x424   : > { %v1256_v63 = vadd.f32 %v1252_v58, %v1246_v62  ;;  %v1387_v2 = vpack.c.bf16 %v1255_v30, %v1255_v30 }
 0x425   : > { %v1385_v40 = vpack.c.bf16 %v1253_v53, %v1253_v53  ;;  %v1254_v15 = vadd.f32 %v1250_v59, %v1238_v1 }
 0x426   : > { %1276 = vst.msk [vmem:[%s339_s20 + $0x8] sm:$0xf] %vm1273_vm8, %v1387_v2  ;;  %v1388_v48 = vpack.c.bf16 %v1256_v63, %v1256_v63 }
 0x427   : > { %1274 = vst.msk [vmem:[%s339_s20] sm:$0xf] %vm1273_vm8, %v1385_v40  ;;  %v1386_v47 = vpack.c.bf16 %v1254_v15, %v1254_v15 }
 0x428   : > { %1277 = vst.msk [vmem:[%s339_s20 + $0xc] sm:$0xf] %vm1273_vm8, %v1388_v48 }
 0x429   : > { %1275 = vst.msk [vmem:[%s339_s20 + $0x4] sm:$0xf] %vm1273_vm8, %v1386_v47 }
 0x42a PF: > { %s19_s30 = sadd.s32 1, %s1564_s30  }
 0x42b   : > { %p16_p4 = scmp.ge.s32.totalorder %s19_s30, 4  }
 0x42d   :  { %18 = sbr.rel (!%p16_p4) target bundleno = 1 (0x1), region = 89 }

// kernel: tokenizer_forward.5
= control target key start
LH: loop header
LB: loop body
LE: loop exit
PB: predicated region body
PF: predicated region fallthrough
CT: control target
= control target key end

     0   :  { %s2004_s30 = smov 0   ;;  %s2531_s0 = inlined_call_operand.vmem [shape: bf16[4,8,8,16], index: 0, kind: input, shape index: {}]   ;;  %s2532_s1 = inlined_call_operand.vmem [shape: bf16[16,96], index: 1, kind: input, shape index: {}]   ;;  %s2533_s2 = inlined_call_operand.vmem [shape: f32[1,96], index: 2, kind: input, shape index: {}]   ;;  %s2534_s3 = inlined_call_operand.vmem [shape: f32[9,96], index: 3, kind: input, shape index: {}]   ;;  %s2535_s4 = inlined_call_operand.vmem [shape: f32[1,96], index: 4, kind: input, shape index: {}]   ;;  %s2536_s5 = inlined_call_operand.vmem [shape: f32[96,24], index: 5, kind: input, shape index: {}]   ;;  %s2537_s6 = inlined_call_operand.vmem [shape: f32[24,96], index: 6, kind: input, shape index: {}]   ;;  %s2538_s7 = inlined_call_operand.vmem [shape: bf16[96,24], index: 7, kind: input, shape index: {}]   ;;  %s2539_s8 = inlined_call_operand.vmem [shape: f32[1,24], index: 8, kind: input, shape index: {}]   ;;  %s2540_s9 = inlined_call_operand.vmem [shape: bf16[4,16,24], index: 9, kind: output, shape index: {}]  }
   0x1 LB: > { %s1668_s10 = sadd.s32 4294967295, %s1948_s30   ;;  %p1672_p0 = scmp.ge.s32.totalorder %s1948_s30, 1  ;;  %s1948_s30 = sphi %s2004_s30, %s19_s30  }
   0x2   : > { %p289_p1 = scmp.lt.s32.totalorder %s1948_s30, 3 }
   0x4   : > { %p290_p2 = pnand %p1672_p0, %p289_p1 }
   0x5   : > { %v1871_v0 = vld [vmem:[%s2532_s1] sm:$0xff] (!%p290_p2)   ;;  %s1673_s13 = sshll.u32 (!%p290_p2), %s1668_s10, 1  ;;  %vm413_vm0 = vcmask (!%p290_p2), 130048   ;;  %vm679_vm1 = vcmask (!%p290_p2), 785408   ;;  %vm690_vm2 = vcmask (!%p290_p2), 778240   ;;  %v1950_v9 = vmov (!%p290_p2), 0.0  }
   0x6   : > { %293 = sbr.rel (%p290_p2) target bundleno = 1088 (0x440), region = 56  ;;  %p328_p3 = scmp.lt.s32.totalorder (!%p290_p2), %s1673_s13, 3  ;;  %1766 = vmatprep.subr.bf16.mxu0 (!%p290_p2), %v1871_v0  ;;  %1857 = vmatprep.subr.bf16.mxu1 (!%p290_p2), %v1871_v0  ;;  %680 = vst.msk [vmem:[#allocation2] sm:$0xff] (!%p290_p2), %vm679_vm1, %v1950_v9  ;;  %683 = vst.msk [vmem:[#allocation2 + $0xa0] sm:$0xff] (!%p290_p2), %vm679_vm1, %v1950_v9  ;;  %vm681_vm3 = vcmask (!%p290_p2), 779264   ;;  %v1196_v10 = vld [vmem:[%s2536_s5] sm:$0xff] (!%p290_p2) }
   0x7   : > { %1767 = vmatpush3.bf16.msra.mxu0 (!%p290_p2), %v1871_v0  ;;  %1858 = vmatpush3.bf16.msra.mxu1 (!%p290_p2), %v1871_v0  ;;  %694 = vst.msk [vmem:[#allocation2 + $0x30] sm:$0x1] (!%p290_p2), %vm690_vm2, %v1950_v9  ;;  %692 = vst.msk [vmem:[#allocation2 + $0x10] sm:$0x1] (!%p290_p2), %vm690_vm2, %v1950_v9  ;;  %v1197_v11 = vld [vmem:[%s2536_s5 + $0x8] sm:$0xff] (!%p290_p2)  ;;  %v1198_v12 = vld [vmem:[%s2536_s5 + $0x10] sm:$0xff] (!%p290_p2) }
   0x8   : > { %693 = vst.msk [vmem:[#allocation2 + $0x20] sm:$0x1] (!%p290_p2), %vm690_vm2, %v1950_v9  ;;  %695 = vst.msk [vmem:[#allocation2 + $0x40] sm:$0x1] (!%p290_p2), %vm690_vm2, %v1950_v9  ;;  %v1951_v13 = vmov (!%p290_p2), 0.0|0.0   ;;  %v1837_v14 = vpack.c.bf16 (!%p290_p2), %v1197_v11, %v1196_v10  ;;  %v1199_v15 = vld [vmem:[%s2536_s5 + $0x18] sm:$0xff] (!%p290_p2) }
   0x9   : > { %696 = vst.msk [vmem:[#allocation2 + $0x50] sm:$0x1] (!%p290_p2), %vm690_vm2, %v1950_v9  ;;  %697 = vst.msk [vmem:[#allocation2 + $0x60] sm:$0x1] (!%p290_p2), %vm690_vm2, %v1950_v9  ;;  %1836 = vmatprep.subr.bf16.mxu1 (!%p290_p2), %v1951_v13  ;;  %vm1952_vm4 = vmmov (!%p290_p2), 0   ;;  %v1840_v16 = vpack.c.bf16 (!%p290_p2), %v1199_v15, %v1198_v12  ;;  %v1200_v17 = vld [vmem:[%s2536_s5 + $0x20] sm:$0xff] (!%p290_p2) }
   0xa   : > { %698 = vst.msk [vmem:[#allocation2 + $0x70] sm:$0x1] (!%p290_p2), %vm690_vm2, %v1950_v9  ;;  %699 = vst.msk [vmem:[#allocation2 + $0x80] sm:$0x1] (!%p290_p2), %vm690_vm2, %v1950_v9  ;;  %v1201_v18 = vld [vmem:[%s2536_s5 + $0x28] sm:$0xff] (!%p290_p2)  ;;  %v1202_v20 = vld [vmem:[%s2536_s5 + $0x30] sm:$0xff] (!%p290_p2) }
   0xb   : > { %702 = vst.msk [vmem:[#allocation2 + $0xb0] sm:$0x1] (!%p290_p2), %vm690_vm2, %v1950_v9  ;;  %703 = vst.msk [vmem:[#allocation2 + $0xc0] sm:$0x1] (!%p290_p2), %vm690_vm2, %v1950_v9  ;;  %v1843_v19 = vpack.c.bf16 (!%p290_p2), %v1201_v18, %v1200_v17  ;;  %v1203_v21 = vld [vmem:[%s2536_s5 + $0x38] sm:$0xff] (!%p290_p2)  ;;  %v1204_v23 = vld [vmem:[%s2536_s5 + $0x40] sm:$0xff] (!%p290_p2) }
   0xc   : > { %704 = vst.msk [vmem:[#allocation2 + $0xd0] sm:$0x1] (!%p290_p2), %vm690_vm2, %v1950_v9  ;;  %705 = vst.msk [vmem:[#allocation2 + $0xe0] sm:$0x1] (!%p290_p2), %vm690_vm2, %v1950_v9  ;;  %v1846_v22 = vpack.c.bf16 (!%p290_p2), %v1203_v21, %v1202_v20  ;;  %v1205_v24 = vld [vmem:[%s2536_s5 + $0x48] sm:$0xff] (!%p290_p2)  ;;  %v1206_v26 = vld [vmem:[%s2536_s5 + $0x50] sm:$0xff] (!%p290_p2) }
   0xd   : > { %s2542_s13 = smov (!%p328_p3, %s1673_s13), 3  ;;  %706 = vst.msk [vmem:[#allocation2 + $0xf0] sm:$0x1] %vm690_vm2, %v1950_v9  ;;  %707 = vst.msk [vmem:[#allocation2 + $0x100] sm:$0x1] %vm690_vm2, %v1950_v9  ;;  %v1849_v25 = vpack.c.bf16 %v1205_v24, %v1204_v23  ;;  %v1207_v27 = vld [vmem:[%s2536_s5 + $0x58] sm:$0xff] }
   0xe   : > { %s1726_s14 = sshll.u32 %s2542_s13, 5  ;;  %708 = vst.msk [vmem:[#allocation2 + $0x110] sm:$0x1] %vm690_vm2, %v1950_v9  ;;  %709 = vst.msk [vmem:[#allocation2 + $0x120] sm:$0x1] %vm690_vm2, %v1950_v9  ;;  %v1852_v28 = vpack.c.bf16 %v1207_v27, %v1206_v26  ;;  %vm1166_vm5 = vcmask 781312  }
   0xf   : > { %s332_s17 = scalar_lea.vmem %s2531_s0, %s1726_s14  ;;  %691 = vst.msk [vmem:[#allocation2] sm:$0x1] %vm690_vm2, %v1950_v9  ;;  %701 = vst.msk [vmem:[#allocation2 + $0xa0] sm:$0x1] %vm690_vm2, %v1950_v9  ;;  %v2112_v29 = vld [vmem:[%s2533_s2] ss:$0 sm:$0xff] }
  0x10   : > { %v1872_v1 = vld [vmem:[%s332_s17] sm:$0xff]   ;;  %v1873_v2 = vld [vmem:[%s332_s17 + $0x30] sm:$0xff]   ;;  %v1874_v3 = vld [vmem:[%s332_s17 + $0x8] sm:$0xff]   ;;  %682 = vst.msk [vmem:[#allocation2 + $0x8] sm:$0x3] %vm681_vm3, %v1950_v9  ;;  %vm1210_vm6 = vcmask 1041409  }
  0x11   : > { %1768 = vmatprep.mubr.msk.bf16.mxu0 %vm413_vm0, %v1872_v1  ;;  %1780 = vmatprep.mubr.msk.bf16.mxu1 %vm413_vm0, %v1873_v2  ;;  %v1875_v4 = vld [vmem:[%s332_s17 + $0x38] sm:$0xff]   ;;  %v1876_v5 = vld [vmem:[%s332_s17 + $0x10] sm:$0xff]   ;;  %v1878_v7 = vld [vmem:[%s332_s17 + $0x20] sm:$0xff]   ;;  %684 = vst.msk [vmem:[#allocation2 + $0xa8] sm:$0x3] %vm681_vm3, %v1950_v9  ;;  %vm1294_vm7 = vcmask 195584  }
  0x12   : > { %1769 = vmatmul.mubr.msk.bf16.vlgmr.msra.gmra.mrb[0].mxu0 %vm413_vm0, %v1874_v3  ;;  %1781 = vmatmul.mubr.msk.bf16.vlgmr.msra.gmra.mrb[0].mxu1 %vm413_vm0, %v1875_v4  ;;  %v1877_v6 = vld [vmem:[%s332_s17 + $0x18] sm:$0xff]   ;;  %v1879_v8 = vld [vmem:[%s332_s17 + $0x28] sm:$0xff]   ;;  %v2151_v58 = vld [vmem:[%s2534_s3] ss:$0 sm:$0xff]  ;;  %s1727_s27 = sshll.u32 %s2542_s13, 3  ;;  %vm1559_vm8 = vcmask 191488  }
  0x13   : > { %1772 = vmatprep.mubr.msk.bf16.mxu0 %vm413_vm0, %v1876_v5  ;;  %1808 = vmatprep.mubr.msk.f32.mxu1 %vm1952_vm4, %v1950_v9  ;;  %s339_s10 = scalar_lea.vmem %s2540_s9, %s1727_s27 }
  0x14   : > { %1838 = vmatpush3.bf16.msra.mxu1 %v1837_v14 }
  0x15   : > { %1839 = vmatprep.subr.bf16.mxu1 %v1951_v13 }
  0x16   : > { %v748_v60 = vld [vmem:[#allocation2] ss:$2 sm:$0xf] }
  0x17   : > { %v2166_v12 = vmul.f32 %v2151_v58, %v748_v60 }
  0x18   : > { %1841 = vmatpush3.bf16.msra.mxu1 %v1840_v16 }
  0x19   : > { %1842 = vmatprep.subr.bf16.mxu1 %v1951_v13 }
  0x1a   : > { %1773 = vmatmul.mubr.msk.bf16.gmra.mrb[4].mxu0 %vm413_vm0, %v1877_v6 }
  0x1b   : > { %1776 = vmatprep.mubr.msk.bf16.mxu0 %vm413_vm0, %v1878_v7 }
  0x1c   : > { %1844 = vmatpush3.bf16.msra.mxu1 %v1843_v19  ;;  %v2173_v19 = vld [vmem:[%s2534_s3 + $0x1] ss:$0 sm:$0xff] }
  0x1d   : > { %1845 = vmatprep.subr.bf16.mxu1 %v1951_v13 }
  0x20   : > { %1847 = vmatpush3.bf16.msra.mxu1 %v1846_v22 }
  0x21   : > { %1848 = vmatprep.subr.bf16.mxu1 %v1951_v13 }
  0x22   : > { %1777 = vmatmul.mubr.msk.bf16.gmra.mrb[8].mxu0 %vm413_vm0, %v1879_v8 }
  0x24   : > { %1850 = vmatpush3.bf16.msra.mxu1 %v1849_v25 }
  0x25   : > { %1851 = vmatprep.subr.bf16.mxu1 %v1951_v13 }
  0x28   : > { %1853 = vmatpush3.bf16.msra.mxu1 %v1852_v28 }
  0x29   : > { %1854 = vmatprep.subr.bf16.mxu1 %v1951_v13  ;;  %v785_v13 = vld [vmem:[#allocation2 + $0x1] ss:$2 sm:$0xf] }
  0xe5   : > { %v1770_v30 = vpop.f32.mrb[0].mxu0  ;;  %v1782_v32 = vpop.f32.mrb[0].mxu1 }
  0xe6   : > { %v2115_v31 = vadd.f32 %v1770_v30, %v2112_v29  ;;  %v472_v33 = vpop.f32.mrb[1].mxu0  ;;  %v2118_v34 = vadd.f32 %v1782_v32, %v2112_v29  ;;  %v520_v36 = vpop.f32.mrb[1].mxu1 }
  0xe7   : > { %v2121_v35 = vadd.f32 %v2112_v29, %v472_v33  ;;  %v1771_v37 = vpop.f32.mrb[2].mxu0  ;;  %v2125_v39 = vadd.f32 %v2112_v29, %v520_v36  ;;  %v1783_v41 = vpop.f32.mrb[2].mxu1  ;;  %v2189_v33 = vmul.f32 %v2173_v19, %v785_v13 }
  0xe8   : > { %v553_v38 = vmul.f32 0.044715, %v2115_v31  ;;  %v2128_v40 = vadd.f32 %v1771_v37, %v2112_v29  ;;  %v475_v42 = vpop.f32.mrb[3].mxu0  ;;  %v565_v43 = vmul.f32 0.044715, %v2118_v34  ;;  %v523_v47 = vpop.f32.mrb[3].mxu1  ;;  %v2138_v51 = vadd.f32 %v1783_v41, %v2112_v29 }
  0xe9   : > { %v551_v44 = vmul.f32 0.044715, %v2121_v35  ;;  %v563_v46 = vmul.f32 0.044715, %v2125_v39  ;;  %v2143_v54 = vadd.f32 %v2112_v29, %v475_v42  ;;  %v2157_v0 = vadd.f32 %v2112_v29, %v523_v47 }
  0xea   : > { %v569_v45 = vmul.f32 %v553_v38, %v2115_v31  ;;  %v581_v48 = vmul.f32 %v565_v43, %v2118_v34  ;;  %v554_v50 = vmul.f32 0.044715, %v2128_v40  ;;  %v566_v63 = vmul.f32 0.044715, %v2138_v51 }
  0xeb   : > { %v567_v49 = vmul.f32 %v551_v44, %v2121_v35  ;;  %v579_v53 = vmul.f32 %v563_v46, %v2125_v39  ;;  %v552_v5 = vmul.f32 0.044715, %v2143_v54  ;;  %v564_v21 = vmul.f32 0.044715, %v2157_v0 }
  0xec   : > { %v585_v52 = vmul.f32 %v569_v45, %v2115_v31  ;;  %v597_v55 = vmul.f32 %v581_v48, %v2118_v34  ;;  %v570_v57 = vmul.f32 %v554_v50, %v2128_v40  ;;  %v582_v10 = vmul.f32 %v566_v63, %v2138_v51 }
  0xed   : > { %v583_v56 = vmul.f32 %v567_v49, %v2121_v35  ;;  %v1774_v59 = vpop.f32.mrb[4].mxu0  ;;  %v595_v62 = vmul.f32 %v579_v53, %v2125_v39  ;;  %v568_v17 = vmul.f32 %v552_v5, %v2143_v54  ;;  %v580_v26 = vmul.f32 %v564_v21, %v2157_v0 }
  0xee   : > { %v601_v61 = vadd.f32 %v585_v52, %v2115_v31  ;;  %v488_v1 = vpop.f32.mrb[5].mxu0  ;;  %v613_v2 = vadd.f32 %v597_v55, %v2118_v34  ;;  %v586_v4 = vmul.f32 %v570_v57, %v2128_v40  ;;  %v598_v20 = vmul.f32 %v582_v10, %v2138_v51 }
  0xef   : > { %v599_v3 = vadd.f32 %v583_v56, %v2121_v35  ;;  %v1775_v6 = vpop.f32.mrb[6].mxu0  ;;  %v611_v8 = vadd.f32 %v595_v62, %v2125_v39  ;;  %v584_v23 = vmul.f32 %v568_v17, %v2143_v54  ;;  %v2179_v24 = vadd.f32 %v1774_v59, %v2112_v29 }
  0xf0   : > { %v617_v7 = vmul.f32 0.7978846, %v601_v61  ;;  %v491_v11 = vpop.f32.mrb[7].mxu0  ;;  %v629_v14 = vmul.f32 0.7978846, %v613_v2  ;;  %v602_v16 = vadd.f32 %v586_v4, %v2128_v40  ;;  %v614_v25 = vadd.f32 %v598_v20, %v2138_v51 }
  0xf1   : > { %v615_v15 = vmul.f32 0.7978846, %v599_v3  ;;  %v627_v18 = vmul.f32 0.7978846, %v611_v8  ;;  %v2184_v27 = vadd.f32 %v2112_v29, %v488_v1  ;;  %v600_v28 = vadd.f32 %v584_v23, %v2143_v54 }
  0xf2   : > { %1886 = vtanh.f32 %v617_v7  ;;  %v618_v22 = vmul.f32 0.7978846, %v602_v16  ;;  %v557_v30 = vmul.f32 0.044715, %v2179_v24  ;;  %v537_v36 = vmul.f32 0.5, %v2115_v31 }
  0xf3   : > { %1888 = vtanh.f32 %v629_v14  ;;  %v630_v37 = vmul.f32 0.7978846, %v614_v25  ;;  %v596_v38 = vmul.f32 %v580_v26, %v2157_v0  ;;  %v616_v42 = vmul.f32 0.7978846, %v600_v28 }
  0xf4   : > { %1890 = vtanh.f32 %v615_v15  ;;  %v573_v43 = vmul.f32 %v557_v30, %v2179_v24  ;;  %v555_v44 = vmul.f32 0.044715, %v2184_v27  ;;  %v2196_v45 = vadd.f32 %v1775_v6, %v2112_v29 }
  0xf5   : > { %1892 = vtanh.f32 %v627_v18  ;;  %v1778_v32 = vpop.f32.mrb[8].mxu0  ;;  %v612_v47 = vadd.f32 %v596_v38, %v2157_v0  ;;  %v2200_v48 = vadd.f32 %v2112_v29, %v491_v11  ;;  %v549_v50 = vmul.f32 0.5, %v2118_v34 }
  0xf6   : > { %1894 = vtanh.f32 %v618_v22  ;;  %v504_v41 = vpop.f32.mrb[9].mxu0  ;;  %v2203_v31 = vadd.f32 %v1778_v32, %v2112_v29  ;;  %v589_v52 = vmul.f32 %v573_v43, %v2179_v24  ;;  %v571_v53 = vmul.f32 %v555_v44, %v2184_v27 }
  0xf7   : > { %v1779_v46 = vpop.f32.mrb[10].mxu0  ;;  %1896 = vtanh.f32 %v630_v37  ;;  %v535_v55 = vmul.f32 0.5, %v2121_v35  ;;  %v547_v56 = vmul.f32 0.5, %v2125_v39  ;;  %v628_v57 = vmul.f32 0.7978846, %v612_v47 }
  0xf8   : > { %v2205_v49 = vpop.f32.mrb[11].mxu0  ;;  %1898 = vtanh.f32 %v616_v42  ;;  %v558_v59 = vmul.f32 0.044715, %v2196_v45  ;;  %v605_v60 = vadd.f32 %v589_v52, %v2179_v24  ;;  %v587_v61 = vmul.f32 %v571_v53, %v2184_v27  ;;  %v2245_v52 = vld [vmem:[%s2534_s3 + $0x2] ss:$0 sm:$0xff] }
  0xf9   : > { %v556_v62 = vmul.f32 0.044715, %v2200_v48  ;;  %v561_v34 = vmul.f32 0.044715, %v2203_v31  ;;  %v538_v1 = vmul.f32 0.5, %v2128_v40  ;;  %1900 = vtanh.f32 %v628_v57 }
  0xfa   : > { %v574_v2 = vmul.f32 %v558_v59, %v2196_v45  ;;  %v2220_v35 = vadd.f32 %v2112_v29, %v504_v41  ;;  %v621_v4 = vmul.f32 0.7978846, %v605_v60  ;;  %v603_v5 = vadd.f32 %v587_v61, %v2184_v27 }
  0xfb   : > { %v572_v6 = vmul.f32 %v556_v62, %v2200_v48  ;;  %v577_v11 = vmul.f32 %v561_v34, %v2203_v31  ;;  %v2227_v40 = vadd.f32 %v1779_v46, %v2112_v29  ;;  %v550_v32 = vmul.f32 0.5, %v2138_v51  ;;  %v822_v46 = vld [vmem:[#allocation2 + $0x2] ss:$2 sm:$0xf] }
  0xfc   : > { %v1887_v63 = vpop.eup %1886  ;;  %v590_v10 = vmul.f32 %v574_v2, %v2196_v45  ;;  %1902 = vtanh.f32 %v621_v4  ;;  %v619_v16 = vmul.f32 0.7978846, %v603_v5  ;;  %v559_v44 = vmul.f32 0.044715, %v2220_v35 }
  0xfd   : > { %v1889_v39 = vpop.eup %1888  ;;  %v649_v3 = vadd.f32 1.0, %v1887_v63  ;;  %v588_v22 = vmul.f32 %v572_v6, %v2200_v48  ;;  %v593_v26 = vmul.f32 %v577_v11, %v2203_v31  ;;  %v536_v47 = vmul.f32 0.5, %v2143_v54 }
  0xfe   : > { %v1891_v7 = vpop.eup %1890  ;;  %v661_v8 = vadd.f32 1.0, %v1889_v39  ;;  %v606_v21 = vadd.f32 %v590_v10, %v2196_v45  ;;  %1904 = vtanh.f32 %v619_v16  ;;  %v548_v54 = vmul.f32 0.5, %v2157_v0  ;;  %v2259_v0 = vld [vmem:[%s2534_s3 + $0x3] ss:$0 sm:$0xff] }
  0xff   : > { %v1893_v13 = vpop.eup %1892  ;;  %v665_v14 = vmul.f32 %v649_v3, %v537_v36  ;;  %v647_v15 = vadd.f32 1.0, %v1891_v7  ;;  %v604_v37 = vadd.f32 %v588_v22, %v2200_v48  ;;  %v609_v43 = vadd.f32 %v593_v26, %v2203_v31 }
 0x100   : > { %v1895_v17 = vpop.eup %1894  ;;  %v677_v18 = vmul.f32 %v661_v8, %v549_v50  ;;  %v659_v20 = vadd.f32 1.0, %v1893_v13  ;;  %v622_v36 = vmul.f32 0.7978846, %v606_v21  ;;  %v575_v61 = vmul.f32 %v559_v44, %v2220_v35 }
 0x101   : > { %734 = vst.msk [vmem:[#allocation2 + $0x31] sm:$0xff] %vm679_vm1, %v665_v14  ;;  %v663_v23 = vmul.f32 %v647_v15, %v535_v55  ;;  %v650_v25 = vadd.f32 1.0, %v1895_v17  ;;  %v1897_v28 = vpop.eup %1896  ;;  %v620_v51 = vmul.f32 0.7978846, %v604_v37  ;;  %v625_v55 = vmul.f32 0.7978846, %v609_v43 }
 0x102   : > { %746 = vst.msk [vmem:[#allocation2 + $0x111] sm:$0xff] %vm679_vm1, %v677_v18  ;;  %v675_v30 = vmul.f32 %v659_v20, %v547_v56  ;;  %v1899_v38 = vpop.eup %1898  ;;  %v662_v42 = vadd.f32 1.0, %v1897_v28  ;;  %1906 = vtanh.f32 %v622_v36  ;;  %v562_v56 = vmul.f32 0.044715, %v2227_v40 }
 0x103   : > { %732 = vst.msk [vmem:[#allocation2 + $0x11] sm:$0xff] %vm679_vm1, %v663_v23  ;;  %v666_v41 = vmul.f32 %v650_v25, %v538_v1  ;;  %v648_v50 = vadd.f32 1.0, %v1899_v38  ;;  %v1901_v57 = vpop.eup %1900  ;;  %1908 = vtanh.f32 %v620_v51  ;;  %v813_v62 = vadd.f32 %v2189_v33, %v2166_v12  ;;  %v2266_v12 = vld [vmem:[%s2534_s3 + $0x4] ss:$0 sm:$0xff] }
 0x104   : > { %744 = vst.msk [vmem:[#allocation2 + $0xf1] sm:$0xff] %vm679_vm1, %v675_v30  ;;  %v678_v53 = vmul.f32 %v662_v42, %v550_v32  ;;  %v660_v60 = vadd.f32 1.0, %v1901_v57  ;;  %1910 = vtanh.f32 %v625_v55  ;;  %v842_v34 = vmul.f32 %v2245_v52, %v822_v46  ;;  %v2294_v57 = vld [vmem:[%s2534_s3 + $0x5] ss:$0 sm:$0xff] }
 0x105   : > { %735 = vst.msk [vmem:[#allocation2 + $0x41] sm:$0xff] %vm679_vm1, %v666_v41  ;;  %v664_v59 = vmul.f32 %v648_v50, %v536_v47  ;;  %v578_v2 = vmul.f32 %v562_v56, %v2227_v40  ;;  %v591_v4 = vmul.f32 %v575_v61, %v2220_v35  ;;  %v541_v33 = vmul.f32 0.5, %v2179_v24 }
 0x106   : > { %747 = vst.msk [vmem:[#allocation2 + $0x121] sm:$0xff] %vm679_vm1, %v678_v53  ;;  %v1903_v63 = vpop.eup %1902  ;;  %v676_v1 = vmul.f32 %v660_v60, %v548_v54  ;;  %v850_v6 = vadd.f32 %v842_v34, %v813_v62  ;;  %v539_v8 = vmul.f32 0.5, %v2184_v27  ;;  %v542_v10 = vmul.f32 0.5, %v2196_v45  ;;  %v756_v34 = vld [vmem:[#allocation2 + $0xa0] ss:$2 sm:$0xf] }
 0x107   : > { %733 = vst.msk [vmem:[#allocation2 + $0x21] sm:$0xff] %vm679_vm1, %v664_v59  ;;  %v540_v11 = vmul.f32 0.5, %v2200_v48  ;;  %v594_v13 = vmul.f32 %v578_v2, %v2227_v40  ;;  %v653_v17 = vadd.f32 1.0, %v1903_v63  ;;  %v545_v20 = vmul.f32 0.5, %v2203_v31 }
 0x108   : > { %v1905_v39 = vpop.eup %1904  ;;  %745 = vst.msk [vmem:[#allocation2 + $0x101] sm:$0xff] %vm679_vm1, %v676_v1  ;;  %v860_v5 = vld [vmem:[#allocation2 + $0x30] ss:$2 sm:$0xf]  ;;  %v607_v27 = vadd.f32 %v591_v4, %v2220_v35  ;;  %v2279_v45 = vadd.f32 %v2112_v29, %v2205_v49  ;;  %v2301_v1 = vmul.f32 0.5, %v2220_v35 }
 0x109   : > { %v651_v18 = vadd.f32 1.0, %v1905_v39  ;;  %v879_v24 = vmul.f32 %v2259_v0, %v860_v5  ;;  %v669_v31 = vmul.f32 %v653_v17, %v541_v33  ;;  %v897_v36 = vld [vmem:[#allocation2 + $0x31] ss:$2 sm:$0xf]  ;;  %v610_v42 = vadd.f32 %v594_v13, %v2227_v40  ;;  %v2314_v17 = vld [vmem:[%s2534_s3 + $0x6] ss:$0 sm:$0xff] }
 0x10a   : > { %v858_v3 = vld [vmem:[#allocation2 + $0x10] ss:$2 sm:$0xf]  ;;  %v895_v7 = vld [vmem:[#allocation2 + $0x11] ss:$2 sm:$0xf]  ;;  %v916_v63 = vmul.f32 %v2266_v12, %v897_v36 }
 0x10b   : > { %v878_v15 = vmul.f32 %v2259_v0, %v858_v3  ;;  %v915_v23 = vmul.f32 %v2266_v12, %v895_v7  ;;  %v667_v37 = vmul.f32 %v651_v18, %v539_v8  ;;  %738 = vst.msk [vmem:[#allocation2 + $0x71] sm:$0xff] %vm679_vm1, %v669_v31  ;;  %v934_v50 = vld [vmem:[#allocation2 + $0x32] ss:$2 sm:$0xf]  ;;  %v623_v62 = vmul.f32 0.7978846, %v607_v27 }
 0x10c   : > { %v1907_v14 = vpop.eup %1906  ;;  %v752_v16 = vld [vmem:[#allocation2 + $0x40] ss:$2 sm:$0xf]  ;;  %v789_v25 = vld [vmem:[#allocation2 + $0x41] ss:$2 sm:$0xf] }
 0x10d   : > { %v1909_v48 = vpop.eup %1908  ;;  %v654_v38 = vadd.f32 1.0, %v1907_v14  ;;  %v770_v29 = vmul.f32 %v2151_v58, %v752_v16  ;;  %v886_v47 = vadd.f32 %v878_v15, %v850_v6  ;;  %v807_v51 = vmul.f32 %v2173_v19, %v789_v25  ;;  %736 = vst.msk [vmem:[#allocation2 + $0x51] sm:$0xff] %vm679_vm1, %v667_v37  ;;  %v932_v59 = vld [vmem:[#allocation2 + $0x12] ss:$2 sm:$0xf] }
 0x10e   : > { %v750_v21 = vld [vmem:[#allocation2 + $0x20] ss:$2 sm:$0xf]  ;;  %v787_v22 = vld [vmem:[#allocation2 + $0x21] ss:$2 sm:$0xf]  ;;  %v1911_v32 = vpop.eup %1910  ;;  %1912 = vtanh.f32 %v623_v62  ;;  %v952_v15 = vmul.f32 %v2294_v57, %v932_v59  ;;  %v953_v16 = vmul.f32 %v2294_v57, %v934_v50 }
 0x10f   : > { %v769_v26 = vmul.f32 %v2151_v58, %v750_v21  ;;  %v806_v28 = vmul.f32 %v2173_v19, %v787_v22  ;;  %v824_v30 = vld [vmem:[#allocation2 + $0x22] ss:$2 sm:$0xf]  ;;  %v652_v41 = vadd.f32 1.0, %v1909_v48  ;;  %v670_v55 = vmul.f32 %v654_v38, %v542_v10 }
 0x110   : > { %v843_v43 = vmul.f32 %v2245_v52, %v824_v30  ;;  %v762_v44 = vld [vmem:[#allocation2 + $0x100] ss:$2 sm:$0xf]  ;;  %v799_v46 = vld [vmem:[#allocation2 + $0x101] ss:$2 sm:$0xf]  ;;  %v923_v6 = vadd.f32 %v915_v23, %v886_v47  ;;  %v815_v7 = vadd.f32 %v807_v51, %v770_v29 }
 0x111   : > { %v814_v49 = vadd.f32 %v806_v28, %v769_v26  ;;  %v775_v53 = vmul.f32 %v2151_v58, %v762_v44  ;;  %v668_v56 = vmul.f32 %v652_v41, %v540_v11  ;;  %v812_v60 = vmul.f32 %v2173_v19, %v799_v46  ;;  %739 = vst.msk [vmem:[#allocation2 + $0x81] sm:$0xff] %vm679_vm1, %v670_v55  ;;  %v826_v3 = vld [vmem:[#allocation2 + $0x42] ss:$2 sm:$0xf]  ;;  %v2329_v29 = vld [vmem:[%s2534_s3 + $0x7] ss:$0 sm:$0xff] }
 0x112   : > { %v657_v61 = vadd.f32 1.0, %v1911_v32  ;;  %v626_v2 = vmul.f32 0.7978846, %v610_v42  ;;  %v560_v39 = vmul.f32 0.044715, %v2279_v45  ;;  %v2305_v10 = vmul.f32 0.5, %v2227_v40 }
 0x113   : > { %v851_v54 = vadd.f32 %v843_v43, %v814_v49  ;;  %737 = vst.msk [vmem:[#allocation2 + $0x61] sm:$0xff] %vm679_vm1, %v668_v56  ;;  %v793_v5 = vld [vmem:[#allocation2 + $0xa1] ss:$2 sm:$0xf]  ;;  %v820_v35 = vadd.f32 %v812_v60, %v775_v53  ;;  %v844_v40 = vmul.f32 %v2245_v52, %v826_v3  ;;  %v960_v26 = vadd.f32 %v952_v15, %v923_v6 }
 0x114   : > { %v673_v4 = vmul.f32 %v657_v61, %v545_v20  ;;  %v836_v8 = vld [vmem:[#allocation2 + $0x102] ss:$2 sm:$0xf]  ;;  %1914 = vtanh.f32 %v626_v2  ;;  %v576_v11 = vmul.f32 %v560_v39, %v2279_v45  ;;  %v872_v13 = vld [vmem:[#allocation2 + $0x110] ss:$2 sm:$0xf]  ;;  %v2319_v20 = vmul.f32 %v2151_v58, %v756_v34 }
 0x115   : > { %v887_v33 = vadd.f32 %v879_v24, %v851_v54  ;;  %v909_v24 = vld [vmem:[#allocation2 + $0x111] ss:$2 sm:$0xf]  ;;  %v969_v21 = vld [vmem:[#allocation2 + $0x20] ss:$2 sm:$0xf]  ;;  %v849_v27 = vmul.f32 %v2245_v52, %v836_v8  ;;  %v809_v25 = vmul.f32 %v2173_v19, %v793_v5  ;;  %v852_v36 = vadd.f32 %v844_v40, %v815_v7 }
 0x116   : > { %742 = vst.msk [vmem:[#allocation2 + $0xd1] sm:$0xff] %vm679_vm1, %v673_v4  ;;  %v592_v18 = vmul.f32 %v576_v11, %v2279_v45  ;;  %v971_v22 = vld [vmem:[#allocation2 + $0x40] ss:$2 sm:$0xf]  ;;  %v885_v37 = vmul.f32 %v2259_v0, %v872_v13  ;;  %v989_v47 = vmul.f32 %v2314_v17, %v969_v21  ;;  %v922_v54 = vmul.f32 %v2266_v12, %v909_v24 }
 0x117   : > { %v924_v14 = vadd.f32 %v916_v63, %v887_v33  ;;  %v862_v48 = vld [vmem:[#allocation2 + $0x50] ss:$2 sm:$0xf]  ;;  %v899_v23 = vld [vmem:[#allocation2 + $0x51] ss:$2 sm:$0xf]  ;;  %v857_v44 = vadd.f32 %v849_v27, %v820_v35  ;;  %v990_v50 = vmul.f32 %v2314_v17, %v971_v22 }
 0x118   : > { %v864_v30 = vld [vmem:[#allocation2 + $0x70] ss:$2 sm:$0xf]  ;;  %v880_v31 = vmul.f32 %v2259_v0, %v862_v48  ;;  %v608_v32 = vadd.f32 %v592_v18, %v2279_v45  ;;  %v1006_v41 = vld [vmem:[#allocation2 + $0x21] ss:$2 sm:$0xf]  ;;  %v917_v46 = vmul.f32 %v2266_v12, %v899_v23  ;;  %v997_v62 = vadd.f32 %v989_v47, %v960_v26  ;;  %v1913_v4 = vpop.eup %1912 }
 0x119   : > { %v961_v28 = vadd.f32 %v953_v16, %v924_v14  ;;  %v936_v38 = vld [vmem:[#allocation2 + $0x52] ss:$2 sm:$0xf]  ;;  %v1008_v42 = vld [vmem:[#allocation2 + $0x41] ss:$2 sm:$0xf]  ;;  %v881_v5 = vmul.f32 %v2259_v0, %v864_v30  ;;  %v893_v33 = vadd.f32 %v885_v37, %v857_v44  ;;  %v1026_v7 = vmul.f32 %v2329_v29, %v1006_v41 }
 0x11a   : > { %v754_v49 = vld [vmem:[#allocation2 + $0x60] ss:$2 sm:$0xf]  ;;  %v791_v43 = vld [vmem:[#allocation2 + $0x61] ss:$2 sm:$0xf]  ;;  %v888_v59 = vadd.f32 %v880_v31, %v852_v36  ;;  %v954_v60 = vmul.f32 %v2294_v57, %v936_v38  ;;  %v1027_v8 = vmul.f32 %v2329_v29, %v1008_v42  ;;  %v817_v37 = vadd.f32 %v809_v25, %v2319_v20 }
 0x11b   : > { %v771_v51 = vmul.f32 %v2151_v58, %v754_v49  ;;  %v808_v53 = vmul.f32 %v2173_v19, %v791_v43  ;;  %v828_v55 = vld [vmem:[#allocation2 + $0x62] ss:$2 sm:$0xf]  ;;  %v624_v56 = vmul.f32 0.7978846, %v608_v32  ;;  %v998_v34 = vadd.f32 %v990_v50, %v961_v28 }
 0x11c   : > { %v973_v61 = vld [vmem:[#allocation2 + $0x60] ss:$2 sm:$0xf]  ;;  %v845_v63 = vmul.f32 %v2245_v52, %v828_v55  ;;  %v901_v39 = vld [vmem:[#allocation2 + $0x71] ss:$2 sm:$0xf]  ;;  %v925_v3 = vadd.f32 %v917_v46, %v888_v59  ;;  %v1034_v22 = vadd.f32 %v1026_v7, %v997_v62 }
 0x11d   : > { %1916 = vtanh.f32 %v624_v56  ;;  %v816_v2 = vadd.f32 %v808_v53, %v771_v51  ;;  %v1010_v6 = vld [vmem:[#allocation2 + $0x61] ss:$2 sm:$0xf]  ;;  %v655_v13 = vadd.f32 1.0, %v1913_v4  ;;  %v991_v40 = vmul.f32 %v2314_v17, %v973_v61  ;;  %v2346_v18 = vld [vmem:[%s2534_s3 + $0x8] ss:$0 sm:$0xff] }
 0x11e   : > { %v1915_v11 = vpop.eup %1914  ;;  %v830_v35 = vld [vmem:[#allocation2 + $0xa2] ss:$2 sm:$0xf]  ;;  %v938_v15 = vld [vmem:[#allocation2 + $0x72] ss:$2 sm:$0xf]  ;;  %v962_v16 = vadd.f32 %v954_v60, %v925_v3  ;;  %v918_v21 = vmul.f32 %v2266_v12, %v901_v39  ;;  %v1035_v27 = vadd.f32 %v1027_v8, %v998_v34  ;;  %v1028_v30 = vmul.f32 %v2329_v29, %v1010_v6 }
 0x11f   : > { %v853_v14 = vadd.f32 %v845_v63, %v816_v2  ;;  %v658_v24 = vadd.f32 1.0, %v1915_v11  ;;  %v1043_v48 = vld [vmem:[#allocation2 + $0x22] ss:$2 sm:$0xf]  ;;  %v671_v23 = vmul.f32 %v655_v13, %v2301_v1  ;;  %v930_v1 = vadd.f32 %v922_v54, %v893_v33  ;;  %v2360_v47 = vld [vmem:[%s2535_s4] ss:$0 sm:$0xff] }
 0x120   : > { %v999_v28 = vadd.f32 %v991_v40, %v962_v16  ;;  %v1045_v31 = vld [vmem:[#allocation2 + $0x42] ss:$2 sm:$0xf]  ;;  %v946_v38 = vld [vmem:[#allocation2 + $0x112] ss:$2 sm:$0xf]  ;;  %v1063_v42 = vmul.f32 %v2346_v18, %v1043_v48  ;;  %v955_v44 = vmul.f32 %v2294_v57, %v938_v15 }
 0x121   : > { %v889_v26 = vadd.f32 %v881_v5, %v853_v14  ;;  %v1047_v32 = vld [vmem:[#allocation2 + $0x62] ss:$2 sm:$0xf]  ;;  %v674_v36 = vmul.f32 %v658_v24, %v2305_v10  ;;  %v1064_v49 = vmul.f32 %v2346_v18, %v1045_v31  ;;  %740 = vst.msk [vmem:[#allocation2 + $0xb1] sm:$0xff] %vm679_vm1, %v671_v23  ;;  %v846_v10 = vmul.f32 %v2245_v52, %v830_v35 }
 0x122   : > { %v975_v41 = vld [vmem:[#allocation2 + $0x80] ss:$2 sm:$0xf]  ;;  %v1036_v46 = vadd.f32 %v1028_v30, %v999_v28  ;;  %v1012_v20 = vld [vmem:[#allocation2 + $0x81] ss:$2 sm:$0xf]  ;;  %v1065_v25 = vmul.f32 %v2346_v18, %v1047_v32  ;;  %v1071_v50 = vadd.f32 %v1063_v42, %v1034_v22  ;;  %v959_v53 = vmul.f32 %v2294_v57, %v946_v38 }
 0x123   : > { %v926_v43 = vadd.f32 %v918_v21, %v889_v26  ;;  %743 = vst.msk [vmem:[#allocation2 + $0xe1] sm:$0xff] %vm679_vm1, %v674_v36  ;;  %v1072_v51 = vadd.f32 %v1064_v49, %v1035_v27  ;;  %v983_v56 = vld [vmem:[#allocation2 + $0x120] ss:$2 sm:$0xf]  ;;  %v992_v59 = vmul.f32 %v2314_v17, %v975_v41  ;;  %v1029_v39 = vmul.f32 %v2329_v29, %v1012_v20 }
 0x124   : > { %v1049_v54 = vld [vmem:[#allocation2 + $0x82] ss:$2 sm:$0xf]  ;;  %v1073_v60 = vadd.f32 %v1065_v25, %v1036_v46  ;;  %v2368_v61 = vadd.f32 %v2360_v47, %v1071_v50  ;;  %v967_v63 = vadd.f32 %v959_v53, %v930_v1  ;;  %v544_v3 = vmul.f32 0.5, %v2279_v45 }
 0x125   : > { %v963_v55 = vadd.f32 %v955_v44, %v926_v43  ;;  %v2371_v62 = vadd.f32 %v2360_v47, %v1072_v51  ;;  %v854_v5 = vadd.f32 %v846_v10, %v817_v37  ;;  %v996_v33 = vmul.f32 %v2314_v17, %v983_v56  ;;  %v1020_v6 = vld [vmem:[#allocation2 + $0x121] ss:$2 sm:$0xf]  ;;  %v870_v30 = vld [vmem:[#allocation2 + $0xf0] ss:$2 sm:$0xf] }
 0x126   : > { %v1066_v8 = vmul.f32 %v2346_v18, %v1049_v54  ;;  %v1102_v11 = vmul.f32 0.044715, %v2368_v61  ;;  %v2380_v16 = vadd.f32 %v2360_v47, %v1073_v60  ;;  %v1033_v26 = vmul.f32 %v2329_v29, %v1020_v6  ;;  %v1057_v36 = vld [vmem:[#allocation2 + $0x122] ss:$2 sm:$0xf] }
 0x127   : > { %v1917_v34 = vpop.eup %1916  ;;  %v1000_v2 = vadd.f32 %v992_v59, %v963_v55  ;;  %v1103_v13 = vmul.f32 0.044715, %v2371_v62  ;;  %v1004_v24 = vadd.f32 %v996_v33, %v967_v63  ;;  %v907_v49 = vld [vmem:[#allocation2 + $0xf1] ss:$2 sm:$0xf]  ;;  %v884_v10 = vmul.f32 %v2259_v0, %v870_v30 }
 0x128   : > { %v656_v4 = vadd.f32 1.0, %v1917_v34  ;;  %v866_v35 = vld [vmem:[#allocation2 + $0xb0] ss:$2 sm:$0xf]  ;;  %v1110_v28 = vmul.f32 %v1102_v11, %v2368_v61  ;;  %v1104_v42 = vmul.f32 0.044715, %v2380_v16  ;;  %v1070_v56 = vmul.f32 %v2346_v18, %v1057_v36 }
 0x129   : > { %v1037_v7 = vadd.f32 %v1029_v39, %v1000_v2  ;;  %v903_v14 = vld [vmem:[#allocation2 + $0xb1] ss:$2 sm:$0xf]  ;;  %v882_v45 = vmul.f32 %v2259_v0, %v866_v35  ;;  %v1111_v38 = vmul.f32 %v1103_v13, %v2371_v62  ;;  %v940_v41 = vld [vmem:[#allocation2 + $0xb2] ss:$2 sm:$0xf]  ;;  %v1041_v46 = vadd.f32 %v1033_v26, %v1004_v24 }
 0x12a   : > { %v672_v15 = vmul.f32 %v656_v4, %v544_v3  ;;  %v760_v40 = vld [vmem:[#allocation2 + $0xe0] ss:$2 sm:$0xf]  ;;  %v919_v22 = vmul.f32 %v2266_v12, %v903_v14  ;;  %v797_v48 = vld [vmem:[#allocation2 + $0xe1] ss:$2 sm:$0xf]  ;;  %v1112_v25 = vmul.f32 %v1104_v42, %v2380_v16  ;;  %v1118_v50 = vmul.f32 %v1110_v28, %v2368_v61 }
 0x12b   : > { %v1074_v21 = vadd.f32 %v1066_v8, %v1037_v7  ;;  %v774_v27 = vmul.f32 %v2151_v58, %v760_v40  ;;  %v834_v23 = vld [vmem:[#allocation2 + $0xe2] ss:$2 sm:$0xf]  ;;  %v811_v31 = vmul.f32 %v2173_v19, %v797_v48  ;;  %v890_v32 = vadd.f32 %v882_v45, %v854_v5  ;;  %v944_v53 = vld [vmem:[#allocation2 + $0xf2] ss:$2 sm:$0xf] }
 0x12c   : > { %741 = vst.msk [vmem:[#allocation2 + $0xc1] sm:$0xff] %vm679_vm1, %v672_v15  ;;  %v848_v1 = vmul.f32 %v2245_v52, %v834_v23  ;;  %v956_v55 = vmul.f32 %v2294_v57, %v940_v41  ;;  %v1119_v59 = vmul.f32 %v1111_v38, %v2371_v62  ;;  %v868_v54 = vld [vmem:[#allocation2 + $0xd0] ss:$2 sm:$0xf]  ;;  %v921_v60 = vmul.f32 %v2266_v12, %v907_v49 }
 0x12d   : > { %v2390_v37 = vadd.f32 %v2360_v47, %v1074_v21  ;;  %v819_v43 = vadd.f32 %v811_v31, %v774_v27  ;;  %v927_v44 = vadd.f32 %v919_v22, %v890_v32  ;;  %v981_v34 = vld [vmem:[#allocation2 + $0x100] ss:$2 sm:$0xf]  ;;  %v1120_v2 = vmul.f32 %v1112_v25, %v2380_v16  ;;  %v1018_v22 = vld [vmem:[#allocation2 + $0x101] ss:$2 sm:$0xf] }
 0x12e   : > { %v1078_v33 = vadd.f32 %v1070_v56, %v1041_v46  ;;  %v1126_v6 = vadd.f32 %v1118_v50, %v2368_v61  ;;  %v1127_v14 = vadd.f32 %v1119_v59, %v2371_v62  ;;  %v958_v45 = vmul.f32 %v2294_v57, %v944_v53  ;;  %v942_v28 = vld [vmem:[#allocation2 + $0xd2] ss:$2 sm:$0xf]  ;;  %v1055_v36 = vld [vmem:[#allocation2 + $0x102] ss:$2 sm:$0xf] }
 0x12f   : > { %v1105_v20 = vmul.f32 0.044715, %v2390_v37  ;;  %v856_v51 = vadd.f32 %v848_v1, %v819_v43  ;;  %v964_v5 = vadd.f32 %v956_v55, %v927_v44  ;;  %v995_v24 = vmul.f32 %v2314_v17, %v981_v34  ;;  %v979_v50 = vld [vmem:[#allocation2 + $0xe0] ss:$2 sm:$0xf] }
 0x130   : > { %v883_v27 = vmul.f32 %v2259_v0, %v868_v54  ;;  %v1128_v26 = vadd.f32 %v1120_v2, %v2380_v16  ;;  %v2418_v38 = vadd.f32 %v2360_v47, %v1078_v33  ;;  %v1134_v0 = vmul.f32 0.7978846, %v1126_v6 }
 0x131   : > { %v1113_v63 = vmul.f32 %v1105_v20, %v2390_v37  ;;  %v892_v4 = vadd.f32 %v884_v10, %v856_v51  ;;  %v1135_v49 = vmul.f32 0.7978846, %v1127_v14  ;;  %v957_v25 = vmul.f32 %v2294_v57, %v942_v28  ;;  %v1053_v57 = vld [vmem:[#allocation2 + $0xe2] ss:$2 sm:$0xf] }
 0x132   : > { %v1136_v20 = vmul.f32 0.7978846, %v1128_v26  ;;  %v1069_v53 = vmul.f32 %v2346_v18, %v1055_v36  ;;  %v1109_v59 = vmul.f32 0.044715, %v2418_v38  ;;  %v994_v2 = vmul.f32 %v2314_v17, %v979_v50 }
 0x133   : > { %v758_v39 = vld [vmem:[#allocation2 + $0xc0] ss:$2 sm:$0xf]  ;;  %v795_v3 = vld [vmem:[#allocation2 + $0xc1] ss:$2 sm:$0xf]  ;;  %v1121_v35 = vmul.f32 %v1113_v63, %v2390_v37  ;;  %v929_v15 = vadd.f32 %v921_v60, %v892_v4  ;;  %1918 = vtanh.f32 %v1135_v49 }
 0x134   : > { %v773_v7 = vmul.f32 %v2151_v58, %v758_v39  ;;  %v810_v8 = vmul.f32 %v2173_v19, %v795_v3  ;;  %v832_v11 = vld [vmem:[#allocation2 + $0xc2] ss:$2 sm:$0xf]  ;;  %v1014_v21 = vld [vmem:[#allocation2 + $0xc1] ss:$2 sm:$0xf]  ;;  %1920 = vtanh.f32 %v1134_v0  ;;  %v1117_v33 = vmul.f32 %v1109_v59, %v2418_v38 }
 0x135   : > { %v977_v13 = vld [vmem:[#allocation2 + $0xc0] ss:$2 sm:$0xf]  ;;  %v905_v58 = vld [vmem:[#allocation2 + $0xd1] ss:$2 sm:$0xf]  ;;  %v847_v19 = vmul.f32 %v2245_v52, %v832_v11  ;;  %v966_v30 = vadd.f32 %v958_v45, %v929_v15  ;;  %v1030_v32 = vmul.f32 %v2329_v29, %v1014_v21  ;;  %v1129_v42 = vadd.f32 %v1121_v35, %v2390_v37 }
 0x136   : > { %v993_v40 = vmul.f32 %v2314_v17, %v977_v13  ;;  %v818_v48 = vadd.f32 %v810_v8, %v773_v7  ;;  %v1051_v23 = vld [vmem:[#allocation2 + $0xc2] ss:$2 sm:$0xf]  ;;  %v1032_v52 = vmul.f32 %v2329_v29, %v1018_v22  ;;  %v920_v46 = vmul.f32 %v2266_v12, %v905_v58  ;;  %v1016_v60 = vld [vmem:[#allocation2 + $0xe1] ss:$2 sm:$0xf] }
 0x137   : > { %v1003_v43 = vadd.f32 %v995_v24, %v966_v30  ;;  %v1067_v44 = vmul.f32 %v2346_v18, %v1051_v23  ;;  %v1137_v54 = vmul.f32 0.7978846, %v1129_v42  ;;  %1922 = vtanh.f32 %v1136_v20 }
 0x138   : > { %v1001_v31 = vadd.f32 %v993_v40, %v964_v5  ;;  %v855_v41 = vadd.f32 %v847_v19, %v818_v48  ;;  %v1031_v5 = vmul.f32 %v2329_v29, %v1016_v60  ;;  %v1068_v11 = vmul.f32 %v2346_v18, %v1053_v57 }
 0x139   : > { %v1040_v51 = vadd.f32 %v1032_v52, %v1003_v43  ;;  %1924 = vtanh.f32 %v1137_v54  ;;  %v1125_v15 = vmul.f32 %v1117_v33, %v2418_v38  ;;  %v1095_v19 = vmul.f32 0.5, %v2371_v62 }
 0x13a   : > { %v1038_v1 = vadd.f32 %v1030_v32, %v1001_v31  ;;  %v891_v10 = vadd.f32 %v883_v27, %v855_v41  ;;  %v1094_v31 = vmul.f32 0.5, %v2368_v61  ;;  %v1096_v42 = vmul.f32 0.5, %v2380_v16 }
 0x13b   : > { %v1077_v34 = vadd.f32 %v1069_v53, %v1040_v51  ;;  %v1133_v48 = vadd.f32 %v1125_v15, %v2418_v38  ;;  %v1097_v62 = vmul.f32 0.5, %v2390_v37 }
 0x13c   : > { %v1075_v55 = vadd.f32 %v1067_v44, %v1038_v1  ;;  %v928_v56 = vadd.f32 %v920_v46, %v891_v10 }
 0x13d   : > { %v1092_v39 = vadd.f32 %v2360_v47, %v1077_v34  ;;  %v1919_v35 = vpop.eup %1918 }
 0x13e   : > { %v2428_v63 = vadd.f32 %v2360_v47, %v1075_v55  ;;  %v965_v12 = vadd.f32 %v957_v25, %v928_v56  ;;  %v1921_v29 = vpop.eup %1920  ;;  %v1151_v22 = vadd.f32 1.0, %v1919_v35 }
 0x13f   : > { %v1108_v6 = vmul.f32 0.044715, %v1092_v39  ;;  %v1150_v23 = vadd.f32 1.0, %v1921_v29  ;;  %v1100_v60 = vmul.f32 0.5, %v1092_v39 }
 0x140   : > { %v1106_v3 = vmul.f32 0.044715, %v2428_v63  ;;  %v1002_v4 = vadd.f32 %v994_v2, %v965_v12  ;;  %v2444_v36 = vmul.f32 %v1151_v22, %v1095_v19  ;;  %v1098_v56 = vmul.f32 0.5, %v2428_v63  ;;  %v1291_v19 = vld [vmem:[%s2537_s6] sm:$0xff] }
 0x141   : > { %v1116_v13 = vmul.f32 %v1108_v6, %v1092_v39  ;;  %v1923_v27 = vpop.eup %1922  ;;  %v2447_v49 = vmul.f32 %v1150_v23, %v1094_v31  ;;  %v1292_v23 = vld [vmem:[%s2537_s6 + $0x8] sm:$0xff] }
 0x142   : > { %v1114_v7 = vmul.f32 %v1106_v3, %v2428_v63  ;;  %v1039_v8 = vadd.f32 %v1031_v5, %v1002_v4  ;;  %v1152_v32 = vadd.f32 1.0, %v1923_v27  ;;  %v1168_v61 = vsel %vm1166_vm5, %v2444_v36, 0.0 }
 0x143   : > { %v1124_v45 = vmul.f32 %v1116_v13, %v1092_v39  ;;  %v1925_v26 = vpop.eup %1924  ;;  %v1167_v16 = vsel %vm1166_vm5, %v2447_v49, 0.0  ;;  %v1101_v4 = vmul.f32 0.5, %v2418_v38 }
 0x144   : > { %v1122_v17 = vmul.f32 %v1114_v7, %v2428_v63  ;;  %v1076_v14 = vadd.f32 %v1068_v11, %v1039_v8  ;;  %v1153_v0 = vadd.f32 1.0, %v1925_v26  ;;  %v2450_v52 = vmul.f32 %v1152_v32, %v1096_v42 }
 0x145   : > { %v1132_v21 = vadd.f32 %v1124_v45, %v1092_v39  ;;  %v1169_v46 = vadd.f32 %v1168_v61, %v1167_v16  ;;  %v1855_v26 = vpack.c.bf16 %v1292_v23, %v1291_v19  ;;  %v1883_v61 = vld [vmem:[%s2538_s7 + $0x18] sm:$0xff]   ;;  %v1885_v16 = vld [vmem:[%s2538_s7 + $0x28] sm:$0xff]  }
 0x146   : > { %v1130_v40 = vadd.f32 %v1122_v17, %v2428_v63  ;;  %v1091_v24 = vadd.f32 %v2360_v47, %v1076_v14  ;;  %v1141_v47 = vmul.f32 0.7978846, %v1133_v48  ;;  %v2454_v44 = vmul.f32 %v1153_v0, %v1097_v62  ;;  %v1882_v62 = vld [vmem:[%s2538_s7 + $0x10] sm:$0xff]  }
 0x147   : > { %v1140_v30 = vmul.f32 0.7978846, %v1132_v21  ;;  %v1170_v10 = vsel %vm1166_vm5, %v2450_v52, 0.0 }
 0x148   : > { %v1107_v58 = vmul.f32 0.044715, %v1091_v24  ;;  %v1138_v18 = vmul.f32 0.7978846, %v1130_v40  ;;  %v1172_v37 = vsel %vm1166_vm5, %v2454_v44, 0.0  ;;  %v1171_v25 = vadd.f32 %v1170_v10, %v1169_v46 }
 0x149   : > { %v1099_v12 = vmul.f32 0.5, %v1091_v24 }
 0x14a   : > { %v1115_v28 = vmul.f32 %v1107_v58, %v1091_v24  ;;  %1926 = vtanh.f32 %v1138_v18  ;;  %v1173_v51 = vadd.f32 %v1172_v37, %v1171_v25 }
 0x14b   : > { %1928 = vtanh.f32 %v1140_v30 }
 0x14c   : > { %v1123_v41 = vmul.f32 %v1115_v28, %v1091_v24  ;;  %1930 = vtanh.f32 %v1141_v47  ;;  %v1174_v34 = vrot.slane %v1173_v51, 4  ;;  %v1293_v28 = vld [vmem:[%s2537_s6 + $0x10] sm:$0xff] }
 0x14e   : > { %v1131_v43 = vadd.f32 %v1123_v41, %v1091_v24  ;;  %v1175_v6 = vadd.f32 %v1174_v34, %v1173_v51 }
 0x150   : > { %v1139_v1 = vmul.f32 0.7978846, %v1131_v43  ;;  %v1176_v13 = vrot.slane %v1175_v6, 2  ;;  %v1881_v43 = vld [vmem:[%s2538_s7 + $0x8] sm:$0xff]  }
 0x152   : > { %1932 = vtanh.f32 %v1139_v1  ;;  %v1177_v14 = vadd.f32 %v1176_v13, %v1175_v6  ;;  %v1884_v1 = vld [vmem:[%s2538_s7 + $0x20] sm:$0xff]  }
 0x154   : > { %v1927_v20 = vpop.eup %1926  ;;  %v1178_v40 = vrot.slane %v1177_v14, 1 }
 0x155   : > { %v1929_v50 = vpop.eup %1928  ;;  %v1154_v53 = vadd.f32 1.0, %v1927_v20 }
 0x156   : > { %v1931_v55 = vpop.eup %1930  ;;  %v1156_v59 = vadd.f32 1.0, %v1929_v50  ;;  %v1179_v21 = vadd.f32 %v1178_v40, %v1177_v14  ;;  %v1953_v50 = vmov 1966171168  }
 0x157   : > { %v1157_v57 = vadd.f32 1.0, %v1931_v55  ;;  %v2463_v3 = vmul.f32 %v1154_v53, %v1098_v56  ;;  %v1376_v51 = vunpack.c.l.s4 %v1953_v50  ;;  %v1378_v53 = vlaneseq }
 0x158   : > { %v2468_v33 = vmul.f32 %v1156_v59, %v1100_v60  ;;  %v1194_v58 = vmul.f32 0.0625, %v1179_v21 }
 0x159   : > { %v2470_v7 = vmul.f32 %v1157_v57, %v1101_v4  ;;  %v1180_v63 = vsel %vm1166_vm5, %v2463_v3, 0.0  ;;  %v1377_v55 = vunpack.c.0.s8 %v1376_v51  ;;  %v1379_v56 = vshrl.u32 %v1378_v53, 7 }
 0x15a   : > { %v1183_v11 = vsel %vm1166_vm5, %v2468_v33, 0.0 }
 0x15b   : > { %v1185_v38 = vsel %vm1166_vm5, %v2470_v7, 0.0  ;;  %v1380_v59 = vsub.s32 %v1377_v55, %v1379_v56  ;;  %v1399_v34 = vsub.s32 0, %v1379_v56 }
 0x15c   : > { %v1933_v54 = vpop.eup %1932 }
 0x15d   : > { %v1155_v2 = vadd.f32 1.0, %v1933_v54 }
 0x15f   : > { %v2466_v5 = vmul.f32 %v1155_v2, %v1099_v12 }
 0x161   : > { %v1181_v39 = vsel %vm1166_vm5, %v2466_v5, 0.0 }
 0x162   : > { %v1182_v8 = vadd.f32 %v1181_v39, %v1180_v63 }
 0x164   : > { %v1184_v17 = vadd.f32 %v1183_v11, %v1182_v8 }
 0x166   : > { %v1186_v35 = vadd.f32 %v1185_v38, %v1184_v17 }
 0x168   : > { %v1187_v15 = vrot.slane %v1186_v35, 4 }
 0x16a   : > { %v1188_v45 = vadd.f32 %v1187_v15, %v1186_v35 }
 0x16c   : > { %v1189_v29 = vrot.slane %v1188_v45, 2 }
 0x16e   : > { %v1190_v24 = vadd.f32 %v1189_v29, %v1188_v45 }
 0x170   : > { %v1191_v22 = vrot.slane %v1190_v24, 1 }
 0x172   : > { %v1192_v27 = vadd.f32 %v1191_v22, %v1190_v24 }
 0x174   : > { %v1195_v48 = vmul.f32 0.0625, %v1192_v27 }
 0x176   : > { %v1211_v18 = vsel %vm1210_vm6, %v1195_v48, %v1194_v58 }
 0x177   : > { %1809 = vmatmul.mubr.msk.f32.vlgmr.msra.gmra.mrb[4].mxu1 %vm679_vm1, %v1211_v18 }
 0x178   : > { %1817 = vmatprep.mubr.msk.f32.mxu1 %vm1952_vm4, %v1950_v9  ;;  %1856 = vmatpush3.bf16.msra.mxu1 %v1855_v26 }
 0x179   : > { %1815 = vmatprep.subr.mxu1 %v1950_v9  ;;  %v1880_v9 = vld [vmem:[%s2538_s7] sm:$0xff]  }
 0x17a   : > { %1820 = vmatprep.subr.bf16.mxu0 %v1880_v9 }
 0x17b   : > { %1821 = vmatpush3.bf16.msra.mxu0 %v1880_v9 }
 0x17c   : > { %1816 = vmatpush3.msra.mxu1 %v1293_v28  ;;  %1822 = vmatprep.subr.bf16.mxu0 %v1881_v43 }
 0x17f   : > { %1823 = vmatpush3.bf16.msra.mxu0 %v1881_v43 }
 0x180   : > { %1824 = vmatprep.subr.bf16.mxu0 %v1882_v62 }
 0x183   : > { %1825 = vmatpush3.bf16.msra.mxu0 %v1882_v62 }
 0x184   : > { %1826 = vmatprep.subr.bf16.mxu0 %v1883_v61 }
 0x187   : > { %1827 = vmatpush3.bf16.msra.mxu0 %v1883_v61 }
 0x188   : > { %1828 = vmatprep.subr.bf16.mxu0 %v1884_v1 }
 0x18b   : > { %1829 = vmatpush3.bf16.msra.mxu0 %v1884_v1 }
 0x18c   : > { %1830 = vmatprep.subr.bf16.mxu0 %v1885_v16 }
 0x18f   : > { %1831 = vmatpush3.bf16.msra.mxu0 %v1885_v16 }
 0x24a   : > { %v1280_v30 = vpop.f32.mrb[4].mxu1 }
 0x24b   : > { %v1708_v31 = vmul.f32 -1.442695, %v1280_v30  ;;  %v1810_v32 = vpop.f32.mrb[5].mxu1 }
 0x24d   : > { %1934 = vpow2.f32 %v1708_v31 }
 0x257   : > { %v1935_v41 = vpop.eup %1934 }
 0x258   : > { %v1287_v47 = vadd.f32 1.0, %v1935_v41 }
 0x25a   : > { %1936 = vrcp.f32 %v1287_v47 }
 0x264   : > { %v1937_v42 = vpop.eup %1936 }
 0x265   : > { %v1290_v0 = vmul.f32 %v1937_v42, %v1280_v30 }
 0x267   : > { %1818 = vmatmul.mubr.msk.f32.vlgmr.msra.gmra.mrb[6].mxu1 %vm1294_vm7, %v1290_v0 }
 0x33a   : > { %v1364_v46 = vpop.f32.mrb[6].mxu1 }
 0x33b   : > { %v1710_v10 = vmul.f32 -1.442695, %v1364_v46  ;;  %v1819_v37 = vpop.f32.mrb[7].mxu1 }
 0x33d   : > { %1938 = vpow2.f32 %v1710_v10 }
 0x347   : > { %v1939_v20 = vpop.eup %1938 }
 0x348   : > { %v1371_v25 = vadd.f32 1.0, %v1939_v20 }
 0x34a   : > { %1940 = vrcp.f32 %v1371_v25 }
 0x354   : > { %v1941_v54 = vpop.eup %1940 }
 0x355   : > { %v1381_v60 = vrot.slane %v1941_v54, %v1380_v59 }
 0x357   : > { %v1382_v12 = vcombine.high %v1381_v60, %v1381_v60  ;;  %v1389_v2 = vrot.slane %v1381_v60, %v1380_v59 }
 0x359   : > { %v1396_v57 = vrot.slane %v1382_v12, %v1380_v59  ;;  %v1400_v4 = vrot.slane %v1389_v2, %v1399_v34 }
 0x35b   : > { %v1404_v6 = vrot.slane %v1396_v57, %v1399_v34  ;;  %v1407_v63 = vmul.f32 %v1400_v4, %v2447_v49  ;;  %v1408_v39 = vmul.f32 %v1400_v4, %v2444_v36  ;;  %v1409_v8 = vmul.f32 %v1400_v4, %v2450_v52  ;;  %v1711_v52 = vld [vmem:[%s2539_s8] ss:$0 sm:$0xff] }
 0x35c   : > { %v1410_v11 = vmul.f32 %v1400_v4, %v2454_v44 }
 0x35d   : > { %v1423_v13 = vcombine.low %v1407_v63, %v1408_v39  ;;  %v1411_v17 = vmul.f32 %v1404_v6, %v2463_v3  ;;  %v1412_v38 = vmul.f32 %v1404_v6, %v2466_v5  ;;  %v1413_v35 = vmul.f32 %v1404_v6, %v2468_v33 }
 0x35e   : > { %v1424_v14 = vcombine.low %v1409_v8, %v1410_v11  ;;  %v1414_v15 = vmul.f32 %v1404_v6, %v2470_v7 }
 0x35f   : > { %v1425_v45 = vcombine.low %v1411_v17, %v1412_v38 }
 0x360   : > { %v1431_v40 = vpack.c.bf16 %v1424_v14, %v1423_v13  ;;  %v1426_v49 = vcombine.low %v1413_v35, %v1414_v15 }
 0x362   : > { %1832 = vmatprep.mubr.msk.bf16.mxu0 %vm679_vm1, %v1431_v40  ;;  %v1432_v36 = vpack.c.bf16 %v1426_v49, %v1425_v45 }
 0x364   : > { %1833 = vmatmul.mubr.msk.bf16.vlgmr.msra.gmra.mrb[12].mxu0 %vm679_vm1, %v1432_v36 }
 0x437   : > { %v1834_v44 = vpop.f32.mrb[12].mxu0 }
 0x438   : > { %v1537_v3 = vadd.f32 %v1834_v44, %v1711_v52  ;;  %v1528_v5 = vpop.f32.mrb[13].mxu0 }
 0x439   : > { %v1529_v33 = vadd.f32 %v1711_v52, %v1528_v5  ;;  %v1835_v29 = vpop.f32.mrb[14].mxu0 }
 0x43a   : > { %v1540_v7 = vadd.f32 %v1835_v29, %v1711_v52  ;;  %v1531_v24 = vpop.f32.mrb[15].mxu0  ;;  %v1730_v27 = vpack.c.bf16 %v1537_v3, %v1537_v3 }
 0x43b   : > { %v1728_v21 = vpack.c.bf16 %v1529_v33, %v1529_v33  ;;  %v1532_v22 = vadd.f32 %v1711_v52, %v1531_v24 }
 0x43c   : > { %1562 = vst.msk [vmem:[%s339_s10 + $0x8] sm:$0xf] %vm1559_vm8, %v1730_v27  ;;  %v1731_v48 = vpack.c.bf16 %v1540_v7, %v1540_v7 }
 0x43d   : > { %1560 = vst.msk [vmem:[%s339_s10] sm:$0xf] %vm1559_vm8, %v1728_v21  ;;  %v1729_v58 = vpack.c.bf16 %v1532_v22, %v1532_v22 }
 0x43e   : > { %1563 = vst.msk [vmem:[%s339_s10 + $0xc] sm:$0xf] %vm1559_vm8, %v1731_v48 }
 0x43f   : > { %1561 = vst.msk [vmem:[%s339_s10 + $0x4] sm:$0xf] %vm1559_vm8, %v1729_v58 }
 0x440 PF: > { %s19_s30 = sadd.s32 1, %s1948_s30  }
 0x441   : > { %p16_p4 = scmp.ge.s32.totalorder %s19_s30, 4  }
 0x443   :  { %18 = sbr.rel (!%p16_p4) target bundleno = 1 (0x1), region = 158 }

// kernel: tokenizer_forward.4
= control target key start
LH: loop header
LB: loop body
LE: loop exit
PB: predicated region body
PF: predicated region fallthrough
CT: control target
= control target key end

     0   :  { %s4079_s15 = smov 0   ;;  %s7287_s0 = inlined_call_operand.vmem [shape: f32[4,16,16,3], index: 0, kind: input, shape index: {}]   ;;  %s7288_s1 = inlined_call_operand.vmem [shape: f32[1,3], index: 1, kind: input, shape index: {}]   ;;  %s7289_s2 = inlined_call_operand.vmem [shape: f32[27,16], index: 2, kind: input, shape index: {}]   ;;  %s7290_s3 = inlined_call_operand.vmem [shape: f32[1,16], index: 3, kind: input, shape index: {}]   ;;  %s7291_s4 = inlined_call_operand.vmem [shape: bf16[4,8,8,16], index: 4, kind: output, shape index: {}]  }
   0x1 LB: > { %s3859_s16 = sadd.s32 4294967295, %s4048_s15   ;;  %p3863_p0 = scmp.ge.s32.totalorder %s4048_s15, 1  ;;  %s4048_s15 = sphi %s4079_s15, %s14_s15  }
   0x2   : > { %p164_p1 = scmp.lt.s32.totalorder %s4048_s15, 3 }
   0x4   : > { %p165_p2 = pnand %p3863_p0, %p164_p1 }
   0x6   : > { %168 = sbr.rel (%p165_p2) target bundleno = 1136 (0x470), region = 36 }
   0xd   : > { %vm206_vm0 = vcmask 23552   ;;  %vm221_vm1 = vcmask 16384   ;;  %s4087_s17 = sshll.u32 %s3859_s16, 1  ;;  %v7294_v0 = vmov 0   ;;  %v4051_v1 = vmov 0.0  }
   0xe   : > { %3915 = vset.pattern.permute.xlu0 %v7294_v0  ;;  %207 = vst.msk [vmem:[#allocation2] sm:$0xff] %vm206_vm0, %v4051_v1  ;;  %208 = vst.msk [vmem:[#allocation2 + $0x8] sm:$0xff] %vm206_vm0, %v4051_v1  ;;  %3916 = vset.pattern.permute.xlu1 %v7294_v0  ;;  %p193_p3 = scmp.lt.s32.totalorder %s4087_s17, 3  ;;  %vm209_vm2 = vcmask 17408   ;;  %v4137_v2 = vld [vmem:[%s7288_s1] ss:$0 sm:$0xff] }
   0xf   : > { %211 = vst.msk [vmem:[#allocation2 + $0x1b0] sm:$0xff] %vm206_vm0, %v4051_v1  ;;  %212 = vst.msk [vmem:[#allocation2 + $0x1b8] sm:$0xff] %vm206_vm0, %v4051_v1  ;;  %vm3690_vm3 = vcmask 125952  }
  0x10   : > { %223 = vst.msk [vmem:[#allocation2 + $0x18] sm:$0x1] %vm221_vm1, %v4051_v1  ;;  %224 = vst.msk [vmem:[#allocation2 + $0x30] sm:$0x1] %vm221_vm1, %v4051_v1  ;;  %s8110_s17 = smov (!%p193_p3, %s4087_s17), 3 }
  0x11   : > { %225 = vst.msk [vmem:[#allocation2 + $0x48] sm:$0x1] %vm221_vm1, %v4051_v1  ;;  %226 = vst.msk [vmem:[#allocation2 + $0x60] sm:$0x1] %vm221_vm1, %v4051_v1  ;;  %s3901_s18 = sshll.u32 %s8110_s17, 8  ;;  %s3902_s12 = sshll.u32 %s8110_s17, 5 }
  0x12   : > { %227 = vst.msk [vmem:[#allocation2 + $0x78] sm:$0x1] %vm221_vm1, %v4051_v1  ;;  %228 = vst.msk [vmem:[#allocation2 + $0x90] sm:$0x1] %vm221_vm1, %v4051_v1  ;;  %s4142_s23 = scalar_lea.vmem %s7287_s0, %s3901_s18  ;;  %s7172_s16 = scalar_lea.vmem %s7291_s4, %s3902_s12 }
  0x13   : > { %229 = vst.msk [vmem:[#allocation2 + $0xa8] sm:$0x1] %vm221_vm1, %v4051_v1  ;;  %230 = vst.msk [vmem:[#allocation2 + $0xc0] sm:$0x1] %vm221_vm1, %v4051_v1  ;;  %v300_v3 = vld [vmem:[%s4142_s23 + $0x30] sm:$0xff]  ;;  %v301_v4 = vld [vmem:[%s4142_s23 + $0x38] sm:$0xff] }
  0x14   : > { %231 = vst.msk [vmem:[#allocation2 + $0xd8] sm:$0x1] %vm221_vm1, %v4051_v1  ;;  %232 = vst.msk [vmem:[#allocation2 + $0xf0] sm:$0x1] %vm221_vm1, %v4051_v1  ;;  %v296_v5 = vld [vmem:[%s4142_s23 + $0x10] sm:$0xff]  ;;  %v371_v6 = vsub.f32 %v300_v3, %v4137_v2  ;;  %v372_v7 = vsub.f32 %v301_v4, %v4137_v2  ;;  %v297_v8 = vld [vmem:[%s4142_s23 + $0x18] sm:$0xff] }
  0x15   : > { %233 = vst.msk [vmem:[#allocation2 + $0x108] sm:$0x1] %vm221_vm1, %v4051_v1  ;;  %234 = vst.msk [vmem:[#allocation2 + $0x120] sm:$0x1] %vm221_vm1, %v4051_v1  ;;  %v367_v9 = vsub.f32 %v296_v5, %v4137_v2  ;;  %v304_v10 = vld [vmem:[%s4142_s23 + $0x50] sm:$0xff]  ;;  %v305_v11 = vld [vmem:[%s4142_s23 + $0x58] sm:$0xff]  ;;  %v368_v14 = vsub.f32 %v297_v8, %v4137_v2 }
  0x16   : > { %235 = vst.msk [vmem:[#allocation2 + $0x138] sm:$0x1] %vm221_vm1, %v4051_v1  ;;  %236 = vst.msk [vmem:[#allocation2 + $0x150] sm:$0x1] %vm221_vm1, %v4051_v1  ;;  %v375_v15 = vsub.f32 %v304_v10, %v4137_v2  ;;  %v376_v16 = vsub.f32 %v305_v11, %v4137_v2  ;;  %v308_v17 = vld [vmem:[%s4142_s23 + $0x70] sm:$0xff]  ;;  %v309_v18 = vld [vmem:[%s4142_s23 + $0x78] sm:$0xff] }
  0x17   : > { %237 = vst.msk [vmem:[#allocation2 + $0x168] sm:$0x1] %vm221_vm1, %v4051_v1  ;;  %238 = vst.msk [vmem:[#allocation2 + $0x180] sm:$0x1] %vm221_vm1, %v4051_v1  ;;  %v379_v19 = vsub.f32 %v308_v17, %v4137_v2  ;;  %v312_v20 = vld [vmem:[%s4142_s23 + $0x90] sm:$0xff]  ;;  %v313_v21 = vld [vmem:[%s4142_s23 + $0x98] sm:$0xff]  ;;  %v380_v22 = vsub.f32 %v309_v18, %v4137_v2 }
  0x18   : > { %241 = vst.msk [vmem:[#allocation2 + $0x1c8] sm:$0x1] %vm221_vm1, %v4051_v1  ;;  %242 = vst.msk [vmem:[#allocation2 + $0x1e0] sm:$0x1] %vm221_vm1, %v4051_v1  ;;  %v383_v23 = vsub.f32 %v312_v20, %v4137_v2  ;;  %v384_v24 = vsub.f32 %v313_v21, %v4137_v2  ;;  %v316_v25 = vld [vmem:[%s4142_s23 + $0xb0] sm:$0xff]  ;;  %v317_v26 = vld [vmem:[%s4142_s23 + $0xb8] sm:$0xff] }
  0x19   : > { %243 = vst.msk [vmem:[#allocation2 + $0x1f8] sm:$0x1] %vm221_vm1, %v4051_v1  ;;  %244 = vst.msk [vmem:[#allocation2 + $0x210] sm:$0x1] %vm221_vm1, %v4051_v1  ;;  %v320_v27 = vld [vmem:[%s4142_s23 + $0xd0] sm:$0xff]  ;;  %v387_v28 = vsub.f32 %v316_v25, %v4137_v2  ;;  %v388_v29 = vsub.f32 %v317_v26, %v4137_v2  ;;  %v321_v30 = vld [vmem:[%s4142_s23 + $0xd8] sm:$0xff] }
  0x1a   : > { %245 = vst.msk [vmem:[#allocation2 + $0x228] sm:$0x1] %vm221_vm1, %v4051_v1  ;;  %246 = vst.msk [vmem:[#allocation2 + $0x240] sm:$0x1] %vm221_vm1, %v4051_v1  ;;  %v391_v31 = vsub.f32 %v320_v27, %v4137_v2  ;;  %v332_v32 = vld [vmem:[%s4142_s23 + $0x130] sm:$0xff]  ;;  %v333_v33 = vld [vmem:[%s4142_s23 + $0x138] sm:$0xff]  ;;  %v392_v34 = vsub.f32 %v321_v30, %v4137_v2 }
  0x1b   : > { %247 = vst.msk [vmem:[#allocation2 + $0x258] sm:$0x1] %vm221_vm1, %v4051_v1  ;;  %248 = vst.msk [vmem:[#allocation2 + $0x270] sm:$0x1] %vm221_vm1, %v4051_v1  ;;  %v403_v35 = vsub.f32 %v332_v32, %v4137_v2  ;;  %v404_v36 = vsub.f32 %v333_v33, %v4137_v2  ;;  %v328_v37 = vld [vmem:[%s4142_s23 + $0x110] sm:$0xff]  ;;  %v329_v38 = vld [vmem:[%s4142_s23 + $0x118] sm:$0xff] }
  0x1c   : > { %249 = vst.msk [vmem:[#allocation2 + $0x288] sm:$0x1] %vm221_vm1, %v4051_v1  ;;  %250 = vst.msk [vmem:[#allocation2 + $0x2a0] sm:$0x1] %vm221_vm1, %v4051_v1  ;;  %v340_v39 = vld [vmem:[%s4142_s23 + $0x170] sm:$0xff]  ;;  %v399_v40 = vsub.f32 %v328_v37, %v4137_v2  ;;  %v400_v41 = vsub.f32 %v329_v38, %v4137_v2  ;;  %v341_v42 = vld [vmem:[%s4142_s23 + $0x178] sm:$0xff] }
  0x1d   : > { %251 = vst.msk [vmem:[#allocation2 + $0x2b8] sm:$0x1] %vm221_vm1, %v4051_v1  ;;  %252 = vst.msk [vmem:[#allocation2 + $0x2d0] sm:$0x1] %vm221_vm1, %v4051_v1  ;;  %v411_v43 = vsub.f32 %v340_v39, %v4137_v2  ;;  %v336_v44 = vld [vmem:[%s4142_s23 + $0x150] sm:$0xff]  ;;  %v337_v45 = vld [vmem:[%s4142_s23 + $0x158] sm:$0xff]  ;;  %v412_v46 = vsub.f32 %v341_v42, %v4137_v2 }
  0x1e   : > { %253 = vst.msk [vmem:[#allocation2 + $0x2e8] sm:$0x1] %vm221_vm1, %v4051_v1  ;;  %254 = vst.msk [vmem:[#allocation2 + $0x300] sm:$0x1] %vm221_vm1, %v4051_v1  ;;  %v407_v47 = vsub.f32 %v336_v44, %v4137_v2  ;;  %v408_v48 = vsub.f32 %v337_v45, %v4137_v2  ;;  %v348_v49 = vld [vmem:[%s4142_s23 + $0x1b0] sm:$0xff]  ;;  %v349_v50 = vld [vmem:[%s4142_s23 + $0x1b8] sm:$0xff] }
  0x1f   : > { %255 = vst.msk [vmem:[#allocation2 + $0x318] sm:$0x1] %vm221_vm1, %v4051_v1  ;;  %256 = vst.msk [vmem:[#allocation2 + $0x330] sm:$0x1] %vm221_vm1, %v4051_v1  ;;  %v344_v51 = vld [vmem:[%s4142_s23 + $0x190] sm:$0xff]  ;;  %v419_v52 = vsub.f32 %v348_v49, %v4137_v2  ;;  %v420_v53 = vsub.f32 %v349_v50, %v4137_v2  ;;  %v345_v54 = vld [vmem:[%s4142_s23 + $0x198] sm:$0xff] }
  0x20   : > { %222 = vst.msk [vmem:[#allocation2] sm:$0x1] %vm221_vm1, %v4051_v1  ;;  %240 = vst.msk [vmem:[#allocation2 + $0x1b0] sm:$0x1] %vm221_vm1, %v4051_v1  ;;  %v415_v55 = vsub.f32 %v344_v51, %v4137_v2  ;;  %v352_v56 = vld [vmem:[%s4142_s23 + $0x1d0] sm:$0xff]  ;;  %v416_v58 = vsub.f32 %v345_v54, %v4137_v2  ;;  %v353_v59 = vld [vmem:[%s4142_s23 + $0x1d8] sm:$0xff] }
  0x21   : > { %213 = vst.msk [vmem:[#allocation2 + $0x1c0] sm:$0x3] %vm209_vm2, %v4051_v1  ;;  %210 = vst.msk [vmem:[#allocation2 + $0x10] sm:$0x3] %vm209_vm2, %v4051_v1  ;;  %v423_v60 = vsub.f32 %v352_v56, %v4137_v2  ;;  %v424_v62 = vsub.f32 %v353_v59, %v4137_v2  ;;  %v294_v1 = vld [vmem:[%s4142_s23] sm:$0xff]  ;;  %v295_v3 = vld [vmem:[%s4142_s23 + $0x8] sm:$0xff] }
  0x22   : > { %436 = vst.msk [vmem:[#allocation2 + $0x61] sm:$0xff] %vm206_vm0, %v371_v6  ;;  %437 = vst.msk [vmem:[#allocation2 + $0x69] sm:$0xff] %vm206_vm0, %v372_v7  ;;  %v365_v5 = vsub.f32 %v294_v1, %v4137_v2  ;;  %v366_v6 = vsub.f32 %v295_v3, %v4137_v2  ;;  %v314_v17 = vld [vmem:[%s4142_s23 + $0xa0] sm:$0xff]  ;;  %v315_v18 = vld [vmem:[%s4142_s23 + $0xa8] sm:$0xff] }
  0x23   : > { %432 = vst.msk [vmem:[#allocation2 + $0x31] sm:$0xff] %vm206_vm0, %v367_v9  ;;  %433 = vst.msk [vmem:[#allocation2 + $0x39] sm:$0xff] %vm206_vm0, %v368_v14  ;;  %v306_v9 = vld [vmem:[%s4142_s23 + $0x60] sm:$0xff]  ;;  %v307_v14 = vld [vmem:[%s4142_s23 + $0x68] sm:$0xff]  ;;  %v385_v20 = vsub.f32 %v314_v17, %v4137_v2  ;;  %v386_v21 = vsub.f32 %v315_v18, %v4137_v2 }
  0x24   : > { %440 = vst.msk [vmem:[#allocation2 + $0x91] sm:$0xff] %vm206_vm0, %v375_v15  ;;  %441 = vst.msk [vmem:[#allocation2 + $0x99] sm:$0xff] %vm206_vm0, %v376_v16  ;;  %v377_v15 = vsub.f32 %v306_v9, %v4137_v2  ;;  %v378_v16 = vsub.f32 %v307_v14, %v4137_v2  ;;  %v331_v26 = vld [vmem:[%s4142_s23 + $0x128] sm:$0xff]  ;;  %v346_v33 = vld [vmem:[%s4142_s23 + $0x1a0] sm:$0xff] }
  0x25   : > { %444 = vst.msk [vmem:[#allocation2 + $0xc1] sm:$0xff] %vm206_vm0, %v379_v19  ;;  %445 = vst.msk [vmem:[#allocation2 + $0xc9] sm:$0xff] %vm206_vm0, %v380_v22  ;;  %v322_v19 = vld [vmem:[%s4142_s23 + $0xe0] sm:$0xff]  ;;  %v323_v22 = vld [vmem:[%s4142_s23 + $0xe8] sm:$0xff]  ;;  %v402_v30 = vsub.f32 %v331_v26, %v4137_v2  ;;  %v417_v37 = vsub.f32 %v346_v33, %v4137_v2  ;;  %v7292_v26 = vmov 1  }
  0x26   : > { %448 = vst.msk [vmem:[#allocation2 + $0xf1] sm:$0xff] %vm206_vm0, %v383_v23  ;;  %449 = vst.msk [vmem:[#allocation2 + $0xf9] sm:$0xff] %vm206_vm0, %v384_v24  ;;  %v393_v23 = vsub.f32 %v322_v19, %v4137_v2  ;;  %v330_v24 = vld [vmem:[%s4142_s23 + $0x120] sm:$0xff]  ;;  %v394_v25 = vsub.f32 %v323_v22, %v4137_v2  ;;  %v299_v44 = vld [vmem:[%s4142_s23 + $0x28] sm:$0xff] }
  0x27   : > { %v4153_v12 = vld [vmem:[#allocation2] ss:$2 sm:$0xff]  ;;  %v4155_v13 = vld [vmem:[#allocation2 + $0x1b0] ss:$2 sm:$0xff]  ;;  %452 = vst.msk [vmem:[#allocation2 + $0x121] sm:$0xff] %vm206_vm0, %v387_v28  ;;  %453 = vst.msk [vmem:[#allocation2 + $0x129] sm:$0xff] %vm206_vm0, %v388_v29  ;;  %v401_v27 = vsub.f32 %v330_v24, %v4137_v2 }
  0x28   : > { %528 = vperm.xlu0 %3915, %v4153_v12   ;;  %456 = vst.msk [vmem:[#allocation2 + $0x151] sm:$0xff] %vm206_vm0, %v391_v31  ;;  %457 = vst.msk [vmem:[#allocation2 + $0x159] sm:$0xff] %vm206_vm0, %v392_v34  ;;  %v338_v28 = vld [vmem:[%s4142_s23 + $0x160] sm:$0xff]  ;;  %v339_v31 = vld [vmem:[%s4142_s23 + $0x168] sm:$0xff] }
  0x29   : > { %468 = vst.msk [vmem:[#allocation2 + $0x211] sm:$0xff] %vm206_vm0, %v403_v35  ;;  %469 = vst.msk [vmem:[#allocation2 + $0x219] sm:$0xff] %vm206_vm0, %v404_v36  ;;  %v4221_v57 = vld [vmem:[#allocation2 + $0x60] ss:$2 sm:$0xff]  ;;  %v409_v32 = vsub.f32 %v338_v28, %v4137_v2  ;;  %v410_v35 = vsub.f32 %v339_v31, %v4137_v2  ;;  %v4346_v14 = vld [vmem:[#allocation2 + $0x1] ss:$2 sm:$0xff] }
  0x2a   : > { %464 = vst.msk [vmem:[#allocation2 + $0x1e1] sm:$0xff] %vm206_vm0, %v399_v40  ;;  %465 = vst.msk [vmem:[#allocation2 + $0x1e9] sm:$0xff] %vm206_vm0, %v400_v41  ;;  %538 = vperm.xlu1 %3916, %v4221_v57   ;;  %v4230_v61 = vld [vmem:[#allocation2 + $0x30] ss:$2 sm:$0xff]  ;;  %v347_v36 = vld [vmem:[%s4142_s23 + $0x1a8] sm:$0xff] }
  0x2b   : > { %476 = vst.msk [vmem:[#allocation2 + $0x271] sm:$0xff] %vm206_vm0, %v411_v43  ;;  %477 = vst.msk [vmem:[#allocation2 + $0x279] sm:$0xff] %vm206_vm0, %v412_v46  ;;  %v4237_v63 = vld [vmem:[#allocation2 + $0x90] ss:$2 sm:$0xff]  ;;  %v354_v38 = vld [vmem:[%s4142_s23 + $0x1e0] sm:$0xff]  ;;  %v418_v39 = vsub.f32 %v347_v36, %v4137_v2 }
  0x2c   : > { %568 = vperm.xlu0 %3915, %v4155_v13   ;;  %472 = vst.msk [vmem:[#allocation2 + $0x241] sm:$0xff] %vm206_vm0, %v407_v47  ;;  %473 = vst.msk [vmem:[#allocation2 + $0x249] sm:$0xff] %vm206_vm0, %v408_v48  ;;  %v4243_v4 = vld [vmem:[#allocation2 + $0xc0] ss:$2 sm:$0xff]  ;;  %v425_v41 = vsub.f32 %v354_v38, %v4137_v2  ;;  %v370_v47 = vsub.f32 %v299_v44, %v4137_v2  ;;  %v4367_v24 = vld [vmem:[#allocation2 + $0x91] ss:$2 sm:$0xff] }
  0x2d   : > { %484 = vst.msk [vmem:[#allocation2 + $0x2d1] sm:$0xff] %vm206_vm0, %v419_v52  ;;  %485 = vst.msk [vmem:[#allocation2 + $0x2d9] sm:$0xff] %vm206_vm0, %v420_v53  ;;  %v4252_v7 = vld [vmem:[#allocation2 + $0xf0] ss:$2 sm:$0xff]  ;;  %v355_v40 = vld [vmem:[%s4142_s23 + $0x1e8] sm:$0xff] }
  0x2e   : > { %480 = vst.msk [vmem:[#allocation2 + $0x2a1] sm:$0xff] %vm206_vm0, %v415_v55  ;;  %481 = vst.msk [vmem:[#allocation2 + $0x2a9] sm:$0xff] %vm206_vm0, %v416_v58  ;;  %543 = vperm.xlu1 %3916, %v4237_v63   ;;  %v4254_v8 = vld [vmem:[#allocation2 + $0x120] ss:$2 sm:$0xff]  ;;  %v426_v43 = vsub.f32 %v355_v40, %v4137_v2  ;;  %v324_v36 = vld [vmem:[%s4142_s23 + $0xf0] sm:$0xff] }
  0x2f   : > { %488 = vst.msk [vmem:[#allocation2 + $0x301] sm:$0xff] %vm206_vm0, %v423_v60  ;;  %489 = vst.msk [vmem:[#allocation2 + $0x309] sm:$0xff] %vm206_vm0, %v424_v62  ;;  %v4259_v10 = vld [vmem:[#allocation2 + $0x150] ss:$2 sm:$0xff]  ;;  %v298_v42 = vld [vmem:[%s4142_s23 + $0x20] sm:$0xff]  ;;  %v395_v38 = vsub.f32 %v324_v36, %v4137_v2 }
  0x30   : > { %533 = vperm.xlu0 %3915, %v4230_v61   ;;  %430 = vst.msk [vmem:[#allocation2 + $0x19] sm:$0xff] %vm206_vm0, %v365_v5  ;;  %431 = vst.msk [vmem:[#allocation2 + $0x21] sm:$0xff] %vm206_vm0, %v366_v6  ;;  %v4261_v11 = vld [vmem:[#allocation2 + $0x210] ss:$2 sm:$0xff]  ;;  %v369_v45 = vsub.f32 %v298_v42, %v4137_v2  ;;  %v310_v48 = vld [vmem:[%s4142_s23 + $0x80] sm:$0xff] }
  0x31   : > { %442 = vst.msk [vmem:[#allocation2 + $0xa9] sm:$0xff] %vm206_vm0, %v377_v15  ;;  %443 = vst.msk [vmem:[#allocation2 + $0xb1] sm:$0xff] %vm206_vm0, %v378_v16  ;;  %v4282_v29 = vld [vmem:[#allocation2 + $0x1e0] ss:$2 sm:$0xff]  ;;  %v381_v51 = vsub.f32 %v310_v48, %v4137_v2  ;;  %v4381_v28 = vld [vmem:[#allocation2 + $0x1e1] ss:$2 sm:$0xff] }
  0x32   : > { %553 = vperm.xlu1 %3916, %v4252_v7   ;;  %450 = vst.msk [vmem:[#allocation2 + $0x109] sm:$0xff] %vm206_vm0, %v385_v20  ;;  %451 = vst.msk [vmem:[#allocation2 + $0x111] sm:$0xff] %vm206_vm0, %v386_v21  ;;  %v4291_v34 = vld [vmem:[#allocation2 + $0x270] ss:$2 sm:$0xff]  ;;  %v311_v49 = vld [vmem:[%s4142_s23 + $0x88] sm:$0xff] }
  0x33   : > { %458 = vst.msk [vmem:[#allocation2 + $0x169] sm:$0xff] %vm206_vm0, %v393_v23  ;;  %459 = vst.msk [vmem:[#allocation2 + $0x171] sm:$0xff] %vm206_vm0, %v394_v25  ;;  %v4312_v46 = vld [vmem:[#allocation2 + $0x240] ss:$2 sm:$0xff]  ;;  %v382_v52 = vsub.f32 %v311_v49, %v4137_v2  ;;  %v4372_v25 = vld [vmem:[#allocation2 + $0xf1] ss:$2 sm:$0xff] }
  0x34   : > { %548 = vperm.xlu0 %3915, %v4243_v4   ;;  %466 = vst.msk [vmem:[#allocation2 + $0x1f9] sm:$0xff] %vm206_vm0, %v401_v27  ;;  %467 = vst.msk [vmem:[#allocation2 + $0x201] sm:$0xff] %vm206_vm0, %v402_v30  ;;  %v4319_v50 = vld [vmem:[#allocation2 + $0x2d0] ss:$2 sm:$0xff]  ;;  %v318_v53 = vld [vmem:[%s4142_s23 + $0xc0] sm:$0xff] }
  0x35   : > { %474 = vst.msk [vmem:[#allocation2 + $0x259] sm:$0xff] %vm206_vm0, %v409_v32  ;;  %475 = vst.msk [vmem:[#allocation2 + $0x261] sm:$0xff] %vm206_vm0, %v410_v35  ;;  %v319_v54 = vld [vmem:[%s4142_s23 + $0xc8] sm:$0xff]  ;;  %v389_v55 = vsub.f32 %v318_v53, %v4137_v2  ;;  %v326_v58 = vld [vmem:[%s4142_s23 + $0x100] sm:$0xff] }
  0x36   : > { %563 = vperm.xlu1 %3916, %v4259_v10   ;;  %482 = vst.msk [vmem:[#allocation2 + $0x2b9] sm:$0xff] %vm206_vm0, %v417_v37  ;;  %483 = vst.msk [vmem:[#allocation2 + $0x2c1] sm:$0xff] %vm206_vm0, %v418_v39  ;;  %v390_v56 = vsub.f32 %v319_v54, %v4137_v2  ;;  %v327_v59 = vld [vmem:[%s4142_s23 + $0x108] sm:$0xff]  ;;  %v397_v60 = vsub.f32 %v326_v58, %v4137_v2  ;;  %v334_v1 = vld [vmem:[%s4142_s23 + $0x140] sm:$0xff] }
  0x37   : > { %490 = vst.msk [vmem:[#allocation2 + $0x319] sm:$0xff] %vm206_vm0, %v425_v41  ;;  %491 = vst.msk [vmem:[#allocation2 + $0x321] sm:$0xff] %vm206_vm0, %v426_v43  ;;  %v398_v62 = vsub.f32 %v327_v59, %v4137_v2  ;;  %v4339_v3 = vld [vmem:[#allocation2 + $0x2a0] ss:$2 sm:$0xff]  ;;  %v405_v6 = vsub.f32 %v334_v1, %v4137_v2  ;;  %v4377_v27 = vld [vmem:[#allocation2 + $0x151] ss:$2 sm:$0xff] }
  0x38   : > { %558 = vperm.xlu0 %3915, %v4254_v8   ;;  %434 = vst.msk [vmem:[#allocation2 + $0x49] sm:$0xff] %vm206_vm0, %v369_v45  ;;  %435 = vst.msk [vmem:[#allocation2 + $0x51] sm:$0xff] %vm206_vm0, %v370_v47  ;;  %v335_v5 = vld [vmem:[%s4142_s23 + $0x148] sm:$0xff]  ;;  %v342_v9 = vld [vmem:[%s4142_s23 + $0x180] sm:$0xff] }
  0x39   : > { %446 = vst.msk [vmem:[#allocation2 + $0xd9] sm:$0xff] %vm206_vm0, %v381_v51  ;;  %447 = vst.msk [vmem:[#allocation2 + $0xe1] sm:$0xff] %vm206_vm0, %v382_v52  ;;  %v406_v15 = vsub.f32 %v335_v5, %v4137_v2  ;;  %v343_v16 = vld [vmem:[%s4142_s23 + $0x188] sm:$0xff]  ;;  %v413_v17 = vsub.f32 %v342_v9, %v4137_v2  ;;  %v350_v18 = vld [vmem:[%s4142_s23 + $0x1c0] sm:$0xff] }
  0x3a   : > { %573 = vperm.xlu1 %3916, %v4282_v29   ;;  %454 = vst.msk [vmem:[#allocation2 + $0x139] sm:$0xff] %vm206_vm0, %v389_v55  ;;  %455 = vst.msk [vmem:[#allocation2 + $0x141] sm:$0xff] %vm206_vm0, %v390_v56  ;;  %v414_v19 = vsub.f32 %v343_v16, %v4137_v2  ;;  %v351_v20 = vld [vmem:[%s4142_s23 + $0x1c8] sm:$0xff]  ;;  %v421_v21 = vsub.f32 %v350_v18, %v4137_v2  ;;  %v4397_v32 = vld [vmem:[#allocation2 + $0x32] ss:$2 sm:$0xff] }
  0x3b   : > { %462 = vst.msk [vmem:[#allocation2 + $0x1c9] sm:$0xff] %vm206_vm0, %v397_v60  ;;  %463 = vst.msk [vmem:[#allocation2 + $0x1d1] sm:$0xff] %vm206_vm0, %v398_v62  ;;  %v422_v22 = vsub.f32 %v351_v20, %v4137_v2  ;;  %v4363_v23 = vld [vmem:[#allocation2 + $0x300] ss:$2 sm:$0xff]  ;;  %v4385_v30 = vld [vmem:[#allocation2 + $0x241] ss:$2 sm:$0xff] }
  0x3c   : > { %578 = vperm.xlu0 %3915, %v4261_v11   ;;  %470 = vst.msk [vmem:[#allocation2 + $0x229] sm:$0xff] %vm206_vm0, %v405_v6  ;;  %471 = vst.msk [vmem:[#allocation2 + $0x231] sm:$0xff] %vm206_vm0, %v406_v15  ;;  %v4389_v31 = vld [vmem:[#allocation2 + $0x2a1] ss:$2 sm:$0xff]  ;;  %v4414_v33 = vld [vmem:[#allocation2 + $0x212] ss:$2 sm:$0xff] }
  0x3d   : > { %478 = vst.msk [vmem:[#allocation2 + $0x289] sm:$0xff] %vm206_vm0, %v413_v17  ;;  %479 = vst.msk [vmem:[#allocation2 + $0x291] sm:$0xff] %vm206_vm0, %v414_v19  ;;  %v4422_v35 = vld [vmem:[#allocation2 + $0x2d2] ss:$2 sm:$0xff]  ;;  %v4456_v49 = vld [vmem:[#allocation2 + $0x31] ss:$2 sm:$0xff] }
  0x3e   : > { %583 = vperm.xlu1 %3916, %v4312_v46   ;;  %486 = vst.msk [vmem:[#allocation2 + $0x2e9] sm:$0xff] %vm206_vm0, %v421_v21  ;;  %487 = vst.msk [vmem:[#allocation2 + $0x2f1] sm:$0xff] %vm206_vm0, %v422_v22  ;;  %v325_v37 = vld [vmem:[%s4142_s23 + $0xf8] sm:$0xff]  ;;  %v4436_v40 = vld [vmem:[#allocation2 + $0xa8] ss:$2 sm:$0xff] }
  0x3f   : > { %460 = vst.msk [vmem:[#allocation2 + $0x181] sm:$0xff] %vm206_vm0, %v395_v38  ;;  %v4432_v39 = vld [vmem:[#allocation2 + $0x18] ss:$2 sm:$0xff]  ;;  %v4440_v41 = vld [vmem:[#allocation2 + $0x108] ss:$2 sm:$0xff] }
  0x40   : > { %588 = vperm.xlu0 %3915, %v4291_v34   ;;  %v4444_v42 = vld [vmem:[#allocation2 + $0x168] ss:$2 sm:$0xff]  ;;  %v357_v44 = vld [vmem:[%s4142_s23 + $0x1f8] sm:$0xff]  ;;  %v4463_v51 = vld [vmem:[#allocation2 + $0x61] ss:$2 sm:$0xff] }
  0x41   : > { %v356_v43 = vld [vmem:[%s4142_s23 + $0x1f0] sm:$0xff]  ;;  %v428_v47 = vsub.f32 %v357_v44, %v4137_v2  ;;  %v4454_v48 = vld [vmem:[#allocation2 + $0x1f8] ss:$2 sm:$0xff]  ;;  %v4469_v53 = vld [vmem:[#allocation2 + $0xc1] ss:$2 sm:$0xff] }
  0x42   : > { %593 = vperm.xlu1 %3916, %v4339_v3   ;;  %v427_v45 = vsub.f32 %v356_v43, %v4137_v2  ;;  %v4466_v52 = vld [vmem:[#allocation2 + $0x2b8] ss:$2 sm:$0xff]  ;;  %v4475_v55 = vld [vmem:[#allocation2 + $0x121] ss:$2 sm:$0xff]  ;;  %v4481_v58 = vld [vmem:[#allocation2 + $0x1b1] ss:$2 sm:$0xff] }
  0x43   : > { %493 = vst.msk [vmem:[#allocation2 + $0x339] sm:$0xff] %vm206_vm0, %v428_v47  ;;  %v4472_v54 = vld [vmem:[#allocation2 + $0x318] ss:$2 sm:$0xff]  ;;  %v4478_v56 = vld [vmem:[#allocation2 + $0x49] ss:$2 sm:$0xff] }
  0x44   : > { %598 = vperm.xlu0 %3915, %v4319_v50   ;;  %492 = vst.msk [vmem:[#allocation2 + $0x331] sm:$0xff] %vm206_vm0, %v427_v45  ;;  %v4484_v59 = vld [vmem:[#allocation2 + $0xd9] ss:$2 sm:$0xff]  ;;  %v4500_v9 = vld [vmem:[#allocation2 + $0x1c9] ss:$2 sm:$0xff] }
  0x45   : > { %v4489_v62 = vld [vmem:[#allocation2 + $0x211] ss:$2 sm:$0xff]  ;;  %v2248_v43 = vld [vmem:[#allocation2 + $0x1a] ss:$2 sm:$0xff] }
  0x46   : > { %603 = vperm.xlu1 %3916, %v4363_v23   ;;  %v4492_v1 = vld [vmem:[#allocation2 + $0x139] ss:$2 sm:$0xff]  ;;  %v4510_v18 = vld [vmem:[#allocation2 + $0x229] ss:$2 sm:$0xff] }
  0x47   : > { %v4497_v6 = vld [vmem:[#allocation2 + $0x271] ss:$2 sm:$0xff] }
  0x48   : > { %879 = vperm.xlu0 %3915, %v4346_v14   ;;  %v4507_v17 = vld [vmem:[#allocation2 + $0x2d1] ss:$2 sm:$0xff] }
  0x49   : > { %v4518_v21 = vld [vmem:[#allocation2 + $0x289] ss:$2 sm:$0xff] }
  0x4a   : > { %3917 = vset.pattern.permute.xlu1 %v7292_v26 }
  0x4b   : > { %648 = vperm.xlu1 %3917, %v4230_v61   ;;  %v4393_v61 = vld [vmem:[#allocation2 + $0x301] ss:$2 sm:$0xff] }
  0x4c   : > { %894 = vperm.xlu0 %3915, %v4367_v24  }
  0x4f   : > { %652 = vperm.xlu1 %3917, %v4221_v57  }
  0x50   : > { %904 = vperm.xlu0 %3915, %v4372_v25  }
  0x53   : > { %660 = vperm.xlu1 %3917, %v4243_v4   ;;  %v4401_v4 = vld [vmem:[#allocation2 + $0xc2] ss:$2 sm:$0xff] }
  0x54   : > { %914 = vperm.xlu0 %3915, %v4377_v27  }
  0x57   : > { %668 = vperm.xlu1 %3917, %v4254_v8   ;;  %v7296_v8 = vmov 2  }
  0x58   : > { %924 = vperm.xlu0 %3915, %v4381_v28  }
  0x5b   : > { %676 = vperm.xlu1 %3917, %v4155_v13   ;;  %v4405_v13 = vld [vmem:[#allocation2 + $0x122] ss:$2 sm:$0xff] }
  0x5c   : > { %934 = vperm.xlu0 %3915, %v4385_v30  }
  0x5f   : > { %684 = vperm.xlu1 %3917, %v4261_v11   ;;  %v4410_v11 = vld [vmem:[#allocation2 + $0x1b2] ss:$2 sm:$0xff] }
  0x60   : > { %944 = vperm.xlu0 %3915, %v4389_v31  }
  0x63   : > { %692 = vperm.xlu1 %3917, %v4291_v34   ;;  %v4418_v34 = vld [vmem:[#allocation2 + $0x272] ss:$2 sm:$0xff] }
  0x64   : > { %954 = vperm.xlu0 %3915, %v4393_v61  }
  0x67   : > { %700 = vperm.xlu1 %3917, %v4319_v50   ;;  %v4460_v50 = vld [vmem:[#allocation2 + $0x258] ss:$2 sm:$0xff] }
  0x68   : > { %1235 = vperm.xlu0 %3915, %v4397_v32  }
  0x6b   : > { %3918 = vset.pattern.permute.xlu1 %v7296_v8 }
  0x6c   : > { %1250 = vperm.xlu0 %3915, %v4401_v4   ;;  %745 = vperm.xlu1 %3918, %v4153_v12  }
  0x70   : > { %1260 = vperm.xlu0 %3915, %v4405_v13   ;;  %753 = vperm.xlu1 %3918, %v4221_v57   ;;  %v396_v57 = vsub.f32 %v325_v37, %v4137_v2  ;;  %v4527_v37 = vld [vmem:[#allocation2 + $0x2e9] ss:$2 sm:$0xff] }
  0x72   : > { %461 = vst.msk [vmem:[#allocation2 + $0x189] sm:$0xff] %vm206_vm0, %v396_v57 }
  0x74   : > { %1270 = vperm.xlu0 %3915, %v4410_v11   ;;  %757 = vperm.xlu1 %3918, %v4237_v63  }
  0x78   : > { %1280 = vperm.xlu0 %3915, %v4414_v33   ;;  %765 = vperm.xlu1 %3918, %v4252_v7  }
  0x7c   : > { %1290 = vperm.xlu0 %3915, %v4418_v34   ;;  %773 = vperm.xlu1 %3918, %v4259_v10  }
  0x80   : > { %1300 = vperm.xlu0 %3915, %v4422_v35   ;;  %781 = vperm.xlu1 %3918, %v4282_v29  }
  0x84   : > { %1580 = vperm.xlu0 %3915, %v4432_v39   ;;  %789 = vperm.xlu1 %3918, %v4312_v46  }
  0x88   : > { %1595 = vperm.xlu0 %3915, %v4436_v40   ;;  %797 = vperm.xlu1 %3918, %v4339_v3  }
  0x8c   : > { %1605 = vperm.xlu0 %3915, %v4440_v41   ;;  %805 = vperm.xlu1 %3918, %v4363_v23  }
  0x90   : > { %1615 = vperm.xlu0 %3915, %v4444_v42   ;;  %3919 = vset.pattern.permute.xlu1 %v7294_v0  ;;  %v2258_v0 = vld [vmem:[#allocation2 + $0x10a] ss:$2 sm:$0xff] }
  0x91   : > { %884 = vperm.xlu1 %3919, %v4456_v49  }
  0x94   : > { %1625 = vperm.xlu0 %3915, %v4454_v48  }
  0x95   : > { %889 = vperm.xlu1 %3919, %v4463_v51  }
  0x98   : > { %1635 = vperm.xlu0 %3915, %v4460_v50  }
  0x99   : > { %899 = vperm.xlu1 %3919, %v4469_v53  }
  0x9c   : > { %1645 = vperm.xlu0 %3915, %v4466_v52  }
  0x9d   : > { %909 = vperm.xlu1 %3919, %v4475_v55  }
  0xa0   : > { %1655 = vperm.xlu0 %3915, %v4472_v54  }
  0xa1   : > { %919 = vperm.xlu1 %3919, %v4481_v58  }
  0xa4   : > { %1936 = vperm.xlu0 %3915, %v4478_v56  }
  0xa5   : > { %929 = vperm.xlu1 %3919, %v4489_v62  }
  0xa7   : > { %v4486_v60 = vpop.permute.xlu0 %528 }
  0xa8   : > { %1951 = vperm.xlu0 %3915, %v4484_v59  }
  0xa9   : > { %v4502_v15 = vpop.permute.xlu1 %538  ;;  %939 = vperm.xlu1 %3919, %v4497_v6  }
  0xaa   : > { %7325 = vst [vmem:[#allocation3_spill] sm:$0xff] %v4502_v15 }
  0xab   : > { %v4494_v5 = vpop.permute.xlu0 %568 }
  0xac   : > { %1961 = vperm.xlu0 %3915, %v4492_v1  }
  0xad   : > { %v4512_v19 = vpop.permute.xlu1 %543  ;;  %949 = vperm.xlu1 %3919, %v4507_v17  }
  0xaf   : > { %v4505_v16 = vpop.permute.xlu0 %533 }
  0xb0   : > { %7326 = vst [vmem:[#allocation4_spill] sm:$0xff] %v4505_v16  ;;  %1971 = vperm.xlu0 %3915, %v4500_v9   ;;  %v2262_v16 = vld [vmem:[#allocation2 + $0x16a] ss:$2 sm:$0xff] }
  0xb1   : > { %v4520_v22 = vpop.permute.xlu1 %553  ;;  %3920 = vset.pattern.permute.xlu1 %v7292_v26 }
  0xb2   : > { %995 = vperm.xlu1 %3920, %v4346_v14   ;;  %v2254_v14 = vld [vmem:[#allocation2 + $0xaa] ss:$2 sm:$0xff] }
  0xb3   : > { %v4515_v20 = vpop.permute.xlu0 %548 }
  0xb4   : > { %1981 = vperm.xlu0 %3915, %v4510_v18  }
  0xb5   : > { %v4529_v38 = vpop.permute.xlu1 %563 }
  0xb6   : > { %7328 = vst [vmem:[#allocation6_spill] sm:$0xff] %v4529_v38  ;;  %1003 = vperm.xlu1 %3920, %v4463_v51  }
  0xb7   : > { %v4523_v36 = vpop.permute.xlu0 %558 }
  0xb8   : > { %7327 = vst [vmem:[#allocation5_spill] sm:$0xff] %v4523_v36  ;;  %1991 = vperm.xlu0 %3915, %v4518_v21   ;;  %v3313_v36 = vld [vmem:[#allocation2 + $0x152] ss:$2 sm:$0xff] }
  0xb9   : > { %v4535_v44 = vpop.permute.xlu1 %573 }
  0xba   : > { %7330 = vst [vmem:[#allocation8_spill] sm:$0xff] %v4535_v44  ;;  %1007 = vperm.xlu1 %3920, %v4367_v24  }
  0xbb   : > { %v4531_v57 = vpop.permute.xlu0 %578 }
  0xbc   : > { %7329 = vst [vmem:[#allocation7_spill] sm:$0xff] %v4531_v57  ;;  %2001 = vperm.xlu0 %3915, %v4527_v37  }
  0xbd   : > { %v4540_v47 = vpop.permute.xlu1 %583 }
  0xbe   : > { %7332 = vst [vmem:[#allocation10_spill] sm:$0xff] %v4540_v47  ;;  %1015 = vperm.xlu1 %3920, %v4372_v25  }
  0xbf   : > { %v4537_v45 = vpop.permute.xlu0 %588 }
  0xc0   : > { %7331 = vst [vmem:[#allocation9_spill] sm:$0xff] %v4537_v45  ;;  %2282 = vperm.xlu0 %3915, %v2248_v43   ;;  %v2266_v43 = vld [vmem:[#allocation2 + $0x1fa] ss:$2 sm:$0xff] }
  0xc1   : > { %v4545_v8 = vpop.permute.xlu1 %593 }
  0xc2   : > { %7334 = vst [vmem:[#allocation12_spill] sm:$0xff] %v4545_v8  ;;  %1023 = vperm.xlu1 %3920, %v4377_v27   ;;  %v4565_v27 = vld [vmem:[#allocation2 + $0x2ba] ss:$2 sm:$0xff] }
  0xc3   : > { %v4542_v26 = vpop.permute.xlu0 %598 }
  0xc4   : > { %7333 = vst [vmem:[#allocation11_spill] sm:$0xff] %v4542_v26  ;;  %2297 = vperm.xlu0 %3915, %v2254_v14   ;;  %v2270_v14 = vld [vmem:[#allocation2 + $0x25a] ss:$2 sm:$0xff] }
  0xc5   : > { %v4550_v45 = vpop.permute.xlu1 %603 }
  0xc6   : > { %7336 = vst [vmem:[#allocation14_spill] sm:$0xff] %v4550_v45  ;;  %1031 = vperm.xlu1 %3920, %v4381_v28  }
  0xc7   : > { %v4547_v15 = vpop.permute.xlu0 %879 }
  0xc8   : > { %7335 = vst [vmem:[#allocation13_spill] sm:$0xff] %v4547_v15  ;;  %2307 = vperm.xlu0 %3915, %v2258_v0  }
  0xca   : > { %1039 = vperm.xlu1 %3920, %v4385_v30   ;;  %v4558_v25 = vpop.permute.xlu1 %648 }
  0xcb   : > { %v4552_v24 = vpop.permute.xlu0 %894  ;;  %7339 = vst [vmem:[#allocation17_spill] sm:$0xff] %v4558_v25 }
  0xcc   : > { %7337 = vst [vmem:[#allocation15_spill] sm:$0xff] %v4552_v24  ;;  %2317 = vperm.xlu0 %3915, %v2262_v16   ;;  %v4573_v16 = vld [vmem:[#allocation2 + $0x31a] ss:$2 sm:$0xff] }
  0xce   : > { %1047 = vperm.xlu1 %3920, %v4389_v31   ;;  %v4563_v0 = vpop.permute.xlu1 %652  ;;  %v7345_v31 = vmov 2  }
  0xcf   : > { %v4555_v26 = vpop.permute.xlu0 %904  ;;  %7341 = vst [vmem:[#allocation19_spill] sm:$0xff] %v4563_v0 }
  0xd0   : > { %7338 = vst [vmem:[#allocation16_spill] sm:$0xff] %v4555_v26  ;;  %2327 = vperm.xlu0 %3915, %v2266_v43   ;;  %v303_v26 = vld [vmem:[%s4142_s23 + $0x48] sm:$0xff] }
  0xd1   : > { %v374_v8 = vsub.f32 %v303_v26, %v4137_v2 }
  0xd2   : > { %1055 = vperm.xlu1 %3920, %v4393_v61   ;;  %v4570_v30 = vpop.permute.xlu1 %660 }
  0xd3   : > { %v4560_v15 = vpop.permute.xlu0 %914  ;;  %7343 = vst [vmem:[#allocation21_spill] sm:$0xff] %v4570_v30  ;;  %439 = vst.msk [vmem:[#allocation2 + $0x81] sm:$0xff] %vm206_vm0, %v374_v8 }
  0xd4   : > { %7340 = vst [vmem:[#allocation18_spill] sm:$0xff] %v4560_v15  ;;  %2337 = vperm.xlu0 %3915, %v2270_v14   ;;  %v2601_v14 = vld [vmem:[#allocation2 + $0x60] ss:$2 sm:$0xff] }
  0xd5   : > { %v302_v15 = vld [vmem:[%s4142_s23 + $0x40] sm:$0xff] }
  0xd6   : > { %3921 = vset.pattern.permute.xlu1 %v7345_v31  ;;  %v4578_v0 = vpop.permute.xlu1 %668  ;;  %v373_v45 = vsub.f32 %v302_v15, %v4137_v2  ;;  %v2619_v2 = vld [vmem:[#allocation2 + $0x240] ss:$2 sm:$0xff] }
  0xd7   : > { %v4567_v28 = vpop.permute.xlu0 %924  ;;  %7346 = vst [vmem:[#allocation23_spill] sm:$0xff] %v4578_v0  ;;  %1100 = vperm.xlu1 %3921, %v4456_v49  }
  0xd8   : > { %7342 = vst [vmem:[#allocation20_spill] sm:$0xff] %v4567_v28  ;;  %2347 = vperm.xlu0 %3915, %v4565_v27   ;;  %v2607_v28 = vld [vmem:[#allocation2 + $0xf0] ss:$2 sm:$0xff]  ;;  %438 = vst.msk [vmem:[#allocation2 + $0x79] sm:$0xff] %vm206_vm0, %v373_v45  ;;  %v2623_v45 = vld [vmem:[#allocation2 + $0x2a0] ss:$2 sm:$0xff] }
  0xda   : > { %v4584_v61 = vpop.permute.xlu1 %676 }
  0xdb   : > { %v4575_v43 = vpop.permute.xlu0 %934  ;;  %7348 = vst [vmem:[#allocation25_spill] sm:$0xff] %v4584_v61  ;;  %1104 = vperm.xlu1 %3921, %v4463_v51   ;;  %v4645_v61 = vld [vmem:[#allocation2 + $0xf2] ss:$2 sm:$0xff] }
  0xdc   : > { %7344 = vst [vmem:[#allocation22_spill] sm:$0xff] %v4575_v43  ;;  %2357 = vperm.xlu0 %3915, %v4573_v16  }
  0xde   : > { %v4591_v24 = vpop.permute.xlu1 %684 }
  0xdf   : > { %v4582_v25 = vpop.permute.xlu0 %944  ;;  %7350 = vst [vmem:[#allocation27_spill] sm:$0xff] %v4591_v24  ;;  %1112 = vperm.xlu1 %3921, %v4469_v53  }
  0xe0   : > { %7347 = vst [vmem:[#allocation24_spill] sm:$0xff] %v4582_v25  ;;  %2638 = vperm.xlu0 %3915, %v2601_v14   ;;  %v2611_v25 = vld [vmem:[#allocation2 + $0x150] ss:$2 sm:$0xff] }
  0xe2   : > { %v4600_v14 = vpop.permute.xlu1 %692 }
  0xe3   : > { %v4589_v43 = vpop.permute.xlu0 %954  ;;  %7352 = vst [vmem:[#allocation29_spill] sm:$0xff] %v4600_v14  ;;  %1120 = vperm.xlu1 %3921, %v4475_v55   ;;  %v4638_v14 = vld [vmem:[#allocation2 + $0x92] ss:$2 sm:$0xff] }
  0xe4   : > { %7349 = vst [vmem:[#allocation26_spill] sm:$0xff] %v4589_v43  ;;  %2653 = vperm.xlu0 %3915, %v2607_v28   ;;  %v2615_v43 = vld [vmem:[#allocation2 + $0x1e0] ss:$2 sm:$0xff] }
  0xe6   : > { %v4605_v15 = vpop.permute.xlu1 %700 }
  0xe7   : > { %v4598_v51 = vpop.permute.xlu0 %1235  ;;  %7354 = vst [vmem:[#allocation31_spill] sm:$0xff] %v4605_v15  ;;  %1128 = vperm.xlu1 %3921, %v4481_v58   ;;  %v4631_v15 = vld [vmem:[#allocation2 + $0x62] ss:$2 sm:$0xff] }
  0xe8   : > { %7351 = vst [vmem:[#allocation28_spill] sm:$0xff] %v4598_v51  ;;  %2663 = vperm.xlu0 %3915, %v2611_v25   ;;  %v2627_v51 = vld [vmem:[#allocation2 + $0x300] ss:$2 sm:$0xff] }
  0xeb   : > { %v4603_v24 = vpop.permute.xlu0 %1250  ;;  %1136 = vperm.xlu1 %3921, %v4489_v62   ;;  %v4611_v8 = vpop.permute.xlu1 %745 }
  0xec   : > { %7353 = vst [vmem:[#allocation30_spill] sm:$0xff] %v4603_v24  ;;  %2673 = vperm.xlu0 %3915, %v2615_v43   ;;  %7356 = vst [vmem:[#allocation33_spill] sm:$0xff] %v4611_v8  ;;  %v4623_v24 = vld [vmem:[#allocation2 + $0x2] ss:$2 sm:$0xff] }
  0xef   : > { %v4608_v26 = vpop.permute.xlu0 %1260  ;;  %1144 = vperm.xlu1 %3921, %v4497_v6   ;;  %v4616_v28 = vpop.permute.xlu1 %753 }
  0xf0   : > { %7355 = vst [vmem:[#allocation32_spill] sm:$0xff] %v4608_v26  ;;  %2683 = vperm.xlu0 %3915, %v2619_v2   ;;  %7358 = vst [vmem:[#allocation35_spill] sm:$0xff] %v4616_v28  ;;  %v2950_v2 = vld [vmem:[#allocation2 + $0x31] ss:$2 sm:$0xff]  ;;  %v2956_v28 = vld [vmem:[#allocation2 + $0xc1] ss:$2 sm:$0xff] }
  0xf3   : > { %v4613_v25 = vpop.permute.xlu0 %1270  ;;  %1152 = vperm.xlu1 %3921, %v4507_v17   ;;  %v4621_v26 = vpop.permute.xlu1 %757 }
  0xf4   : > { %7357 = vst [vmem:[#allocation34_spill] sm:$0xff] %v4613_v25  ;;  %2693 = vperm.xlu0 %3915, %v2623_v45   ;;  %7360 = vst [vmem:[#allocation37_spill] sm:$0xff] %v4621_v26  ;;  %v7362_v25 = vmov 0   ;;  %v2960_v26 = vld [vmem:[#allocation2 + $0x121] ss:$2 sm:$0xff] }
  0xf7   : > { %v4618_v43 = vpop.permute.xlu0 %1280  ;;  %3922 = vset.pattern.permute.xlu1 %v7362_v25  ;;  %v4628_v45 = vpop.permute.xlu1 %765 }
  0xf8   : > { %7359 = vst [vmem:[#allocation36_spill] sm:$0xff] %v4618_v43  ;;  %2703 = vperm.xlu0 %3915, %v2627_v51   ;;  %7363 = vst [vmem:[#allocation39_spill] sm:$0xff] %v4628_v45  ;;  %1230 = vperm.xlu1 %3922, %v4623_v24   ;;  %v2964_v45 = vld [vmem:[#allocation2 + $0x181] ss:$2 sm:$0xff] }
  0xfb   : > { %v4625_v8 = vpop.permute.xlu0 %1290  ;;  %v4635_v43 = vpop.permute.xlu1 %773 }
  0xfc   : > { %7361 = vst [vmem:[#allocation38_spill] sm:$0xff] %v4625_v8  ;;  %2984 = vperm.xlu0 %3915, %v2950_v2   ;;  %7365 = vst [vmem:[#allocation41_spill] sm:$0xff] %v4635_v43  ;;  %1240 = vperm.xlu1 %3922, %v4631_v15   ;;  %v2968_v43 = vld [vmem:[#allocation2 + $0x211] ss:$2 sm:$0xff] }
  0xff   : > { %v4633_v51 = vpop.permute.xlu0 %1300  ;;  %v4642_v8 = vpop.permute.xlu1 %781 }
 0x100   : > { %7364 = vst [vmem:[#allocation40_spill] sm:$0xff] %v4633_v51  ;;  %2999 = vperm.xlu0 %3915, %v2956_v28   ;;  %7367 = vst [vmem:[#allocation43_spill] sm:$0xff] %v4642_v8  ;;  %1245 = vperm.xlu1 %3922, %v4638_v14   ;;  %v4652_v51 = vld [vmem:[#allocation2 + $0x152] ss:$2 sm:$0xff]  ;;  %v2972_v8 = vld [vmem:[#allocation2 + $0x271] ss:$2 sm:$0xff] }
 0x103   : > { %v4640_v2 = vpop.permute.xlu0 %1580  ;;  %v4649_v28 = vpop.permute.xlu1 %789 }
 0x104   : > { %7366 = vst [vmem:[#allocation42_spill] sm:$0xff] %v4640_v2  ;;  %3009 = vperm.xlu0 %3915, %v2960_v26   ;;  %7369 = vst [vmem:[#allocation45_spill] sm:$0xff] %v4649_v28  ;;  %1255 = vperm.xlu1 %3922, %v4645_v61   ;;  %v4659_v2 = vld [vmem:[#allocation2 + $0x1e2] ss:$2 sm:$0xff]  ;;  %v2976_v28 = vld [vmem:[#allocation2 + $0x2d1] ss:$2 sm:$0xff] }
 0x107   : > { %v4647_v0 = vpop.permute.xlu0 %1595  ;;  %v4656_v26 = vpop.permute.xlu1 %797 }
 0x108   : > { %7368 = vst [vmem:[#allocation44_spill] sm:$0xff] %v4647_v0  ;;  %3019 = vperm.xlu0 %3915, %v2964_v45   ;;  %7371 = vst [vmem:[#allocation47_spill] sm:$0xff] %v4656_v26  ;;  %1265 = vperm.xlu1 %3922, %v4652_v51   ;;  %v4666_v0 = vld [vmem:[#allocation2 + $0x242] ss:$2 sm:$0xff]  ;;  %v2980_v26 = vld [vmem:[#allocation2 + $0x331] ss:$2 sm:$0xff] }
 0x10b   : > { %v4654_v30 = vpop.permute.xlu0 %1605  ;;  %v4663_v45 = vpop.permute.xlu1 %805 }
 0x10c   : > { %7370 = vst [vmem:[#allocation46_spill] sm:$0xff] %v4654_v30  ;;  %3029 = vperm.xlu0 %3915, %v2968_v43   ;;  %7373 = vst [vmem:[#allocation49_spill] sm:$0xff] %v4663_v45  ;;  %1275 = vperm.xlu1 %3922, %v4659_v2   ;;  %v4673_v30 = vld [vmem:[#allocation2 + $0x2a2] ss:$2 sm:$0xff] }
 0x10d   : > { %v3303_v45 = vld [vmem:[#allocation2 + $0x62] ss:$2 sm:$0xff] }
 0x10f   : > { %v4661_v47 = vpop.permute.xlu0 %1615 }
 0x110   : > { %7372 = vst [vmem:[#allocation48_spill] sm:$0xff] %v4661_v47  ;;  %3039 = vperm.xlu0 %3915, %v2972_v8   ;;  %1285 = vperm.xlu1 %3922, %v4666_v0   ;;  %v4671_v43 = vpop.permute.xlu1 %884  ;;  %v4680_v47 = vld [vmem:[#allocation2 + $0x302] ss:$2 sm:$0xff] }
 0x111   : > { %7375 = vst [vmem:[#allocation51_spill] sm:$0xff] %v4671_v43  ;;  %v3309_v43 = vld [vmem:[#allocation2 + $0xf2] ss:$2 sm:$0xff] }
 0x113   : > { %v4668_v44 = vpop.permute.xlu0 %1625 }
 0x114   : > { %7374 = vst [vmem:[#allocation50_spill] sm:$0xff] %v4668_v44  ;;  %3049 = vperm.xlu0 %3915, %v2976_v28   ;;  %1295 = vperm.xlu1 %3922, %v4673_v30   ;;  %v4678_v8 = vpop.permute.xlu1 %889 }
 0x115   : > { %7377 = vst [vmem:[#allocation53_spill] sm:$0xff] %v4678_v8 }
 0x117   : > { %v4675_v57 = vpop.permute.xlu0 %1635 }
 0x118   : > { %7376 = vst [vmem:[#allocation52_spill] sm:$0xff] %v4675_v57  ;;  %3059 = vperm.xlu0 %3915, %v2980_v26   ;;  %1305 = vperm.xlu1 %3922, %v4680_v47   ;;  %v4685_v28 = vpop.permute.xlu1 %899  ;;  %v7381_v57 = vmov 1  }
 0x119   : > { %7379 = vst [vmem:[#allocation55_spill] sm:$0xff] %v4685_v28 }
 0x11b   : > { %v4682_v38 = vpop.permute.xlu0 %1645 }
 0x11c   : > { %7378 = vst [vmem:[#allocation54_spill] sm:$0xff] %v4682_v38  ;;  %3340 = vperm.xlu0 %3915, %v3303_v45   ;;  %3923 = vset.pattern.permute.xlu1 %v7381_v57  ;;  %v4690_v26 = vpop.permute.xlu1 %909  ;;  %v3317_v45 = vld [vmem:[#allocation2 + $0x1e2] ss:$2 sm:$0xff] }
 0x11d   : > { %7382 = vst [vmem:[#allocation57_spill] sm:$0xff] %v4690_v26  ;;  %1350 = vperm.xlu1 %3923, %v4397_v32  }
 0x11f   : > { %v4687_v44 = vpop.permute.xlu0 %1655 }
 0x120   : > { %7380 = vst [vmem:[#allocation56_spill] sm:$0xff] %v4687_v44  ;;  %3355 = vperm.xlu0 %3915, %v3309_v43   ;;  %v4695_v38 = vpop.permute.xlu1 %919  ;;  %v3321_v43 = vld [vmem:[#allocation2 + $0x242] ss:$2 sm:$0xff] }
 0x121   : > { %7384 = vst [vmem:[#allocation59_spill] sm:$0xff] %v4695_v38  ;;  %1354 = vperm.xlu1 %3923, %v4631_v15  }
 0x123   : > { %v4693_v8 = vpop.permute.xlu0 %1936 }
 0x124   : > { %7383 = vst [vmem:[#allocation58_spill] sm:$0xff] %v4693_v8  ;;  %3365 = vperm.xlu0 %3915, %v3313_v36   ;;  %v4700_v44 = vpop.permute.xlu1 %929  ;;  %v3325_v8 = vld [vmem:[#allocation2 + $0x2a2] ss:$2 sm:$0xff] }
 0x125   : > { %1362 = vperm.xlu1 %3923, %v4401_v4  }
 0x127   : > { %v4698_v28 = vpop.permute.xlu0 %1951 }
 0x128   : > { %7385 = vst [vmem:[#allocation60_spill] sm:$0xff] %v4698_v28  ;;  %3375 = vperm.xlu0 %3915, %v3317_v45   ;;  %v4705_v32 = vpop.permute.xlu1 %939  ;;  %v3329_v28 = vld [vmem:[#allocation2 + $0x302] ss:$2 sm:$0xff] }
 0x129   : > { %1370 = vperm.xlu1 %3923, %v4405_v13  }
 0x12b   : > { %v4703_v26 = vpop.permute.xlu0 %1961 }
 0x12c   : > { %7386 = vst [vmem:[#allocation61_spill] sm:$0xff] %v4703_v26  ;;  %3385 = vperm.xlu0 %3915, %v3321_v43   ;;  %v4710_v38 = vpop.permute.xlu1 %949 }
 0x12d   : > { %1378 = vperm.xlu1 %3923, %v4410_v11  }
 0x12f   : > { %v4708_v36 = vpop.permute.xlu0 %1971 }
 0x130   : > { %3395 = vperm.xlu0 %3915, %v3325_v8  }
 0x131   : > { %1386 = vperm.xlu1 %3923, %v4414_v33   ;;  %v4716_v4 = vpop.permute.xlu1 %995 }
 0x133   : > { %v4713_v45 = vpop.permute.xlu0 %1981 }
 0x134   : > { %3405 = vperm.xlu0 %3915, %v3329_v28  }
 0x135   : > { %1394 = vperm.xlu1 %3923, %v4418_v34   ;;  %v4723_v13 = vpop.permute.xlu1 %1003 }
 0x136   : > { %7387 = vst [vmem:[#allocation62_spill] sm:$0xff] %v4723_v13 }
 0x137   : > { %v4718_v43 = vpop.permute.xlu0 %1991 }
 0x138   : > { %3941 = vset.pattern.permute.xlu0 %v7381_v57 }
 0x139   : > { %644 = vperm.xlu0 %3941, %v4153_v12   ;;  %1402 = vperm.xlu1 %3923, %v4422_v35   ;;  %v4729_v11 = vpop.permute.xlu1 %1007 }
 0x13b   : > { %v4725_v8 = vpop.permute.xlu0 %2001 }
 0x13d   : > { %656 = vperm.xlu0 %3941, %v4237_v63   ;;  %3924 = vset.pattern.permute.xlu1 %v7345_v31  ;;  %v4735_v28 = vpop.permute.xlu1 %1015 }
 0x13e   : > { %1447 = vperm.xlu1 %3924, %v4623_v24  }
 0x13f   : > { %v4731_v33 = vpop.permute.xlu0 %2282 }
 0x141   : > { %664 = vperm.xlu0 %3941, %v4252_v7   ;;  %v4741_v34 = vpop.permute.xlu1 %1023 }
 0x142   : > { %1455 = vperm.xlu1 %3924, %v4631_v15  }
 0x143   : > { %v4737_v12 = vpop.permute.xlu0 %2297 }
 0x145   : > { %672 = vperm.xlu0 %3941, %v4259_v10   ;;  %v4747_v35 = vpop.permute.xlu1 %1031 }
 0x146   : > { %1459 = vperm.xlu1 %3924, %v4638_v14  }
 0x147   : > { %v4743_v63 = vpop.permute.xlu0 %2307 }
 0x149   : > { %680 = vperm.xlu0 %3941, %v4282_v29   ;;  %v4753_v13 = vpop.permute.xlu1 %1039 }
 0x14a   : > { %1467 = vperm.xlu1 %3924, %v4645_v61  }
 0x14b   : > { %v4749_v7 = vpop.permute.xlu0 %2317 }
 0x14c   : > { %7388 = vst [vmem:[#allocation63_spill] sm:$0xff] %v4749_v7 }
 0x14d   : > { %688 = vperm.xlu0 %3941, %v4312_v46   ;;  %v4759_v10 = vpop.permute.xlu1 %1047 }
 0x14e   : > { %7390 = vst [vmem:[#allocation65_spill] sm:$0xff] %v4759_v10  ;;  %1475 = vperm.xlu1 %3924, %v4652_v51  }
 0x14f   : > { %v4755_v26 = vpop.permute.xlu0 %2327 }
 0x150   : > { %7389 = vst [vmem:[#allocation64_spill] sm:$0xff] %v4755_v26 }
 0x151   : > { %696 = vperm.xlu0 %3941, %v4339_v3   ;;  %v4765_v29 = vpop.permute.xlu1 %1055 }
 0x152   : > { %7392 = vst [vmem:[#allocation67_spill] sm:$0xff] %v4765_v29  ;;  %1483 = vperm.xlu1 %3924, %v4659_v2  }
 0x153   : > { %v4761_v15 = vpop.permute.xlu0 %2337 }
 0x154   : > { %7391 = vst [vmem:[#allocation66_spill] sm:$0xff] %v4761_v15 }
 0x155   : > { %704 = vperm.xlu0 %3941, %v4363_v23  }
 0x156   : > { %1491 = vperm.xlu1 %3924, %v4666_v0   ;;  %v4774_v3 = vpop.permute.xlu1 %1100 }
 0x157   : > { %v4767_v7 = vpop.permute.xlu0 %2347  ;;  %7395 = vst [vmem:[#allocation70_spill] sm:$0xff] %v4774_v3 }
 0x158   : > { %7393 = vst [vmem:[#allocation68_spill] sm:$0xff] %v4767_v7 }
 0x159   : > { %999 = vperm.xlu0 %3941, %v4456_v49  }
 0x15a   : > { %1499 = vperm.xlu1 %3924, %v4673_v30   ;;  %v4780_v23 = vpop.permute.xlu1 %1104 }
 0x15b   : > { %v4771_v46 = vpop.permute.xlu0 %2357  ;;  %7397 = vst [vmem:[#allocation72_spill] sm:$0xff] %v4780_v23 }
 0x15c   : > { %7394 = vst [vmem:[#allocation69_spill] sm:$0xff] %v4771_v46  ;;  %v4789_v46 = vld [vmem:[#allocation2 + $0x48] ss:$2 sm:$0xff] }
 0x15d   : > { %1011 = vperm.xlu0 %3941, %v4469_v53  }
 0x15e   : > { %1507 = vperm.xlu1 %3924, %v4680_v47   ;;  %v4786_v49 = vpop.permute.xlu1 %1112 }
 0x15f   : > { %v4777_v15 = vpop.permute.xlu0 %2638  ;;  %7399 = vst [vmem:[#allocation74_spill] sm:$0xff] %v4786_v49 }
 0x160   : > { %7396 = vst [vmem:[#allocation71_spill] sm:$0xff] %v4777_v15 }
 0x161   : > { %1019 = vperm.xlu0 %3941, %v4475_v55   ;;  %v4798_v55 = vld [vmem:[#allocation2 + $0x78] ss:$2 sm:$0xff] }
 0x162   : > { %3925 = vset.pattern.permute.xlu1 %v7362_v25  ;;  %v4794_v53 = vpop.permute.xlu1 %1120 }
 0x163   : > { %v4783_v7 = vpop.permute.xlu0 %2653  ;;  %7401 = vst [vmem:[#allocation76_spill] sm:$0xff] %v4794_v53  ;;  %1585 = vperm.xlu1 %3925, %v4789_v46  }
 0x164   : > { %7398 = vst [vmem:[#allocation73_spill] sm:$0xff] %v4783_v7 }
 0x165   : > { %1027 = vperm.xlu0 %3941, %v4481_v58   ;;  %v4806_v58 = vld [vmem:[#allocation2 + $0xd8] ss:$2 sm:$0xff] }
 0x166   : > { %v4802_v23 = vpop.permute.xlu1 %1128 }
 0x167   : > { %v4791_v3 = vpop.permute.xlu0 %2663  ;;  %7403 = vst [vmem:[#allocation78_spill] sm:$0xff] %v4802_v23  ;;  %1590 = vperm.xlu1 %3925, %v4798_v55  }
 0x168   : > { %7400 = vst [vmem:[#allocation75_spill] sm:$0xff] %v4791_v3 }
 0x169   : > { %1035 = vperm.xlu0 %3941, %v4489_v62   ;;  %v4814_v62 = vld [vmem:[#allocation2 + $0x138] ss:$2 sm:$0xff] }
 0x16a   : > { %v4810_v7 = vpop.permute.xlu1 %1136 }
 0x16b   : > { %v4800_v15 = vpop.permute.xlu0 %2673  ;;  %7405 = vst [vmem:[#allocation80_spill] sm:$0xff] %v4810_v7  ;;  %1600 = vperm.xlu1 %3925, %v4806_v58  }
 0x16c   : > { %7402 = vst [vmem:[#allocation77_spill] sm:$0xff] %v4800_v15 }
 0x16d   : > { %1043 = vperm.xlu0 %3941, %v4497_v6   ;;  %v4822_v6 = vld [vmem:[#allocation2 + $0x1c8] ss:$2 sm:$0xff] }
 0x16e   : > { %v4818_v15 = vpop.permute.xlu1 %1144 }
 0x16f   : > { %v4808_v3 = vpop.permute.xlu0 %2683  ;;  %7407 = vst [vmem:[#allocation82_spill] sm:$0xff] %v4818_v15  ;;  %1610 = vperm.xlu1 %3925, %v4814_v62  }
 0x170   : > { %7404 = vst [vmem:[#allocation79_spill] sm:$0xff] %v4808_v3 }
 0x171   : > { %1051 = vperm.xlu0 %3941, %v4507_v17   ;;  %v4830_v17 = vld [vmem:[#allocation2 + $0x228] ss:$2 sm:$0xff] }
 0x172   : > { %v4826_v3 = vpop.permute.xlu1 %1152 }
 0x173   : > { %v4816_v53 = vpop.permute.xlu0 %2693  ;;  %7409 = vst [vmem:[#allocation84_spill] sm:$0xff] %v4826_v3  ;;  %1620 = vperm.xlu1 %3925, %v4822_v6  }
 0x174   : > { %7406 = vst [vmem:[#allocation81_spill] sm:$0xff] %v4816_v53 }
 0x175   : > { %1346 = vperm.xlu0 %3941, %v4623_v24   ;;  %v4838_v24 = vld [vmem:[#allocation2 + $0x288] ss:$2 sm:$0xff] }
 0x177   : > { %v4824_v23 = vpop.permute.xlu0 %2703  ;;  %1630 = vperm.xlu1 %3925, %v4830_v17   ;;  %v4835_v53 = vpop.permute.xlu1 %1230 }
 0x178   : > { %7408 = vst [vmem:[#allocation83_spill] sm:$0xff] %v4824_v23  ;;  %7411 = vst [vmem:[#allocation86_spill] sm:$0xff] %v4835_v53 }
 0x179   : > { %1358 = vperm.xlu0 %3941, %v4638_v14   ;;  %v4846_v14 = vld [vmem:[#allocation2 + $0x2e8] ss:$2 sm:$0xff] }
 0x17b   : > { %v4832_v7 = vpop.permute.xlu0 %2984  ;;  %1640 = vperm.xlu1 %3925, %v4838_v24   ;;  %v4843_v23 = vpop.permute.xlu1 %1240 }
 0x17c   : > { %7410 = vst [vmem:[#allocation85_spill] sm:$0xff] %v4832_v7  ;;  %7413 = vst [vmem:[#allocation88_spill] sm:$0xff] %v4843_v23 }
 0x17d   : > { %1366 = vperm.xlu0 %3941, %v4645_v61  }
 0x17f   : > { %v4840_v15 = vpop.permute.xlu0 %2999  ;;  %1650 = vperm.xlu1 %3925, %v4846_v14   ;;  %v4851_v7 = vpop.permute.xlu1 %1245 }
 0x180   : > { %7412 = vst [vmem:[#allocation87_spill] sm:$0xff] %v4840_v15  ;;  %7415 = vst [vmem:[#allocation90_spill] sm:$0xff] %v4851_v7 }
 0x181   : > { %1374 = vperm.xlu0 %3941, %v4652_v51  }
 0x183   : > { %v4848_v3 = vpop.permute.xlu0 %3009  ;;  %3926 = vset.pattern.permute.xlu1 %v7381_v57  ;;  %v4857_v15 = vpop.permute.xlu1 %1255 }
 0x184   : > { %7414 = vst [vmem:[#allocation89_spill] sm:$0xff] %v4848_v3  ;;  %7417 = vst [vmem:[#allocation92_spill] sm:$0xff] %v4857_v15  ;;  %1696 = vperm.xlu1 %3926, %v4432_v39  }
 0x185   : > { %1382 = vperm.xlu0 %3941, %v4659_v2  }
 0x187   : > { %v4854_v61 = vpop.permute.xlu0 %3019  ;;  %v4863_v23 = vpop.permute.xlu1 %1265 }
 0x188   : > { %7416 = vst [vmem:[#allocation91_spill] sm:$0xff] %v4854_v61  ;;  %7419 = vst [vmem:[#allocation94_spill] sm:$0xff] %v4863_v23  ;;  %1704 = vperm.xlu1 %3926, %v4798_v55  }
 0x189   : > { %1390 = vperm.xlu0 %3941, %v4666_v0  }
 0x18b   : > { %v4861_v51 = vpop.permute.xlu0 %3029  ;;  %v4869_v2 = vpop.permute.xlu1 %1275 }
 0x18c   : > { %7418 = vst [vmem:[#allocation93_spill] sm:$0xff] %v4861_v51  ;;  %7421 = vst [vmem:[#allocation96_spill] sm:$0xff] %v4869_v2  ;;  %1708 = vperm.xlu1 %3926, %v4436_v40  }
 0x18d   : > { %1398 = vperm.xlu0 %3941, %v4673_v30  }
 0x18f   : > { %v4867_v3 = vpop.permute.xlu0 %3039  ;;  %v4875_v0 = vpop.permute.xlu1 %1285 }
 0x190   : > { %7420 = vst [vmem:[#allocation95_spill] sm:$0xff] %v4867_v3  ;;  %7423 = vst [vmem:[#allocation98_spill] sm:$0xff] %v4875_v0  ;;  %1716 = vperm.xlu1 %3926, %v4440_v41   ;;  %v4998_v0 = vld [vmem:[#allocation2 + $0x13a] ss:$2 sm:$0xff] }
 0x191   : > { %1406 = vperm.xlu0 %3941, %v4680_v47  }
 0x193   : > { %v4873_v61 = vpop.permute.xlu0 %3049  ;;  %v4881_v30 = vpop.permute.xlu1 %1295 }
 0x194   : > { %7422 = vst [vmem:[#allocation97_spill] sm:$0xff] %v4873_v61  ;;  %7425 = vst [vmem:[#allocation100_spill] sm:$0xff] %v4881_v30  ;;  %1724 = vperm.xlu1 %3926, %v4444_v42  }
 0x195   : > { %1700 = vperm.xlu0 %3941, %v4789_v46  }
 0x197   : > { %v4879_v39 = vpop.permute.xlu0 %3059  ;;  %v4887_v47 = vpop.permute.xlu1 %1305 }
 0x198   : > { %7424 = vst [vmem:[#allocation99_spill] sm:$0xff] %v4879_v39  ;;  %7427 = vst [vmem:[#allocation102_spill] sm:$0xff] %v4887_v47  ;;  %1732 = vperm.xlu1 %3926, %v4454_v48   ;;  %v4985_v47 = vld [vmem:[#allocation2 + $0x79] ss:$2 sm:$0xff] }
 0x199   : > { %1712 = vperm.xlu0 %3941, %v4806_v58  }
 0x19b   : > { %v4885_v3 = vpop.permute.xlu0 %3340 }
 0x19c   : > { %7426 = vst [vmem:[#allocation101_spill] sm:$0xff] %v4885_v3  ;;  %v4894_v41 = vpop.permute.xlu1 %1350  ;;  %1740 = vperm.xlu1 %3926, %v4460_v50  }
 0x19d   : > { %1720 = vperm.xlu0 %3941, %v4814_v62   ;;  %7429 = vst [vmem:[#allocation104_spill] sm:$0xff] %v4894_v41 }
 0x19f   : > { %v4891_v40 = vpop.permute.xlu0 %3355 }
 0x1a0   : > { %7428 = vst [vmem:[#allocation103_spill] sm:$0xff] %v4891_v40  ;;  %v4900_v42 = vpop.permute.xlu1 %1354  ;;  %1748 = vperm.xlu1 %3926, %v4466_v52  }
 0x1a1   : > { %1728 = vperm.xlu0 %3941, %v4822_v6   ;;  %7431 = vst [vmem:[#allocation106_spill] sm:$0xff] %v4900_v42 }
 0x1a3   : > { %v4897_v39 = vpop.permute.xlu0 %3365 }
 0x1a4   : > { %7430 = vst [vmem:[#allocation105_spill] sm:$0xff] %v4897_v39  ;;  %v4906_v48 = vpop.permute.xlu1 %1362  ;;  %1756 = vperm.xlu1 %3926, %v4472_v54   ;;  %v4916_v39 = vld [vmem:[#allocation2 + $0x19] ss:$2 sm:$0xff]  ;;  %v4924_v54 = vld [vmem:[#allocation2 + $0xa9] ss:$2 sm:$0xff] }
 0x1a5   : > { %1736 = vperm.xlu0 %3941, %v4830_v17   ;;  %7433 = vst [vmem:[#allocation108_spill] sm:$0xff] %v4906_v48 }
 0x1a7   : > { %v4903_v3 = vpop.permute.xlu0 %3375 }
 0x1a8   : > { %7432 = vst [vmem:[#allocation107_spill] sm:$0xff] %v4903_v3  ;;  %v4912_v50 = vpop.permute.xlu1 %1370  ;;  %3927 = vset.pattern.permute.xlu1 %v7345_v31 }
 0x1a9   : > { %1744 = vperm.xlu0 %3941, %v4838_v24   ;;  %7435 = vst [vmem:[#allocation110_spill] sm:$0xff] %v4912_v50  ;;  %1801 = vperm.xlu1 %3927, %v4789_v46   ;;  %v4932_v46 = vld [vmem:[#allocation2 + $0x109] ss:$2 sm:$0xff] }
 0x1ab   : > { %v4909_v40 = vpop.permute.xlu0 %3385 }
 0x1ac   : > { %7434 = vst [vmem:[#allocation109_spill] sm:$0xff] %v4909_v40  ;;  %v4921_v3 = vpop.permute.xlu1 %1378 }
 0x1ad   : > { %1752 = vperm.xlu0 %3941, %v4846_v14   ;;  %7437 = vst [vmem:[#allocation112_spill] sm:$0xff] %v4921_v3  ;;  %1805 = vperm.xlu1 %3927, %v4798_v55   ;;  %v4940_v55 = vld [vmem:[#allocation2 + $0x169] ss:$2 sm:$0xff] }
 0x1af   : > { %v4918_v52 = vpop.permute.xlu0 %3395 }
 0x1b0   : > { %7436 = vst [vmem:[#allocation111_spill] sm:$0xff] %v4918_v52  ;;  %v4929_v61 = vpop.permute.xlu1 %1386 }
 0x1b1   : > { %2047 = vperm.xlu0 %3941, %v4916_v39   ;;  %7439 = vst [vmem:[#allocation114_spill] sm:$0xff] %v4929_v61  ;;  %1813 = vperm.xlu1 %3927, %v4806_v58   ;;  %v4948_v58 = vld [vmem:[#allocation2 + $0x1f9] ss:$2 sm:$0xff] }
 0x1b3   : > { %v4926_v40 = vpop.permute.xlu0 %3405 }
 0x1b4   : > { %7438 = vst [vmem:[#allocation113_spill] sm:$0xff] %v4926_v40  ;;  %v4937_v52 = vpop.permute.xlu1 %1394 }
 0x1b5   : > { %2059 = vperm.xlu0 %3941, %v4924_v54   ;;  %7440 = vst [vmem:[#allocation115_spill] sm:$0xff] %v4937_v52  ;;  %1821 = vperm.xlu1 %3927, %v4814_v62   ;;  %v4956_v62 = vld [vmem:[#allocation2 + $0x259] ss:$2 sm:$0xff] }
 0x1b8   : > { %v4934_v51 = vpop.permute.xlu0 %644  ;;  %v4945_v40 = vpop.permute.xlu1 %1402 }
 0x1b9   : > { %2067 = vperm.xlu0 %3941, %v4932_v46   ;;  %7441 = vst [vmem:[#allocation116_spill] sm:$0xff] %v4945_v40  ;;  %1829 = vperm.xlu1 %3927, %v4822_v6   ;;  %v4964_v6 = vld [vmem:[#allocation2 + $0x2b9] ss:$2 sm:$0xff] }
 0x1bc   : > { %v4942_v42 = vpop.permute.xlu0 %656 }
 0x1bd   : > { %2075 = vperm.xlu0 %3941, %v4940_v55   ;;  %v4953_v50 = vpop.permute.xlu1 %1447  ;;  %1837 = vperm.xlu1 %3927, %v4830_v17   ;;  %v4972_v17 = vld [vmem:[#allocation2 + $0x319] ss:$2 sm:$0xff] }
 0x1be   : > { %7442 = vst [vmem:[#allocation117_spill] sm:$0xff] %v4953_v50 }
 0x1c0   : > { %v4950_v41 = vpop.permute.xlu0 %664 }
 0x1c1   : > { %2083 = vperm.xlu0 %3941, %v4948_v58   ;;  %v4961_v61 = vpop.permute.xlu1 %1455  ;;  %1845 = vperm.xlu1 %3927, %v4838_v24   ;;  %v4980_v24 = vld [vmem:[#allocation2 + $0x4a] ss:$2 sm:$0xff] }
 0x1c2   : > { %7443 = vst [vmem:[#allocation118_spill] sm:$0xff] %v4961_v61 }
 0x1c4   : > { %v4958_v52 = vpop.permute.xlu0 %672 }
 0x1c5   : > { %2091 = vperm.xlu0 %3941, %v4956_v62   ;;  %v4969_v3 = vpop.permute.xlu1 %1459  ;;  %1853 = vperm.xlu1 %3927, %v4846_v14  }
 0x1c6   : > { %7445 = vst [vmem:[#allocation120_spill] sm:$0xff] %v4969_v3  ;;  %v4990_v3 = vld [vmem:[#allocation2 + $0xda] ss:$2 sm:$0xff] }
 0x1c8   : > { %v4966_v40 = vpop.permute.xlu0 %680 }
 0x1c9   : > { %7444 = vst [vmem:[#allocation119_spill] sm:$0xff] %v4966_v40  ;;  %2099 = vperm.xlu0 %3941, %v4964_v6   ;;  %v4977_v48 = vpop.permute.xlu1 %1467  ;;  %3928 = vset.pattern.permute.xlu1 %v7362_v25 }
 0x1ca   : > { %7447 = vst [vmem:[#allocation122_spill] sm:$0xff] %v4977_v48  ;;  %1931 = vperm.xlu1 %3928, %v4916_v39  }
 0x1cc   : > { %v4974_v50 = vpop.permute.xlu0 %688 }
 0x1cd   : > { %7446 = vst [vmem:[#allocation121_spill] sm:$0xff] %v4974_v50  ;;  %2107 = vperm.xlu0 %3941, %v4972_v17   ;;  %v4988_v14 = vpop.permute.xlu1 %1475 }
 0x1ce   : > { %7449 = vst [vmem:[#allocation124_spill] sm:$0xff] %v4988_v14  ;;  %1941 = vperm.xlu1 %3928, %v4985_v47   ;;  %v5006_v14 = vld [vmem:[#allocation2 + $0x1ca] ss:$2 sm:$0xff] }
 0x1d0   : > { %v4983_v61 = vpop.permute.xlu0 %696 }
 0x1d1   : > { %7448 = vst [vmem:[#allocation123_spill] sm:$0xff] %v4983_v61  ;;  %2402 = vperm.xlu0 %3941, %v4980_v24   ;;  %v4996_v48 = vpop.permute.xlu1 %1483 }
 0x1d2   : > { %7451 = vst [vmem:[#allocation126_spill] sm:$0xff] %v4996_v48  ;;  %1946 = vperm.xlu1 %3928, %v4924_v54   ;;  %v5014_v48 = vld [vmem:[#allocation2 + $0x22a] ss:$2 sm:$0xff] }
 0x1d4   : > { %v4993_v30 = vpop.permute.xlu0 %704 }
 0x1d5   : > { %7450 = vst [vmem:[#allocation125_spill] sm:$0xff] %v4993_v30  ;;  %2414 = vperm.xlu0 %3941, %v4990_v3   ;;  %v5004_v23 = vpop.permute.xlu1 %1491 }
 0x1d6   : > { %7453 = vst [vmem:[#allocation128_spill] sm:$0xff] %v5004_v23  ;;  %1956 = vperm.xlu1 %3928, %v4932_v46   ;;  %v5022_v23 = vld [vmem:[#allocation2 + $0x28a] ss:$2 sm:$0xff] }
 0x1d8   : > { %v5001_v2 = vpop.permute.xlu0 %999 }
 0x1d9   : > { %7452 = vst [vmem:[#allocation127_spill] sm:$0xff] %v5001_v2  ;;  %2422 = vperm.xlu0 %3941, %v4998_v0   ;;  %v5012_v7 = vpop.permute.xlu1 %1499 }
 0x1da   : > { %7455 = vst [vmem:[#allocation130_spill] sm:$0xff] %v5012_v7  ;;  %1966 = vperm.xlu1 %3928, %v4940_v55  }
 0x1dc   : > { %v5009_v15 = vpop.permute.xlu0 %1011 }
 0x1dd   : > { %7454 = vst [vmem:[#allocation129_spill] sm:$0xff] %v5009_v15  ;;  %2430 = vperm.xlu0 %3941, %v5006_v14   ;;  %v5020_v2 = vpop.permute.xlu1 %1507  ;;  %v5028_v15 = vld [vmem:[#allocation2 + $0x2ea] ss:$2 sm:$0xff] }
 0x1de   : > { %7457 = vst [vmem:[#allocation132_spill] sm:$0xff] %v5020_v2  ;;  %1976 = vperm.xlu1 %3928, %v4948_v58  }
 0x1e0   : > { %v5017_v53 = vpop.permute.xlu0 %1019 }
 0x1e1   : > { %7456 = vst [vmem:[#allocation131_spill] sm:$0xff] %v5017_v53  ;;  %2438 = vperm.xlu0 %3941, %v5014_v48   ;;  %v5036_v53 = vld [vmem:[#allocation2 + $0x30] ss:$2 sm:$0xff] }
 0x1e2   : > { %v5030_v7 = vpop.permute.xlu1 %1585  ;;  %1986 = vperm.xlu1 %3928, %v4956_v62  }
 0x1e3   : > { %7459 = vst [vmem:[#allocation134_spill] sm:$0xff] %v5030_v7 }
 0x1e4   : > { %v5025_v30 = vpop.permute.xlu0 %1027 }
 0x1e5   : > { %7458 = vst [vmem:[#allocation133_spill] sm:$0xff] %v5025_v30  ;;  %2446 = vperm.xlu0 %3941, %v5022_v23   ;;  %v5044_v30 = vld [vmem:[#allocation2 + $0xc0] ss:$2 sm:$0xff] }
 0x1e6   : > { %v5038_v2 = vpop.permute.xlu1 %1590  ;;  %1996 = vperm.xlu1 %3928, %v4964_v6  }
 0x1e7   : > { %7461 = vst [vmem:[#allocation136_spill] sm:$0xff] %v5038_v2 }
 0x1e8   : > { %v5033_v61 = vpop.permute.xlu0 %1035 }
 0x1e9   : > { %7460 = vst [vmem:[#allocation135_spill] sm:$0xff] %v5033_v61  ;;  %2454 = vperm.xlu0 %3941, %v5028_v15   ;;  %v5052_v61 = vld [vmem:[#allocation2 + $0x120] ss:$2 sm:$0xff] }
 0x1ea   : > { %v5046_v50 = vpop.permute.xlu1 %1600  ;;  %2006 = vperm.xlu1 %3928, %v4972_v17  }
 0x1eb   : > { %7463 = vst [vmem:[#allocation138_spill] sm:$0xff] %v5046_v50 }
 0x1ec   : > { %v5041_v49 = vpop.permute.xlu0 %1043 }
 0x1ed   : > { %7462 = vst [vmem:[#allocation137_spill] sm:$0xff] %v5041_v49  ;;  %2749 = vperm.xlu0 %3941, %v5036_v53   ;;  %v5061_v49 = vld [vmem:[#allocation2 + $0x180] ss:$2 sm:$0xff] }
 0x1ee   : > { %v5054_v29 = vpop.permute.xlu1 %1610  ;;  %3929 = vset.pattern.permute.xlu1 %v7381_v57 }
 0x1ef   : > { %7465 = vst [vmem:[#allocation140_spill] sm:$0xff] %v5054_v29  ;;  %2051 = vperm.xlu1 %3929, %v4478_v56   ;;  %v5077_v56 = vld [vmem:[#allocation2 + $0x270] ss:$2 sm:$0xff] }
 0x1f0   : > { %v5049_v7 = vpop.permute.xlu0 %1051 }
 0x1f1   : > { %7464 = vst [vmem:[#allocation139_spill] sm:$0xff] %v5049_v7  ;;  %2761 = vperm.xlu0 %3941, %v5044_v30   ;;  %v5069_v7 = vld [vmem:[#allocation2 + $0x210] ss:$2 sm:$0xff] }
 0x1f2   : > { %v5063_v50 = vpop.permute.xlu1 %1620 }
 0x1f3   : > { %7467 = vst [vmem:[#allocation142_spill] sm:$0xff] %v5063_v50  ;;  %2055 = vperm.xlu1 %3929, %v4985_v47  }
 0x1f4   : > { %v5057_v2 = vpop.permute.xlu0 %1346 }
 0x1f5   : > { %7466 = vst [vmem:[#allocation141_spill] sm:$0xff] %v5057_v2  ;;  %2769 = vperm.xlu0 %3941, %v5052_v61  }
 0x1f6   : > { %v5071_v29 = vpop.permute.xlu1 %1630 }
 0x1f7   : > { %7469 = vst [vmem:[#allocation144_spill] sm:$0xff] %v5071_v29  ;;  %2063 = vperm.xlu1 %3929, %v4484_v59   ;;  %v5093_v59 = vld [vmem:[#allocation2 + $0x330] ss:$2 sm:$0xff] }
 0x1f8   : > { %v5065_v10 = vpop.permute.xlu0 %1358 }
 0x1f9   : > { %7468 = vst [vmem:[#allocation143_spill] sm:$0xff] %v5065_v10  ;;  %2777 = vperm.xlu0 %3941, %v5061_v49   ;;  %v5085_v10 = vld [vmem:[#allocation2 + $0x2d0] ss:$2 sm:$0xff] }
 0x1fa   : > { %v5079_v2 = vpop.permute.xlu1 %1640 }
 0x1fb   : > { %7471 = vst [vmem:[#allocation146_spill] sm:$0xff] %v5079_v2  ;;  %2071 = vperm.xlu1 %3929, %v4492_v1   ;;  %v5101_v1 = vld [vmem:[#allocation2 + $0x61] ss:$2 sm:$0xff] }
 0x1fc   : > { %v5073_v26 = vpop.permute.xlu0 %1366 }
 0x1fd   : > { %7470 = vst [vmem:[#allocation145_spill] sm:$0xff] %v5073_v26  ;;  %2785 = vperm.xlu0 %3941, %v5069_v7  }
 0x1fe   : > { %v5087_v40 = vpop.permute.xlu1 %1650 }
 0x1ff   : > { %7473 = vst [vmem:[#allocation148_spill] sm:$0xff] %v5087_v40  ;;  %2079 = vperm.xlu1 %3929, %v4500_v9   ;;  %v5109_v9 = vld [vmem:[#allocation2 + $0xf1] ss:$2 sm:$0xff] }
 0x200   : > { %v5081_v50 = vpop.permute.xlu0 %1374 }
 0x201   : > { %7472 = vst [vmem:[#allocation147_spill] sm:$0xff] %v5081_v50  ;;  %2793 = vperm.xlu0 %3941, %v5077_v56  }
 0x203   : > { %2087 = vperm.xlu1 %3929, %v4510_v18   ;;  %v5098_v50 = vpop.permute.xlu1 %1696 }
 0x204   : > { %v5089_v29 = vpop.permute.xlu0 %1382  ;;  %7476 = vst [vmem:[#allocation151_spill] sm:$0xff] %v5098_v50  ;;  %v5117_v50 = vld [vmem:[#allocation2 + $0x151] ss:$2 sm:$0xff] }
 0x205   : > { %7474 = vst [vmem:[#allocation149_spill] sm:$0xff] %v5089_v29  ;;  %2801 = vperm.xlu0 %3941, %v5085_v10  }
 0x207   : > { %2095 = vperm.xlu1 %3929, %v4518_v21   ;;  %v5106_v29 = vpop.permute.xlu1 %1704 }
 0x208   : > { %v5095_v26 = vpop.permute.xlu0 %1390  ;;  %7478 = vst [vmem:[#allocation153_spill] sm:$0xff] %v5106_v29  ;;  %v5126_v29 = vld [vmem:[#allocation2 + $0x1e1] ss:$2 sm:$0xff] }
 0x209   : > { %7475 = vst [vmem:[#allocation150_spill] sm:$0xff] %v5095_v26  ;;  %2809 = vperm.xlu0 %3941, %v5093_v59   ;;  %7483 = vst [vmem:[#allocation158_spill] sm:$0xff] %v5126_v29 }
 0x20b   : > { %2103 = vperm.xlu1 %3929, %v4527_v37   ;;  %v5114_v18 = vpop.permute.xlu1 %1708 }
 0x20c   : > { %v5103_v2 = vpop.permute.xlu0 %1398  ;;  %7480 = vst [vmem:[#allocation155_spill] sm:$0xff] %v5114_v18  ;;  %v5134_v18 = vld [vmem:[#allocation2 + $0x241] ss:$2 sm:$0xff] }
 0x20d   : > { %7477 = vst [vmem:[#allocation152_spill] sm:$0xff] %v5103_v2  ;;  %3104 = vperm.xlu0 %3941, %v5101_v1   ;;  %7486 = vst [vmem:[#allocation161_spill] sm:$0xff] %v5134_v18 }
 0x20f   : > { %3930 = vset.pattern.permute.xlu1 %v7345_v31  ;;  %v5122_v21 = vpop.permute.xlu1 %1716 }
 0x210   : > { %v5111_v40 = vpop.permute.xlu0 %1406  ;;  %7482 = vst [vmem:[#allocation157_spill] sm:$0xff] %v5122_v21  ;;  %2148 = vperm.xlu1 %3930, %v4916_v39   ;;  %v5142_v39 = vld [vmem:[#allocation2 + $0x2a1] ss:$2 sm:$0xff] }
 0x211   : > { %7479 = vst [vmem:[#allocation154_spill] sm:$0xff] %v5111_v40  ;;  %3116 = vperm.xlu0 %3941, %v5109_v9   ;;  %7489 = vst [vmem:[#allocation164_spill] sm:$0xff] %v5142_v39 }
 0x213   : > { %v5130_v37 = vpop.permute.xlu1 %1724 }
 0x214   : > { %v5119_v26 = vpop.permute.xlu0 %1700  ;;  %7485 = vst [vmem:[#allocation160_spill] sm:$0xff] %v5130_v37  ;;  %2156 = vperm.xlu1 %3930, %v4985_v47   ;;  %v5150_v47 = vld [vmem:[#allocation2 + $0x301] ss:$2 sm:$0xff] }
 0x215   : > { %7481 = vst [vmem:[#allocation156_spill] sm:$0xff] %v5119_v26  ;;  %3124 = vperm.xlu0 %3941, %v5117_v50   ;;  %7492 = vst [vmem:[#allocation167_spill] sm:$0xff] %v5150_v47 }
 0x217   : > { %v5138_v2 = vpop.permute.xlu1 %1732 }
 0x218   : > { %v5128_v40 = vpop.permute.xlu0 %1712  ;;  %7488 = vst [vmem:[#allocation163_spill] sm:$0xff] %v5138_v2  ;;  %2160 = vperm.xlu1 %3930, %v4924_v54   ;;  %v3301_v54 = vld [vmem:[#allocation2 + $0x32] ss:$2 sm:$0xff] }
 0x219   : > { %7484 = vst [vmem:[#allocation159_spill] sm:$0xff] %v5128_v40  ;;  %3132 = vperm.xlu0 %3941, %v5126_v29   ;;  %v3964_v29 = vld [vmem:[#allocation2 + $0x2a1] ss:$2 sm:$0xff] }
 0x21b   : > { %v5146_v40 = vpop.permute.xlu1 %1740 }
 0x21c   : > { %v5136_v26 = vpop.permute.xlu0 %1720  ;;  %7491 = vst [vmem:[#allocation166_spill] sm:$0xff] %v5146_v40  ;;  %2168 = vperm.xlu1 %3930, %v4932_v46   ;;  %v3307_v40 = vld [vmem:[#allocation2 + $0xc2] ss:$2 sm:$0xff] }
 0x21d   : > { %7487 = vst [vmem:[#allocation162_spill] sm:$0xff] %v5136_v26  ;;  %3140 = vperm.xlu0 %3941, %v5134_v18   ;;  %v3963_v18 = vld [vmem:[#allocation2 + $0x241] ss:$2 sm:$0xff] }
 0x21f   : > { %v5154_v26 = vpop.permute.xlu1 %1748 }
 0x220   : > { %v5144_v21 = vpop.permute.xlu0 %1728  ;;  %7494 = vst [vmem:[#allocation169_spill] sm:$0xff] %v5154_v26  ;;  %2176 = vperm.xlu1 %3930, %v4940_v55   ;;  %v3311_v26 = vld [vmem:[#allocation2 + $0x122] ss:$2 sm:$0xff] }
 0x221   : > { %7490 = vst [vmem:[#allocation165_spill] sm:$0xff] %v5144_v21  ;;  %3148 = vperm.xlu0 %3941, %v5142_v39  }
 0x223   : > { %v5160_v21 = vpop.permute.xlu1 %1756 }
 0x224   : > { %v5152_v37 = vpop.permute.xlu0 %1736  ;;  %7496 = vst [vmem:[#allocation171_spill] sm:$0xff] %v5160_v21  ;;  %2184 = vperm.xlu1 %3930, %v4948_v58   ;;  %v3315_v21 = vld [vmem:[#allocation2 + $0x182] ss:$2 sm:$0xff] }
 0x225   : > { %7493 = vst [vmem:[#allocation168_spill] sm:$0xff] %v5152_v37  ;;  %3156 = vperm.xlu0 %3941, %v5150_v47  }
 0x228   : > { %v5158_v2 = vpop.permute.xlu0 %1744  ;;  %2192 = vperm.xlu1 %3930, %v4956_v62   ;;  %v5166_v37 = vpop.permute.xlu1 %1801 }
 0x229   : > { %7495 = vst [vmem:[#allocation170_spill] sm:$0xff] %v5158_v2  ;;  %3451 = vperm.xlu0 %3941, %v3301_v54   ;;  %7498 = vst [vmem:[#allocation173_spill] sm:$0xff] %v5166_v37 }
 0x22c   : > { %v5163_v46 = vpop.permute.xlu0 %1752  ;;  %2200 = vperm.xlu1 %3930, %v4964_v6   ;;  %v5171_v55 = vpop.permute.xlu1 %1805  ;;  %v5184_v6 = vld [vmem:[#allocation2 + $0x7a] ss:$2 sm:$0xff] }
 0x22d   : > { %7497 = vst [vmem:[#allocation172_spill] sm:$0xff] %v5163_v46  ;;  %3463 = vperm.xlu0 %3941, %v3307_v40   ;;  %7500 = vst [vmem:[#allocation175_spill] sm:$0xff] %v5171_v55  ;;  %v3319_v40 = vld [vmem:[#allocation2 + $0x212] ss:$2 sm:$0xff] }
 0x230   : > { %v5168_v47 = vpop.permute.xlu0 %2047  ;;  %2208 = vperm.xlu1 %3930, %v4972_v17   ;;  %v5176_v58 = vpop.permute.xlu1 %1813  ;;  %v3327_v17 = vld [vmem:[#allocation2 + $0x2d2] ss:$2 sm:$0xff] }
 0x231   : > { %7499 = vst [vmem:[#allocation174_spill] sm:$0xff] %v5168_v47  ;;  %3471 = vperm.xlu0 %3941, %v3311_v26   ;;  %7502 = vst [vmem:[#allocation177_spill] sm:$0xff] %v5176_v58  ;;  %v3323_v26 = vld [vmem:[#allocation2 + $0x272] ss:$2 sm:$0xff]  ;;  %v3954_v47 = vld [vmem:[#allocation2 + $0x1] ss:$2 sm:$0xff] }
 0x234   : > { %v5173_v54 = vpop.permute.xlu0 %2059  ;;  %3931 = vset.pattern.permute.xlu1 %v7362_v25  ;;  %v5181_v37 = vpop.permute.xlu1 %1821 }
 0x235   : > { %7501 = vst [vmem:[#allocation176_spill] sm:$0xff] %v5173_v54  ;;  %3479 = vperm.xlu0 %3941, %v3315_v21   ;;  %7504 = vst [vmem:[#allocation179_spill] sm:$0xff] %v5181_v37  ;;  %2287 = vperm.xlu1 %3931, %v4980_v24   ;;  %v3331_v37 = vld [vmem:[#allocation2 + $0x332] ss:$2 sm:$0xff] }
 0x238   : > { %v5178_v62 = vpop.permute.xlu0 %2067  ;;  %v5188_v21 = vpop.permute.xlu1 %1829 }
 0x239   : > { %7503 = vst [vmem:[#allocation178_spill] sm:$0xff] %v5178_v62  ;;  %3487 = vperm.xlu0 %3941, %v3319_v40   ;;  %7506 = vst [vmem:[#allocation181_spill] sm:$0xff] %v5188_v21  ;;  %2292 = vperm.xlu1 %3931, %v5184_v6  }
 0x23c   : > { %v5186_v55 = vpop.permute.xlu0 %2075  ;;  %v5193_v40 = vpop.permute.xlu1 %1837 }
 0x23d   : > { %7505 = vst [vmem:[#allocation180_spill] sm:$0xff] %v5186_v55  ;;  %3495 = vperm.xlu0 %3941, %v3323_v26   ;;  %7508 = vst [vmem:[#allocation183_spill] sm:$0xff] %v5193_v40  ;;  %2302 = vperm.xlu1 %3931, %v4990_v3   ;;  %v3946_v40 = vld [vmem:[#allocation2 + $0xc0] ss:$2 sm:$0xff]  ;;  %v3949_v55 = vld [vmem:[#allocation2 + $0x210] ss:$2 sm:$0xff] }
 0x240   : > { %v5191_v58 = vpop.permute.xlu0 %2083  ;;  %v5198_v54 = vpop.permute.xlu1 %1845 }
 0x241   : > { %7507 = vst [vmem:[#allocation182_spill] sm:$0xff] %v5191_v58  ;;  %3503 = vperm.xlu0 %3941, %v3327_v17   ;;  %7510 = vst [vmem:[#allocation185_spill] sm:$0xff] %v5198_v54  ;;  %2312 = vperm.xlu1 %3931, %v4998_v0   ;;  %v3945_v58 = vld [vmem:[#allocation2 + $0x30] ss:$2 sm:$0xff]  ;;  %v3947_v54 = vld [vmem:[#allocation2 + $0x120] ss:$2 sm:$0xff] }
 0x244   : > { %v5196_v62 = vpop.permute.xlu0 %2091  ;;  %v5204_v21 = vpop.permute.xlu1 %1853 }
 0x245   : > { %7509 = vst [vmem:[#allocation184_spill] sm:$0xff] %v5196_v62  ;;  %3511 = vperm.xlu0 %3941, %v3331_v37   ;;  %7512 = vst [vmem:[#allocation187_spill] sm:$0xff] %v5204_v21  ;;  %2322 = vperm.xlu1 %3931, %v5006_v14  }
 0x248   : > { %v5201_v26 = vpop.permute.xlu0 %2099 }
 0x249   : > { %7511 = vst [vmem:[#allocation186_spill] sm:$0xff] %v5201_v26  ;;  %3943 = vset.pattern.permute.xlu0 %v7345_v31  ;;  %2332 = vperm.xlu1 %3931, %v5014_v48   ;;  %v5210_v37 = vpop.permute.xlu1 %1931 }
 0x24a   : > { %749 = vperm.xlu0 %3943, %v3945_v58   ;;  %7514 = vst [vmem:[#allocation189_spill] sm:$0xff] %v5210_v37  ;;  %v3948_v58 = vld [vmem:[#allocation2 + $0x1b0] ss:$2 sm:$0xff] }
 0x24b   : > { %v5239_v37 = vld [vmem:[#allocation2 + $0xaa] ss:$2 sm:$0xff] }
 0x24c   : > { %v5207_v17 = vpop.permute.xlu0 %2107 }
 0x24d   : > { %7513 = vst [vmem:[#allocation188_spill] sm:$0xff] %v5207_v17  ;;  %2342 = vperm.xlu1 %3931, %v5022_v23   ;;  %v5215_v26 = vpop.permute.xlu1 %1941 }
 0x24e   : > { %761 = vperm.xlu0 %3943, %v3946_v40   ;;  %7516 = vst [vmem:[#allocation191_spill] sm:$0xff] %v5215_v26 }
 0x250   : > { %v5212_v62 = vpop.permute.xlu0 %2402 }
 0x251   : > { %7515 = vst [vmem:[#allocation190_spill] sm:$0xff] %v5212_v62  ;;  %2352 = vperm.xlu1 %3931, %v5028_v15   ;;  %v5220_v17 = vpop.permute.xlu1 %1946 }
 0x252   : > { %769 = vperm.xlu0 %3943, %v3947_v54   ;;  %7518 = vst [vmem:[#allocation193_spill] sm:$0xff] %v5220_v17  ;;  %v5227_v54 = vld [vmem:[#allocation2 + $0x1a] ss:$2 sm:$0xff] }
 0x254   : > { %v5217_v21 = vpop.permute.xlu0 %2414 }
 0x255   : > { %7517 = vst [vmem:[#allocation192_spill] sm:$0xff] %v5217_v21  ;;  %3932 = vset.pattern.permute.xlu1 %v7381_v57  ;;  %v5225_v62 = vpop.permute.xlu1 %1956  ;;  %v3951_v21 = vld [vmem:[#allocation2 + $0x270] ss:$2 sm:$0xff] }
 0x256   : > { %777 = vperm.xlu0 %3943, %v3948_v58   ;;  %7520 = vst [vmem:[#allocation195_spill] sm:$0xff] %v5225_v62  ;;  %2398 = vperm.xlu1 %3932, %v5227_v54  }
 0x258   : > { %v5222_v40 = vpop.permute.xlu0 %2422 }
 0x259   : > { %7519 = vst [vmem:[#allocation194_spill] sm:$0xff] %v5222_v40  ;;  %v5232_v58 = vpop.permute.xlu1 %1966  ;;  %v3952_v40 = vld [vmem:[#allocation2 + $0x2d0] ss:$2 sm:$0xff] }
 0x25a   : > { %785 = vperm.xlu0 %3943, %v3949_v55   ;;  %7522 = vst [vmem:[#allocation197_spill] sm:$0xff] %v5232_v58  ;;  %2406 = vperm.xlu1 %3932, %v5184_v6  }
 0x25c   : > { %v5230_v26 = vpop.permute.xlu0 %2430 }
 0x25d   : > { %7521 = vst [vmem:[#allocation196_spill] sm:$0xff] %v5230_v26  ;;  %v5237_v55 = vpop.permute.xlu1 %1976 }
 0x25e   : > { %793 = vperm.xlu0 %3943, %v3951_v21   ;;  %7524 = vst [vmem:[#allocation199_spill] sm:$0xff] %v5237_v55  ;;  %2410 = vperm.xlu1 %3932, %v5239_v37   ;;  %v5246_v21 = vld [vmem:[#allocation2 + $0x10a] ss:$2 sm:$0xff] }
 0x25f   : > { %v5253_v55 = vld [vmem:[#allocation2 + $0x16a] ss:$2 sm:$0xff] }
 0x260   : > { %v5235_v17 = vpop.permute.xlu0 %2438 }
 0x261   : > { %7523 = vst [vmem:[#allocation198_spill] sm:$0xff] %v5235_v17  ;;  %v5244_v26 = vpop.permute.xlu1 %1986  ;;  %v3956_v17 = vld [vmem:[#allocation2 + $0x91] ss:$2 sm:$0xff] }
 0x262   : > { %801 = vperm.xlu0 %3943, %v3952_v40   ;;  %7526 = vst [vmem:[#allocation201_spill] sm:$0xff] %v5244_v26  ;;  %2418 = vperm.xlu1 %3932, %v5246_v21   ;;  %v5260_v26 = vld [vmem:[#allocation2 + $0x1fa] ss:$2 sm:$0xff] }
 0x264   : > { %v5242_v62 = vpop.permute.xlu0 %2446 }
 0x265   : > { %7525 = vst [vmem:[#allocation200_spill] sm:$0xff] %v5242_v62  ;;  %v5251_v40 = vpop.permute.xlu1 %1996  ;;  %v3958_v62 = vld [vmem:[#allocation2 + $0xf1] ss:$2 sm:$0xff] }
 0x266   : > { %1096 = vperm.xlu0 %3943, %v3954_v47   ;;  %7528 = vst [vmem:[#allocation203_spill] sm:$0xff] %v5251_v40  ;;  %2426 = vperm.xlu1 %3932, %v5253_v55  }
 0x268   : > { %v5249_v58 = vpop.permute.xlu0 %2454 }
 0x269   : > { %7527 = vst [vmem:[#allocation202_spill] sm:$0xff] %v5249_v58  ;;  %v5258_v47 = vpop.permute.xlu1 %2006  ;;  %v3960_v58 = vld [vmem:[#allocation2 + $0x151] ss:$2 sm:$0xff] }
 0x26a   : > { %1108 = vperm.xlu0 %3943, %v3956_v17   ;;  %7530 = vst [vmem:[#allocation205_spill] sm:$0xff] %v5258_v47  ;;  %2434 = vperm.xlu1 %3932, %v5260_v26   ;;  %v5265_v17 = vld [vmem:[#allocation2 + $0x25a] ss:$2 sm:$0xff] }
 0x26c   : > { %v5256_v46 = vpop.permute.xlu0 %2749 }
 0x26d   : > { %7529 = vst [vmem:[#allocation204_spill] sm:$0xff] %v5256_v46  ;;  %v3962_v46 = vld [vmem:[#allocation2 + $0x1e1] ss:$2 sm:$0xff] }
 0x26e   : > { %1116 = vperm.xlu0 %3943, %v3958_v62   ;;  %2442 = vperm.xlu1 %3932, %v5265_v17   ;;  %v5268_v40 = vpop.permute.xlu1 %2051 }
 0x26f   : > { %7532 = vst [vmem:[#allocation207_spill] sm:$0xff] %v5268_v40 }
 0x270   : > { %v5263_v2 = vpop.permute.xlu0 %2761 }
 0x271   : > { %7531 = vst [vmem:[#allocation206_spill] sm:$0xff] %v5263_v2 }
 0x272   : > { %1124 = vperm.xlu0 %3943, %v3960_v58   ;;  %2450 = vperm.xlu1 %3932, %v4565_v27   ;;  %v5273_v62 = vpop.permute.xlu1 %2055  ;;  %v3965_v27 = vld [vmem:[#allocation2 + $0x301] ss:$2 sm:$0xff] }
 0x273   : > { %7534 = vst [vmem:[#allocation209_spill] sm:$0xff] %v5273_v62 }
 0x274   : > { %v5270_v39 = vpop.permute.xlu0 %2769 }
 0x275   : > { %7533 = vst [vmem:[#allocation208_spill] sm:$0xff] %v5270_v39 }
 0x276   : > { %1132 = vperm.xlu0 %3943, %v3962_v46   ;;  %2458 = vperm.xlu1 %3932, %v4573_v16   ;;  %v5278_v58 = vpop.permute.xlu1 %2063  ;;  %v3966_v16 = vld [vmem:[#allocation2 + $0x32] ss:$2 sm:$0xff] }
 0x277   : > { %7536 = vst [vmem:[#allocation211_spill] sm:$0xff] %v5278_v58 }
 0x278   : > { %v5275_v47 = vpop.permute.xlu0 %2777 }
 0x279   : > { %7535 = vst [vmem:[#allocation210_spill] sm:$0xff] %v5275_v47  ;;  %v3967_v47 = vld [vmem:[#allocation2 + $0xc2] ss:$2 sm:$0xff] }
 0x27a   : > { %1140 = vperm.xlu0 %3943, %v3963_v18   ;;  %3933 = vset.pattern.permute.xlu1 %v7345_v31  ;;  %v5283_v40 = vpop.permute.xlu1 %2071 }
 0x27b   : > { %7538 = vst [vmem:[#allocation213_spill] sm:$0xff] %v5283_v40  ;;  %2503 = vperm.xlu1 %3933, %v4980_v24  }
 0x27c   : > { %v5280_v2 = vpop.permute.xlu0 %2785 }
 0x27d   : > { %7537 = vst [vmem:[#allocation212_spill] sm:$0xff] %v5280_v2 }
 0x27e   : > { %1148 = vperm.xlu0 %3943, %v3964_v29   ;;  %v5288_v62 = vpop.permute.xlu1 %2079 }
 0x27f   : > { %7540 = vst [vmem:[#allocation215_spill] sm:$0xff] %v5288_v62  ;;  %2507 = vperm.xlu1 %3933, %v5184_v6  }
 0x280   : > { %v5285_v46 = vpop.permute.xlu0 %2793 }
 0x281   : > { %7539 = vst [vmem:[#allocation214_spill] sm:$0xff] %v5285_v46 }
 0x282   : > { %1156 = vperm.xlu0 %3943, %v3965_v27   ;;  %v5293_v2 = vpop.permute.xlu1 %2087  ;;  %v3968_v27 = vld [vmem:[#allocation2 + $0x122] ss:$2 sm:$0xff] }
 0x283   : > { %7542 = vst [vmem:[#allocation217_spill] sm:$0xff] %v5293_v2  ;;  %2515 = vperm.xlu1 %3933, %v4990_v3   ;;  %v7614_v2 = vld [vmem:[#allocation25_spill] sm:$0xff] }
 0x284   : > { %v5290_v18 = vpop.permute.xlu0 %2801 }
 0x285   : > { %7541 = vst [vmem:[#allocation216_spill] sm:$0xff] %v5290_v18 }
 0x286   : > { %1451 = vperm.xlu0 %3943, %v3966_v16   ;;  %v5298_v46 = vpop.permute.xlu1 %2095  ;;  %v3969_v16 = vld [vmem:[#allocation2 + $0x1b2] ss:$2 sm:$0xff] }
 0x287   : > { %7544 = vst [vmem:[#allocation219_spill] sm:$0xff] %v5298_v46  ;;  %2523 = vperm.xlu1 %3933, %v4998_v0   ;;  %v5514_v46 = vld [vmem:[%s7289_s2 + $0x3] ss:$0 sm:$0xff] }
 0x288   : > { %v5295_v29 = vpop.permute.xlu0 %2809 }
 0x289   : > { %7543 = vst [vmem:[#allocation218_spill] sm:$0xff] %v5295_v29 }
 0x28a   : > { %1463 = vperm.xlu0 %3943, %v3967_v47   ;;  %v5303_v18 = vpop.permute.xlu1 %2103  ;;  %v3970_v47 = vld [vmem:[#allocation2 + $0x212] ss:$2 sm:$0xff] }
 0x28b   : > { %7546 = vst [vmem:[#allocation221_spill] sm:$0xff] %v5303_v18  ;;  %2531 = vperm.xlu1 %3933, %v5006_v14  }
 0x28c   : > { %v5300_v24 = vpop.permute.xlu0 %3104 }
 0x28d   : > { %7545 = vst [vmem:[#allocation220_spill] sm:$0xff] %v5300_v24 }
 0x28e   : > { %1471 = vperm.xlu0 %3943, %v3968_v27   ;;  %v3971_v27 = vld [vmem:[#allocation2 + $0x272] ss:$2 sm:$0xff] }
 0x28f   : > { %2539 = vperm.xlu1 %3933, %v5014_v48   ;;  %v5311_v3 = vpop.permute.xlu1 %2148 }
 0x290   : > { %v5305_v6 = vpop.permute.xlu0 %3116  ;;  %7549 = vst [vmem:[#allocation224_spill] sm:$0xff] %v5311_v3 }
 0x291   : > { %7547 = vst [vmem:[#allocation222_spill] sm:$0xff] %v5305_v6 }
 0x292   : > { %1479 = vperm.xlu0 %3943, %v3969_v16   ;;  %v3972_v16 = vld [vmem:[#allocation2 + $0x2d2] ss:$2 sm:$0xff] }
 0x293   : > { %2547 = vperm.xlu1 %3933, %v5022_v23   ;;  %v5316_v0 = vpop.permute.xlu1 %2156  ;;  %v3973_v23 = vld [vmem:[#allocation2 + $0x18] ss:$2 sm:$0xff] }
 0x294   : > { %v5308_v29 = vpop.permute.xlu0 %3124  ;;  %7551 = vst [vmem:[#allocation226_spill] sm:$0xff] %v5316_v0 }
 0x295   : > { %7548 = vst [vmem:[#allocation223_spill] sm:$0xff] %v5308_v29  ;;  %v3975_v29 = vld [vmem:[#allocation2 + $0x108] ss:$2 sm:$0xff] }
 0x296   : > { %1487 = vperm.xlu0 %3943, %v3970_v47  }
 0x297   : > { %2555 = vperm.xlu1 %3933, %v5028_v15   ;;  %v5321_v14 = vpop.permute.xlu1 %2160  ;;  %v3974_v15 = vld [vmem:[#allocation2 + $0xa8] ss:$2 sm:$0xff] }
 0x298   : > { %v5313_v24 = vpop.permute.xlu0 %3132  ;;  %7553 = vst [vmem:[#allocation228_spill] sm:$0xff] %v5321_v14  ;;  %v5396_v14 = vld [vmem:[#allocation2 + $0x1e0] ss:$2 sm:$0xff] }
 0x299   : > { %7550 = vst [vmem:[#allocation225_spill] sm:$0xff] %v5313_v24  ;;  %v5329_v24 = vld [vmem:[#allocation2 + $0x90] ss:$2 sm:$0xff] }
 0x29a   : > { %1495 = vperm.xlu0 %3943, %v3971_v27  }
 0x29b   : > { %3934 = vset.pattern.permute.xlu1 %v7362_v25  ;;  %v5326_v47 = vpop.permute.xlu1 %2168 }
 0x29c   : > { %v5318_v6 = vpop.permute.xlu0 %3140  ;;  %7555 = vst [vmem:[#allocation230_spill] sm:$0xff] %v5326_v47  ;;  %2633 = vperm.xlu1 %3934, %v5036_v53   ;;  %v3989_v47 = vld [vmem:[#allocation2 + $0x289] ss:$2 sm:$0xff] }
 0x29d   : > { %7552 = vst [vmem:[#allocation227_spill] sm:$0xff] %v5318_v6 }
 0x29e   : > { %1503 = vperm.xlu0 %3943, %v3972_v16  }
 0x29f   : > { %v5333_v6 = vpop.permute.xlu1 %2176 }
 0x2a0   : > { %v5323_v48 = vpop.permute.xlu0 %3148  ;;  %7557 = vst [vmem:[#allocation232_spill] sm:$0xff] %v5333_v6  ;;  %2643 = vperm.xlu1 %3934, %v5329_v24   ;;  %v3987_v6 = vld [vmem:[#allocation2 + $0x229] ss:$2 sm:$0xff] }
 0x2a1   : > { %7554 = vst [vmem:[#allocation229_spill] sm:$0xff] %v5323_v48 }
 0x2a2   : > { %1797 = vperm.xlu0 %3943, %v3973_v23  }
 0x2a3   : > { %v5338_v48 = vpop.permute.xlu1 %2184 }
 0x2a4   : > { %v5331_v27 = vpop.permute.xlu0 %3156  ;;  %7559 = vst [vmem:[#allocation234_spill] sm:$0xff] %v5338_v48  ;;  %2648 = vperm.xlu1 %3934, %v5044_v30  }
 0x2a5   : > { %7556 = vst [vmem:[#allocation231_spill] sm:$0xff] %v5331_v27  ;;  %v3976_v27 = vld [vmem:[#allocation2 + $0x168] ss:$2 sm:$0xff] }
 0x2a6   : > { %1809 = vperm.xlu0 %3943, %v3974_v15   ;;  %v3977_v15 = vld [vmem:[#allocation2 + $0x1f8] ss:$2 sm:$0xff] }
 0x2a7   : > { %v5343_v23 = vpop.permute.xlu1 %2192 }
 0x2a8   : > { %v5336_v16 = vpop.permute.xlu0 %3451  ;;  %7561 = vst [vmem:[#allocation236_spill] sm:$0xff] %v5343_v23  ;;  %2658 = vperm.xlu1 %3934, %v5052_v61  }
 0x2a9   : > { %7558 = vst [vmem:[#allocation233_spill] sm:$0xff] %v5336_v16 }
 0x2aa   : > { %1817 = vperm.xlu0 %3943, %v3975_v29   ;;  %v3978_v29 = vld [vmem:[#allocation2 + $0x258] ss:$2 sm:$0xff] }
 0x2ab   : > { %v5348_v40 = vpop.permute.xlu1 %2200 }
 0x2ac   : > { %v5341_v0 = vpop.permute.xlu0 %3463  ;;  %7563 = vst [vmem:[#allocation238_spill] sm:$0xff] %v5348_v40  ;;  %2668 = vperm.xlu1 %3934, %v5061_v49  }
 0x2ad   : > { %7560 = vst [vmem:[#allocation235_spill] sm:$0xff] %v5341_v0 }
 0x2ae   : > { %1825 = vperm.xlu0 %3943, %v3976_v27  }
 0x2af   : > { %v5353_v58 = vpop.permute.xlu1 %2208 }
 0x2b0   : > { %v5346_v39 = vpop.permute.xlu0 %3471  ;;  %7565 = vst [vmem:[#allocation240_spill] sm:$0xff] %v5353_v58  ;;  %2678 = vperm.xlu1 %3934, %v5069_v7  }
 0x2b1   : > { %7562 = vst [vmem:[#allocation237_spill] sm:$0xff] %v5346_v39  ;;  %v3979_v39 = vld [vmem:[#allocation2 + $0x2b8] ss:$2 sm:$0xff] }
 0x2b2   : > { %1833 = vperm.xlu0 %3943, %v3977_v15  }
 0x2b4   : > { %v5351_v16 = vpop.permute.xlu0 %3479  ;;  %2688 = vperm.xlu1 %3934, %v5077_v56   ;;  %v5359_v27 = vpop.permute.xlu1 %2287 }
 0x2b5   : > { %7564 = vst [vmem:[#allocation239_spill] sm:$0xff] %v5351_v16  ;;  %7567 = vst [vmem:[#allocation242_spill] sm:$0xff] %v5359_v27  ;;  %v3980_v16 = vld [vmem:[#allocation2 + $0x318] ss:$2 sm:$0xff] }
 0x2b6   : > { %1841 = vperm.xlu0 %3943, %v3978_v29   ;;  %v5376_v27 = vld [vmem:[#allocation2 + $0x60] ss:$2 sm:$0xff] }
 0x2b8   : > { %v5356_v0 = vpop.permute.xlu0 %3487  ;;  %2698 = vperm.xlu1 %3934, %v5085_v10   ;;  %v5364_v15 = vpop.permute.xlu1 %2292 }
 0x2b9   : > { %7566 = vst [vmem:[#allocation241_spill] sm:$0xff] %v5356_v0  ;;  %7569 = vst [vmem:[#allocation244_spill] sm:$0xff] %v5364_v15  ;;  %v3981_v0 = vld [vmem:[#allocation2 + $0x49] ss:$2 sm:$0xff]  ;;  %v3984_v15 = vld [vmem:[#allocation2 + $0x139] ss:$2 sm:$0xff] }
 0x2ba   : > { %1849 = vperm.xlu0 %3943, %v3979_v39  }
 0x2bc   : > { %v5361_v40 = vpop.permute.xlu0 %3495  ;;  %2708 = vperm.xlu1 %3934, %v5093_v59   ;;  %v5369_v29 = vpop.permute.xlu1 %2302 }
 0x2bd   : > { %7568 = vst [vmem:[#allocation243_spill] sm:$0xff] %v5361_v40  ;;  %7571 = vst [vmem:[#allocation246_spill] sm:$0xff] %v5369_v29  ;;  %v3982_v40 = vld [vmem:[#allocation2 + $0xd9] ss:$2 sm:$0xff]  ;;  %v3985_v29 = vld [vmem:[#allocation2 + $0x1c9] ss:$2 sm:$0xff] }
 0x2be   : > { %1857 = vperm.xlu0 %3943, %v3980_v16  }
 0x2c0   : > { %v5366_v58 = vpop.permute.xlu0 %3503  ;;  %3935 = vset.pattern.permute.xlu1 %v7381_v57  ;;  %v5374_v39 = vpop.permute.xlu1 %2312 }
 0x2c1   : > { %7570 = vst [vmem:[#allocation245_spill] sm:$0xff] %v5366_v58  ;;  %7573 = vst [vmem:[#allocation248_spill] sm:$0xff] %v5374_v39  ;;  %2753 = vperm.xlu1 %3935, %v5376_v27   ;;  %v3986_v39 = vld [vmem:[#allocation2 + $0xf0] ss:$2 sm:$0xff] }
 0x2c2   : > { %2152 = vperm.xlu0 %3943, %v3981_v0  }
 0x2c4   : > { %v5371_v23 = vpop.permute.xlu0 %3511  ;;  %v5381_v58 = vpop.permute.xlu1 %2322 }
 0x2c5   : > { %7572 = vst [vmem:[#allocation247_spill] sm:$0xff] %v5371_v23  ;;  %7575 = vst [vmem:[#allocation250_spill] sm:$0xff] %v5381_v58  ;;  %2757 = vperm.xlu1 %3935, %v5329_v24  }
 0x2c6   : > { %2164 = vperm.xlu0 %3943, %v3982_v40  }
 0x2c8   : > { %v5386_v23 = vpop.permute.xlu1 %2332 }
 0x2c9   : > { %v5379_v16 = vpop.permute.xlu0 %749  ;;  %7577 = vst [vmem:[#allocation252_spill] sm:$0xff] %v5386_v23  ;;  %2765 = vperm.xlu1 %3935, %v3986_v39   ;;  %v3991_v23 = vld [vmem:[#allocation2 + $0x2e9] ss:$2 sm:$0xff] }
 0x2ca   : > { %7574 = vst [vmem:[#allocation249_spill] sm:$0xff] %v5379_v16  ;;  %2172 = vperm.xlu0 %3943, %v3984_v15   ;;  %v3988_v16 = vld [vmem:[#allocation2 + $0x150] ss:$2 sm:$0xff] }
 0x2cc   : > { %v5390_v48 = vpop.permute.xlu1 %2342 }
 0x2cd   : > { %v5384_v0 = vpop.permute.xlu0 %761  ;;  %7579 = vst [vmem:[#allocation254_spill] sm:$0xff] %v5390_v48  ;;  %2773 = vperm.xlu1 %3935, %v3988_v16  }
 0x2ce   : > { %7576 = vst [vmem:[#allocation251_spill] sm:$0xff] %v5384_v0  ;;  %2180 = vperm.xlu0 %3943, %v3985_v29  }
 0x2d0   : > { %v5394_v15 = vpop.permute.xlu1 %2352 }
 0x2d1   : > { %v5388_v40 = vpop.permute.xlu0 %769  ;;  %7580 = vst [vmem:[#allocation255_spill] sm:$0xff] %v5394_v15  ;;  %2781 = vperm.xlu1 %3935, %v5396_v14   ;;  %v5409_v15 = vld [vmem:[#allocation2 + $0x2a0] ss:$2 sm:$0xff] }
 0x2d2   : > { %7578 = vst [vmem:[#allocation253_spill] sm:$0xff] %v5388_v40  ;;  %2188 = vperm.xlu0 %3943, %v3987_v6   ;;  %v5401_v40 = vld [vmem:[#allocation2 + $0x240] ss:$2 sm:$0xff] }
 0x2d5   : > { %v5392_v58 = vpop.permute.xlu0 %777  ;;  %2789 = vperm.xlu1 %3935, %v5401_v40   ;;  %v5404_v6 = vpop.permute.xlu1 %2398 }
 0x2d6   : > { %2196 = vperm.xlu0 %3943, %v3989_v47   ;;  %7581 = vst [vmem:[#allocation256_spill] sm:$0xff] %v5404_v6 }
 0x2d9   : > { %v5399_v29 = vpop.permute.xlu0 %785  ;;  %2797 = vperm.xlu1 %3935, %v5409_v15   ;;  %v5412_v47 = vpop.permute.xlu1 %2406 }
 0x2da   : > { %2204 = vperm.xlu0 %3943, %v3991_v23   ;;  %7583 = vst [vmem:[#allocation258_spill] sm:$0xff] %v5412_v47  ;;  %v5417_v23 = vld [vmem:[#allocation2 + $0x300] ss:$2 sm:$0xff] }
 0x2dd   : > { %v5406_v48 = vpop.permute.xlu0 %793  ;;  %2805 = vperm.xlu1 %3935, %v5417_v23   ;;  %v5420_v18 = vpop.permute.xlu1 %2410 }
 0x2de   : > { %7582 = vst [vmem:[#allocation257_spill] sm:$0xff] %v5406_v48  ;;  %2499 = vperm.xlu0 %3943, %v5227_v54   ;;  %7585 = vst [vmem:[#allocation260_spill] sm:$0xff] %v5420_v18 }
 0x2e1   : > { %v5414_v3 = vpop.permute.xlu0 %801  ;;  %3936 = vset.pattern.permute.xlu1 %v7345_v31  ;;  %v5426_v54 = vpop.permute.xlu1 %2418 }
 0x2e2   : > { %7584 = vst [vmem:[#allocation259_spill] sm:$0xff] %v5414_v3  ;;  %2511 = vperm.xlu0 %3943, %v5239_v37   ;;  %7587 = vst [vmem:[#allocation262_spill] sm:$0xff] %v5426_v54  ;;  %2850 = vperm.xlu1 %3936, %v5036_v53  }
 0x2e5   : > { %v5422_v6 = vpop.permute.xlu0 %1096  ;;  %v5432_v37 = vpop.permute.xlu1 %2426 }
 0x2e6   : > { %7586 = vst [vmem:[#allocation261_spill] sm:$0xff] %v5422_v6  ;;  %2519 = vperm.xlu0 %3943, %v5246_v21   ;;  %7589 = vst [vmem:[#allocation264_spill] sm:$0xff] %v5432_v37  ;;  %2858 = vperm.xlu1 %3936, %v5329_v24   ;;  %v3995_v37 = vld [vmem:[#allocation2 + $0x2ba] ss:$2 sm:$0xff] }
 0x2e9   : > { %v5429_v47 = vpop.permute.xlu0 %1108  ;;  %v5438_v18 = vpop.permute.xlu1 %2434 }
 0x2ea   : > { %7588 = vst [vmem:[#allocation263_spill] sm:$0xff] %v5429_v47  ;;  %2527 = vperm.xlu0 %3943, %v5253_v55   ;;  %7591 = vst [vmem:[#allocation266_spill] sm:$0xff] %v5438_v18  ;;  %2862 = vperm.xlu1 %3936, %v5044_v30   ;;  %v3996_v18 = vld [vmem:[#allocation2 + $0x31a] ss:$2 sm:$0xff] }
 0x2eb   : > { %v7620_v47 = vld [vmem:[#allocation31_spill] sm:$0xff] }
 0x2ed   : > { %v5435_v0 = vpop.permute.xlu0 %1116  ;;  %v5444_v53 = vpop.permute.xlu1 %2442 }
 0x2ee   : > { %7590 = vst [vmem:[#allocation265_spill] sm:$0xff] %v5435_v0  ;;  %2535 = vperm.xlu0 %3943, %v5260_v26   ;;  %7593 = vst [vmem:[#allocation268_spill] sm:$0xff] %v5444_v53  ;;  %2870 = vperm.xlu1 %3936, %v5052_v61  }
 0x2f1   : > { %v5441_v21 = vpop.permute.xlu0 %1124  ;;  %v5449_v24 = vpop.permute.xlu1 %2450 }
 0x2f2   : > { %7592 = vst [vmem:[#allocation267_spill] sm:$0xff] %v5441_v21  ;;  %2543 = vperm.xlu0 %3943, %v5265_v17   ;;  %7595 = vst [vmem:[#allocation270_spill] sm:$0xff] %v5449_v24  ;;  %2878 = vperm.xlu1 %3936, %v5061_v49   ;;  %v7605_v24 = vld [vmem:[#allocation6_spill] sm:$0xff] }
 0x2f3   : > { %v7619_v21 = vld [vmem:[#allocation14_spill] sm:$0xff] }
 0x2f5   : > { %v5447_v55 = vpop.permute.xlu0 %1132  ;;  %v5454_v30 = vpop.permute.xlu1 %2458 }
 0x2f6   : > { %7594 = vst [vmem:[#allocation269_spill] sm:$0xff] %v5447_v55  ;;  %2551 = vperm.xlu0 %3943, %v3995_v37   ;;  %7597 = vst [vmem:[#allocation272_spill] sm:$0xff] %v5454_v30  ;;  %2886 = vperm.xlu1 %3936, %v5069_v7  }
 0x2f9   : > { %v5452_v26 = vpop.permute.xlu0 %1140 }
 0x2fa   : > { %7596 = vst [vmem:[#allocation271_spill] sm:$0xff] %v5452_v26  ;;  %2559 = vperm.xlu0 %3943, %v3996_v18   ;;  %2894 = vperm.xlu1 %3936, %v5077_v56   ;;  %v5461_v61 = vpop.permute.xlu1 %2503  ;;  %v3871_v18 = vld [vmem:[%s7289_s2] ss:$0 sm:$0xff]  ;;  %v7616_v26 = vld [vmem:[#allocation29_spill] sm:$0xff] }
 0x2fb   : > { %7599 = vst [vmem:[#allocation274_spill] sm:$0xff] %v5461_v61  ;;  %v5474_v30 = vmul.f32 %v3871_v18, %v4486_v60  ;;  %v618_v56 = vmul.f32 %v3871_v18, %v4494_v5  ;;  %v7604_v61 = vld [vmem:[#allocation5_spill] sm:$0xff]  ;;  %v5489_v60 = vmul.f32 %v3871_v18, %v7605_v24  ;;  %v7607_v5 = vld [vmem:[#allocation8_spill] sm:$0xff]  ;;  %v7611_v24 = vld [vmem:[#allocation23_spill] sm:$0xff]  ;;  %v5531_v0 = vmul.f32 %v3871_v18, %v7619_v21 }
 0x2fc   : > { %v5493_v54 = vmul.f32 %v3871_v18, %v7607_v5  ;;  %v7613_v5 = vld [vmem:[#allocation11_spill] sm:$0xff]  ;;  %v7627_v21 = vld [vmem:[#allocation20_spill] sm:$0xff] }
 0x2fd   : > { %v5457_v17 = vpop.permute.xlu0 %1148 }
 0x2fe   : > { %7598 = vst [vmem:[#allocation273_spill] sm:$0xff] %v5457_v17  ;;  %2854 = vperm.xlu0 %3943, %v5376_v27   ;;  %2902 = vperm.xlu1 %3936, %v5085_v10   ;;  %v5466_v49 = vpop.permute.xlu1 %2507  ;;  %v5478_v27 = vmul.f32 %v3871_v18, %v4512_v19  ;;  %v5482_v10 = vmul.f32 %v3871_v18, %v4520_v22  ;;  %v5498_v19 = vld [vmem:[%s7289_s2 + $0x1] ss:$0 sm:$0xff] }
 0x2ff   : > { %7601 = vst [vmem:[#allocation276_spill] sm:$0xff] %v5466_v49  ;;  %v624_v17 = vmul.f32 %v3871_v18, %v7613_v5  ;;  %v7618_v5 = vld [vmem:[#allocation13_spill] sm:$0xff] }
 0x300   : > { %v5528_v55 = vmul.f32 %v5514_v46, %v7618_v5  ;;  %v7625_v5 = vld [vmem:[#allocation18_spill] sm:$0xff] }
 0x301   : > { %v5463_v37 = vpop.permute.xlu0 %1156  ;;  %v5548_v57 = vmul.f32 %v5514_v46, %v7625_v5  ;;  %v7630_v5 = vld [vmem:[#allocation22_spill] sm:$0xff] }
 0x302   : > { %7600 = vst [vmem:[#allocation275_spill] sm:$0xff] %v5463_v37  ;;  %2866 = vperm.xlu0 %3943, %v3986_v39   ;;  %v614_v39 = vmul.f32 %v3871_v18, %v4515_v20  ;;  %2910 = vperm.xlu1 %3936, %v5093_v59   ;;  %v5485_v49 = vpop.permute.xlu1 %2515  ;;  %v7608_v20 = vld [vmem:[#allocation9_spill] sm:$0xff]  ;;  %v7609_v59 = vld [vmem:[#allocation10_spill] sm:$0xff]  ;;  %v717_v37 = vmul.f32 %v5498_v19, %v7611_v24  ;;  %v7617_v24 = vld [vmem:[#allocation12_spill] sm:$0xff] }
 0x303   : > { %7603 = vst [vmem:[#allocation278_spill] sm:$0xff] %v5485_v49  ;;  %v622_v22 = vmul.f32 %v3871_v18, %v7608_v20  ;;  %v5502_v31 = vmul.f32 %v3871_v18, %v7609_v59  ;;  %v7610_v49 = vld [vmem:[#allocation21_spill] sm:$0xff]  ;;  %v719_v20 = vmul.f32 %v5498_v19, %v7614_v2  ;;  %v7615_v59 = vld [vmem:[#allocation27_spill] sm:$0xff]  ;;  %v725_v2 = vmul.f32 %v5498_v19, %v7620_v47 }
 0x304   : > { %v721_v62 = vmul.f32 %v5498_v19, %v7615_v59  ;;  %7626 = vst [vmem:[#allocation8_spill] sm:$0xff] %v5548_v57  ;;  %v5557_v47 = vld [vmem:[%s7289_s2 + $0x6] ss:$0 sm:$0xff] }
 0x305   : > { %v5471_v7 = vpop.permute.xlu0 %1451  ;;  %v5581_v57 = vadd.f32 %v719_v20, %v618_v56  ;;  %v5601_v56 = vadd.f32 %v725_v2, %v624_v17  ;;  %v7641_v20 = vld [vmem:[#allocation32_spill] sm:$0xff]  ;;  %v7649_v17 = vld [vmem:[#allocation37_spill] sm:$0xff] }
 0x306   : > { %7602 = vst [vmem:[#allocation277_spill] sm:$0xff] %v5471_v7  ;;  %2874 = vperm.xlu0 %3943, %v3988_v16   ;;  %v616_v7 = vmul.f32 %v3871_v18, %v7604_v61  ;;  %v7606_v16 = vld [vmem:[#allocation7_spill] sm:$0xff]  ;;  %v715_v61 = vmul.f32 %v5498_v19, %v7610_v49  ;;  %v723_v49 = vmul.f32 %v5498_v19, %v7616_v26  ;;  %v5536_v59 = vpop.permute.xlu1 %2523 }
 0x307   : > { %v620_v53 = vmul.f32 %v3871_v18, %v7606_v16  ;;  %3937 = vset.pattern.permute.xlu1 %v7362_v25  ;;  %7621 = vst [vmem:[#allocation6_spill] sm:$0xff] %v5536_v59  ;;  %v7622_v26 = vld [vmem:[#allocation15_spill] sm:$0xff]  ;;  %v5569_v59 = vmul.f32 %v5514_v46, %v7630_v5  ;;  %v7632_v25 = vld [vmem:[#allocation24_spill] sm:$0xff]  ;;  %7640 = vst [vmem:[#allocation12_spill] sm:$0xff] %v5601_v56 }
 0x308   : > { %2989 = vperm.xlu1 %3937, %v5101_v1   ;;  %v5575_v3 = vmul.f32 %v5514_v46, %v7632_v25  ;;  %v7638_v25 = vld [vmem:[#allocation30_spill] sm:$0xff]  ;;  %v7679_v56 = vld [vmem:[#allocation56_spill] sm:$0xff] }
 0x309   : > { %v5508_v16 = vpop.permute.xlu0 %1463 }
 0x30a   : > { %7612 = vst [vmem:[#allocation5_spill] sm:$0xff] %v5508_v16  ;;  %2882 = vperm.xlu0 %3943, %v5396_v14   ;;  %v5524_v16 = vmul.f32 %v3871_v18, %v7617_v24  ;;  %v5540_v14 = vmul.f32 %v5514_v46, %v7622_v26  ;;  %v7623_v24 = vld [vmem:[#allocation16_spill] sm:$0xff]  ;;  %v5552_v18 = vmul.f32 %v5514_v46, %v7627_v21  ;;  %v5562_v26 = vld [vmem:[%s7289_s2 + $0x2] ss:$0 sm:$0xff] }
 0x30b   : > { %v5544_v6 = vmul.f32 %v5514_v46, %v7623_v24  ;;  %v5565_v24 = vadd.f32 %v715_v61, %v614_v39  ;;  %v5571_v21 = vadd.f32 %v717_v37, %v616_v7  ;;  %v5587_v39 = vadd.f32 %v721_v62, %v620_v53  ;;  %v5594_v37 = vld [vmem:[%s7289_s2 + $0x9] ss:$0 sm:$0xff]  ;;  %v7643_v62 = vld [vmem:[#allocation33_spill] sm:$0xff] }
 0x30c   : > { %7628 = vst [vmem:[#allocation9_spill] sm:$0xff] %v5552_v18  ;;  %v5579_v18 = vld [vmem:[#allocation2 + $0x91] ss:$2 sm:$0xff]  ;;  %v5589_v61 = vadd.f32 %v723_v49, %v622_v22  ;;  %7637 = vst [vmem:[#allocation27_spill] sm:$0xff] %v5594_v37  ;;  %v5599_v7 = vmul.f32 %v5557_v47, %v7638_v25  ;;  %v5609_v53 = vmul.f32 %v5562_v26, %v7643_v62  ;;  %v5611_v22 = vpop.permute.xlu1 %2531  ;;  %v7652_v62 = vld [vmem:[#allocation39_spill] sm:$0xff] }
 0x30d   : > { %7624 = vst [vmem:[#allocation7_spill] sm:$0xff] %v5544_v6  ;;  %7629 = vst [vmem:[#allocation10_spill] sm:$0xff] %v5565_v24  ;;  %v5577_v48 = vpop.permute.xlu0 %1471  ;;  %v7635_v6 = vld [vmem:[#allocation26_spill] sm:$0xff]  ;;  %v5623_v2 = vmul.f32 %v5562_v26, %v7649_v17  ;;  %2994 = vperm.xlu1 %3937, %v5579_v18   ;;  %v7659_v24 = vld [vmem:[#allocation43_spill] sm:$0xff] }
 0x30e   : > { %7631 = vst [vmem:[#allocation21_spill] sm:$0xff] %v5571_v21  ;;  %7633 = vst [vmem:[#allocation23_spill] sm:$0xff] %v5577_v48  ;;  %v5585_v1 = vmul.f32 %v5514_v46, %v7635_v6  ;;  %2890 = vperm.xlu0 %3943, %v5401_v40   ;;  %v5605_v6 = vmul.f32 %v5557_v47, %v7641_v20  ;;  %v7645_v49 = vld [vmem:[#allocation34_spill] sm:$0xff]  ;;  %v7647_v40 = vld [vmem:[#allocation36_spill] sm:$0xff] }
 0x30f   : > { %7634 = vst [vmem:[#allocation11_spill] sm:$0xff] %v5579_v18  ;;  %7636 = vst [vmem:[#allocation25_spill] sm:$0xff] %v5589_v61  ;;  %v5615_v5 = vmul.f32 %v5557_v47, %v7645_v49  ;;  %v5619_v25 = vmul.f32 %v5557_v47, %v7647_v40  ;;  %v7650_v20 = vld [vmem:[#allocation38_spill] sm:$0xff]  ;;  %v7653_v49 = vld [vmem:[#allocation40_spill] sm:$0xff]  ;;  %v5707_v61 = vmul.f32 %v5594_v37, %v7679_v56 }
 0x310   : > { %7639 = vst [vmem:[#allocation29_spill] sm:$0xff] %v5599_v7  ;;  %7642 = vst [vmem:[#allocation13_spill] sm:$0xff] %v5605_v6  ;;  %v5627_v48 = vmul.f32 %v5557_v47, %v7650_v20  ;;  %v5636_v6 = vmul.f32 %v5557_v47, %v7653_v49  ;;  %v7655_v40 = vld [vmem:[#allocation41_spill] sm:$0xff]  ;;  %v7656_v17 = vld [vmem:[#allocation42_spill] sm:$0xff]  ;;  %v5729_v56 = vmul.f32 %v5514_v46, %v4705_v32 }
 0x311   : > { %7644 = vst [vmem:[#allocation14_spill] sm:$0xff] %v5611_v22  ;;  %7646 = vst [vmem:[#allocation31_spill] sm:$0xff] %v5615_v5  ;;  %v5632_v22 = vmul.f32 %v5562_v26, %v7652_v62  ;;  %v5640_v7 = vmul.f32 %v5562_v26, %v7655_v40  ;;  %v5644_v21 = vmul.f32 %v5594_v37, %v7656_v17  ;;  %v5646_v20 = vpop.permute.xlu0 %1479  ;;  %v7660_v62 = vld [vmem:[#allocation44_spill] sm:$0xff]  ;;  %v7662_v49 = vld [vmem:[#allocation45_spill] sm:$0xff]  ;;  %3004 = vperm.xlu1 %3937, %v5109_v9  }
 0x312   : > { %7648 = vst [vmem:[#allocation15_spill] sm:$0xff] %v5619_v25  ;;  %7651 = vst [vmem:[#allocation16_spill] sm:$0xff] %v5627_v48  ;;  %v5650_v48 = vmul.f32 %v5562_v26, %v7659_v24  ;;  %v5654_v25 = vmul.f32 %v5594_v37, %v7660_v62  ;;  %v7663_v40 = vld [vmem:[#allocation46_spill] sm:$0xff]  ;;  %2898 = vperm.xlu0 %3943, %v5409_v15   ;;  %v7665_v17 = vld [vmem:[#allocation47_spill] sm:$0xff] }
 0x313   : > { %7654 = vst [vmem:[#allocation18_spill] sm:$0xff] %v5636_v6  ;;  %7657 = vst [vmem:[#allocation20_spill] sm:$0xff] %v5644_v21  ;;  %v5658_v6 = vmul.f32 %v5562_v26, %v7662_v49  ;;  %v5662_v5 = vmul.f32 %v5594_v37, %v7663_v40  ;;  %v5667_v21 = vmul.f32 %v5562_v26, %v7665_v17  ;;  %v7666_v24 = vld [vmem:[#allocation48_spill] sm:$0xff]  ;;  %v7668_v62 = vld [vmem:[#allocation49_spill] sm:$0xff]  ;;  %v5691_v17 = vpop.permute.xlu1 %2539 }
 0x314   : > { %7658 = vst [vmem:[#allocation22_spill] sm:$0xff] %v5646_v20  ;;  %7661 = vst [vmem:[#allocation24_spill] sm:$0xff] %v5654_v25  ;;  %v5671_v20 = vmul.f32 %v5594_v37, %v7666_v24  ;;  %v5675_v25 = vmul.f32 %v5562_v26, %v7668_v62  ;;  %v7669_v49 = vld [vmem:[#allocation50_spill] sm:$0xff]  ;;  %v5684_v15 = vld [vmem:[%s7289_s2 + $0xc] ss:$0 sm:$0xff] }
 0x315   : > { %7664 = vst [vmem:[#allocation26_spill] sm:$0xff] %v5662_v5  ;;  %v5679_v18 = vmul.f32 %v5594_v37, %v7669_v49  ;;  %7671 = vst [vmem:[#allocation33_spill] sm:$0xff] %v5684_v15  ;;  %v5689_v40 = vld [vmem:[%s7289_s2 + $0x4] ss:$0 sm:$0xff]  ;;  %v7673_v24 = vld [vmem:[#allocation52_spill] sm:$0xff]  ;;  %v5735_v9 = vmul.f32 %v5684_v15, %v4708_v36  ;;  %v5752_v32 = vmul.f32 %v5684_v15, %v4718_v43  ;;  %3014 = vperm.xlu1 %3937, %v5117_v50  }
 0x316   : > { %7667 = vst [vmem:[#allocation30_spill] sm:$0xff] %v5671_v20  ;;  %7672 = vst [vmem:[#allocation34_spill] sm:$0xff] %v5691_v17  ;;  %v5695_v62 = vmul.f32 %v5594_v37, %v7673_v24  ;;  %v7675_v20 = vld [vmem:[#allocation54_spill] sm:$0xff]  ;;  %v5712_v17 = vld [vmem:[%s7289_s2 + $0xf] ss:$0 sm:$0xff]  ;;  %2906 = vperm.xlu0 %3943, %v5417_v23   ;;  %v5756_v36 = vmul.f32 %v5684_v15, %v4725_v8  ;;  %v5778_v8 = vmul.f32 %v5689_v40, %v4741_v34 }
 0x317   : > { %7670 = vst [vmem:[#allocation32_spill] sm:$0xff] %v5679_v18  ;;  %v5699_v49 = vmul.f32 %v5594_v37, %v7675_v20  ;;  %v7677_v18 = vld [vmem:[#allocation55_spill] sm:$0xff]  ;;  %7680 = vst [vmem:[#allocation39_spill] sm:$0xff] %v5707_v61  ;;  %v7682_v24 = vld [vmem:[#allocation57_spill] sm:$0xff]  ;;  %v5731_v61 = vpop.permute.xlu0 %1487  ;;  %v5774_v43 = vmul.f32 %v5712_v17, %v4737_v12  ;;  %v714_v12 = vmul.f32 %v5498_v19, %v4942_v42 }
 0x318   : > { %7674 = vst [vmem:[#allocation36_spill] sm:$0xff] %v5695_v62  ;;  %v5703_v5 = vmul.f32 %v5514_v46, %v7677_v18  ;;  %7681 = vst [vmem:[#allocation40_spill] sm:$0xff] %v5712_v17  ;;  %v5717_v62 = vmul.f32 %v5514_v46, %v7682_v24  ;;  %v7684_v20 = vld [vmem:[#allocation59_spill] sm:$0xff]  ;;  %v5725_v18 = vmul.f32 %v5514_v46, %v4700_v44  ;;  %v5809_v42 = vld [vmem:[#allocation2 + $0x31] ss:$2 sm:$0xff] }
 0x319   : > { %7676 = vst [vmem:[#allocation37_spill] sm:$0xff] %v5699_v49  ;;  %v5721_v49 = vmul.f32 %v5514_v46, %v7684_v20  ;;  %7685 = vst [vmem:[#allocation42_spill] sm:$0xff] %v5735_v9  ;;  %v5739_v24 = vmul.f32 %v5514_v46, %v4710_v38  ;;  %v5743_v20 = vmul.f32 %v5684_v15, %v4713_v45  ;;  %v7696_v50 = vld [vmem:[#allocation119_spill] sm:$0xff]  ;;  %v7709_v9 = vld [vmem:[#allocation78_spill] sm:$0xff] }
 0x31a   : > { %7678 = vst [vmem:[#allocation38_spill] sm:$0xff] %v5703_v5  ;;  %7683 = vst [vmem:[#allocation41_spill] sm:$0xff] %v5717_v62  ;;  %v5747_v44 = vmul.f32 %v5689_v40, %v4716_v4  ;;  %v5760_v38 = vmul.f32 %v5689_v40, %v4729_v11  ;;  %v5764_v45 = vmul.f32 %v5712_v17, %v4731_v33  ;;  %v5766_v4 = vpop.permute.xlu1 %2547  ;;  %3201 = vperm.xlu0 %3943, %v5809_v42   ;;  %v7707_v5 = vld [vmem:[#allocation123_spill] sm:$0xff] }
 0x31b   : > { %7686 = vst [vmem:[#allocation43_spill] sm:$0xff] %v5743_v20  ;;  %7687 = vst [vmem:[#allocation44_spill] sm:$0xff] %v5752_v32  ;;  %v5770_v46 = vmul.f32 %v5689_v40, %v4735_v28  ;;  %v711_v11 = vmul.f32 %v5498_v19, %v4934_v51  ;;  %v5785_v33 = vmul.f32 %v5712_v17, %v4743_v63  ;;  %v5795_v23 = vpop.permute.xlu0 %1495  ;;  %v7708_v20 = vld [vmem:[#allocation158_spill] sm:$0xff] }
 0x31c   : > { %7688 = vst [vmem:[#allocation45_spill] sm:$0xff] %v5756_v36  ;;  %7689 = vst [vmem:[#allocation46_spill] sm:$0xff] %v5764_v45  ;;  %v5789_v28 = vmul.f32 %v5689_v40, %v4747_v35  ;;  %v716_v34 = vmul.f32 %v5498_v19, %v4950_v41  ;;  %v5803_v63 = vmul.f32 %v5689_v40, %v4753_v13  ;;  %v7697_v41 = vld [vmem:[#allocation64_spill] sm:$0xff]  ;;  %v7700_v13 = vld [vmem:[#allocation67_spill] sm:$0xff]  ;;  %3024 = vperm.xlu1 %3937, %v7708_v20  }
 0x31d   : > { %7690 = vst [vmem:[#allocation47_spill] sm:$0xff] %v5766_v4  ;;  %7691 = vst [vmem:[#allocation48_spill] sm:$0xff] %v5774_v43  ;;  %v7694_v4 = vld [vmem:[#allocation63_spill] sm:$0xff]  ;;  %v718_v35 = vmul.f32 %v5498_v19, %v4958_v52  ;;  %v5814_v43 = vmul.f32 %v5712_v17, %v7697_v41  ;;  %v5822_v45 = vmul.f32 %v5689_v40, %v7700_v13  ;;  %v7703_v41 = vld [vmem:[#allocation74_spill] sm:$0xff] }
 0x31e   : > { %7692 = vst [vmem:[#allocation49_spill] sm:$0xff] %v5785_v33  ;;  %7693 = vst [vmem:[#allocation50_spill] sm:$0xff] %v5795_v23  ;;  %v5799_v51 = vmul.f32 %v5712_v17, %v7694_v4  ;;  %v720_v33 = vmul.f32 %v5498_v19, %v7696_v50  ;;  %v7699_v4 = vld [vmem:[#allocation65_spill] sm:$0xff]  ;;  %v5827_v52 = vld [vmem:[%s7289_s2 + $0x5] ss:$0 sm:$0xff]  ;;  %v5831_v36 = vpop.permute.xlu1 %2555  ;;  %v727_v13 = vadd.f32 %v711_v11, %v5474_v30 }
 0x31f   : > { %7698 = vst [vmem:[#allocation54_spill] sm:$0xff] %v5814_v43  ;;  %v7701_v50 = vld [vmem:[#allocation121_spill] sm:$0xff]  ;;  %7702 = vst [vmem:[#allocation55_spill] sm:$0xff] %v5831_v36  ;;  %v5835_v17 = vmul.f32 %v5827_v52, %v7703_v41  ;;  %v724_v32 = vmul.f32 %v5498_v19, %v7707_v5  ;;  %v730_v36 = vadd.f32 %v714_v12, %v5478_v27  ;;  %v7713_v5 = vld [vmem:[#allocation82_spill] sm:$0xff] }
 0x320   : > { %7695 = vst [vmem:[#allocation52_spill] sm:$0xff] %v5799_v51  ;;  %v5818_v51 = vmul.f32 %v5689_v40, %v7699_v4  ;;  %v722_v62 = vmul.f32 %v5498_v19, %v7701_v50  ;;  %v7705_v4 = vld [vmem:[#allocation76_spill] sm:$0xff]  ;;  %v5847_v50 = vmul.f32 %v5827_v52, %v7709_v9  ;;  %v732_v41 = vadd.f32 %v716_v34, %v5482_v10 }
 0x321   : > { %7704 = vst [vmem:[#allocation56_spill] sm:$0xff] %v5835_v17  ;;  %v5839_v43 = vmul.f32 %v5827_v52, %v7705_v4  ;;  %v7710_v17 = vld [vmem:[#allocation125_spill] sm:$0xff]  ;;  %v5853_v4 = vpop.permute.xlu0 %1503  ;;  %v5861_v20 = vmul.f32 %v5827_v52, %v7713_v5  ;;  %v734_v9 = vadd.f32 %v718_v35, %v5489_v60  ;;  %v736_v11 = vadd.f32 %v720_v33, %v5493_v54  ;;  %v5865_v27 = vld [vmem:[#allocation2 + $0xc1] ss:$2 sm:$0xff]  ;;  %v7716_v60 = vld [vmem:[#allocation90_spill] sm:$0xff] }
 0x322   : > { %v726_v15 = vmul.f32 %v5498_v19, %v7710_v17  ;;  %7711 = vst [vmem:[#allocation59_spill] sm:$0xff] %v5853_v4  ;;  %3213 = vperm.xlu0 %3943, %v5865_v27   ;;  %v7714_v10 = vld [vmem:[#allocation84_spill] sm:$0xff]  ;;  %v7715_v17 = vld [vmem:[#allocation86_spill] sm:$0xff]  ;;  %v738_v12 = vadd.f32 %v722_v62, %v5502_v31  ;;  %v820_v34 = vmul.f32 %v5562_v26, %v5392_v58  ;;  %v7719_v4 = vld [vmem:[#allocation161_spill] sm:$0xff] }
 0x323   : > { %7706 = vst [vmem:[#allocation57_spill] sm:$0xff] %v5839_v43  ;;  %v7712_v43 = vld [vmem:[#allocation80_spill] sm:$0xff]  ;;  %v5870_v19 = vmul.f32 %v5827_v52, %v7714_v10  ;;  %v5881_v54 = vmul.f32 %v5557_v47, %v7716_v60  ;;  %v828_v5 = vadd.f32 %v5609_v53, %v727_v13  ;;  %v740_v10 = vadd.f32 %v724_v32, %v5524_v16  ;;  %v7721_v31 = vld [vmem:[#allocation94_spill] sm:$0xff] }
 0x324   : > { %v5857_v30 = vmul.f32 %v5827_v52, %v7712_v43  ;;  %v5874_v43 = vmul.f32 %v5557_v47, %v7715_v17  ;;  %v7717_v33 = vld [vmem:[#allocation92_spill] sm:$0xff]  ;;  %3034 = vperm.xlu1 %3937, %v7719_v4   ;;  %v5890_v17 = vpop.permute.xlu1 %2633  ;;  %v5894_v62 = vmul.f32 %v5557_v47, %v7721_v31  ;;  %v831_v58 = vadd.f32 %v5623_v2, %v730_v36  ;;  %v7723_v16 = vld [vmem:[#allocation98_spill] sm:$0xff]  ;;  %v5921_v2 = vld [vmem:[%s7289_s2 + $0x7] ss:$0 sm:$0xff] }
 0x325   : > { %v5885_v35 = vmul.f32 %v5557_v47, %v7717_v33  ;;  %7720 = vst [vmem:[#allocation119_spill] sm:$0xff] %v5890_v17  ;;  %v833_v60 = vadd.f32 %v5632_v22, %v732_v41  ;;  %v742_v23 = vadd.f32 %v726_v15, %v5531_v0  ;;  %v5899_v33 = vpop.permute.xlu0 %1797  ;;  %v5907_v32 = vmul.f32 %v5557_v47, %v7723_v16  ;;  %v5911_v31 = vld [vmem:[#allocation2 + $0x121] ss:$2 sm:$0xff]  ;;  %v7739_v17 = vld [vmem:[#allocation9_spill] sm:$0xff] }
 0x326   : > { %v835_v13 = vadd.f32 %v5640_v7, %v734_v9  ;;  %v837_v4 = vadd.f32 %v5650_v48, %v736_v11  ;;  %3221 = vperm.xlu0 %3943, %v5911_v31   ;;  %v7725_v22 = vld [vmem:[#allocation100_spill] sm:$0xff]  ;;  %7727 = vst [vmem:[#allocation67_spill] sm:$0xff] %v5921_v2  ;;  %v839_v15 = vadd.f32 %v5658_v6, %v738_v12  ;;  %v7728_v7 = vld [vmem:[#allocation102_spill] sm:$0xff] }
 0x327   : > { %7718 = vst [vmem:[#allocation63_spill] sm:$0xff] %v5885_v35  ;;  %v7722_v35 = vld [vmem:[#allocation96_spill] sm:$0xff]  ;;  %7724 = vst [vmem:[#allocation64_spill] sm:$0xff] %v5907_v32  ;;  %v5916_v0 = vmul.f32 %v5557_v47, %v7725_v22  ;;  %v836_v36 = vadd.f32 %v820_v34, %v5581_v57  ;;  %v822_v48 = vmul.f32 %v5562_v26, %v5399_v29 }
 0x328   : > { %v5903_v53 = vmul.f32 %v5557_v47, %v7722_v35  ;;  %v5929_v41 = vmul.f32 %v5557_v47, %v7728_v7  ;;  %v7730_v9 = vld [vmem:[#allocation108_spill] sm:$0xff]  ;;  %v841_v35 = vadd.f32 %v5667_v21, %v740_v10  ;;  %v977_v16 = vadd.f32 %v5528_v55, %v828_v5  ;;  %v5938_v6 = vpop.permute.xlu1 %2643  ;;  %v7735_v21 = vld [vmem:[#allocation7_spill] sm:$0xff]  ;;  %v7736_v5 = vld [vmem:[#allocation114_spill] sm:$0xff] }
 0x329   : > { %7726 = vst [vmem:[#allocation65_spill] sm:$0xff] %v5916_v0  ;;  %v5933_v11 = vmul.f32 %v5921_v2, %v7730_v9  ;;  %v7732_v22 = vld [vmem:[#allocation164_spill] sm:$0xff]  ;;  %7733 = vst [vmem:[#allocation76_spill] sm:$0xff] %v5938_v6  ;;  %v843_v47 = vadd.f32 %v5675_v25, %v742_v23  ;;  %v980_v34 = vadd.f32 %v5540_v14, %v831_v58  ;;  %v5952_v55 = vpop.permute.xlu0 %1809  ;;  %v7737_v9 = vld [vmem:[#allocation115_spill] sm:$0xff] }
 0x32a   : > { %7729 = vst [vmem:[#allocation121_spill] sm:$0xff] %v5929_v41  ;;  %3044 = vperm.xlu1 %3937, %v7732_v22   ;;  %v7734_v57 = vld [vmem:[#allocation112_spill] sm:$0xff]  ;;  %v982_v10 = vadd.f32 %v7735_v21, %v833_v60  ;;  %v5956_v7 = vmul.f32 %v5921_v2, %v7736_v5  ;;  %v5960_v22 = vmul.f32 %v5921_v2, %v7737_v9  ;;  %v7741_v21 = vld [vmem:[#allocation117_spill] sm:$0xff] }
 0x32b   : > { %7731 = vst [vmem:[#allocation74_spill] sm:$0xff] %v5933_v11  ;;  %v5942_v12 = vmul.f32 %v5921_v2, %v7734_v57  ;;  %v5947_v29 = vld [vmem:[%s7289_s2 + $0x8] ss:$0 sm:$0xff]  ;;  %v986_v11 = vadd.f32 %v7739_v17, %v837_v4  ;;  %v5964_v41 = vld [vmem:[#allocation2 + $0x181] ss:$2 sm:$0xff]  ;;  %v985_v23 = vadd.f32 %v5721_v49, %v836_v36  ;;  %v838_v58 = vadd.f32 %v822_v48, %v5587_v39  ;;  %v7745_v49 = vld [vmem:[#allocation133_spill] sm:$0xff] }
 0x32c   : > { %v7738_v57 = vld [vmem:[#allocation8_spill] sm:$0xff]  ;;  %3229 = vperm.xlu0 %3943, %v5964_v41   ;;  %v988_v60 = vadd.f32 %v5569_v59, %v839_v15  ;;  %v5976_v5 = vmul.f32 %v5947_v29, %v7741_v21  ;;  %v5981_v4 = vadd.f32 %v5747_v44, %v977_v16  ;;  %v990_v9 = vadd.f32 %v5575_v3, %v841_v35  ;;  %v7748_v35 = vld [vmem:[#allocation122_spill] sm:$0xff] }
 0x32d   : > { %v984_v6 = vadd.f32 %v7738_v57, %v835_v13  ;;  %v7740_v14 = vld [vmem:[#allocation116_spill] sm:$0xff]  ;;  %v7742_v13 = vld [vmem:[#allocation257_spill] sm:$0xff]  ;;  %v7743_v57 = vld [vmem:[#allocation167_spill] sm:$0xff]  ;;  %v1070_v39 = vmul.f32 %v5689_v40, %v7745_v49  ;;  %v5990_v59 = vadd.f32 %v5760_v38, %v980_v34  ;;  %v5993_v15 = vadd.f32 %v5770_v46, %v982_v10  ;;  %v5996_v48 = vpop.permute.xlu0 %1817 }
 0x32e   : > { %v5969_v25 = vmul.f32 %v5921_v2, %v7740_v14  ;;  %v824_v17 = vmul.f32 %v5562_v26, %v7742_v13  ;;  %3054 = vperm.xlu1 %3937, %v7743_v57   ;;  %v5985_v14 = vpop.permute.xlu1 %2648  ;;  %v992_v36 = vadd.f32 %v5585_v1, %v843_v47  ;;  %7746 = vst [vmem:[#allocation158_spill] sm:$0xff] %v5996_v48  ;;  %v7747_v44 = vld [vmem:[#allocation120_spill] sm:$0xff]  ;;  %v6012_v46 = vld [vmem:[#allocation2 + $0x211] ss:$2 sm:$0xff] }
 0x32f   : > { %7744 = vst [vmem:[#allocation123_spill] sm:$0xff] %v5985_v14  ;;  %v6000_v3 = vmul.f32 %v5947_v29, %v7747_v44  ;;  %v6004_v16 = vmul.f32 %v5947_v29, %v7748_v35  ;;  %v6007_v21 = vadd.f32 %v5778_v8, %v984_v6  ;;  %v6010_v38 = vadd.f32 %v5789_v28, %v986_v11  ;;  %v7749_v1 = vld [vmem:[#allocation124_spill] sm:$0xff]  ;;  %v7751_v57 = vld [vmem:[#allocation126_spill] sm:$0xff]  ;;  %v7753_v28 = vld [vmem:[#allocation25_spill] sm:$0xff] }
 0x330   : > { %3237 = vperm.xlu0 %3943, %v6012_v46   ;;  %v6017_v47 = vmul.f32 %v5947_v29, %v7749_v1  ;;  %v1086_v34 = vadd.f32 %v1070_v39, %v985_v23  ;;  %v987_v10 = vadd.f32 %v5725_v18, %v838_v58  ;;  %v6021_v13 = vadd.f32 %v5803_v63, %v988_v60  ;;  %v7754_v6 = vld [vmem:[#allocation259_spill] sm:$0xff]  ;;  %v7758_v18 = vld [vmem:[#allocation128_spill] sm:$0xff]  ;;  %v7760_v58 = vld [vmem:[#allocation129_spill] sm:$0xff] }
 0x331   : > { %v6025_v8 = vmul.f32 %v5947_v29, %v7751_v57  ;;  %v840_v11 = vadd.f32 %v824_v17, %v7753_v28  ;;  %v826_v49 = vmul.f32 %v5562_v26, %v7754_v6  ;;  %v6031_v44 = vadd.f32 %v5818_v51, %v990_v9  ;;  %v7762_v39 = vld [vmem:[#allocation135_spill] sm:$0xff]  ;;  %v6049_v51 = vpop.permute.xlu0 %1825  ;;  %v7765_v9 = vld [vmem:[#allocation130_spill] sm:$0xff]  ;;  %v7794_v48 = vld [vmem:[#allocation152_spill] sm:$0xff] }
 0x332   : > { %7750 = vst [vmem:[#allocation78_spill] sm:$0xff] %v6017_v47  ;;  %v7756_v35 = vmov 1   ;;  %v6034_v23 = vpop.permute.xlu1 %2658  ;;  %v6038_v63 = vmul.f32 %v5947_v29, %v7758_v18  ;;  %v6042_v60 = vmul.f32 %v5689_v40, %v7760_v58  ;;  %v1072_v17 = vmul.f32 %v5689_v40, %v7762_v39  ;;  %7764 = vst [vmem:[#allocation92_spill] sm:$0xff] %v6049_v51  ;;  %v7767_v28 = vld [vmem:[#allocation131_spill] sm:$0xff]  ;;  %v7769_v18 = vld [vmem:[#allocation132_spill] sm:$0xff] }
 0x333   : > { %7752 = vst [vmem:[#allocation125_spill] sm:$0xff] %v6025_v8  ;;  %7755 = vst [vmem:[#allocation80_spill] sm:$0xff] %v6031_v44  ;;  %3938 = vset.pattern.permute.xlu1 %v7756_v35  ;;  %v6047_v1 = vadd.f32 %v5822_v45, %v992_v36  ;;  %v6054_v57 = vmul.f32 %v5947_v29, %v7765_v9  ;;  %v6058_v6 = vmul.f32 %v5689_v40, %v7767_v28  ;;  %v7771_v39 = vld [vmem:[#allocation137_spill] sm:$0xff] }
 0x334   : > { %7757 = vst [vmem:[#allocation82_spill] sm:$0xff] %v6034_v23  ;;  %7759 = vst [vmem:[#allocation84_spill] sm:$0xff] %v6038_v63  ;;  %3100 = vperm.xlu1 %3938, %v5809_v42   ;;  %v6062_v58 = vmul.f32 %v5947_v29, %v7769_v18  ;;  %v1074_v45 = vmul.f32 %v5689_v40, %v7771_v39  ;;  %v6066_v36 = vld [vmem:[#allocation2 + $0x271] ss:$2 sm:$0xff]  ;;  %v7772_v42 = vld [vmem:[#allocation139_spill] sm:$0xff]  ;;  %v1088_v28 = vadd.f32 %v1072_v17, %v987_v10 }
 0x335   : > { %7761 = vst [vmem:[#allocation86_spill] sm:$0xff] %v6042_v60  ;;  %7763 = vst [vmem:[#allocation90_spill] sm:$0xff] %v6047_v1  ;;  %3245 = vperm.xlu0 %3943, %v6066_v36   ;;  %v1076_v23 = vmul.f32 %v5689_v40, %v7772_v42  ;;  %v7773_v9 = vld [vmem:[#allocation141_spill] sm:$0xff]  ;;  %v1187_v35 = vadd.f32 %v5847_v50, %v1086_v34  ;;  %v6083_v39 = vld [vmem:[%s7289_s2 + $0xa] ss:$0 sm:$0xff]  ;;  %v6139_v44 = vmul.f32 %v5921_v2, %v7794_v48 }
 0x336   : > { %7766 = vst [vmem:[#allocation161_spill] sm:$0xff] %v6054_v57  ;;  %7768 = vst [vmem:[#allocation94_spill] sm:$0xff] %v6058_v6  ;;  %v6073_v14 = vmul.f32 %v5921_v2, %v7773_v9  ;;  %v7774_v6 = vld [vmem:[#allocation142_spill] sm:$0xff]  ;;  %v7776_v57 = vld [vmem:[#allocation12_spill] sm:$0xff]  ;;  %v6089_v60 = vpop.permute.xlu1 %2668 }
 0x337   : > { %7770 = vst [vmem:[#allocation96_spill] sm:$0xff] %v6062_v58  ;;  %v6078_v18 = vmul.f32 %v5594_v37, %v7774_v6  ;;  %7775 = vst [vmem:[#allocation98_spill] sm:$0xff] %v6083_v39  ;;  %v989_v58 = vadd.f32 %v5729_v56, %v840_v11  ;;  %v842_v40 = vadd.f32 %v826_v49, %v7776_v57  ;;  %v7777_v42 = vld [vmem:[#allocation261_spill] sm:$0xff]  ;;  %v7779_v10 = vld [vmem:[#allocation143_spill] sm:$0xff]  ;;  %v6107_v49 = vpop.permute.xlu0 %1833 }
 0x338   : > { %v1163_v9 = vmul.f32 %v5827_v52, %v7777_v42  ;;  %7778 = vst [vmem:[#allocation100_spill] sm:$0xff] %v6089_v60  ;;  %v6093_v50 = vmul.f32 %v5921_v2, %v7779_v10  ;;  %v7780_v34 = vld [vmem:[#allocation144_spill] sm:$0xff]  ;;  %v7781_v6 = vld [vmem:[#allocation145_spill] sm:$0xff]  ;;  %v7782_v56 = vld [vmem:[#allocation146_spill] sm:$0xff] }
 0x339   : > { %v6097_v17 = vmul.f32 %v5594_v37, %v7780_v34  ;;  %v6101_v63 = vmul.f32 %v5921_v2, %v7781_v6  ;;  %v6105_v11 = vmul.f32 %v5594_v37, %v7782_v56  ;;  %7783 = vst [vmem:[#allocation102_spill] sm:$0xff] %v6107_v49  ;;  %v7784_v57 = vld [vmem:[#allocation11_spill] sm:$0xff]  ;;  %v7786_v60 = vld [vmem:[#allocation148_spill] sm:$0xff]  ;;  %v7787_v51 = vld [vmem:[#allocation149_spill] sm:$0xff] }
 0x33a   : > { %3108 = vperm.xlu1 %3938, %v7784_v57   ;;  %v7785_v42 = vld [vmem:[#allocation147_spill] sm:$0xff]  ;;  %v6116_v34 = vmul.f32 %v5594_v37, %v7786_v60  ;;  %v6120_v6 = vmul.f32 %v5921_v2, %v7787_v51  ;;  %v7789_v1 = vld [vmem:[#allocation150_spill] sm:$0xff]  ;;  %v1189_v51 = vadd.f32 %v5857_v30, %v1088_v28  ;;  %7795 = vst [vmem:[#allocation112_spill] sm:$0xff] %v6139_v44  ;;  %v6143_v47 = vpop.permute.xlu1 %2678  ;;  %v7800_v30 = vld [vmem:[#allocation157_spill] sm:$0xff] }
 0x33b   : > { %v6112_v10 = vmul.f32 %v5921_v2, %v7785_v42  ;;  %v6124_v56 = vmul.f32 %v5921_v2, %v7789_v1  ;;  %v6126_v0 = vld [vmem:[#allocation2 + $0x2d1] ss:$2 sm:$0xff]  ;;  %v7791_v57 = vld [vmem:[#allocation151_spill] sm:$0xff]  ;;  %v1090_v1 = vadd.f32 %v1074_v45, %v989_v58  ;;  %v1179_v32 = vadd.f32 %v1163_v9, %v5981_v4  ;;  %7796 = vst [vmem:[#allocation7_spill] sm:$0xff] %v6143_v47  ;;  %v7804_v4 = vld [vmem:[#allocation160_spill] sm:$0xff] }
 0x33c   : > { %7788 = vst [vmem:[#allocation108_spill] sm:$0xff] %v6120_v6  ;;  %3253 = vperm.xlu0 %3943, %v6126_v0   ;;  %v6131_v42 = vmul.f32 %v6083_v39, %v7791_v57  ;;  %v7792_v49 = vld [vmem:[#allocation263_spill] sm:$0xff]  ;;  %v7797_v57 = vld [vmem:[#allocation154_spill] sm:$0xff]  ;;  %v6164_v45 = vmul.f32 %v6083_v39, %v7804_v4  ;;  %v7808_v9 = vld [vmem:[#allocation165_spill] sm:$0xff] }
 0x33d   : > { %7790 = vst [vmem:[#allocation164_spill] sm:$0xff] %v6124_v56  ;;  %v1166_v60 = vmul.f32 %v5827_v52, %v7792_v49  ;;  %v7793_v37 = vld [vmem:[#allocation31_spill] sm:$0xff]  ;;  %v991_v56 = vadd.f32 %v5739_v24, %v842_v40  ;;  %v6147_v6 = vmul.f32 %v5921_v2, %v7797_v57  ;;  %v7802_v48 = vld [vmem:[#allocation22_spill] sm:$0xff]  ;;  %v6159_v24 = vpop.permute.xlu0 %1841  ;;  %v1771_v57 = vmul.f32 %v6083_v39, %v7808_v9 }
 0x33e   : > { %v1336_v8 = vadd.f32 %v7793_v37, %v1187_v35  ;;  %v7799_v49 = vld [vmem:[#allocation155_spill] sm:$0xff]  ;;  %v6155_v35 = vmul.f32 %v6083_v39, %v7800_v30  ;;  %v1522_v58 = vmul.f32 %v5947_v29, %v7802_v48  ;;  %7803 = vst [vmem:[#allocation8_spill] sm:$0xff] %v6159_v24  ;;  %3112 = vperm.xlu1 %3938, %v5865_v27   ;;  %7805 = vst [vmem:[#allocation9_spill] sm:$0xff] %v6164_v45  ;;  %v6176_v48 = vld [vmem:[#allocation2 + $0x331] ss:$2 sm:$0xff]  ;;  %v6195_v45 = vpop.permute.xlu1 %2688 }
 0x33f   : > { %7798 = vst [vmem:[#allocation114_spill] sm:$0xff] %v6147_v6  ;;  %v6151_v37 = vmul.f32 %v6083_v39, %v7799_v49  ;;  %v7806_v28 = vld [vmem:[#allocation163_spill] sm:$0xff]  ;;  %v7809_v49 = vld [vmem:[#allocation166_spill] sm:$0xff]  ;;  %v6182_v27 = vld [vmem:[%s7289_s2 + $0xd] ss:$0 sm:$0xff]  ;;  %v1182_v4 = vadd.f32 %v1166_v60, %v5990_v59  ;;  %v1092_v6 = vadd.f32 %v1076_v23, %v991_v56  ;;  %v1191_v44 = vadd.f32 %v5861_v20, %v1090_v1 }
 0x340   : > { %7801 = vst [vmem:[#allocation115_spill] sm:$0xff] %v6155_v35  ;;  %v6168_v40 = vmul.f32 %v6083_v39, %v7806_v28  ;;  %v6174_v30 = vmul.f32 %v6083_v39, %v7809_v49  ;;  %3261 = vperm.xlu0 %3943, %v6176_v48   ;;  %v7811_v28 = vld [vmem:[#allocation265_spill] sm:$0xff]  ;;  %v1437_v9 = vadd.f32 %v5942_v12, %v1336_v8  ;;  %v7812_v2 = vld [vmem:[#allocation15_spill] sm:$0xff]  ;;  %v7813_v49 = vld [vmem:[#allocation168_spill] sm:$0xff] }
 0x341   : > { %v1168_v47 = vmul.f32 %v5827_v52, %v7811_v28  ;;  %v1338_v24 = vadd.f32 %v7812_v2, %v1189_v51  ;;  %7814 = vst [vmem:[#allocation257_spill] sm:$0xff] %v6195_v45  ;;  %v7815_v35 = vld [vmem:[#allocation169_spill] sm:$0xff]  ;;  %v7816_v60 = vld [vmem:[#allocation170_spill] sm:$0xff]  ;;  %v1524_v8 = vmul.f32 %v5947_v29, %v5731_v61  ;;  %v6207_v51 = vpop.permute.xlu0 %1849  ;;  %v7825_v45 = vld [vmem:[#allocation16_spill] sm:$0xff] }
 0x342   : > { %7807 = vst [vmem:[#allocation116_spill] sm:$0xff] %v6168_v40  ;;  %7810 = vst [vmem:[#allocation117_spill] sm:$0xff] %v6174_v30  ;;  %v6191_v30 = vmul.f32 %v6083_v39, %v7813_v49  ;;  %v1328_v40 = vadd.f32 %v5874_v43, %v1179_v32  ;;  %v6199_v59 = vmul.f32 %v6083_v39, %v7815_v35  ;;  %3120 = vperm.xlu1 %3938, %v5911_v31   ;;  %v7817_v43 = vld [vmem:[#allocation171_spill] sm:$0xff]  ;;  %v7819_v32 = vld [vmem:[#allocation172_spill] sm:$0xff] }
 0x343   : > { %v6203_v12 = vmul.f32 %v6083_v39, %v7816_v60  ;;  %v1538_v2 = vadd.f32 %v1522_v58, %v1437_v9  ;;  %v6212_v20 = vmul.f32 %v6083_v39, %v7817_v43  ;;  %v6216_v23 = vmul.f32 %v6083_v39, %v7819_v32  ;;  %v7820_v56 = vld [vmem:[#allocation174_spill] sm:$0xff]  ;;  %v7821_v35 = vld [vmem:[#allocation176_spill] sm:$0xff]  ;;  %v7823_v9 = vld [vmem:[#allocation267_spill] sm:$0xff] }
 0x344   : > { %v6220_v1 = vmul.f32 %v6182_v27, %v7820_v56  ;;  %v6224_v58 = vmul.f32 %v6182_v27, %v7821_v35  ;;  %v6226_v61 = vld [vmem:[#allocation2 + $0x62] ss:$2 sm:$0xff]  ;;  %v1331_v31 = vadd.f32 %v5881_v54, %v1182_v4  ;;  %v1184_v28 = vadd.f32 %v1168_v47, %v5993_v15  ;;  %v6237_v43 = vld [vmem:[%s7289_s2 + $0xb] ss:$0 sm:$0xff]  ;;  %v7824_v32 = vld [vmem:[#allocation178_spill] sm:$0xff]  ;;  %v6246_v47 = vpop.permute.xlu1 %2698 }
 0x345   : > { %7818 = vst [vmem:[#allocation167_spill] sm:$0xff] %v6212_v20  ;;  %7822 = vst [vmem:[#allocation133_spill] sm:$0xff] %v6226_v61  ;;  %3556 = vperm.xlu0 %3943, %v6226_v61   ;;  %v1170_v49 = vmul.f32 %v5827_v52, %v7823_v9  ;;  %v1439_v60 = vadd.f32 %v5956_v7, %v1338_v24  ;;  %v6241_v56 = vmul.f32 %v6182_v27, %v7824_v32  ;;  %v7827_v4 = vld [vmem:[#allocation180_spill] sm:$0xff]  ;;  %v7828_v24 = vld [vmem:[#allocation181_spill] sm:$0xff]  ;;  %v6255_v32 = vpop.permute.xlu0 %1857 }
 0x346   : > { %v1429_v35 = vadd.f32 %v6073_v14, %v1328_v40  ;;  %v1340_v54 = vadd.f32 %v7825_v45, %v1191_v44  ;;  %v1193_v15 = vadd.f32 %v5870_v19, %v1092_v6  ;;  %7826 = vst [vmem:[#allocation120_spill] sm:$0xff] %v6246_v47  ;;  %v6250_v7 = vmul.f32 %v6182_v27, %v7827_v4  ;;  %v7830_v14 = vld [vmem:[#allocation182_spill] sm:$0xff]  ;;  %v7832_v19 = vld [vmem:[#allocation183_spill] sm:$0xff]  ;;  %v7833_v45 = vld [vmem:[#allocation185_spill] sm:$0xff] }
 0x347   : > { %v1872_v9 = vmul.f32 %v6237_v43, %v7828_v24  ;;  %v1686_v61 = vadd.f32 %v6078_v18, %v1538_v2  ;;  %v1540_v39 = vadd.f32 %v1524_v8, %v1439_v60  ;;  %7829 = vst [vmem:[#allocation122_spill] sm:$0xff] %v6255_v32  ;;  %3128 = vperm.xlu1 %3938, %v5964_v41   ;;  %v7834_v4 = vld [vmem:[#allocation50_spill] sm:$0xff]  ;;  %v7836_v2 = vld [vmem:[#allocation63_spill] sm:$0xff] }
 0x348   : > { %v6260_v44 = vmul.f32 %v6182_v27, %v7830_v14  ;;  %v1874_v6 = vmul.f32 %v6237_v43, %v7832_v19  ;;  %v6266_v40 = vmul.f32 %v6237_v43, %v7833_v45  ;;  %v1526_v24 = vmul.f32 %v5947_v29, %v7834_v4  ;;  %v6270_v18 = vld [vmem:[#allocation2 + $0xf2] ss:$2 sm:$0xff] }
 0x349   : > { %7835 = vst [vmem:[#allocation126_spill] sm:$0xff] %v6270_v18  ;;  %3568 = vperm.xlu0 %3943, %v6270_v18   ;;  %v1432_v41 = vadd.f32 %v6093_v50, %v1331_v31  ;;  %v1333_v8 = vadd.f32 %v7836_v2, %v1184_v28  ;;  %v1186_v60 = vadd.f32 %v1170_v49, %v6007_v21  ;;  %v7837_v14 = vld [vmem:[#allocation269_spill] sm:$0xff]  ;;  %v7838_v47 = vld [vmem:[#allocation187_spill] sm:$0xff]  ;;  %v7839_v4 = vld [vmem:[#allocation18_spill] sm:$0xff]  ;;  %v6285_v18 = vpop.permute.xlu1 %2708 }
 0x34a   : > { %7831 = vst [vmem:[#allocation124_spill] sm:$0xff] %v6260_v44  ;;  %v1172_v19 = vmul.f32 %v5827_v52, %v7837_v14  ;;  %v6280_v45 = vmul.f32 %v6237_v43, %v7838_v47  ;;  %v1441_v20 = vadd.f32 %v5960_v22, %v1340_v54  ;;  %v1342_v32 = vadd.f32 %v7839_v4, %v1193_v15  ;;  %v7841_v50 = vld [vmem:[#allocation189_spill] sm:$0xff]  ;;  %v6296_v14 = vpop.permute.xlu0 %2152  ;;  %v7845_v22 = vld [vmem:[#allocation195_spill] sm:$0xff] }
 0x34b   : > { %v1530_v44 = vadd.f32 %v5976_v5, %v1429_v35  ;;  %7840 = vst [vmem:[#allocation25_spill] sm:$0xff] %v6285_v18  ;;  %v7842_v31 = vld [vmem:[#allocation33_spill] sm:$0xff]  ;;  %v1787_v2 = vadd.f32 %v1771_v57, %v1686_v61  ;;  %v1688_v47 = vadd.f32 %v6097_v17, %v1540_v39  ;;  %7844 = vst [vmem:[#allocation259_spill] sm:$0xff] %v6296_v14  ;;  %3136 = vperm.xlu1 %3938, %v6012_v46   ;;  %v7847_v4 = vld [vmem:[#allocation59_spill] sm:$0xff] }
 0x34c   : > { %v6289_v28 = vmul.f32 %v7842_v31, %v7841_v50  ;;  %v7843_v21 = vld [vmem:[#allocation193_spill] sm:$0xff]  ;;  %v6301_v5 = vmul.f32 %v7842_v31, %v7845_v22  ;;  %v1542_v15 = vadd.f32 %v1526_v24, %v1441_v20  ;;  %v1528_v50 = vmul.f32 %v5947_v29, %v7847_v4  ;;  %v7848_v61 = vld [vmem:[#allocation199_spill] sm:$0xff]  ;;  %v7850_v4 = vld [vmem:[#allocation20_spill] sm:$0xff] }
 0x34d   : > { %v6293_v49 = vmul.f32 %v7842_v31, %v7843_v21  ;;  %v7846_v35 = vld [vmem:[#allocation197_spill] sm:$0xff]  ;;  %v1434_v39 = vadd.f32 %v6101_v63, %v1333_v8  ;;  %v1335_v46 = vadd.f32 %v5894_v62, %v1186_v60  ;;  %v1188_v17 = vadd.f32 %v1172_v19, %v6010_v38  ;;  %v7849_v20 = vld [vmem:[#allocation271_spill] sm:$0xff] }
 0x34e   : > { %v6305_v54 = vmul.f32 %v7842_v31, %v7846_v35  ;;  %v6309_v21 = vld [vmem:[#allocation2 + $0x152] ss:$2 sm:$0xff]  ;;  %v1533_v57 = vadd.f32 %v6000_v3, %v1432_v41  ;;  %v6318_v22 = vmul.f32 %v7842_v31, %v7848_v61  ;;  %v1174_v24 = vmul.f32 %v5827_v52, %v7849_v20  ;;  %v6331_v38 = vpop.permute.xlu0 %2164  ;;  %v6334_v41 = vpop.permute.xlu1 %2753  ;;  %v6343_v61 = vld [vmem:[#allocation2 + $0x1e2] ss:$2 sm:$0xff] }
 0x34f   : > { %3576 = vperm.xlu0 %3943, %v6309_v21   ;;  %v1443_v35 = vadd.f32 %v5969_v25, %v1342_v32  ;;  %v1678_v18 = vadd.f32 %v7850_v4, %v1530_v44  ;;  %v7851_v14 = vld [vmem:[#allocation215_spill] sm:$0xff]  ;;  %v7852_v8 = vld [vmem:[#allocation217_spill] sm:$0xff]  ;;  %v1789_v3 = vadd.f32 %v6191_v30, %v1688_v47  ;;  %3144 = vperm.xlu1 %3938, %v6066_v36   ;;  %v6349_v36 = vld [vmem:[%s7289_s2 + $0xe] ss:$0 sm:$0xff] }
 0x350   : > { %v2122_v63 = vmul.f32 %v6182_v27, %v7851_v14  ;;  %v6328_v62 = vmul.f32 %v6182_v27, %v7852_v8  ;;  %7853 = vst [vmem:[#allocation128_spill] sm:$0xff] %v6334_v41  ;;  %v1888_v60 = vadd.f32 %v1872_v9, %v1787_v2  ;;  %v7854_v19 = vld [vmem:[#allocation219_spill] sm:$0xff]  ;;  %v1690_v32 = vadd.f32 %v6105_v11, %v1542_v15  ;;  %v7855_v2 = vld [vmem:[#allocation24_spill] sm:$0xff]  ;;  %v7857_v20 = vld [vmem:[#allocation273_spill] sm:$0xff] }
 0x351   : > { %v6338_v25 = vmul.f32 %v6182_v27, %v7854_v19  ;;  %v1544_v44 = vadd.f32 %v1528_v50, %v1443_v35  ;;  %v1864_v14 = vmul.f32 %v6237_v43, %v5899_v33  ;;  %v1436_v30 = vadd.f32 %v6112_v10, %v1335_v46  ;;  %v7856_v15 = vld [vmem:[#allocation251_spill] sm:$0xff]  ;;  %v7858_v8 = vld [vmem:[#allocation221_spill] sm:$0xff] }
 0x352   : > { %v1337_v9 = vadd.f32 %v5903_v53, %v1188_v17  ;;  %v1681_v47 = vadd.f32 %v7855_v2, %v1533_v57  ;;  %v1535_v11 = vadd.f32 %v6004_v16, %v1434_v39  ;;  %v816_v33 = vmul.f32 %v5562_v26, %v7856_v15  ;;  %v6367_v10 = vpop.permute.xlu0 %2172  ;;  %v6370_v16 = vpop.permute.xlu1 %2757  ;;  %v7860_v39 = vld [vmem:[#allocation42_spill] sm:$0xff]  ;;  %v7861_v17 = vld [vmem:[#allocation224_spill] sm:$0xff] }
 0x353   : > { %3584 = vperm.xlu0 %3943, %v6343_v61   ;;  %v1190_v50 = vadd.f32 %v1174_v24, %v6021_v13  ;;  %v1176_v35 = vmul.f32 %v5827_v52, %v7857_v20  ;;  %v1779_v4 = vadd.f32 %v6131_v42, %v1678_v18  ;;  %v6363_v19 = vmul.f32 %v6182_v27, %v7858_v8  ;;  %v6379_v2 = vld [vmem:[#allocation2 + $0x242] ss:$2 sm:$0xff]  ;;  %v7863_v20 = vld [vmem:[#allocation26_spill] sm:$0xff] }
 0x354   : > { %v1867_v53 = vmul.f32 %v6237_v43, %v5952_v55  ;;  %3152 = vperm.xlu1 %3938, %v6126_v0   ;;  %7859 = vst [vmem:[#allocation129_spill] sm:$0xff] %v6370_v16  ;;  %v2037_v13 = vadd.f32 %v7860_v39, %v1888_v60  ;;  %v1890_v46 = vadd.f32 %v1874_v6, %v1789_v3  ;;  %v7862_v55 = vld [vmem:[#allocation108_spill] sm:$0xff]  ;;  %v7864_v6 = vld [vmem:[#allocation78_spill] sm:$0xff] }
 0x355   : > { %v6375_v57 = vmul.f32 %v6349_v36, %v7861_v17  ;;  %v1791_v42 = vadd.f32 %v6203_v12, %v1690_v32  ;;  %v1692_v18 = vadd.f32 %v6116_v34, %v1544_v44  ;;  %v1880_v24 = vadd.f32 %v1864_v14, %v1779_v4  ;;  %v7865_v8 = vld [vmem:[#allocation10_spill] sm:$0xff]  ;;  %v7866_v17 = vld [vmem:[#allocation64_spill] sm:$0xff]  ;;  %v7868_v34 = vld [vmem:[#allocation275_spill] sm:$0xff] }
 0x356   : > { %v1438_v0 = vadd.f32 %v7862_v55, %v1337_v9  ;;  %v1782_v15 = vadd.f32 %v6151_v37, %v1681_v47  ;;  %v1683_v60 = vadd.f32 %v7863_v20, %v1535_v11  ;;  %v1537_v3 = vadd.f32 %v7864_v6, %v1436_v30  ;;  %v7867_v12 = vld [vmem:[#allocation80_spill] sm:$0xff]  ;;  %v7869_v4 = vld [vmem:[#allocation158_spill] sm:$0xff]  ;;  %v2181_v55 = vpop.permute.xlu0 %2180  ;;  %v6394_v37 = vpop.permute.xlu1 %2765  ;;  %v7870_v30 = vld [vmem:[#allocation43_spill] sm:$0xff] }
 0x357   : > { %3592 = vperm.xlu0 %3943, %v6379_v2   ;;  %v832_v39 = vadd.f32 %v816_v33, %v7865_v8  ;;  %v1339_v16 = vadd.f32 %v7866_v17, %v1190_v50  ;;  %v1192_v32 = vadd.f32 %v1176_v35, %v7867_v12  ;;  %v1178_v44 = vmul.f32 %v5827_v52, %v7868_v34  ;;  %v6400_v35 = vld [vmem:[#allocation2 + $0x2a2] ss:$2 sm:$0xff]  ;;  %v7877_v8 = vld [vmem:[#allocation90_spill] sm:$0xff] }
 0x358   : > { %v1883_v14 = vadd.f32 %v1867_v53, %v1782_v15  ;;  %v1869_v41 = vmul.f32 %v6237_v43, %v7869_v4  ;;  %v2138_v9 = vadd.f32 %v2122_v63, %v2037_v13  ;;  %3160 = vperm.xlu1 %3938, %v6176_v48   ;;  %v2039_v47 = vadd.f32 %v7870_v30, %v1890_v46  ;;  %v7871_v63 = vld [vmem:[#allocation253_spill] sm:$0xff]  ;;  %v7872_v48 = vld [vmem:[#allocation115_spill] sm:$0xff]  ;;  %v7873_v15 = vld [vmem:[#allocation30_spill] sm:$0xff] }
 0x359   : > { %v1793_v11 = vadd.f32 %v6216_v23, %v1692_v18  ;;  %v2029_v33 = vadd.f32 %v6289_v28, %v1880_v24  ;;  %v2223_v50 = vmul.f32 %v6349_v36, %v2181_v55  ;;  %v1892_v52 = vadd.f32 %v6266_v40, %v1791_v42  ;;  %v7874_v46 = vld [vmem:[#allocation125_spill] sm:$0xff]  ;;  %v7875_v23 = vld [vmem:[#allocation164_spill] sm:$0xff] }
 0x35a   : > { %v818_v53 = vmul.f32 %v5562_v26, %v7871_v63  ;;  %v1784_v13 = vadd.f32 %v7872_v48, %v1683_v60  ;;  %v1685_v20 = vadd.f32 %v7873_v15, %v1537_v3  ;;  %v1539_v6 = vadd.f32 %v7874_v46, %v1438_v0  ;;  %v7876_v28 = vld [vmem:[#allocation65_spill] sm:$0xff]  ;;  %v7878_v42 = vld [vmem:[#allocation92_spill] sm:$0xff]  ;;  %v2189_v4 = vpop.permute.xlu0 %2188  ;;  %v6419_v0 = vpop.permute.xlu1 %2773 }
 0x35b   : > { %3600 = vperm.xlu0 %3943, %v6400_v35   ;;  %v1440_v18 = vadd.f32 %v7875_v23, %v1339_v16  ;;  %v1341_v24 = vadd.f32 %v7876_v28, %v1192_v32  ;;  %v1194_v17 = vadd.f32 %v1178_v44, %v7877_v8  ;;  %v6412_v12 = vadd.f32 %v2223_v50, %v2138_v9  ;;  %v6423_v44 = vld [vmem:[#allocation2 + $0x302] ss:$2 sm:$0xff]  ;;  %v7881_v9 = vld [vmem:[#allocation38_spill] sm:$0xff] }
 0x35c   : > { %v2032_v34 = vadd.f32 %v6293_v49, %v1883_v14  ;;  %v1885_v40 = vadd.f32 %v1869_v41, %v1784_v13  ;;  %v1871_v26 = vmul.f32 %v6237_v43, %v7878_v42  ;;  %v2140_v60 = vadd.f32 %v6328_v62, %v2039_v47  ;;  %v7880_v49 = vld [vmem:[#allocation44_spill] sm:$0xff]  ;;  %v7882_v62 = vld [vmem:[#allocation21_spill] sm:$0xff] }
 0x35d   : > { %v7879_v3 = vmov 2   ;;  %v2130_v16 = vadd.f32 %v6220_v1, %v2029_v33  ;;  %v2225_v32 = vmul.f32 %v6349_v36, %v2189_v4  ;;  %v2041_v41 = vadd.f32 %v7880_v49, %v1892_v52  ;;  %v7883_v47 = vld [vmem:[#allocation9_spill] sm:$0xff]  ;;  %v7884_v63 = vld [vmem:[#allocation32_spill] sm:$0xff]  ;;  %v7888_v52 = vld [vmem:[#allocation102_spill] sm:$0xff] }
 0x35e   : > { %3939 = vset.pattern.permute.xlu1 %v7879_v3  ;;  %v1894_v14 = vadd.f32 %v6280_v45, %v1793_v11  ;;  %v981_v55 = vadd.f32 %v7881_v9, %v832_v39  ;;  %v834_v30 = vadd.f32 %v818_v53, %v7882_v62  ;;  %v1786_v50 = vadd.f32 %v7883_v47, %v1685_v20  ;;  %v4012_v13 = vld [vmem:[#allocation2 + $0x61] ss:$2 sm:$0xff]  ;;  %v7886_v15 = vld [vmem:[#allocation121_spill] sm:$0xff]  ;;  %v2197_v20 = vpop.permute.xlu0 %2196  ;;  %v7895_v62 = vld [vmem:[#allocation114_spill] sm:$0xff] }
 0x35f   : > { %3608 = vperm.xlu0 %3943, %v6423_v44   ;;  %v1687_v48 = vadd.f32 %v7884_v63, %v1539_v6  ;;  %3205 = vperm.xlu1 %3939, %v4012_v13   ;;  %v7885_v1 = vld [vmem:[#allocation112_spill] sm:$0xff]  ;;  %v1343_v46 = vadd.f32 %v7886_v15, %v1194_v17  ;;  %v6435_v8 = vadd.f32 %v2225_v32, %v2140_v60  ;;  %v6441_v6 = vpop.permute.xlu1 %2781  ;;  %v7889_v17 = vld [vmem:[#allocation45_spill] sm:$0xff]  ;;  %v7894_v9 = vld [vmem:[#allocation11_spill] sm:$0xff] }
 0x360   : > { %v1442_v33 = vadd.f32 %v7885_v1, %v1341_v24  ;;  %v7887_v23 = vld [vmem:[#allocation84_spill] sm:$0xff]  ;;  %v2133_v45 = vadd.f32 %v6224_v58, %v2032_v34  ;;  %v2034_v39 = vadd.f32 %v6301_v5, %v1885_v40  ;;  %v1887_v11 = vadd.f32 %v1871_v26, %v1786_v50  ;;  %v7891_v34 = vld [vmem:[#allocation86_spill] sm:$0xff]  ;;  %v7892_v40 = vld [vmem:[#allocation41_spill] sm:$0xff] }
 0x361   : > { %v1541_v28 = vadd.f32 %v7887_v23, %v1440_v18  ;;  %v1873_v53 = vmul.f32 %v6237_v43, %v7888_v52  ;;  %v2142_v42 = vadd.f32 %v6338_v25, %v2041_v41  ;;  %v2227_v24 = vmul.f32 %v6349_v36, %v2197_v20  ;;  %v7890_v60 = vld [vmem:[#allocation228_spill] sm:$0xff]  ;;  %v7897_v50 = vld [vmem:[#allocation161_spill] sm:$0xff] }
 0x362   : > { %v2043_v4 = vadd.f32 %v7889_v17, %v1894_v14  ;;  %v2231_v18 = vadd.f32 %v6375_v57, %v2130_v16  ;;  %v2218_v58 = vmul.f32 %v6349_v36, %v7890_v60  ;;  %v1082_v5 = vadd.f32 %v7891_v34, %v981_v55  ;;  %v7893_v32 = vld [vmem:[#allocation116_spill] sm:$0xff]  ;;  %v2205_v55 = vpop.permute.xlu0 %2204  ;;  %v7904_v17 = vld [vmem:[#allocation117_spill] sm:$0xff] }
 0x363   : > { %v983_v26 = vadd.f32 %v7892_v40, %v834_v30  ;;  %v1788_v49 = vadd.f32 %v7893_v32, %v1687_v48  ;;  %3209 = vperm.xlu1 %3939, %v7894_v9   ;;  %v1444_v47 = vadd.f32 %v7895_v62, %v1343_v46  ;;  %v7896_v25 = vld [vmem:[#allocation36_spill] sm:$0xff]  ;;  %v1543_v63 = vadd.f32 %v7897_v50, %v1442_v33  ;;  %v6460_v1 = vpop.permute.xlu1 %2789  ;;  %v6465_v48 = vld [vmem:[%s7289_s2 + $0x10] ss:$0 sm:$0xff] }
 0x364   : > { %v1689_v41 = vadd.f32 %v7896_v25, %v1541_v28  ;;  %v6456_v14 = vadd.f32 %v2227_v24, %v2142_v42  ;;  %v2135_v57 = vadd.f32 %v6241_v56, %v2034_v39  ;;  %v2036_v16 = vadd.f32 %v6305_v54, %v1887_v11  ;;  %v7898_v15 = vld [vmem:[#allocation8_spill] sm:$0xff]  ;;  %v7899_v56 = vld [vmem:[#allocation46_spill] sm:$0xff] }
 0x365   : > { %v1889_v13 = vadd.f32 %v1873_v53, %v1788_v49  ;;  %v2234_v30 = vadd.f32 %v2218_v58, %v2133_v45  ;;  %v1875_v46 = vmul.f32 %v6237_v43, %v7898_v15  ;;  %v2144_v33 = vadd.f32 %v6363_v19, %v2043_v4  ;;  %v7900_v54 = vld [vmem:[#allocation230_spill] sm:$0xff]  ;;  %v7902_v45 = vld [vmem:[#allocation256_spill] sm:$0xff]  ;;  %v7905_v58 = vld [vmem:[#allocation37_spill] sm:$0xff] }
 0x366   : > { %v2229_v23 = vmul.f32 %v6349_v36, %v2205_v55  ;;  %v2380_v28 = vadd.f32 %v7899_v56, %v2231_v18  ;;  %v2220_v39 = vmul.f32 %v6349_v36, %v7900_v54  ;;  %v7901_v11 = vld [vmem:[#allocation94_spill] sm:$0xff]  ;;  %v2465_v53 = vmul.f32 %v6465_v48, %v7902_v45  ;;  %v7903_v20 = vld [vmem:[#allocation56_spill] sm:$0xff]  ;;  %v6486_v18 = vld [vmem:[%s7289_s2 + $0x11] ss:$0 sm:$0xff] }
 0x367   : > { %v1084_v52 = vadd.f32 %v7901_v11, %v983_v26  ;;  %v1183_v42 = vadd.f32 %v7903_v20, %v1082_v5  ;;  %v4013_v24 = vld [vmem:[#allocation2 + $0xf1] ss:$2 sm:$0xff]  ;;  %v1790_v60 = vadd.f32 %v7904_v17, %v1689_v41  ;;  %v1691_v19 = vadd.f32 %v7905_v58, %v1543_v63  ;;  %v7906_v4 = vld [vmem:[#allocation96_spill] sm:$0xff]  ;;  %v2500_v5 = vpop.permute.xlu0 %2499  ;;  %v6490_v49 = vpop.permute.xlu1 %2797  ;;  %v7913_v56 = vld [vmem:[#allocation39_spill] sm:$0xff] }
 0x368   : > { %3217 = vperm.xlu1 %3939, %v4013_v24   ;;  %v1545_v34 = vadd.f32 %v7906_v4, %v1444_v47  ;;  %v6481_v40 = vadd.f32 %v2229_v23, %v2144_v33  ;;  %v2137_v26 = vadd.f32 %v6250_v7, %v2036_v16  ;;  %v2038_v32 = vadd.f32 %v6318_v22, %v1889_v13  ;;  %v7907_v9 = vld [vmem:[#allocation48_spill] sm:$0xff]  ;;  %v7908_v55 = vld [vmem:[#allocation201_spill] sm:$0xff]  ;;  %v7916_v4 = vld [vmem:[#allocation122_spill] sm:$0xff] }
 0x369   : > { %v2383_v62 = vadd.f32 %v7907_v9, %v2234_v30  ;;  %v2236_v25 = vadd.f32 %v2220_v39, %v2135_v57  ;;  %v1891_v41 = vadd.f32 %v1875_v46, %v1790_v60  ;;  %v1877_v47 = vmul.f32 %v6237_v43, %v6207_v51  ;;  %v7909_v33 = vld [vmem:[#allocation232_spill] sm:$0xff]  ;;  %v7911_v13 = vld [vmem:[#allocation29_spill] sm:$0xff]  ;;  %v7919_v9 = vld [vmem:[#allocation262_spill] sm:$0xff] }
 0x36a   : > { %v2481_v50 = vadd.f32 %v2465_v53, %v2380_v28  ;;  %v2566_v63 = vmul.f32 %v6486_v18, %v2500_v5  ;;  %v2024_v15 = vmul.f32 %v7842_v31, %v7908_v55  ;;  %v2222_v7 = vmul.f32 %v6349_v36, %v7909_v33  ;;  %v7910_v22 = vld [vmem:[#allocation260_spill] sm:$0xff]  ;;  %v4014_v30 = vld [vmem:[#allocation2 + $0x151] ss:$2 sm:$0xff] }
 0x36b   : > { %v2468_v16 = vmul.f32 %v6465_v48, %v7910_v22  ;;  %v1332_v23 = vadd.f32 %v7911_v13, %v1183_v42  ;;  %v7912_v57 = vld [vmem:[#allocation57_spill] sm:$0xff]  ;;  %v1792_v51 = vadd.f32 %v6199_v59, %v1691_v19  ;;  %v1693_v28 = vadd.f32 %v7913_v56, %v1545_v34  ;;  %v7914_v39 = vld [vmem:[#allocation124_spill] sm:$0xff]  ;;  %v2512_v53 = vpop.permute.xlu0 %2511  ;;  %v6509_v20 = vpop.permute.xlu1 %2805  ;;  %v7918_v5 = vld [vmem:[#allocation234_spill] sm:$0xff] }
 0x36c   : > { %3225 = vperm.xlu1 %3939, %v4014_v30   ;;  %v1185_v46 = vadd.f32 %v7912_v57, %v1084_v52  ;;  %v6506_v54 = vadd.f32 %v2566_v63, %v2481_v50  ;;  %v2139_v11 = vadd.f32 %v7914_v39, %v2038_v32  ;;  %v7915_v24 = vld [vmem:[#allocation49_spill] sm:$0xff]  ;;  %v2238_v60 = vadd.f32 %v2222_v7, %v2137_v26  ;;  %v7917_v19 = vld [vmem:[#allocation184_spill] sm:$0xff]  ;;  %v7922_v63 = vld [vmem:[#allocation74_spill] sm:$0xff] }
 0x36d   : > { %v2484_v45 = vadd.f32 %v2468_v16, %v2383_v62  ;;  %v2385_v17 = vadd.f32 %v7915_v24, %v2236_v25  ;;  %v2040_v42 = vadd.f32 %v2024_v15, %v1891_v41  ;;  %v1893_v58 = vadd.f32 %v1877_v47, %v1792_v51  ;;  %v7920_v50 = vld [vmem:[#allocation5_spill] sm:$0xff]  ;;  %v4015_v26 = vld [vmem:[#allocation2 + $0x1e1] ss:$2 sm:$0xff] }
 0x36e   : > { %v1879_v52 = vmul.f32 %v6237_v43, %v7916_v4  ;;  %v2569_v59 = vmul.f32 %v6486_v18, %v2512_v53  ;;  %v2125_v34 = vmul.f32 %v6182_v27, %v7917_v19  ;;  %v2224_v32 = vmul.f32 %v6349_v36, %v7918_v5  ;;  %v7921_v41 = vld [vmem:[#allocation203_spill] sm:$0xff]  ;;  %v7924_v22 = vld [vmem:[#allocation13_spill] sm:$0xff]  ;;  %v7925_v57 = vld [vmem:[#allocation52_spill] sm:$0xff] }
 0x36f   : > { %v2470_v62 = vmul.f32 %v6465_v48, %v7919_v9  ;;  %v1518_v25 = vmul.f32 %v5947_v29, %v7920_v50  ;;  %v2026_v47 = vmul.f32 %v7842_v31, %v7921_v41  ;;  %v1433_v55 = vadd.f32 %v7922_v63, %v1332_v23  ;;  %v7923_v15 = vld [vmem:[#allocation167_spill] sm:$0xff]  ;;  %v2520_v30 = vpop.permute.xlu0 %2519  ;;  %v6532_v19 = vpop.permute.xlu1 %2850  ;;  %v7926_v5 = vld [vmem:[#allocation110_spill] sm:$0xff] }
 0x370   : > { %3233 = vperm.xlu1 %3939, %v4015_v26   ;;  %v1794_v33 = vadd.f32 %v7923_v15, %v1693_v28  ;;  %v6527_v7 = vadd.f32 %v2569_v59, %v2484_v45  ;;  %v1334_v16 = vadd.f32 %v7924_v22, %v1185_v46  ;;  %v2387_v51 = vadd.f32 %v7925_v57, %v2238_v60  ;;  %v7927_v23 = vld [vmem:[#allocation67_spill] sm:$0xff]  ;;  %v7928_v28 = vld [vmem:[#allocation264_spill] sm:$0xff]  ;;  %v7933_v50 = vld [vmem:[#allocation138_spill] sm:$0xff] }
 0x371   : > { %v2486_v13 = vadd.f32 %v2470_v62, %v2385_v17  ;;  %v2240_v56 = vadd.f32 %v2224_v32, %v2139_v11  ;;  %v2141_v39 = vadd.f32 %v2125_v34, %v2040_v42  ;;  %v2042_v53 = vadd.f32 %v2026_v47, %v1893_v58  ;;  %v7929_v46 = vld [vmem:[#allocation23_spill] sm:$0xff]  ;;  %v7930_v11 = vld [vmem:[#allocation186_spill] sm:$0xff]  ;;  %v7931_v42 = vld [vmem:[#allocation205_spill] sm:$0xff] }
 0x372   : > { %v1895_v24 = vadd.f32 %v1879_v52, %v1794_v33  ;;  %v2571_v4 = vmul.f32 %v6486_v18, %v2520_v30  ;;  %v1419_v9 = vmul.f32 %v7927_v23, %v7926_v5  ;;  %v2472_v45 = vmul.f32 %v6465_v48, %v7928_v28  ;;  %v4016_v62 = vld [vmem:[#allocation2 + $0x241] ss:$2 sm:$0xff]  ;;  %v7937_v5 = vld [vmem:[#allocation266_spill] sm:$0xff] }
 0x373   : > { %v1534_v59 = vadd.f32 %v1518_v25, %v1433_v55  ;;  %v1520_v17 = vmul.f32 %v5947_v29, %v7929_v46  ;;  %v2127_v60 = vmul.f32 %v6182_v27, %v7930_v11  ;;  %v2028_v58 = vmul.f32 %v7842_v31, %v7931_v42  ;;  %v7932_v52 = vld [vmem:[#allocation236_spill] sm:$0xff]  ;;  %v7934_v26 = vld [vmem:[#allocation27_spill] sm:$0xff]  ;;  %v2528_v63 = vpop.permute.xlu0 %2527  ;;  %v7935_v29 = vld [vmem:[#allocation54_spill] sm:$0xff]  ;;  %v6552_v30 = vpop.permute.xlu1 %2858 }
 0x374   : > { %3241 = vperm.xlu1 %3939, %v4016_v62   ;;  %v2226_v34 = vmul.f32 %v6349_v36, %v7932_v52  ;;  %v6546_v32 = vadd.f32 %v2571_v4, %v2486_v13  ;;  %v1666_v41 = vmul.f32 %v7934_v26, %v7933_v50  ;;  %v1435_v25 = vadd.f32 %v1419_v9, %v1334_v16  ;;  %v4017_v28 = vld [vmem:[#allocation2 + $0x2a1] ss:$2 sm:$0xff]  ;;  %v7938_v46 = vld [vmem:[#allocation66_spill] sm:$0xff] }
 0x375   : > { %v2488_v47 = vadd.f32 %v2472_v45, %v2387_v51  ;;  %v2389_v55 = vadd.f32 %v7935_v29, %v2240_v56  ;;  %v2143_v15 = vadd.f32 %v2127_v60, %v2042_v53  ;;  %v2044_v33 = vadd.f32 %v2028_v58, %v1895_v24  ;;  %7936 = vst [vmem:[#allocation135_spill] sm:$0xff] %v6552_v30  ;;  %v7939_v16 = vld [vmem:[#allocation40_spill] sm:$0xff]  ;;  %v7941_v53 = vld [vmem:[#allocation238_spill] sm:$0xff]  ;;  %v7943_v11 = vld [vmem:[#allocation159_spill] sm:$0xff] }
 0x376   : > { %v2573_v22 = vmul.f32 %v6486_v18, %v2528_v63  ;;  %v2242_v57 = vadd.f32 %v2226_v34, %v2141_v39  ;;  %v2474_v23 = vmul.f32 %v6465_v48, %v7937_v5  ;;  %v1682_v13 = vadd.f32 %v1666_v41, %v1534_v59  ;;  %v7940_v9 = vld [vmem:[#allocation188_spill] sm:$0xff]  ;;  %v7944_v60 = vld [vmem:[#allocation98_spill] sm:$0xff] }
 0x377   : > { %v1536_v4 = vadd.f32 %v1520_v17, %v1435_v25  ;;  %v2375_v51 = vmul.f32 %v7939_v16, %v7938_v46  ;;  %v2129_v56 = vmul.f32 %v6182_v27, %v7940_v9  ;;  %v2228_v24 = vmul.f32 %v6349_v36, %v7941_v53  ;;  %v7942_v62 = vld [vmem:[#allocation140_spill] sm:$0xff]  ;;  %v2536_v42 = vpop.permute.xlu0 %2535  ;;  %v6569_v34 = vpop.permute.xlu1 %2862 }
 0x378   : > { %3249 = vperm.xlu1 %3939, %v4017_v28   ;;  %v6562_v45 = vadd.f32 %v2573_v22, %v2488_v47  ;;  %v1668_v39 = vmul.f32 %v7934_v26, %v7942_v62  ;;  %v1767_v59 = vmul.f32 %v7944_v60, %v7943_v11  ;;  %v2490_v17 = vadd.f32 %v2474_v23, %v2389_v55  ;;  %v4018_v29 = vld [vmem:[#allocation2 + $0x301] ss:$2 sm:$0xff]  ;;  %v7948_v23 = vld [vmem:[#allocation162_spill] sm:$0xff]  ;;  %v7951_v11 = vld [vmem:[#allocation69_spill] sm:$0xff] }
 0x379   : > { %v2145_v58 = vadd.f32 %v2129_v56, %v2044_v33  ;;  %v2575_v52 = vmul.f32 %v6486_v18, %v2536_v42  ;;  %v2391_v50 = vadd.f32 %v2375_v51, %v2242_v57  ;;  %v2244_v41 = vadd.f32 %v2228_v24, %v2143_v15  ;;  %v7945_v47 = vld [vmem:[#allocation68_spill] sm:$0xff]  ;;  %v7949_v57 = vld [vmem:[#allocation177_spill] sm:$0xff] }
 0x37a   : > { %v1783_v25 = vadd.f32 %v1767_v59, %v1682_v13  ;;  %v1684_v63 = vadd.f32 %v1668_v39, %v1536_v4  ;;  %v2377_v22 = vmul.f32 %v7939_v16, %v7945_v47  ;;  %v7946_v26 = vld [vmem:[#allocation240_spill] sm:$0xff]  ;;  %v1769_v46 = vmul.f32 %v7944_v60, %v7948_v23  ;;  %v6600_v47 = vld [vmem:[#allocation2 + $0x92] ss:$2 sm:$0xff] }
 0x37b   : > { %v2230_v5 = vmul.f32 %v6349_v36, %v7946_v26  ;;  %v7947_v28 = vld [vmem:[#allocation268_spill] sm:$0xff]  ;;  %v6577_v33 = vadd.f32 %v2575_v52, %v2490_v17  ;;  %v1868_v15 = vmul.f32 %v6237_v43, %v7949_v57  ;;  %v2544_v13 = vpop.permute.xlu0 %2543  ;;  %v6584_v9 = vpop.permute.xlu1 %2870  ;;  %v7950_v39 = vmov 0   ;;  %v7952_v17 = vld [vmem:[#allocation270_spill] sm:$0xff] }
 0x37c   : > { %3257 = vperm.xlu1 %3939, %v4018_v29   ;;  %v2476_v55 = vmul.f32 %v6465_v48, %v7947_v28  ;;  %v2577_v51 = vmul.f32 %v6486_v18, %v2544_v13  ;;  %v2393_v56 = vadd.f32 %v2377_v22, %v2244_v41  ;;  %v1785_v24 = vadd.f32 %v1769_v46, %v1684_v63  ;;  %v6593_v29 = vld [vmem:[#allocation2 + $0x32] ss:$2 sm:$0xff] }
 0x37d   : > { %v2246_v53 = vadd.f32 %v2230_v5, %v2145_v58  ;;  %v1884_v62 = vadd.f32 %v1868_v15, %v1783_v25  ;;  %v2379_v59 = vmul.f32 %v7939_v16, %v7951_v11  ;;  %v2478_v42 = vmul.f32 %v6465_v48, %v7952_v17  ;;  %v7955_v58 = vld [vmem:[#allocation179_spill] sm:$0xff]  ;;  %v7956_v46 = vld [vmem:[#allocation250_spill] sm:$0xff]  ;;  %v7957_v15 = vld [vmem:[#allocation272_spill] sm:$0xff] }
 0x37e   : > { %v2492_v4 = vadd.f32 %v2476_v55, %v2391_v50  ;;  %v7954_v50 = vld [vmem:[#allocation60_spill] sm:$0xff]  ;;  %v1870_v25 = vmul.f32 %v6237_v43, %v7955_v58  ;;  %v2372_v57 = vmul.f32 %v7939_v16, %v7956_v46  ;;  %v2480_v13 = vmul.f32 %v6465_v48, %v7957_v15 }
 0x37f   : > { %v2017_v41 = vmul.f32 %v7842_v31, %v7954_v50  ;;  %v2552_v63 = vpop.permute.xlu0 %2551  ;;  %v2494_v22 = vadd.f32 %v2478_v42, %v2393_v56  ;;  %v6603_v5 = vpop.permute.xlu1 %2878  ;;  %v2395_v28 = vadd.f32 %v2379_v59, %v2246_v53  ;;  %v2219_v53 = vmul.f32 %v6349_v36, %v6331_v38  ;;  %v7961_v58 = vld [vmem:[#allocation196_spill] sm:$0xff]  ;;  %v7965_v38 = vld [vmem:[#allocation213_spill] sm:$0xff] }
 0x380   : > { %3940 = vset.pattern.permute.xlu1 %v7950_v39  ;;  %v6591_v52 = vadd.f32 %v2577_v51, %v2492_v4  ;;  %v2579_v26 = vmul.f32 %v6486_v18, %v2552_v63  ;;  %v1886_v23 = vadd.f32 %v1870_v25, %v1785_v24  ;;  %v7959_v51 = vld [vmem:[#allocation61_spill] sm:$0xff]  ;;  %v7960_v39 = vld [vmem:[#allocation211_spill] sm:$0xff]  ;;  %v2473_v25 = vmul.f32 %v6465_v48, %v7961_v58 }
 0x381   : > { %3335 = vperm.xlu1 %3940, %v6593_v29   ;;  %v2033_v55 = vadd.f32 %v2017_v41, %v1884_v62  ;;  %v2019_v56 = vmul.f32 %v7842_v31, %v7959_v51  ;;  %v2118_v11 = vmul.f32 %v6182_v27, %v7960_v39  ;;  %v2388_v62 = vadd.f32 %v2372_v57, %v6412_v12  ;;  %v7962_v31 = vld [vmem:[#allocation252_spill] sm:$0xff]  ;;  %v7969_v39 = vld [vmem:[#allocation198_spill] sm:$0xff] }
 0x382   : > { %7953 = vst [vmem:[#allocation130_spill] sm:$0xff] %v6591_v52  ;;  %v6609_v4 = vadd.f32 %v2579_v26, %v2494_v22  ;;  %v2496_v59 = vadd.f32 %v2480_v13, %v2395_v28  ;;  %v2374_v63 = vmul.f32 %v7939_v16, %v7962_v31  ;;  %v6628_v26 = vld [vmem:[#allocation2 + $0xc2] ss:$2 sm:$0xff]  ;;  %v2120_v12 = vmul.f32 %v6182_v27, %v7965_v38  ;;  %v7968_v13 = vld [vmem:[#allocation246_spill] sm:$0xff]  ;;  %v6661_v31 = vld [vmem:[%s7289_s2 + $0x1] ss:$0 sm:$0xff] }
 0x383   : > { %v2560_v24 = vpop.permute.xlu0 %2559  ;;  %v6620_v42 = vpop.permute.xlu1 %2886  ;;  %v2134_v50 = vadd.f32 %v2118_v11, %v2033_v55  ;;  %v2035_v41 = vadd.f32 %v2019_v56, %v1886_v23  ;;  %7964 = vst [vmem:[#allocation137_spill] sm:$0xff] %v6628_v26  ;;  %v2221_v55 = vmul.f32 %v6349_v36, %v6367_v10  ;;  %v2489_v46 = vadd.f32 %v2473_v25, %v2388_v62  ;;  %v7983_v52 = vld [vmem:[#allocation79_spill] sm:$0xff] }
 0x384   : > { %7958 = vst [vmem:[#allocation131_spill] sm:$0xff] %v6609_v4  ;;  %v2581_v17 = vmul.f32 %v6486_v18, %v2560_v24  ;;  %v2390_v57 = vadd.f32 %v2374_v63, %v6435_v8  ;;  %v2368_v51 = vmul.f32 %v7939_v16, %v7968_v13  ;;  %v2475_v11 = vmul.f32 %v6465_v48, %v7969_v39  ;;  %v7970_v24 = vld [vmem:[#allocation14_spill] sm:$0xff]  ;;  %v6654_v16 = vld [vmem:[%s7289_s2] ss:$0 sm:$0xff]  ;;  %v7974_v63 = vld [vmem:[#allocation17_spill] sm:$0xff] }
 0x385   : > { %3345 = vperm.xlu1 %3940, %v6600_v47   ;;  %v2235_v28 = vadd.f32 %v2219_v53, %v2134_v50  ;;  %v2136_v56 = vadd.f32 %v2120_v12, %v2035_v41  ;;  %v2574_v53 = vmul.f32 %v6486_v18, %v7970_v24  ;;  %v7973_v41 = vld [vmem:[#allocation4_spill] sm:$0xff]  ;;  %v712_v38 = vmul.f32 %v6661_v31, %v7974_v63  ;;  %v6668_v12 = vld [vmem:[%s7289_s2 + $0x12] ss:$0 sm:$0xff]  ;;  %v7978_v39 = vld [vmem:[#allocation34_spill] sm:$0xff] }
 0x386   : > { %v6626_v22 = vadd.f32 %v2581_v17, %v2496_v59  ;;  %v6646_v59 = vld [vmem:[#allocation2 + $0x122] ss:$2 sm:$0xff]  ;;  %v2491_v8 = vadd.f32 %v2475_v11, %v2390_v57  ;;  %v611_v25 = vmul.f32 %v6654_v16, %v7973_v41  ;;  %v2576_v11 = vmul.f32 %v6486_v18, %v7978_v39  ;;  %v7982_v4 = vld [vmem:[#allocation278_spill] sm:$0xff] }
 0x387   : > { %v6635_v23 = vpop.permute.xlu0 %2854  ;;  %v6638_v15 = vpop.permute.xlu1 %2894  ;;  %7971 = vst [vmem:[#allocation142_spill] sm:$0xff] %v6646_v59  ;;  %v2384_v10 = vadd.f32 %v2368_v51, %v2235_v28  ;;  %v2237_v62 = vadd.f32 %v2221_v55, %v2136_v56  ;;  %v2590_v50 = vadd.f32 %v2574_v53, %v2489_v46  ;;  %v7975_v28 = vld [vmem:[#allocation192_spill] sm:$0xff]  ;;  %v7977_v51 = vld [vmem:[#allocation77_spill] sm:$0xff]  ;;  %v6694_v41 = vld [vmem:[%s7289_s2 + $0x2] ss:$0 sm:$0xff] }
 0x388   : > { %7963 = vst [vmem:[#allocation132_spill] sm:$0xff] %v6626_v22  ;;  %7966 = vst [vmem:[#allocation139_spill] sm:$0xff] %v6635_v23  ;;  %v2469_v55 = vmul.f32 %v6465_v48, %v7975_v28  ;;  %v6675_v46 = vld [vmem:[%s7289_s2 + $0xf] ss:$0 sm:$0xff]  ;;  %v2723_v56 = vmul.f32 %v6668_v12, %v7977_v51  ;;  %v6683_v24 = vld [vmem:[#allocation2 + $0x182] ss:$2 sm:$0xff]  ;;  %v2592_v23 = vadd.f32 %v2576_v11, %v2491_v8 }
 0x389   : > { %3350 = vperm.xlu1 %3940, %v6628_v26   ;;  %7967 = vst [vmem:[#allocation141_spill] sm:$0xff] %v6638_v15  ;;  %v7976_v57 = vld [vmem:[#allocation248_spill] sm:$0xff]  ;;  %7979 = vst [vmem:[#allocation261_spill] sm:$0xff] %v6683_v24  ;;  %v6689_v53 = vld [vmem:[%s7289_s2 + $0x13] ss:$0 sm:$0xff]  ;;  %v728_v22 = vadd.f32 %v712_v38, %v611_v25  ;;  %v2570_v15 = vmul.f32 %v6486_v18, %v7982_v4 }
 0x38a   : > { %v2370_v13 = vmul.f32 %v6675_v46, %v7976_v57  ;;  %v7980_v63 = vld [vmem:[#allocation249_spill] sm:$0xff]  ;;  %v2485_v57 = vadd.f32 %v2469_v55, %v2384_v10  ;;  %v2739_v30 = vadd.f32 %v2723_v56, %v2590_v50  ;;  %v7981_v26 = vld [vmem:[#allocation194_spill] sm:$0xff]  ;;  %v2826_v4 = vmul.f32 %v6689_v53, %v6460_v1  ;;  %v6722_v55 = vld [vmem:[%s7289_s2 + $0x3] ss:$0 sm:$0xff] }
 0x38b   : > { %v2867_v17 = vpop.permute.xlu0 %2866  ;;  %v6649_v58 = vpop.permute.xlu1 %2902  ;;  %v813_v28 = vmul.f32 %v6694_v41, %v7980_v63  ;;  %v2725_v63 = vmul.f32 %v6668_v12, %v7983_v52  ;;  %v6708_v10 = vld [vmem:[#allocation2 + $0x212] ss:$2 sm:$0xff] }
 0x38c   : > { %7972 = vst [vmem:[#allocation12_spill] sm:$0xff] %v6649_v58  ;;  %v2386_v51 = vadd.f32 %v2370_v13, %v2237_v62  ;;  %v2471_v58 = vmul.f32 %v6465_v48, %v7981_v26  ;;  %7984 = vst [vmem:[#allocation143_spill] sm:$0xff] %v6708_v10  ;;  %v6714_v8 = vld [vmem:[%s7289_s2 + $0x14] ss:$0 sm:$0xff] }
 0x38d   : > { %3360 = vperm.xlu1 %3940, %v6646_v59   ;;  %v829_v62 = vadd.f32 %v813_v28, %v728_v22  ;;  %v2741_v38 = vadd.f32 %v2725_v63, %v2592_v23  ;;  %v7985_v22 = vld [vmem:[#allocation51_spill] sm:$0xff]  ;;  %v7987_v13 = vld [vmem:[#allocation73_spill] sm:$0xff]  ;;  %v2820_v28 = vmul.f32 %v6689_v53, %v6394_v37  ;;  %v7993_v37 = vld [vmem:[#allocation254_spill] sm:$0xff] }
 0x38e   : > { %v2487_v50 = vadd.f32 %v2471_v58, %v2386_v51  ;;  %v2719_v56 = vmul.f32 %v6668_v12, %v7987_v13  ;;  %v6734_v1 = vld [vmem:[#allocation2 + $0x272] ss:$2 sm:$0xff]  ;;  %v6743_v13 = vld [vmem:[%s7289_s2 + $0x4] ss:$0 sm:$0xff] }
 0x38f   : > { %v2875_v39 = vpop.permute.xlu0 %2874  ;;  %v6700_v59 = vpop.permute.xlu1 %2910  ;;  %7989 = vst [vmem:[#allocation145_spill] sm:$0xff] %v6734_v1 }
 0x391   : > { %3370 = vperm.xlu1 %3940, %v6683_v24   ;;  %v2824_v24 = vmul.f32 %v6689_v53, %v6441_v6  ;;  %v2586_v6 = vadd.f32 %v2570_v15, %v2485_v57  ;;  %v962_v15 = vmul.f32 %v6722_v55, %v7985_v22 }
 0x393   : > { %v2883_v25 = vpop.permute.xlu0 %2882  ;;  %v2840_v26 = vadd.f32 %v2824_v24, %v2739_v30  ;;  %v6726_v58 = vpop.permute.xlu1 %2989  ;;  %v7988_v30 = vld [vmem:[#allocation6_spill] sm:$0xff]  ;;  %v978_v24 = vadd.f32 %v962_v15, %v829_v62  ;;  %v2735_v51 = vadd.f32 %v2719_v56, %v2586_v6  ;;  %v7992_v62 = vld [vmem:[#allocation75_spill] sm:$0xff]  ;;  %v2376_v6 = vmul.f32 %v6675_v46, %v7993_v37 }
 0x394   : > { %v2925_v52 = vmul.f32 %v6714_v8, %v2883_v25  ;;  %7986 = vst [vmem:[#allocation144_spill] sm:$0xff] %v6726_v58  ;;  %v2572_v23 = vmul.f32 %v6486_v18, %v7988_v30  ;;  %v2842_v25 = vadd.f32 %v2826_v4, %v2741_v38  ;;  %v2721_v15 = vmul.f32 %v6668_v12, %v7992_v62  ;;  %v6756_v4 = vld [vmem:[#allocation2 + $0x2d2] ss:$2 sm:$0xff]  ;;  %v6765_v62 = vld [vmem:[%s7289_s2 + $0x5] ss:$0 sm:$0xff] }
 0x395   : > { %3380 = vperm.xlu1 %3940, %v6708_v10   ;;  %7994 = vst [vmem:[#allocation147_spill] sm:$0xff] %v6756_v4 }
 0x396   : > { %v6732_v11 = vadd.f32 %v2925_v52, %v2840_v26  ;;  %v2588_v63 = vadd.f32 %v2572_v23, %v2487_v50  ;;  %v7990_v26 = vld [vmem:[#allocation127_spill] sm:$0xff]  ;;  %v2921_v50 = vmul.f32 %v6714_v8, %v2867_v17  ;;  %v2836_v23 = vadd.f32 %v2820_v28, %v2735_v51  ;;  %v7995_v17 = vld [vmem:[#allocation70_spill] sm:$0xff] }
 0x397   : > { %v2891_v57 = vpop.permute.xlu0 %2890  ;;  %v1063_v52 = vmul.f32 %v6743_v13, %v7990_v26  ;;  %v6747_v30 = vpop.permute.xlu1 %2994  ;;  %v2822_v26 = vmul.f32 %v6689_v53, %v6419_v0  ;;  %v7997_v0 = vld [vmem:[#allocation255_spill] sm:$0xff] }
 0x398   : > { %v2927_v22 = vmul.f32 %v6714_v8, %v2891_v57  ;;  %7991 = vst [vmem:[#allocation146_spill] sm:$0xff] %v6747_v30  ;;  %v2737_v57 = vadd.f32 %v2721_v15, %v2588_v63  ;;  %v2937_v63 = vadd.f32 %v2921_v50, %v2836_v23  ;;  %v6779_v15 = vld [vmem:[#allocation2 + $0x332] ss:$2 sm:$0xff]  ;;  %v8000_v50 = vld [vmem:[#allocation28_spill] sm:$0xff] }
 0x399   : > { %3390 = vperm.xlu1 %3940, %v6734_v1   ;;  %v1079_v56 = vadd.f32 %v1063_v52, %v978_v24  ;;  %v2392_v1 = vadd.f32 %v2376_v6, %v6456_v14  ;;  %v7996_v24 = vld [vmem:[#allocation200_spill] sm:$0xff]  ;;  %v2378_v14 = vmul.f32 %v6675_v46, %v7997_v0  ;;  %v2923_v52 = vmul.f32 %v6714_v8, %v2875_v39  ;;  %v8001_v0 = vld [vmem:[#allocation202_spill] sm:$0xff] }
 0x39a   : > { %v6754_v38 = vadd.f32 %v2927_v22, %v2842_v25  ;;  %v1164_v25 = vmul.f32 %v6765_v62, %v7995_v17  ;;  %v6772_v22 = vld [vmem:[%s7289_s2 + $0x15] ss:$0 sm:$0xff]  ;;  %v2477_v28 = vmul.f32 %v6465_v48, %v7996_v24  ;;  %7998 = vst [vmem:[#allocation148_spill] sm:$0xff] %v6779_v15  ;;  %v2838_v17 = vadd.f32 %v2822_v26, %v2737_v57  ;;  %v6789_v24 = vld [vmem:[%s7289_s2 + $0x6] ss:$0 sm:$0xff] }
 0x39b   : > { %v3005_v51 = vpop.permute.xlu1 %3004  ;;  %v2394_v30 = vadd.f32 %v2378_v14, %v6481_v40  ;;  %v1313_v39 = vmul.f32 %v6789_v24, %v8000_v50  ;;  %v8003_v57 = vmov 1   ;;  %v8006_v50 = vld [vmem:[#allocation104_spill] sm:$0xff] }
 0x39c   : > { %v3070_v37 = vmul.f32 %v6772_v22, %v3005_v51  ;;  %v1180_v6 = vadd.f32 %v1164_v25, %v1079_v56  ;;  %v8002_v51 = vld [vmem:[#allocation47_spill] sm:$0xff]  ;;  %v8004_v25 = vld [vmem:[#allocation133_spill] sm:$0xff] }
 0x39d   : > { %3400 = vperm.xlu1 %3940, %v6756_v4   ;;  %v2493_v4 = vadd.f32 %v2477_v28, %v2392_v1  ;;  %v2578_v56 = vmul.f32 %v6486_v18, %v8002_v51  ;;  %v2939_v1 = vadd.f32 %v2923_v52, %v2838_v17  ;;  %v2899_v52 = vpop.permute.xlu0 %2898  ;;  %v8007_v51 = vld [vmem:[#allocation81_spill] sm:$0xff] }
 0x39e   : > { %v6784_v10 = vadd.f32 %v3070_v37, %v2937_v63  ;;  %v1329_v26 = vadd.f32 %v1313_v39, %v1180_v6  ;;  %v6805_v37 = vld [vmem:[%s7289_s2 + $0x7] ss:$0 sm:$0xff] }
 0x39f   : > { %v3015_v23 = vpop.permute.xlu1 %3014  ;;  %v2594_v14 = vadd.f32 %v2578_v56, %v2493_v4  ;;  %v8008_v4 = vld [vmem:[#allocation277_spill] sm:$0xff]  ;;  %v8009_v6 = vld [vmem:[#allocation55_spill] sm:$0xff] }
 0x3a0   : > { %7999 = vst [vmem:[#allocation149_spill] sm:$0xff] %v6784_v10  ;;  %v3072_v40 = vmul.f32 %v6772_v22, %v3015_v23  ;;  %v2727_v23 = vmul.f32 %v6668_v12, %v8007_v51  ;;  %v2580_v39 = vmul.f32 %v6486_v18, %v8009_v6  ;;  %v2929_v6 = vmul.f32 %v6714_v8, %v2899_v52 }
 0x3a1   : > { %3410 = vperm.xlu1 %3940, %v6779_v15   ;;  %v2479_v15 = vmul.f32 %v6465_v48, %v8001_v0  ;;  %v1414_v0 = vmul.f32 %v6805_v37, %v8006_v50  ;;  %v2830_v52 = vmul.f32 %v6689_v53, %v6509_v20 }
 0x3a2   : > { %v6800_v63 = vadd.f32 %v3072_v40, %v2939_v1  ;;  %v2828_v40 = vmul.f32 %v6689_v53, %v6490_v49 }
 0x3a3   : > { %v2495_v28 = vadd.f32 %v2479_v15, %v2394_v30  ;;  %v3025_v17 = vpop.permute.xlu1 %3024  ;;  %v6814_v30 = vld [vmem:[%s7289_s2 + $0x8] ss:$0 sm:$0xff]  ;;  %v1430_v1 = vadd.f32 %v1414_v0, %v1329_v26  ;;  %v6834_v26 = vld [vmem:[%s7289_s2 + $0x9] ss:$0 sm:$0xff]  ;;  %v2907_v0 = vpop.permute.xlu0 %2906 }
 0x3a4   : > { %8005 = vst [vmem:[#allocation150_spill] sm:$0xff] %v6800_v63  ;;  %v1515_v15 = vmul.f32 %v6814_v30, %v8008_v4  ;;  %v3074_v56 = vmul.f32 %v6772_v22, %v3025_v17  ;;  %v8011_v63 = vld [vmem:[#allocation83_spill] sm:$0xff] }
 0x3a5   : > { %3942 = vset.pattern.permute.xlu1 %v8003_v57  ;;  %v2743_v57 = vadd.f32 %v2727_v23, %v2594_v14  ;;  %v2729_v4 = vmul.f32 %v6668_v12, %v8011_v63  ;;  %v8012_v14 = vld [vmem:[#allocation134_spill] sm:$0xff] }
 0x3a6   : > { %3455 = vperm.xlu1 %3942, %v8004_v25   ;;  %v2596_v25 = vadd.f32 %v2580_v39, %v2495_v28  ;;  %v6825_v50 = vadd.f32 %v3074_v56, %v6732_v11  ;;  %v1531_v10 = vadd.f32 %v1515_v15, %v1430_v1  ;;  %v1663_v49 = vmul.f32 %v6834_v26, %v8012_v14  ;;  %v8013_v28 = vld [vmem:[#allocation119_spill] sm:$0xff]  ;;  %v8014_v23 = vld [vmem:[#allocation126_spill] sm:$0xff] }
 0x3a7   : > { %v3035_v51 = vpop.permute.xlu1 %3034  ;;  %v2715_v11 = vmul.f32 %v6668_v12, %v8013_v28  ;;  %v2844_v63 = vadd.f32 %v2828_v40, %v2743_v57  ;;  %v8015_v56 = vld [vmem:[#allocation19_spill] sm:$0xff]  ;;  %v2931_v28 = vmul.f32 %v6714_v8, %v2907_v0  ;;  %v8020_v0 = vld [vmem:[#allocation53_spill] sm:$0xff] }
 0x3a8   : > { %8010 = vst [vmem:[#allocation151_spill] sm:$0xff] %v6825_v50  ;;  %v3076_v17 = vmul.f32 %v6772_v22, %v3035_v51  ;;  %v2745_v15 = vadd.f32 %v2729_v4, %v2596_v25  ;;  %v713_v1 = vmul.f32 %v6661_v31, %v8015_v56  ;;  %v1679_v50 = vadd.f32 %v1663_v49, %v1531_v10  ;;  %v8016_v57 = vld [vmem:[#allocation3_spill] sm:$0xff]  ;;  %v8017_v25 = vld [vmem:[#allocation204_spill] sm:$0xff] }
 0x3a9   : > { %v2731_v51 = vadd.f32 %v2715_v11, %v6506_v54  ;;  %v2945_v58 = vadd.f32 %v2929_v6, %v2844_v63  ;;  %v612_v40 = vmul.f32 %v6654_v16, %v8016_v57  ;;  %v2816_v20 = vmul.f32 %v6689_v53, %v8017_v25  ;;  %v8018_v31 = vld [vmem:[#allocation35_spill] sm:$0xff]  ;;  %v8019_v10 = vld [vmem:[#allocation156_spill] sm:$0xff] }
 0x3aa   : > { %3459 = vperm.xlu1 %3942, %v6600_v47   ;;  %v6844_v39 = vadd.f32 %v3076_v17, %v6754_v38  ;;  %v2917_v38 = vmul.f32 %v6714_v8, %v6532_v19  ;;  %v814_v54 = vmul.f32 %v6694_v41, %v8018_v31  ;;  %v1764_v4 = vmul.f32 %v7944_v60, %v8019_v10  ;;  %v8027_v31 = vld [vmem:[#allocation82_spill] sm:$0xff] }
 0x3ab   : > { %v3045_v14 = vpop.permute.xlu1 %3044  ;;  %v2846_v6 = vadd.f32 %v2830_v52, %v2745_v15  ;;  %v729_v49 = vadd.f32 %v713_v1, %v612_v40  ;;  %v2832_v11 = vadd.f32 %v2816_v20, %v2731_v51  ;;  %v963_v63 = vmul.f32 %v6722_v55, %v8020_v0  ;;  %v8022_v15 = vld [vmem:[#allocation62_spill] sm:$0xff]  ;;  %v8023_v52 = vld [vmem:[#allocation173_spill] sm:$0xff]  ;;  %v8025_v40 = vld [vmem:[#allocation72_spill] sm:$0xff] }
 0x3ac   : > { %v1780_v56 = vadd.f32 %v1764_v4, %v1679_v50  ;;  %v1865_v1 = vmul.f32 %v6237_v43, %v8023_v52  ;;  %v8024_v55 = vld [vmem:[#allocation85_spill] sm:$0xff]  ;;  %v1165_v25 = vmul.f32 %v6765_v62, %v8025_v40  ;;  %v8026_v20 = vld [vmem:[#allocation206_spill] sm:$0xff]  ;;  %v6897_v4 = vld [vmem:[%s7289_s2 + $0xc] ss:$0 sm:$0xff] }
 0x3ad   : > { %v2933_v41 = vadd.f32 %v2917_v38, %v2832_v11  ;;  %v830_v60 = vadd.f32 %v814_v54, %v729_v49  ;;  %v3066_v50 = vmul.f32 %v6772_v22, %v8024_v55  ;;  %v2720_v54 = vmul.f32 %v6668_v12, %v8027_v31  ;;  %v8036_v40 = vld [vmem:[#allocation259_spill] sm:$0xff] }
 0x3ae   : > { %3467 = vperm.xlu1 %3942, %v8014_v23   ;;  %v3078_v23 = vmul.f32 %v6772_v22, %v3045_v14  ;;  %v2947_v14 = vadd.f32 %v2931_v28, %v2846_v6  ;;  %v1881_v43 = vadd.f32 %v1865_v1, %v1780_v56  ;;  %v8028_v6 = vld [vmem:[#allocation58_spill] sm:$0xff] }
 0x3af   : > { %v3055_v16 = vpop.permute.xlu1 %3054  ;;  %v3082_v10 = vadd.f32 %v3066_v50, %v2933_v41  ;;  %v2014_v49 = vmul.f32 %v6897_v4, %v8028_v6  ;;  %v8031_v41 = vld [vmem:[#allocation208_spill] sm:$0xff]  ;;  %v8033_v1 = vld [vmem:[#allocation118_spill] sm:$0xff] }
 0x3b0   : > { %v6862_v17 = vadd.f32 %v3078_v23, %v2945_v58  ;;  %v3080_v19 = vmul.f32 %v6772_v22, %v3055_v16  ;;  %v1064_v58 = vmul.f32 %v6743_v13, %v8022_v15  ;;  %v979_v23 = vadd.f32 %v963_v63, %v830_v60  ;;  %v6886_v13 = vld [vmem:[%s7289_s2 + $0x16] ss:$0 sm:$0xff]  ;;  %v8029_v16 = vld [vmem:[#allocation88_spill] sm:$0xff] }
 0x3b1   : > { %v1314_v0 = vmul.f32 %v6789_v24, %v8029_v16  ;;  %v2736_v63 = vadd.f32 %v2720_v54, %v6546_v32  ;;  %v2821_v60 = vmul.f32 %v6689_v53, %v8031_v41  ;;  %v8032_v15 = vld [vmem:[#allocation100_spill] sm:$0xff]  ;;  %v2922_v32 = vmul.f32 %v6714_v8, %v6584_v9  ;;  %v8037_v9 = vld [vmem:[#allocation210_spill] sm:$0xff] }
 0x3b2   : > { %3475 = vperm.xlu1 %3942, %v6309_v21   ;;  %v8021_v21 = vld [vmem:[#allocation123_spill] sm:$0xff]  ;;  %v6874_v51 = vadd.f32 %v3080_v19, %v2947_v14  ;;  %v1080_v11 = vadd.f32 %v1064_v58, %v979_v23  ;;  %v8030_v14 = vld [vmem:[#allocation106_spill] sm:$0xff]  ;;  %v2722_v58 = vmul.f32 %v6668_v12, %v8032_v15  ;;  %v1516_v55 = vmul.f32 %v6814_v30, %v8033_v1  ;;  %v8044_v15 = vld [vmem:[#allocation257_spill] sm:$0xff] }
 0x3b3   : > { %v2718_v57 = vmul.f32 %v6668_v12, %v8021_v21  ;;  %v3101_v38 = vpop.permute.xlu1 %3100  ;;  %v1415_v19 = vmul.f32 %v6805_v37, %v8030_v14  ;;  %v2030_v21 = vadd.f32 %v2014_v49, %v1881_v43  ;;  %v8034_v37 = vld [vmem:[#allocation207_spill] sm:$0xff]  ;;  %v8043_v41 = vld [vmem:[#allocation242_spill] sm:$0xff] }
 0x3b4   : > { %v3167_v62 = vmul.f32 %v6886_v13, %v3101_v38  ;;  %v2115_v50 = vmul.f32 %v6182_v27, %v8034_v37  ;;  %v8038_v38 = vld [vmem:[#allocation7_spill] sm:$0xff]  ;;  %v2924_v27 = vmul.f32 %v6714_v8, %v6603_v5  ;;  %v8041_v5 = vld [vmem:[#allocation153_spill] sm:$0xff] }
 0x3b5   : > { %v2734_v28 = vadd.f32 %v2718_v57, %v6527_v7  ;;  %v2920_v7 = vmul.f32 %v6714_v8, %v6569_v34  ;;  %v2724_v31 = vmul.f32 %v6668_v12, %v8038_v38  ;;  %v8045_v1 = vld [vmem:[#allocation91_spill] sm:$0xff] }
 0x3b6   : > { %3483 = vperm.xlu1 %3942, %v6343_v61   ;;  %v2819_v61 = vmul.f32 %v6689_v53, %v8026_v20  ;;  %v6904_v56 = vadd.f32 %v3167_v62, %v3082_v10  ;;  %v2738_v20 = vadd.f32 %v2722_v58, %v6562_v45  ;;  %v2131_v30 = vadd.f32 %v2115_v50, %v2030_v21  ;;  %v8039_v45 = vld [vmem:[#allocation89_spill] sm:$0xff]  ;;  %v4040_v50 = vld [vmem:[%s7289_s2 + $0xb] ss:$0 sm:$0xff] }
 0x3b7   : > { %v3071_v6 = vmul.f32 %v6772_v22, %v8039_v45  ;;  %v8052_v45 = vld [vmem:[#allocation93_spill] sm:$0xff] }
 0x3b8   : > { %v2835_v34 = vadd.f32 %v2819_v61, %v2734_v28  ;;  %v8035_v28 = vld [vmem:[#allocation87_spill] sm:$0xff]  ;;  %v2837_v61 = vadd.f32 %v2821_v60, %v2736_v63  ;;  %v2740_v63 = vadd.f32 %v2724_v31, %v6577_v33  ;;  %v2365_v60 = vmul.f32 %v6675_v46, %v8043_v41  ;;  %v8050_v31 = vld [vmem:[#allocation120_spill] sm:$0xff] }
 0x3b9   : > { %v6908_v57 = vpop.permute.xlu1 %3108  ;;  %v3069_v23 = vmul.f32 %v6772_v22, %v8035_v28  ;;  %v8046_v28 = vld [vmem:[#allocation175_spill] sm:$0xff]  ;;  %v8056_v41 = vld [vmem:[#allocation216_spill] sm:$0xff] }
 0x3ba   : > { %3491 = vperm.xlu1 %3942, %v6379_v2   ;;  %v1181_v2 = vadd.f32 %v1165_v25, %v1080_v11  ;;  %v2936_v52 = vadd.f32 %v2920_v7, %v2835_v34  ;;  %v2216_v25 = vmul.f32 %v6349_v36, %v8036_v40  ;;  %v2938_v7 = vadd.f32 %v2922_v32, %v2837_v61  ;;  %v8040_v11 = vld [vmem:[#allocation136_spill] sm:$0xff] }
 0x3bb   : > { %v1664_v16 = vmul.f32 %v6834_v26, %v8040_v11  ;;  %v2726_v26 = vmul.f32 %v6668_v12, %v8044_v15  ;;  %v8053_v11 = vld [vmem:[#allocation191_spill] sm:$0xff]  ;;  %v8057_v15 = vld [vmem:[#allocation274_spill] sm:$0xff] }
 0x3bc   : > { %v1330_v24 = vadd.f32 %v1314_v0, %v1181_v2  ;;  %v3085_v10 = vadd.f32 %v3069_v23, %v2936_v52  ;;  %v2232_v0 = vadd.f32 %v2216_v25, %v2131_v30  ;;  %v2926_v52 = vmul.f32 %v6714_v8, %v6620_v42  ;;  %v8047_v25 = vld [vmem:[#allocation130_spill] sm:$0xff] }
 0x3bd   : > { %v3113_v54 = vpop.permute.xlu1 %3112  ;;  %v3087_v32 = vadd.f32 %v3071_v6, %v2938_v7  ;;  %v1866_v23 = vmul.f32 %v4040_v50, %v8046_v28  ;;  %v2742_v42 = vadd.f32 %v2726_v26, %v8047_v25  ;;  %v2728_v30 = vmul.f32 %v6668_v12, %v8050_v31  ;;  %v8058_v26 = vld [vmem:[#allocation25_spill] sm:$0xff]  ;;  %v8061_v28 = vld [vmem:[#allocation226_spill] sm:$0xff] }
 0x3be   : > { %3499 = vperm.xlu1 %3942, %v6400_v35   ;;  %v1431_v43 = vadd.f32 %v1415_v19, %v1330_v24  ;;  %v2823_v35 = vmul.f32 %v6689_v53, %v8037_v9  ;;  %v3170_v62 = vmul.f32 %v6886_v13, %v3113_v54  ;;  %v8042_v19 = vld [vmem:[#allocation212_spill] sm:$0xff]  ;;  %v2381_v40 = vadd.f32 %v2365_v60, %v2232_v0  ;;  %v8065_v31 = vld [vmem:[#allocation218_spill] sm:$0xff] }
 0x3bf   : > { %v2825_v21 = vmul.f32 %v6689_v53, %v8042_v19  ;;  %v3075_v6 = vmul.f32 %v6772_v22, %v8052_v45  ;;  %v8055_v19 = vld [vmem:[#allocation209_spill] sm:$0xff]  ;;  %v2829_v60 = vmul.f32 %v6689_v53, %v8056_v41 }
 0x3c0   : > { %v1532_v49 = vadd.f32 %v1516_v55, %v1431_v43  ;;  %v2839_v34 = vadd.f32 %v2823_v35, %v2738_v20  ;;  %v6939_v2 = vadd.f32 %v3170_v62, %v3085_v10  ;;  %v3073_v55 = vmul.f32 %v6772_v22, %v8045_v1  ;;  %v8048_v43 = vld [vmem:[#allocation190_spill] sm:$0xff] }
 0x3c1   : > { %v3121_v58 = vpop.permute.xlu1 %3120  ;;  %v2841_v20 = vadd.f32 %v2825_v21, %v2740_v63  ;;  %v2466_v9 = vmul.f32 %v6465_v48, %v8048_v43  ;;  %v8049_v35 = vld [vmem:[#allocation214_spill] sm:$0xff]  ;;  %v8054_v63 = vld [vmem:[#allocation131_spill] sm:$0xff] }
 0x3c2   : > { %3507 = vperm.xlu1 %3942, %v6423_v44   ;;  %v4039_v44 = vld [vmem:[%s7289_s2 + $0xa] ss:$0 sm:$0xff]  ;;  %v2940_v33 = vadd.f32 %v2924_v27, %v2839_v34  ;;  %v3172_v24 = vmul.f32 %v6886_v13, %v3121_v58  ;;  %v1680_v37 = vadd.f32 %v1664_v16, %v1532_v49  ;;  %v2827_v38 = vmul.f32 %v6689_v53, %v8049_v35  ;;  %v8051_v27 = vld [vmem:[#allocation141_spill] sm:$0xff] }
 0x3c3   : > { %v1765_v14 = vmul.f32 %v4039_v44, %v8041_v5  ;;  %v2942_v7 = vadd.f32 %v2926_v52, %v2841_v20  ;;  %v2015_v16 = vmul.f32 %v6897_v4, %v8053_v11  ;;  %v2482_v0 = vadd.f32 %v2466_v9, %v2381_v40  ;;  %v8059_v52 = vld [vmem:[#allocation12_spill] sm:$0xff]  ;;  %v8062_v40 = vld [vmem:[#allocation137_spill] sm:$0xff]  ;;  %v8064_v9 = vld [vmem:[#allocation71_spill] sm:$0xff] }
 0x3c4   : > { %v3089_v10 = vadd.f32 %v3073_v55, %v2940_v33  ;;  %v2744_v34 = vadd.f32 %v2728_v30, %v8054_v63  ;;  %v2843_v44 = vadd.f32 %v2827_v38, %v2742_v42  ;;  %v2567_v4 = vmul.f32 %v6486_v18, %v8057_v15  ;;  %v8060_v55 = vld [vmem:[#allocation95_spill] sm:$0xff]  ;;  %v8063_v42 = vld [vmem:[#allocation132_spill] sm:$0xff]  ;;  %v8068_v11 = vld [vmem:[#allocation142_spill] sm:$0xff] }
 0x3c5   : > { %v1781_v61 = vadd.f32 %v1765_v14, %v1680_v37  ;;  %v4041_v14 = vld [vmem:[%s7289_s2 + $0xd] ss:$0 sm:$0xff]  ;;  %v3077_v37 = vmul.f32 %v6772_v22, %v8060_v55  ;;  %v2716_v35 = vmul.f32 %v6668_v12, %v8064_v9  ;;  %v2831_v30 = vmul.f32 %v6689_v53, %v8065_v31 }
 0x3c6   : > { %3944 = vset.pattern.permute.xlu1 %v7879_v3  ;;  %v6963_v3 = vadd.f32 %v3172_v24, %v3087_v32  ;;  %v3129_v54 = vpop.permute.xlu1 %3128  ;;  %v2116_v21 = vmul.f32 %v4041_v14, %v8055_v19  ;;  %v2930_v32 = vmul.f32 %v6714_v8, %v8059_v52  ;;  %v3091_v24 = vadd.f32 %v3075_v6, %v2942_v7  ;;  %v8067_v6 = vld [vmem:[#allocation258_spill] sm:$0xff]  ;;  %v8070_v14 = vld [vmem:[#allocation276_spill] sm:$0xff]  ;;  %v8074_v52 = vld [vmem:[#allocation261_spill] sm:$0xff] }
 0x3c7   : > { %3552 = vperm.xlu1 %3944, %v6593_v29   ;;  %v2928_v29 = vmul.f32 %v6714_v8, %v8051_v27  ;;  %v3174_v62 = vmul.f32 %v6886_v13, %v3129_v54  ;;  %v1882_v49 = vadd.f32 %v1866_v23, %v1781_v61  ;;  %v2217_v23 = vmul.f32 %v6349_v36, %v8061_v28  ;;  %v8066_v54 = vld [vmem:[#allocation244_spill] sm:$0xff] }
 0x3c8   : > { %v2583_v25 = vadd.f32 %v2567_v4, %v2482_v0  ;;  %v2845_v61 = vadd.f32 %v2829_v60, %v2744_v34  ;;  %v2366_v7 = vmul.f32 %v6675_v46, %v8066_v54  ;;  %v8071_v19 = vld [vmem:[#allocation128_spill] sm:$0xff]  ;;  %v8072_v60 = vld [vmem:[#allocation139_spill] sm:$0xff] }
 0x3c9   : > { %v6980_v5 = vadd.f32 %v3174_v62, %v3089_v10  ;;  %v2944_v33 = vadd.f32 %v2928_v29, %v2843_v44  ;;  %v2031_v50 = vadd.f32 %v2015_v16, %v1882_v49  ;;  %v2932_v29 = vmul.f32 %v6714_v8, %v6700_v59  ;;  %v8069_v16 = vld [vmem:[#allocation97_spill] sm:$0xff] }
 0x3ca   : > { %v3137_v58 = vpop.permute.xlu1 %3136  ;;  %v2946_v36 = vadd.f32 %v2930_v32, %v2845_v61  ;;  %v2467_v49 = vmul.f32 %v6465_v48, %v8067_v6  ;;  %v3079_v0 = vmul.f32 %v6772_v22, %v8069_v16  ;;  %v2732_v63 = vadd.f32 %v2716_v35, %v2583_v25  ;;  %v8075_v32 = vld [vmem:[#allocation76_spill] sm:$0xff]  ;;  %v8078_v61 = vld [vmem:[#allocation143_spill] sm:$0xff] }
 0x3cb   : > { %3560 = vperm.xlu1 %3944, %v6600_v47   ;;  %v2730_v47 = vmul.f32 %v6668_v12, %v8058_v26  ;;  %v3176_v1 = vmul.f32 %v6886_v13, %v3137_v58  ;;  %v2132_v38 = vadd.f32 %v2116_v21, %v2031_v50  ;;  %v3093_v10 = vadd.f32 %v3077_v37, %v2944_v33  ;;  %v8079_v35 = vld [vmem:[#allocation135_spill] sm:$0xff] }
 0x3cc   : > { %v2568_v59 = vmul.f32 %v6486_v18, %v8070_v14  ;;  %v2817_v21 = vmul.f32 %v6689_v53, %v8071_v19  ;;  %v2918_v48 = vmul.f32 %v6714_v8, %v8072_v60  ;;  %v3095_v4 = vadd.f32 %v3079_v0, %v2946_v36  ;;  %v7050_v36 = vld [vmem:[%s7289_s2 + $0x17] ss:$0 sm:$0xff]  ;;  %v8083_v16 = vld [vmem:[#allocation147_spill] sm:$0xff] }
 0x3cd   : > { %v2746_v20 = vadd.f32 %v2730_v47, %v8063_v42  ;;  %v7001_v43 = vadd.f32 %v3176_v1, %v3091_v24  ;;  %v2233_v45 = vadd.f32 %v2217_v23, %v2132_v38  ;;  %v8073_v47 = vld [vmem:[#allocation99_spill] sm:$0xff]  ;;  %v2717_v18 = vmul.f32 %v6668_v12, %v8075_v32  ;;  %v8076_v1 = vld [vmem:[#allocation144_spill] sm:$0xff]  ;;  %v8077_v23 = vld [vmem:[#allocation129_spill] sm:$0xff] }
 0x3ce   : > { %v3145_v27 = vpop.permute.xlu1 %3144  ;;  %v3081_v58 = vmul.f32 %v6772_v22, %v8073_v47  ;;  %v2833_v24 = vadd.f32 %v2817_v21, %v2732_v63  ;;  %v3067_v55 = vmul.f32 %v6772_v22, %v8076_v1  ;;  %v2919_v12 = vmul.f32 %v6714_v8, %v8079_v35  ;;  %v8087_v60 = vld [vmem:[#allocation223_spill] sm:$0xff] }
 0x3cf   : > { %3564 = vperm.xlu1 %3944, %v8062_v40   ;;  %v3178_v62 = vmul.f32 %v6886_v13, %v3145_v27  ;;  %v2847_v34 = vadd.f32 %v2831_v30, %v2746_v20  ;;  %v2382_v44 = vadd.f32 %v2366_v7, %v2233_v45  ;;  %v2818_v40 = vmul.f32 %v6689_v53, %v8077_v23  ;;  %v8080_v30 = vld [vmem:[#allocation220_spill] sm:$0xff]  ;;  %v8081_v27 = vld [vmem:[#allocation146_spill] sm:$0xff]  ;;  %v8090_v1 = vld [vmem:[#allocation151_spill] sm:$0xff] }
 0x3d0   : > { %v2934_v25 = vadd.f32 %v2918_v48, %v2833_v24  ;;  %v3168_v54 = vmul.f32 %v6886_v13, %v8080_v30  ;;  %v3068_v53 = vmul.f32 %v6772_v22, %v8081_v27  ;;  %v3169_v8 = vmul.f32 %v6886_v13, %v6908_v57  ;;  %v8086_v57 = vld [vmem:[#allocation149_spill] sm:$0xff]  ;;  %v8093_v27 = vld [vmem:[#allocation231_spill] sm:$0xff] }
 0x3d1   : > { %v7017_v46 = vadd.f32 %v3178_v62, %v3093_v10  ;;  %v2948_v15 = vadd.f32 %v2932_v29, %v2847_v34  ;;  %v2483_v33 = vadd.f32 %v2467_v49, %v2382_v44  ;;  %v8082_v29 = vld [vmem:[#allocation145_spill] sm:$0xff]  ;;  %v8084_v34 = vld [vmem:[#allocation222_spill] sm:$0xff]  ;;  %v3173_v48 = vmul.f32 %v6886_v13, %v8087_v60 }
 0x3d2   : > { %v3083_v38 = vadd.f32 %v3067_v55, %v2934_v25  ;;  %v3171_v44 = vmul.f32 %v6886_v13, %v8084_v34 }
 0x3d3   : > { %3572 = vperm.xlu1 %3944, %v8068_v11   ;;  %v3153_v41 = vpop.permute.xlu1 %3152  ;;  %v2584_v50 = vadd.f32 %v2568_v59, %v2483_v33  ;;  %v3097_v42 = vadd.f32 %v3081_v58, %v2948_v15  ;;  %v8085_v59 = vld [vmem:[#allocation148_spill] sm:$0xff]  ;;  %v3202_v33 = vpop.permute.xlu0 %3201 }
 0x3d4   : > { %v3180_v26 = vmul.f32 %v6886_v13, %v3153_v41  ;;  %v3184_v45 = vadd.f32 %v3168_v54, %v3083_v38  ;;  %v3187_v21 = vadd.f32 %v3171_v44, %v8086_v57 }
 0x3d5   : > { %v2733_v9 = vadd.f32 %v2717_v18, %v2584_v50 }
 0x3d6   : > { %v7033_v37 = vadd.f32 %v3180_v26, %v3095_v4  ;;  %v8088_v26 = vld [vmem:[#allocation150_spill] sm:$0xff] }
 0x3d7   : > { %3580 = vperm.xlu1 %3944, %v8074_v52   ;;  %v3161_v28 = vpop.permute.xlu1 %3160  ;;  %v2834_v7 = vadd.f32 %v2818_v40, %v2733_v9  ;;  %v3189_v47 = vadd.f32 %v3173_v48, %v8088_v26  ;;  %v8089_v52 = vld [vmem:[#allocation225_spill] sm:$0xff]  ;;  %v3214_v25 = vpop.permute.xlu0 %3213 }
 0x3d8   : > { %v3182_v20 = vmul.f32 %v6886_v13, %v3161_v28  ;;  %v3175_v32 = vmul.f32 %v6886_v13, %v8089_v52  ;;  %v8091_v28 = vld [vmem:[#allocation227_spill] sm:$0xff]  ;;  %v8092_v9 = vld [vmem:[#allocation229_spill] sm:$0xff]  ;;  %v3271_v34 = vmul.f32 %v7050_v36, %v3214_v25 }
 0x3d9   : > { %v2935_v62 = vadd.f32 %v2919_v12, %v2834_v7  ;;  %v3177_v23 = vmul.f32 %v6886_v13, %v8091_v28  ;;  %v3179_v35 = vmul.f32 %v6886_v13, %v8092_v9 }
 0x3da   : > { %v7041_v31 = vadd.f32 %v3182_v20, %v3097_v42  ;;  %v3191_v55 = vadd.f32 %v3175_v32, %v8090_v1 }
 0x3db   : > { %3588 = vperm.xlu1 %3944, %v8078_v61   ;;  %v3084_v49 = vadd.f32 %v3068_v53, %v2935_v62  ;;  %v3193_v20 = vadd.f32 %v3177_v23, %v6844_v39  ;;  %v3195_v30 = vadd.f32 %v3179_v35, %v6862_v17  ;;  %v3222_v7 = vpop.permute.xlu0 %3221  ;;  %v3181_v53 = vmul.f32 %v6886_v13, %v8093_v27  ;;  %v7101_v17 = vld [vmem:[%s7289_s2 + $0x18] ss:$0 sm:$0xff] }
 0x3dd   : > { %v3185_v0 = vadd.f32 %v3169_v8, %v3084_v49  ;;  %v3197_v39 = vadd.f32 %v3181_v53, %v6874_v51 }
 0x3de   : > { %v3206_v10 = vpop.permute.xlu1 %3205 }
 0x3df   : > { %3596 = vperm.xlu1 %3944, %v8082_v29   ;;  %v3269_v6 = vmul.f32 %v7050_v36, %v3206_v10 }
 0x3e1   : > { %v7056_v11 = vadd.f32 %v3269_v6, %v3184_v45  ;;  %v3268_v45 = vmul.f32 %v7050_v36, %v3202_v33  ;;  %v3230_v6 = vpop.permute.xlu0 %3229 }
 0x3e2   : > { %v3210_v22 = vpop.permute.xlu1 %3209  ;;  %v3275_v26 = vmul.f32 %v7050_v36, %v3230_v6 }
 0x3e3   : > { %3604 = vperm.xlu1 %3944, %v8083_v16   ;;  %v3270_v63 = vmul.f32 %v7050_v36, %v3210_v22  ;;  %v3284_v13 = vadd.f32 %v3268_v45, %v6904_v56 }
 0x3e5   : > { %v3286_v14 = vadd.f32 %v3270_v63, %v3185_v0  ;;  %v3238_v0 = vpop.permute.xlu0 %3237 }
 0x3e6   : > { %v3277_v52 = vmul.f32 %v7050_v36, %v3238_v0 }
 0x3e7   : > { %3612 = vperm.xlu1 %3944, %v8085_v59   ;;  %v3218_v19 = vpop.permute.xlu1 %3217 }
 0x3e8   : > { %v3272_v41 = vmul.f32 %v7050_v36, %v3218_v19  ;;  %v3287_v19 = vadd.f32 %v3271_v34, %v6939_v2  ;;  %v3291_v2 = vadd.f32 %v3275_v26, %v6980_v5  ;;  %v3293_v1 = vadd.f32 %v3277_v52, %v7001_v43 }
 0x3e9   : > { %v3246_v56 = vpop.permute.xlu0 %3245 }
 0x3ea   : > { %v7067_v15 = vadd.f32 %v3272_v41, %v3187_v21  ;;  %v3273_v21 = vmul.f32 %v7050_v36, %v3222_v7 }
 0x3eb   : > { %v3226_v4 = vpop.permute.xlu1 %3225 }
 0x3ec   : > { %v3274_v58 = vmul.f32 %v7050_v36, %v3226_v4  ;;  %v3289_v48 = vadd.f32 %v3273_v21, %v6963_v3 }
 0x3ee   : > { %v7073_v18 = vadd.f32 %v3274_v58, %v3189_v47  ;;  %v3254_v58 = vpop.permute.xlu0 %3253 }
 0x3ef   : > { %v3234_v24 = vpop.permute.xlu1 %3233 }
 0x3f0   : > { %v3276_v50 = vmul.f32 %v7050_v36, %v3234_v24 }
 0x3f2   : > { %v7079_v40 = vadd.f32 %v3276_v50, %v3191_v55  ;;  %v3279_v55 = vmul.f32 %v7050_v36, %v3246_v56  ;;  %v3262_v50 = vpop.permute.xlu0 %3261 }
 0x3f3   : > { %v3242_v42 = vpop.permute.xlu1 %3241 }
 0x3f4   : > { %v3278_v61 = vmul.f32 %v7050_v36, %v3242_v42  ;;  %v3295_v25 = vadd.f32 %v3279_v55, %v7017_v46  ;;  %v3281_v42 = vmul.f32 %v7050_v36, %v3254_v58 }
 0x3f6   : > { %v7085_v12 = vadd.f32 %v3278_v61, %v3193_v20  ;;  %v3557_v9 = vpop.permute.xlu0 %3556  ;;  %v3297_v43 = vadd.f32 %v3281_v42, %v7033_v37  ;;  %v7150_v37 = vld [vmem:[%s7289_s2 + $0x19] ss:$0 sm:$0xff] }
 0x3f7   : > { %v3250_v38 = vpop.permute.xlu1 %3249 }
 0x3f8   : > { %v3280_v54 = vmul.f32 %v7050_v36, %v3250_v38  ;;  %v3283_v38 = vmul.f32 %v7050_v36, %v3262_v50 }
 0x3fa   : > { %v7091_v29 = vadd.f32 %v3280_v54, %v3195_v30  ;;  %v3299_v46 = vadd.f32 %v3283_v38, %v7041_v31  ;;  %v3569_v27 = vpop.permute.xlu0 %3568 }
 0x3fb   : > { %v3258_v10 = vpop.permute.xlu1 %3257 }
 0x3fc   : > { %v3282_v62 = vmul.f32 %v7050_v36, %v3258_v10  ;;  %v8094_v10 = vld [vmem:[#allocation101_spill] sm:$0xff]  ;;  %v7155_v36 = vld [vmem:[%s7289_s2 + $0x1a] ss:$0 sm:$0xff] }
 0x3fd   : > { %v3620_v6 = vmul.f32 %v7155_v36, %v3557_v9 }
 0x3fe   : > { %v7095_v8 = vadd.f32 %v3282_v62, %v3197_v39  ;;  %v3418_v39 = vmul.f32 %v7101_v17, %v8094_v10 }
 0x400   : > { %v3336_v49 = vpop.permute.xlu1 %3335  ;;  %v3434_v31 = vadd.f32 %v3418_v39, %v7056_v11 }
 0x401   : > { %v3417_v16 = vmul.f32 %v7101_v17, %v3336_v49 }
 0x403   : > { %v7105_v22 = vadd.f32 %v3417_v16, %v3284_v13  ;;  %v3577_v13 = vpop.permute.xlu0 %3576  ;;  %v7163_v16 = vld [vmem:[%s7290_s3] ss:$0 sm:$0xff] }
 0x404   : > { %v3346_v51 = vpop.permute.xlu1 %3345 }
 0x405   : > { %v3419_v63 = vmul.f32 %v7101_v17, %v3346_v51 }
 0x407   : > { %v7109_v44 = vadd.f32 %v3419_v63, %v3286_v14  ;;  %v8095_v63 = vld [vmem:[#allocation103_spill] sm:$0xff]  ;;  %v3585_v56 = vpop.permute.xlu0 %3584 }
 0x408   : > { %v3351_v59 = vpop.permute.xlu1 %3350  ;;  %v3421_v34 = vmul.f32 %v7101_v17, %v8095_v63 }
 0x409   : > { %v3420_v57 = vmul.f32 %v7101_v17, %v3351_v59 }
 0x40b   : > { %v7114_v41 = vadd.f32 %v3420_v57, %v3287_v19  ;;  %v3437_v57 = vadd.f32 %v3421_v34, %v7067_v15  ;;  %v3625_v15 = vmul.f32 %v7155_v36, %v3577_v13 }
 0x40c   : > { %v3361_v60 = vpop.permute.xlu1 %3360 }
 0x40d   : > { %v3422_v4 = vmul.f32 %v7101_v17, %v3361_v60  ;;  %v8096_v60 = vld [vmem:[#allocation105_spill] sm:$0xff] }
 0x40f   : > { %v7119_v47 = vadd.f32 %v3422_v4, %v3289_v48  ;;  %v3423_v48 = vmul.f32 %v7101_v17, %v8096_v60  ;;  %v3623_v4 = vmul.f32 %v7155_v36, %v3569_v27 }
 0x410   : > { %v3371_v14 = vpop.permute.xlu1 %3370 }
 0x411   : > { %v3424_v33 = vmul.f32 %v7101_v17, %v3371_v14 }
 0x413   : > { %v7124_v32 = vadd.f32 %v3424_v33, %v3291_v2  ;;  %v3439_v2 = vadd.f32 %v3423_v48, %v7073_v18 }
 0x414   : > { %v3381_v24 = vpop.permute.xlu1 %3380 }
 0x415   : > { %v3426_v3 = vmul.f32 %v7101_v17, %v3381_v24 }
 0x417   : > { %v7129_v28 = vadd.f32 %v3426_v3, %v3293_v1  ;;  %v3593_v1 = vpop.permute.xlu0 %3592 }
 0x418   : > { %v3391_v23 = vpop.permute.xlu1 %3390 }
 0x419   : > { %v3428_v5 = vmul.f32 %v7101_v17, %v3391_v23 }
 0x41b   : > { %v7134_v20 = vadd.f32 %v3428_v5, %v3295_v25  ;;  %v3601_v42 = vpop.permute.xlu0 %3600 }
 0x41c   : > { %v3401_v61 = vpop.permute.xlu1 %3400  ;;  %v3631_v10 = vmul.f32 %v7155_v36, %v3601_v42 }
 0x41d   : > { %v3430_v35 = vmul.f32 %v7101_v17, %v3401_v61  ;;  %v8097_v61 = vld [vmem:[#allocation111_spill] sm:$0xff] }
 0x41e   : > { %v3429_v18 = vmul.f32 %v7101_v17, %v8097_v61 }
 0x41f   : > { %v7139_v30 = vadd.f32 %v3430_v35, %v3297_v43  ;;  %v8098_v43 = vld [vmem:[#allocation107_spill] sm:$0xff] }
 0x420   : > { %v3411_v54 = vpop.permute.xlu1 %3410  ;;  %v3425_v35 = vmul.f32 %v7101_v17, %v8098_v43  ;;  %v8103_v43 = vld [vmem:[#allocation237_spill] sm:$0xff] }
 0x421   : > { %v3432_v7 = vmul.f32 %v7101_v17, %v3411_v54  ;;  %v3445_v54 = vadd.f32 %v3429_v18, %v7091_v29 }
 0x422   : > { %v3441_v39 = vadd.f32 %v3425_v35, %v7079_v40  ;;  %v3523_v35 = vmul.f32 %v7150_v37, %v8103_v43 }
 0x423   : > { %v7143_v53 = vadd.f32 %v3432_v7, %v3299_v46  ;;  %v8099_v7 = vld [vmem:[#allocation113_spill] sm:$0xff] }
 0x424   : > { %v3431_v27 = vmul.f32 %v7101_v17, %v8099_v7 }
 0x425   : > { %v3456_v62 = vpop.permute.xlu1 %3455 }
 0x426   : > { %v3519_v45 = vmul.f32 %v7150_v37, %v3456_v62  ;;  %v3447_v13 = vadd.f32 %v3431_v27, %v7095_v8 }
 0x428   : > { %v3535_v49 = vadd.f32 %v3519_v45, %v3434_v31  ;;  %v8100_v31 = vld [vmem:[#allocation109_spill] sm:$0xff] }
 0x429   : > { %v3460_v51 = vpop.permute.xlu1 %3459  ;;  %v3427_v45 = vmul.f32 %v7101_v17, %v8100_v31 }
 0x42a   : > { %v3636_v0 = vadd.f32 %v3620_v6, %v3535_v49  ;;  %v3609_v6 = vpop.permute.xlu0 %3608 }
 0x42b   : > { %v3443_v40 = vadd.f32 %v3427_v45, %v7085_v12  ;;  %v3629_v12 = vmul.f32 %v7155_v36, %v3593_v1  ;;  %v8102_v1 = vld [vmem:[#allocation235_spill] sm:$0xff] }
 0x42c   : > { %v3659_v59 = vadd.f32 %v7163_v16, %v3636_v0 }
 0x42d   : > { %v3468_v11 = vpop.permute.xlu1 %3467 }
 0x42e   : > { %v3675_v19 = vpack.c.bf16 %v3659_v59, %v3659_v59  ;;  %v3522_v21 = vmul.f32 %v7150_v37, %v3468_v11  ;;  %v3627_v59 = vmul.f32 %v7155_v36, %v3585_v56  ;;  %v3633_v11 = vmul.f32 %v7155_v36, %v3609_v6 }
 0x430   : > { %3692 = vst.msk [vmem:[%s7172_s16 + $0x4] sm:$0xf] %vm3690_vm3, %v3675_v19  ;;  %v3538_v26 = vadd.f32 %v3522_v21, %v3437_v57  ;;  %v8101_v57 = vld [vmem:[#allocation233_spill] sm:$0xff] }
 0x431   : > { %v3476_v14 = vpop.permute.xlu1 %3475  ;;  %v3518_v21 = vmul.f32 %v7150_v37, %v8101_v57 }
 0x432   : > { %v3639_v58 = vadd.f32 %v3623_v4, %v3538_v26  ;;  %v3524_v33 = vmul.f32 %v7150_v37, %v3476_v14  ;;  %v3520_v14 = vmul.f32 %v7150_v37, %v3460_v51 }
 0x433   : > { %v3534_v56 = vadd.f32 %v3518_v21, %v7105_v22 }
 0x434   : > { %v3662_v52 = vadd.f32 %v7163_v16, %v3639_v58  ;;  %v3540_v24 = vadd.f32 %v3524_v33, %v3439_v2  ;;  %v3536_v51 = vadd.f32 %v3520_v14, %v7109_v44 }
 0x435   : > { %v3484_v3 = vpop.permute.xlu1 %3483 }
 0x436   : > { %v3678_v55 = vpack.c.bf16 %v3662_v52, %v3662_v52  ;;  %v3641_v50 = vadd.f32 %v3625_v15, %v3540_v24  ;;  %v3526_v38 = vmul.f32 %v7150_v37, %v3484_v3 }
 0x438   : > { %3695 = vst.msk [vmem:[%s7172_s16 + $0x10] sm:$0xf] %vm3690_vm3, %v3678_v55  ;;  %v3664_v23 = vadd.f32 %v7163_v16, %v3641_v50  ;;  %v3542_v0 = vadd.f32 %v3526_v38, %v3441_v39  ;;  %v3521_v50 = vmul.f32 %v7150_v37, %v8102_v1  ;;  %v8104_v39 = vld [vmem:[#allocation239_spill] sm:$0xff] }
 0x439   : > { %v3492_v25 = vpop.permute.xlu1 %3491 }
 0x43a   : > { %v3680_v5 = vpack.c.bf16 %v3664_v23, %v3664_v23  ;;  %v3528_v29 = vmul.f32 %v7150_v37, %v3492_v25  ;;  %v3643_v8 = vadd.f32 %v3627_v59, %v3542_v0  ;;  %v3537_v18 = vadd.f32 %v3521_v50, %v7114_v41 }
 0x43c   : > { %3697 = vst.msk [vmem:[%s7172_s16 + $0x18] sm:$0xf] %vm3690_vm3, %v3680_v5  ;;  %v3544_v60 = vadd.f32 %v3528_v29, %v3443_v40  ;;  %v3666_v15 = vadd.f32 %v7163_v16, %v3643_v8 }
 0x43d   : > { %v3500_v9 = vpop.permute.xlu1 %3499 }
 0x43e   : > { %v3530_v46 = vmul.f32 %v7150_v37, %v3500_v9  ;;  %v3645_v52 = vadd.f32 %v3629_v12, %v3544_v60  ;;  %v3682_v5 = vpack.c.bf16 %v3666_v15, %v3666_v15  ;;  %v8108_v15 = vld [vmem:[#allocation247_spill] sm:$0xff] }
 0x440   : > { %v3546_v62 = vadd.f32 %v3530_v46, %v3445_v54  ;;  %v3668_v42 = vadd.f32 %v7163_v16, %v3645_v52  ;;  %3699 = vst.msk [vmem:[%s7172_s16 + $0x20] sm:$0xf] %vm3690_vm3, %v3682_v5 }
 0x441   : > { %v3508_v49 = vpop.permute.xlu1 %3507 }
 0x442   : > { %v3647_v63 = vadd.f32 %v3631_v10, %v3546_v62  ;;  %v3532_v34 = vmul.f32 %v7150_v37, %v3508_v49  ;;  %v3684_v46 = vpack.c.bf16 %v3668_v42, %v3668_v42  ;;  %v3539_v10 = vadd.f32 %v3523_v35, %v7119_v47  ;;  %v8105_v47 = vld [vmem:[#allocation241_spill] sm:$0xff] }
 0x443   : > { %v3525_v62 = vmul.f32 %v7150_v37, %v8104_v39  ;;  %v3527_v29 = vmul.f32 %v7150_v37, %v8105_v47 }
 0x444   : > { %v3670_v19 = vadd.f32 %v7163_v16, %v3647_v63  ;;  %v3548_v17 = vadd.f32 %v3532_v34, %v3447_v13  ;;  %3701 = vst.msk [vmem:[%s7172_s16 + $0x28] sm:$0xf] %vm3690_vm3, %v3684_v46 }
 0x445   : > { %v3541_v13 = vadd.f32 %v3525_v62, %v7124_v32  ;;  %v3543_v40 = vadd.f32 %v3527_v29, %v7129_v28 }
 0x446   : > { %v3686_v48 = vpack.c.bf16 %v3670_v19, %v3670_v19  ;;  %v3649_v4 = vadd.f32 %v3633_v11, %v3548_v17  ;;  %v3553_v26 = vpop.permute.xlu1 %3552  ;;  %v8106_v17 = vld [vmem:[#allocation243_spill] sm:$0xff] }
 0x447   : > { %v3619_v58 = vmul.f32 %v7155_v36, %v3553_v26  ;;  %v3529_v32 = vmul.f32 %v7150_v37, %v8106_v17  ;;  %v8107_v26 = vld [vmem:[#allocation245_spill] sm:$0xff] }
 0x448   : > { %3703 = vst.msk [vmem:[%s7172_s16 + $0x30] sm:$0xf] %vm3690_vm3, %v3686_v48  ;;  %v3672_v2 = vadd.f32 %v7163_v16, %v3649_v4  ;;  %v3531_v28 = vmul.f32 %v7150_v37, %v8107_v26 }
 0x449   : > { %v3635_v33 = vadd.f32 %v3619_v58, %v3534_v56  ;;  %v3545_v48 = vadd.f32 %v3529_v32, %v7134_v20  ;;  %v3533_v20 = vmul.f32 %v7150_v37, %v8108_v15 }
 0x44a   : > { %v3688_v24 = vpack.c.bf16 %v3672_v2, %v3672_v2  ;;  %v3561_v3 = vpop.permute.xlu1 %3560  ;;  %v3547_v2 = vadd.f32 %v3531_v28, %v7139_v30 }
 0x44b   : > { %v3658_v22 = vadd.f32 %v7163_v16, %v3635_v33  ;;  %v3621_v55 = vmul.f32 %v7155_v36, %v3561_v3 }
 0x44c   : > { %3705 = vst.msk [vmem:[%s7172_s16 + $0x38] sm:$0xf] %vm3690_vm3, %v3688_v24 }
 0x44d   : > { %v3674_v23 = vpack.c.bf16 %v3658_v22, %v3658_v22  ;;  %v3637_v25 = vadd.f32 %v3621_v55, %v3536_v51  ;;  %v3549_v22 = vadd.f32 %v3533_v20, %v7143_v53 }
 0x44e   : > { %v3565_v61 = vpop.permute.xlu1 %3564 }
 0x44f   : > { %3691 = vst.msk [vmem:[%s7172_s16] sm:$0xf] %vm3690_vm3, %v3674_v23  ;;  %v3660_v44 = vadd.f32 %v7163_v16, %v3637_v25  ;;  %v3622_v9 = vmul.f32 %v7155_v36, %v3565_v61 }
 0x451   : > { %v3676_v38 = vpack.c.bf16 %v3660_v44, %v3660_v44  ;;  %v3638_v54 = vadd.f32 %v3622_v9, %v3537_v18 }
 0x452   : > { %v3573_v7 = vpop.permute.xlu1 %3572 }
 0x453   : > { %3693 = vst.msk [vmem:[%s7172_s16 + $0x8] sm:$0xf] %vm3690_vm3, %v3676_v38  ;;  %v3661_v27 = vadd.f32 %v7163_v16, %v3638_v54  ;;  %v3624_v41 = vmul.f32 %v7155_v36, %v3573_v7 }
 0x455   : > { %v3677_v31 = vpack.c.bf16 %v3661_v27, %v3661_v27  ;;  %v3640_v45 = vadd.f32 %v3624_v41, %v3539_v10 }
 0x456   : > { %v3581_v6 = vpop.permute.xlu1 %3580 }
 0x457   : > { %3694 = vst.msk [vmem:[%s7172_s16 + $0xc] sm:$0xf] %vm3690_vm3, %v3677_v31  ;;  %v3663_v49 = vadd.f32 %v7163_v16, %v3640_v45  ;;  %v3626_v0 = vmul.f32 %v7155_v36, %v3581_v6 }
 0x459   : > { %v3679_v63 = vpack.c.bf16 %v3663_v49, %v3663_v49  ;;  %v3642_v34 = vadd.f32 %v3626_v0, %v3541_v13 }
 0x45a   : > { %v3589_v59 = vpop.permute.xlu1 %3588 }
 0x45b   : > { %3696 = vst.msk [vmem:[%s7172_s16 + $0x14] sm:$0xf] %vm3690_vm3, %v3679_v63  ;;  %v3665_v11 = vadd.f32 %v7163_v16, %v3642_v34  ;;  %v3628_v19 = vmul.f32 %v7155_v36, %v3589_v59 }
 0x45d   : > { %v3681_v57 = vpack.c.bf16 %v3665_v11, %v3665_v11  ;;  %v3644_v21 = vadd.f32 %v3628_v19, %v3543_v40 }
 0x45e   : > { %v3597_v8 = vpop.permute.xlu1 %3596 }
 0x45f   : > { %3698 = vst.msk [vmem:[%s7172_s16 + $0x1c] sm:$0xf] %vm3690_vm3, %v3681_v57  ;;  %v3667_v60 = vadd.f32 %v7163_v16, %v3644_v21  ;;  %v3630_v4 = vmul.f32 %v7155_v36, %v3597_v8 }
 0x461   : > { %v3683_v14 = vpack.c.bf16 %v3667_v60, %v3667_v60  ;;  %v3646_v56 = vadd.f32 %v3630_v4, %v3545_v48 }
 0x462   : > { %v3605_v58 = vpop.permute.xlu1 %3604 }
 0x463   : > { %3700 = vst.msk [vmem:[%s7172_s16 + $0x24] sm:$0xf] %vm3690_vm3, %v3683_v14  ;;  %v3669_v12 = vadd.f32 %v7163_v16, %v3646_v56  ;;  %v3632_v33 = vmul.f32 %v7155_v36, %v3605_v58 }
 0x465   : > { %v3685_v52 = vpack.c.bf16 %v3669_v12, %v3669_v12  ;;  %v3648_v24 = vadd.f32 %v3632_v33, %v3547_v2 }
 0x466   : > { %v3613_v3 = vpop.permute.xlu1 %3612 }
 0x467   : > { %3702 = vst.msk [vmem:[%s7172_s16 + $0x2c] sm:$0xf] %vm3690_vm3, %v3685_v52  ;;  %v3671_v51 = vadd.f32 %v7163_v16, %v3648_v24  ;;  %v3634_v55 = vmul.f32 %v7155_v36, %v3613_v3 }
 0x469   : > { %v3687_v1 = vpack.c.bf16 %v3671_v51, %v3671_v51  ;;  %v3650_v50 = vadd.f32 %v3634_v55, %v3549_v22 }
 0x46b   : > { %3704 = vst.msk [vmem:[%s7172_s16 + $0x34] sm:$0xf] %vm3690_vm3, %v3687_v1  ;;  %v3673_v30 = vadd.f32 %v7163_v16, %v3650_v50 }
 0x46d   : > { %v3689_v23 = vpack.c.bf16 %v3673_v30, %v3673_v30 }
 0x46f   : > { %3706 = vst.msk [vmem:[%s7172_s16 + $0x3c] sm:$0xf] %vm3690_vm3, %v3689_v23 }
 0x470 PF: > { %s14_s15 = sadd.s32 1, %s4048_s15  }
 0x471   : > { %p11_p4 = scmp.ge.s32.totalorder %s14_s15, 4  }
 0x473   :  { %13 = sbr.rel (!%p11_p4) target bundleno = 1 (0x1), region = 210 }

</bundles_post_ra>
